<compile_context>
chip_gen: v7x
topology: tpu7x:2x2x1
jax: 0.10.0
libtpu: 0.0.40
codegen_flags: <defaults>
</compile_context>

<pallas_src>
import functools
from math import pi

import jax
import jax.numpy as jnp
from jax.experimental import pallas as pl
from jax.experimental.pallas import tpu as pltpu


CFG = dict(
    num_freq_bands=2,
    depth=2,
    max_freq=10.0,
    input_channels=4,
    input_axis=3,           # 3 spatial axes after the Conv3d patch projection
    num_latents=16,
    latent_dim=32,
    cross_heads=1,
    latent_heads=4,
    cross_dim_head=16,
    latent_dim_head=8,
    num_classes=10,
    self_per_cross_attn=1,
    patch_size=2,
    ff_mult=4,
)


# --------------------------------------------------------------------------
# In-kernel math helpers (f32 elementwise, bf16-at-MXU matmuls)
# --------------------------------------------------------------------------

def _bf16_dot(a, b):
    """MXU matmul: bf16 operands, f32 accumulation."""
    return jnp.dot(a.astype(jnp.bfloat16), b.astype(jnp.bfloat16),
                   preferred_element_type=jnp.float32)


def _ln(v, g, b):
    """LayerNorm over the last dim, eps=1e-5 (PyTorch default)."""
    mu = jnp.mean(v, axis=-1, keepdims=True)
    var = jnp.mean((v - mu) ** 2, axis=-1, keepdims=True)
    return (v - mu) * jax.lax.rsqrt(var + 1e-5) * g + b


def _erf(x):
    # Abramowitz & Stegun 7.1.26 (max abs err ~1.5e-7), built only from
    # exp/VPU ops so it lowers on every TPU generation; matches PyTorch's
    # exact-erf GELU far below the bf16-matmul noise floor of the pipeline.
    a1, a2, a3 = 0.254829592, -0.284496736, 1.421413741
    a4, a5, p = -1.453152027, 1.061405429, 0.3275911
    ax = jnp.abs(x)
    t = 1.0 / (1.0 + p * ax)
    poly = ((((a5 * t + a4) * t + a3) * t + a2) * t + a1) * t
    y = 1.0 - poly * jnp.exp(-ax * ax)
    return jnp.where(x < 0.0, -y, y)


def _gelu_exact(x):
    return 0.5 * x * (1.0 + _erf(x * 0.7071067811865476))


# --------------------------------------------------------------------------
# The single fused Perceiver kernel
# --------------------------------------------------------------------------

def _perceiver_kernel(
    # data / constants
    patches_ref, proj_w_ref, enc_ref, latents_ref, pool_ref,
    # cross-attention (stacked over depth)
    ca_lnx_g, ca_lnx_b, ca_lnc_gf, ca_lnc_bf, ca_lnc_ge, ca_lnc_be,
    ca_wq, ca_wkv_f, ca_wkv_e, ca_wo, ca_bo,
    # cross feed-forward (stacked over depth)
    cf_ln_g, cf_ln_b, cf_w1, cf_b1, cf_w2, cf_b2,
    # latent self-attention (stacked over depth * self_per_cross_attn)
    sa_ln_g, sa_ln_b, sa_wq, sa_wkv, sa_wo, sa_bo,
    # latent feed-forward (stacked over depth * self_per_cross_attn)
    sf_ln_g, sf_ln_b, sf_w1, sf_b1, sf_w2, sf_b2,
    # classifier head
    head_ln_g, head_ln_b, head_w, head_b,
    # output
    o_ref,
    *, batch, n_ctx, num_latents, depth, self_per,
    cross_heads, cross_dim_head, latent_heads, latent_dim_head):
    f32 = jnp.float32
    L = num_latents

    # ---- context: patch projection + Fourier features (built once, reused) --
    feat = _bf16_dot(patches_ref[...], proj_w_ref[...])          # (B*Nc, C)
    enc = enc_ref[...]                                           # (Nc, F)
    enc_b = jnp.concatenate([enc] * batch, axis=0)               # (B*Nc, F)

    # LayerNorm statistics of the (feat | enc) context are layer-invariant:
    # normalize once, only re-apply the per-layer affine inside the loop.
    # feat/enc stay separate, so no lane-dim concatenate is ever materialized;
    # the kv projection is split as cn_f @ Wkv[:C] + cn_e @ Wkv[C:].
    dc = float(feat.shape[-1] + enc_b.shape[-1])
    mean = (jnp.sum(feat, axis=-1, keepdims=True)
            + jnp.sum(enc_b, axis=-1, keepdims=True)) / dc
    feat_c = feat - mean
    enc_c = enc_b - mean
    var = (jnp.sum(feat_c * feat_c, axis=-1, keepdims=True)
           + jnp.sum(enc_c * enc_c, axis=-1, keepdims=True)) / dc
    inv = jax.lax.rsqrt(var + 1e-5)
    feat_hat = feat_c * inv                                      # (B*Nc, C)
    enc_hat = enc_c * inv                                        # (B*Nc, F)

    # ---- latents broadcast over batch (batch-major rows) --------------------
    xL = jnp.concatenate([latents_ref[...]] * batch, axis=0).astype(f32)  # (B*L, D)

    # ---- softmax attention: static per-batch / per-head loops ---------------
    # Per-head outputs are accumulated straight through sublane slices of Wo.
    def attention(q, k, v, wo, heads, dim_head, n_q, n_k):
        scale = dim_head ** -0.5
        rows = []
        for bi in range(batch):
            qb = q[bi * n_q:(bi + 1) * n_q]
            kb = k[bi * n_k:(bi + 1) * n_k]
            vb = v[bi * n_k:(bi + 1) * n_k]
            acc = None
            for hh in range(heads):
                sl = slice(hh * dim_head, (hh + 1) * dim_head)
                s = jax.lax.dot_general(
                    qb[:, sl].astype(jnp.bfloat16),
                    kb[:, sl].astype(jnp.bfloat16),
                    (((1,), (1,)), ((), ())),
                    preferred_element_type=f32) * scale          # (n_q, n_k)
                s = s - jnp.max(s, axis=-1, keepdims=True)
                e = jnp.exp(s)
                pr = e * pl.reciprocal(jnp.sum(e, axis=-1, keepdims=True),
                                       approx=True)
                pv = _bf16_dot(pr, vb[:, sl])                    # (n_q, dim_head)
                contrib = _bf16_dot(pv, wo[sl, :])               # (n_q, D)
                acc = contrib if acc is None else acc + contrib
            rows.append(acc)
        return jnp.concatenate(rows, axis=0)                     # (B*n_q, D)

    # ---- feed-forward: PreNorm -> Linear -> GEGLU -> Linear -----------------
    def feed_forward(x, g, b, w1, b1, w2, b2):
        xn = _ln(x, g, b)
        hid = _bf16_dot(xn, w1) + b1                             # (N, 2*Fh)
        half = hid.shape[-1] // 2
        y = hid[:, :half] * _gelu_exact(hid[:, half:])
        return _bf16_dot(y, w2) + b2

    # ---- depth x (cross-attn -> cross-FF -> self_per x (self-attn -> FF)) ---
    ic = cross_heads * cross_dim_head
    il = latent_heads * latent_dim_head
    for l in range(depth):
        # cross attention (+ residual)
        xn = _ln(xL, ca_lnx_g[l:l + 1], ca_lnx_b[l:l + 1])
        cn_f = feat_hat * ca_lnc_gf[l:l + 1] + ca_lnc_bf[l:l + 1]
        cn_e = enc_hat * ca_lnc_ge[l:l + 1] + ca_lnc_be[l:l + 1]
        q = _bf16_dot(xn, ca_wq[l])                              # (B*L, ic)
        kv = _bf16_dot(cn_f, ca_wkv_f[l]) + _bf16_dot(cn_e, ca_wkv_e[l])
        attn = attention(q, kv[:, :ic], kv[:, ic:], ca_wo[l],
                         cross_heads, cross_dim_head, L, n_ctx)
        xL = xL + attn + ca_bo[l:l + 1]

        # cross feed-forward (+ residual)
        xL = xL + feed_forward(xL, cf_ln_g[l:l + 1], cf_ln_b[l:l + 1],
                               cf_w1[l], cf_b1[l:l + 1], cf_w2[l], cf_b2[l:l + 1])

        # latent self-attention blocks (+ residuals)
        for si in range(self_per):
            idx = l * self_per + si
            # PreNorm(x) with context == x: one LayerNorm feeds q, k and v.
            xn = _ln(xL, sa_ln_g[idx:idx + 1], sa_ln_b[idx:idx + 1])
            q = _bf16_dot(xn, sa_wq[idx])
            kv = _bf16_dot(xn, sa_wkv[idx])
            attn = attention(q, kv[:, :il], kv[:, il:], sa_wo[idx],
                             latent_heads, latent_dim_head, L, L)
            xL = xL + attn + sa_bo[idx:idx + 1]

            xL = xL + feed_forward(xL, sf_ln_g[idx:idx + 1], sf_ln_b[idx:idx + 1],
                                   sf_w1[idx], sf_b1[idx:idx + 1],
                                   sf_w2[idx], sf_b2[idx:idx + 1])

    # ---- classifier head: mean pool -> LayerNorm -> Linear -------------------
    # Mean pooling as a tiny (B, B*L) matmul against a block-averaging matrix:
    # stays on the MXU, avoids any unaligned sublane concatenate.
    pooled = jnp.dot(pool_ref[...], xL, preferred_element_type=f32)   # (B, D)
    pn = _ln(pooled, head_ln_g[...], head_ln_b[...])
    logits = _bf16_dot(pn, head_w[...]) + head_b[...]
    o_ref[...] = logits.astype(o_ref.dtype)
    # TODO(synk): optional attention-mask path (mask=None in the reference
    # forward) is not implemented.


# --------------------------------------------------------------------------
# Parameters, positional encoding, forward wrapper
# --------------------------------------------------------------------------

def fourier_positions(axis_sizes, max_freq, num_bands):
    """Batch-invariant Fourier positional encoding, flattened to (N_tokens, F)."""
    axis_pos = [jnp.linspace(-1.0, 1.0, n, dtype=jnp.float32) for n in axis_sizes]
    pos = jnp.stack(jnp.meshgrid(*axis_pos, indexing="ij"), axis=-1)   # (d,h,w,A)
    x = pos[..., None]                                                 # (d,h,w,A,1)
    scales = jnp.linspace(1.0, max_freq / 2.0, num_bands, dtype=jnp.float32)
    xs = x * scales * pi                                               # (d,h,w,A,nb)
    enc = jnp.concatenate([jnp.sin(xs), jnp.cos(xs), x], axis=-1)      # (..,A,2nb+1)
    n_tokens = 1
    for n in axis_sizes:
        n_tokens *= n
    return enc.reshape(n_tokens, -1)                                   # (N, A*(2nb+1))


def init_params(key, cfg, axis_sizes):
    """Random params mirroring the PyTorch module; per-layer weights stacked
    along a leading depth axis so the fused kernel indexes them statically."""
    ld = cfg["latent_dim"]
    fourier_ch = cfg["input_axis"] * (cfg["num_freq_bands"] * 2 + 1)
    input_dim = fourier_ch + cfg["input_channels"]
    p3 = cfg["patch_size"] ** 3
    mult = cfg["ff_mult"]
    depth = cfg["depth"]
    S = depth * cfg["self_per_cross_attn"]
    ic = cfg["cross_heads"] * cfg["cross_dim_head"]
    il = cfg["latent_heads"] * cfg["latent_dim_head"]

    keys = iter(jax.random.split(key, 32))

    def dense(shape):
        return jax.random.normal(next(keys), shape, jnp.float32) * 0.02

    return {
        "proj_w": dense((p3, cfg["input_channels"])),   # Conv3d(1,C,p,p,p,bias=False)
        "latents": jax.random.normal(next(keys), (cfg["num_latents"], ld), jnp.float32),
        "pos_enc": fourier_positions(axis_sizes, cfg["max_freq"], cfg["num_freq_bands"]),
        "ca": {
            "lnx_g": jnp.ones((depth, ld), jnp.float32),
            "lnx_b": jnp.zeros((depth, ld), jnp.float32),
            "lnc_g": jnp.ones((depth, input_dim), jnp.float32),
            "lnc_b": jnp.zeros((depth, input_dim), jnp.float32),
            "wq": dense((depth, ld, ic)),
            "wkv": dense((depth, input_dim, 2 * ic)),
            "wo": dense((depth, ic, ld)),
            "bo": jnp.zeros((depth, ld), jnp.float32),
        },
        "cf": {
            "ln_g": jnp.ones((depth, ld), jnp.float32),
            "ln_b": jnp.zeros((depth, ld), jnp.float32),
            "w1": dense((depth, ld, ld * mult * 2)),
            "b1": jnp.zeros((depth, ld * mult * 2), jnp.float32),
            "w2": dense((depth, ld * mult, ld)),
            "b2": jnp.zeros((depth, ld), jnp.float32),
        },
        "sa": {
            "ln_g": jnp.ones((S, ld), jnp.float32),
            "ln_b": jnp.zeros((S, ld), jnp.float32),
            "wq": dense((S, ld, il)),
            "wkv": dense((S, ld, 2 * il)),
            "wo": dense((S, il, ld)),
            "bo": jnp.zeros((S, ld), jnp.float32),
        },
        "sf": {
            "ln_g": jnp.ones((S, ld), jnp.float32),
            "ln_b": jnp.zeros((S, ld), jnp.float32),
            "w1": dense((S, ld, ld * mult * 2)),
            "b1": jnp.zeros((S, ld * mult * 2), jnp.float32),
            "w2": dense((S, ld * mult, ld)),
            "b2": jnp.zeros((S, ld), jnp.float32),
        },
        "head_ln_g": jnp.ones((ld,), jnp.float32),
        "head_ln_b": jnp.zeros((ld,), jnp.float32),
        "head_w": dense((ld, cfg["num_classes"])),
        "head_b": jnp.zeros((cfg["num_classes"],), jnp.float32),
    }


def perceiver_forward(params, data, cfg):
    """data: (b, 1, D, H, W) float32 — NCDHW, matching the PyTorch Conv3d input."""
    ps = cfg["patch_size"]
    b = data.shape[0]
    d, h, w = data.shape[2] // ps, data.shape[3] // ps, data.shape[4] // ps
    n_ctx = d * h * w
    L = cfg["num_latents"]
    ld = cfg["latent_dim"]
    ncls = cfg["num_classes"]
    C = cfg["input_channels"]

    # Patch extraction is pure layout (tiny); the projection matmul, Fourier
    # features and everything downstream run inside the single fused kernel.
    xpat = data.reshape(b, d, ps, h, ps, w, ps)
    patches = xpat.transpose(0, 1, 3, 5, 2, 4, 6).reshape(b * n_ctx, ps ** 3)

    # Block-averaging matrix for the mean-pool head: (B, B*L).
    pool_mat = jnp.repeat(jnp.eye(b, dtype=jnp.float32), L, axis=1) / float(L)

    ca, cf, sa, sf = params["ca"], params["cf"], params["sa"], params["sf"]

    kern = functools.partial(
        _perceiver_kernel,
        batch=b, n_ctx=n_ctx, num_latents=L,
        depth=cfg["depth"], self_per=cfg["self_per_cross_attn"],
        cross_heads=cfg["cross_heads"], cross_dim_head=cfg["cross_dim_head"],
        latent_heads=cfg["latent_heads"], latent_dim_head=cfg["latent_dim_head"],
    )

    # One fused pallas_call, no grid: every operand is a whole-array VMEM block
    # (total footprint well under 1 MiB), all intermediates stay in VMEM, and
    # only the (B, num_classes) logits are written back to HBM.
    return pl.pallas_call(
        kern,
        out_shape=jax.ShapeDtypeStruct((b, ncls), jnp.float32),
        compiler_params=pltpu.CompilerParams(vmem_limit_bytes=32 * 1024 * 1024),
    )(
        patches, params["proj_w"], params["pos_enc"], params["latents"], pool_mat,
        ca["lnx_g"], ca["lnx_b"],
        ca["lnc_g"][:, :C], ca["lnc_b"][:, :C],
        ca["lnc_g"][:, C:], ca["lnc_b"][:, C:],
        ca["wq"], ca["wkv"][:, :C, :], ca["wkv"][:, C:, :], ca["wo"], ca["bo"],
        cf["ln_g"], cf["ln_b"], cf["w1"], cf["b1"], cf["w2"], cf["b2"],
        sa["ln_g"], sa["ln_b"], sa["wq"], sa["wkv"], sa["wo"], sa["bo"],
        sf["ln_g"], sf["ln_b"], sf["w1"], sf["b1"], sf["w2"], sf["b2"],
        params["head_ln_g"].reshape(1, ld), params["head_ln_b"].reshape(1, ld),
        params["head_w"], params["head_b"].reshape(1, ncls),
    )


if __name__ == "__main__":
    key = jax.random.PRNGKey(0)
    kdata, kparams = jax.random.split(key)

    cfg = CFG
    data = jax.random.normal(kdata, (2, 1, 8, 8, 8), jnp.float32)
    axis_sizes = tuple(s // cfg["patch_size"] for s in data.shape[2:])
    params = init_params(kparams, cfg, axis_sizes)

    fwd = jax.jit(functools.partial(perceiver_forward, cfg=cfg))
    logits = jax.block_until_ready(fwd(params, data))

    assert logits.shape == (2, cfg["num_classes"]), logits.shape
    assert bool(jnp.all(jnp.isfinite(logits)))
    print("KERNEL_OK")
</pallas_src>

<mosaic_0001>
module attributes {stable_mosaic.version = 11 : i64} {
  func.func @_perceiver_kernel(%arg0: memref<128x8xf32, #tpu.memory_space<vmem>>, %arg1: memref<8x4xf32, #tpu.memory_space<vmem>>, %arg2: memref<64x15xf32, #tpu.memory_space<vmem>>, %arg3: memref<16x32xf32, #tpu.memory_space<vmem>>, %arg4: memref<2x32xf32, #tpu.memory_space<vmem>>, %arg5: memref<2x32xf32, #tpu.memory_space<vmem>>, %arg6: memref<2x32xf32, #tpu.memory_space<vmem>>, %arg7: memref<2x4xf32, #tpu.memory_space<vmem>>, %arg8: memref<2x4xf32, #tpu.memory_space<vmem>>, %arg9: memref<2x15xf32, #tpu.memory_space<vmem>>, %arg10: memref<2x15xf32, #tpu.memory_space<vmem>>, %arg11: memref<2x32x16xf32, #tpu.memory_space<vmem>>, %arg12: memref<2x4x32xf32, #tpu.memory_space<vmem>>, %arg13: memref<2x15x32xf32, #tpu.memory_space<vmem>>, %arg14: memref<2x16x32xf32, #tpu.memory_space<vmem>>, %arg15: memref<2x32xf32, #tpu.memory_space<vmem>>, %arg16: memref<2x32xf32, #tpu.memory_space<vmem>>, %arg17: memref<2x32xf32, #tpu.memory_space<vmem>>, %arg18: memref<2x32x256xf32, #tpu.memory_space<vmem>>, %arg19: memref<2x256xf32, #tpu.memory_space<vmem>>, %arg20: memref<2x128x32xf32, #tpu.memory_space<vmem>>, %arg21: memref<2x32xf32, #tpu.memory_space<vmem>>, %arg22: memref<2x32xf32, #tpu.memory_space<vmem>>, %arg23: memref<2x32xf32, #tpu.memory_space<vmem>>, %arg24: memref<2x32x32xf32, #tpu.memory_space<vmem>>, %arg25: memref<2x32x64xf32, #tpu.memory_space<vmem>>, %arg26: memref<2x32x32xf32, #tpu.memory_space<vmem>>, %arg27: memref<2x32xf32, #tpu.memory_space<vmem>>, %arg28: memref<2x32xf32, #tpu.memory_space<vmem>>, %arg29: memref<2x32xf32, #tpu.memory_space<vmem>>, %arg30: memref<2x32x256xf32, #tpu.memory_space<vmem>>, %arg31: memref<2x256xf32, #tpu.memory_space<vmem>>, %arg32: memref<2x128x32xf32, #tpu.memory_space<vmem>>, %arg33: memref<2x32xf32, #tpu.memory_space<vmem>>, %arg34: memref<1x32xf32, #tpu.memory_space<vmem>>, %arg35: memref<1x32xf32, #tpu.memory_space<vmem>>, %arg36: memref<32x10xf32, #tpu.memory_space<vmem>>, %arg37: memref<1x10xf32, #tpu.memory_space<vmem>>, %arg38: memref<2x10xf32, #tpu.memory_space<vmem>>) attributes {dimension_semantics = [], scalar_prefetch = 0 : i64, scratch_operands = 0 : i64, tpu.core_type = #tpu.core_type<tc>} {
    %c0 = arith.constant 0 : index
    %c0_0 = arith.constant 0 : index
    %0 = vector.load %arg0[%c0, %c0_0] : memref<128x8xf32, #tpu.memory_space<vmem>>, vector<128x8xf32>
    %c0_1 = arith.constant 0 : index
    %c0_2 = arith.constant 0 : index
    %1 = vector.load %arg1[%c0_1, %c0_2] : memref<8x4xf32, #tpu.memory_space<vmem>>, vector<8x4xf32>
    %2 = arith.truncf %0 : vector<128x8xf32> to vector<128x8xbf16>
    %3 = arith.truncf %1 : vector<8x4xf32> to vector<8x4xbf16>
    %cst = arith.constant dense<0.000000e+00> : vector<128x4xf32>
    %4 = tpu.matmul %2, %3, %cst {dimension_numbers = #tpu.dot_dimension_numbers<[1], [0], [0], [1], [0, 0, 1, 1], [], []>} : vector<128x8xbf16>, vector<8x4xbf16>, vector<128x4xf32> -> vector<128x4xf32>
    %c0_3 = arith.constant 0 : index
    %c0_4 = arith.constant 0 : index
    %5 = vector.load %arg2[%c0_3, %c0_4] : memref<64x15xf32, #tpu.memory_space<vmem>>, vector<64x15xf32>
    %6 = tpu.concatenate %5, %5 in 0 : vector<64x15xf32>, vector<64x15xf32> -> vector<128x15xf32>
    %cst_5 = arith.constant dense<0.000000e+00> : vector<128xf32>
    %7 = vector.multi_reduction <add>, %4, %cst_5 [1] : vector<128x4xf32> to vector<128xf32>
    %8 = vector.shape_cast %7 : vector<128xf32> to vector<128x1xf32>
    %cst_6 = arith.constant dense<0.000000e+00> : vector<128xf32>
    %9 = vector.multi_reduction <add>, %6, %cst_6 [1] : vector<128x15xf32> to vector<128xf32>
    %10 = vector.shape_cast %9 : vector<128xf32> to vector<128x1xf32>
    %11 = arith.addf %8, %10 : vector<128x1xf32>
    %cst_7 = arith.constant 1.900000e+01 : f32
    %12 = vector.broadcast %cst_7 : f32 to vector<128x1xf32>
    %13 = arith.divf %11, %12 : vector<128x1xf32>
    %14 = vector.broadcast %13 : vector<128x1xf32> to vector<128x4xf32>
    %15 = arith.subf %4, %14 : vector<128x4xf32>
    %16 = vector.broadcast %13 : vector<128x1xf32> to vector<128x15xf32>
    %17 = arith.subf %6, %16 : vector<128x15xf32>
    %18 = arith.mulf %15, %15 : vector<128x4xf32>
    %cst_8 = arith.constant dense<0.000000e+00> : vector<128xf32>
    %19 = vector.multi_reduction <add>, %18, %cst_8 [1] : vector<128x4xf32> to vector<128xf32>
    %20 = vector.shape_cast %19 : vector<128xf32> to vector<128x1xf32>
    %21 = arith.mulf %17, %17 : vector<128x15xf32>
    %cst_9 = arith.constant dense<0.000000e+00> : vector<128xf32>
    %22 = vector.multi_reduction <add>, %21, %cst_9 [1] : vector<128x15xf32> to vector<128xf32>
    %23 = vector.shape_cast %22 : vector<128xf32> to vector<128x1xf32>
    %24 = arith.addf %20, %23 : vector<128x1xf32>
    %cst_10 = arith.constant 1.900000e+01 : f32
    %25 = vector.broadcast %cst_10 : f32 to vector<128x1xf32>
    %26 = arith.divf %24, %25 : vector<128x1xf32>
    %cst_11 = arith.constant 9.99999974E-6 : f32
    %27 = vector.broadcast %cst_11 : f32 to vector<128x1xf32>
    %28 = arith.addf %26, %27 : vector<128x1xf32>
    %29 = math.rsqrt %28 : vector<128x1xf32>
    %30 = vector.broadcast %29 : vector<128x1xf32> to vector<128x4xf32>
    %31 = arith.mulf %15, %30 : vector<128x4xf32>
    %32 = vector.broadcast %29 : vector<128x1xf32> to vector<128x15xf32>
    %33 = arith.mulf %17, %32 : vector<128x15xf32>
    %c0_12 = arith.constant 0 : index
    %c0_13 = arith.constant 0 : index
    %34 = vector.load %arg3[%c0_12, %c0_13] : memref<16x32xf32, #tpu.memory_space<vmem>>, vector<16x32xf32>
    %35 = tpu.concatenate %34, %34 in 0 : vector<16x32xf32>, vector<16x32xf32> -> vector<32x32xf32>
    %c0_14 = arith.constant 0 : index
    %c0_15 = arith.constant 0 : index
    %36 = vector.load %arg5[%c0_14, %c0_15] : memref<2x32xf32, #tpu.memory_space<vmem>>, vector<1x32xf32>
    %c0_16 = arith.constant 0 : index
    %c0_17 = arith.constant 0 : index
    %37 = vector.load %arg6[%c0_16, %c0_17] : memref<2x32xf32, #tpu.memory_space<vmem>>, vector<1x32xf32>
    %cst_18 = arith.constant dense<0.000000e+00> : vector<32xf32>
    %38 = vector.multi_reduction <add>, %35, %cst_18 [1] : vector<32x32xf32> to vector<32xf32>
    %39 = vector.shape_cast %38 : vector<32xf32> to vector<32x1xf32>
    %cst_19 = arith.constant 3.200000e+01 : f32
    %40 = vector.broadcast %cst_19 : f32 to vector<32x1xf32>
    %41 = arith.divf %39, %40 : vector<32x1xf32>
    %42 = vector.broadcast %41 : vector<32x1xf32> to vector<32x32xf32>
    %43 = arith.subf %35, %42 : vector<32x32xf32>
    %44 = arith.mulf %43, %43 : vector<32x32xf32>
    %cst_20 = arith.constant dense<0.000000e+00> : vector<32xf32>
    %45 = vector.multi_reduction <add>, %44, %cst_20 [1] : vector<32x32xf32> to vector<32xf32>
    %46 = vector.shape_cast %45 : vector<32xf32> to vector<32x1xf32>
    %cst_21 = arith.constant 3.200000e+01 : f32
    %47 = vector.broadcast %cst_21 : f32 to vector<32x1xf32>
    %48 = arith.divf %46, %47 : vector<32x1xf32>
    %49 = vector.broadcast %41 : vector<32x1xf32> to vector<32x32xf32>
    %50 = arith.subf %35, %49 : vector<32x32xf32>
    %cst_22 = arith.constant 9.99999974E-6 : f32
    %51 = vector.broadcast %cst_22 : f32 to vector<32x1xf32>
    %52 = arith.addf %48, %51 : vector<32x1xf32>
    %53 = math.rsqrt %52 : vector<32x1xf32>
    %54 = vector.broadcast %53 : vector<32x1xf32> to vector<32x32xf32>
    %55 = arith.mulf %50, %54 : vector<32x32xf32>
    %56 = vector.broadcast %36 : vector<1x32xf32> to vector<32x32xf32>
    %57 = arith.mulf %55, %56 : vector<32x32xf32>
    %58 = vector.broadcast %37 : vector<1x32xf32> to vector<32x32xf32>
    %59 = arith.addf %57, %58 : vector<32x32xf32>
    %c0_23 = arith.constant 0 : index
    %c0_24 = arith.constant 0 : index
    %60 = vector.load %arg7[%c0_23, %c0_24] : memref<2x4xf32, #tpu.memory_space<vmem>>, vector<1x4xf32>
    %61 = vector.broadcast %60 : vector<1x4xf32> to vector<128x4xf32>
    %62 = arith.mulf %31, %61 : vector<128x4xf32>
    %c0_25 = arith.constant 0 : index
    %c0_26 = arith.constant 0 : index
    %63 = vector.load %arg8[%c0_25, %c0_26] : memref<2x4xf32, #tpu.memory_space<vmem>>, vector<1x4xf32>
    %64 = vector.broadcast %63 : vector<1x4xf32> to vector<128x4xf32>
    %65 = arith.addf %62, %64 : vector<128x4xf32>
    %c0_27 = arith.constant 0 : index
    %c0_28 = arith.constant 0 : index
    %66 = vector.load %arg9[%c0_27, %c0_28] : memref<2x15xf32, #tpu.memory_space<vmem>>, vector<1x15xf32>
    %67 = vector.broadcast %66 : vector<1x15xf32> to vector<128x15xf32>
    %68 = arith.mulf %33, %67 : vector<128x15xf32>
    %c0_29 = arith.constant 0 : index
    %c0_30 = arith.constant 0 : index
    %69 = vector.load %arg10[%c0_29, %c0_30] : memref<2x15xf32, #tpu.memory_space<vmem>>, vector<1x15xf32>
    %70 = vector.broadcast %69 : vector<1x15xf32> to vector<128x15xf32>
    %71 = arith.addf %68, %70 : vector<128x15xf32>
    %c0_31 = arith.constant 0 : index
    %c0_32 = arith.constant 0 : index
    %c0_33 = arith.constant 0 : index
    %72 = vector.load %arg11[%c0_31, %c0_32, %c0_33] : memref<2x32x16xf32, #tpu.memory_space<vmem>>, vector<1x32x16xf32>
    %73 = vector.shape_cast %72 : vector<1x32x16xf32> to vector<32x16xf32>
    %74 = arith.truncf %59 : vector<32x32xf32> to vector<32x32xbf16>
    %75 = arith.truncf %73 : vector<32x16xf32> to vector<32x16xbf16>
    %cst_34 = arith.constant dense<0.000000e+00> : vector<32x16xf32>
    %76 = tpu.matmul %74, %75, %cst_34 {dimension_numbers = #tpu.dot_dimension_numbers<[1], [0], [0], [1], [0, 0, 1, 1], [], []>} : vector<32x32xbf16>, vector<32x16xbf16>, vector<32x16xf32> -> vector<32x16xf32>
    %c0_35 = arith.constant 0 : index
    %c0_36 = arith.constant 0 : index
    %c0_37 = arith.constant 0 : index
    %77 = vector.load %arg12[%c0_35, %c0_36, %c0_37] : memref<2x4x32xf32, #tpu.memory_space<vmem>>, vector<1x4x32xf32>
    %78 = vector.shape_cast %77 : vector<1x4x32xf32> to vector<4x32xf32>
    %79 = arith.truncf %65 : vector<128x4xf32> to vector<128x4xbf16>
    %80 = arith.truncf %78 : vector<4x32xf32> to vector<4x32xbf16>
    %cst_38 = arith.constant dense<0.000000e+00> : vector<128x32xf32>
    %81 = tpu.matmul %79, %80, %cst_38 {dimension_numbers = #tpu.dot_dimension_numbers<[1], [0], [0], [1], [0, 0, 1, 1], [], []>} : vector<128x4xbf16>, vector<4x32xbf16>, vector<128x32xf32> -> vector<128x32xf32>
    %c0_39 = arith.constant 0 : index
    %c0_40 = arith.constant 0 : index
    %c0_41 = arith.constant 0 : index
    %82 = vector.load %arg13[%c0_39, %c0_40, %c0_41] : memref<2x15x32xf32, #tpu.memory_space<vmem>>, vector<1x15x32xf32>
    %83 = vector.shape_cast %82 : vector<1x15x32xf32> to vector<15x32xf32>
    %84 = arith.truncf %71 : vector<128x15xf32> to vector<128x15xbf16>
    %85 = arith.truncf %83 : vector<15x32xf32> to vector<15x32xbf16>
    %cst_42 = arith.constant dense<0.000000e+00> : vector<128x32xf32>
    %86 = tpu.matmul %84, %85, %cst_42 {dimension_numbers = #tpu.dot_dimension_numbers<[1], [0], [0], [1], [0, 0, 1, 1], [], []>} : vector<128x15xbf16>, vector<15x32xbf16>, vector<128x32xf32> -> vector<128x32xf32>
    %87 = arith.addf %81, %86 : vector<128x32xf32>
    %88 = vector.extract_strided_slice %87 {offsets = [0, 0], sizes = [128, 16], strides = [1, 1]} : vector<128x32xf32> to vector<128x16xf32>
    %89 = vector.extract_strided_slice %87 {offsets = [0, 16], sizes = [128, 16], strides = [1, 1]} : vector<128x32xf32> to vector<128x16xf32>
    %c0_43 = arith.constant 0 : index
    %c0_44 = arith.constant 0 : index
    %c0_45 = arith.constant 0 : index
    %90 = vector.load %arg14[%c0_43, %c0_44, %c0_45] : memref<2x16x32xf32, #tpu.memory_space<vmem>>, vector<1x16x32xf32>
    %91 = vector.shape_cast %90 : vector<1x16x32xf32> to vector<16x32xf32>
    %92 = vector.extract_strided_slice %76 {offsets = [0, 0], sizes = [16, 16], strides = [1, 1]} : vector<32x16xf32> to vector<16x16xf32>
    %93 = vector.extract_strided_slice %88 {offsets = [0, 0], sizes = [64, 16], strides = [1, 1]} : vector<128x16xf32> to vector<64x16xf32>
    %94 = vector.extract_strided_slice %89 {offsets = [0, 0], sizes = [64, 16], strides = [1, 1]} : vector<128x16xf32> to vector<64x16xf32>
    %95 = arith.truncf %92 : vector<16x16xf32> to vector<16x16xbf16>
    %96 = arith.truncf %93 : vector<64x16xf32> to vector<64x16xbf16>
    %cst_46 = arith.constant dense<0.000000e+00> : vector<16x64xf32>
    %97 = tpu.matmul %95, %96, %cst_46 {dimension_numbers = #tpu.dot_dimension_numbers<[1], [1], [0], [0], [0, 0, 1, 0], [], []>} : vector<16x16xbf16>, vector<64x16xbf16>, vector<16x64xf32> -> vector<16x64xf32>
    %cst_47 = arith.constant 2.500000e-01 : f32
    %98 = vector.broadcast %cst_47 : f32 to vector<16x64xf32>
    %99 = arith.mulf %97, %98 : vector<16x64xf32>
    %cst_48 = arith.constant dense<0xFF800000> : vector<16xf32>
    %100 = vector.multi_reduction <maximumf>, %99, %cst_48 [1] : vector<16x64xf32> to vector<16xf32>
    %101 = vector.shape_cast %100 : vector<16xf32> to vector<16x1xf32>
    %102 = vector.broadcast %101 : vector<16x1xf32> to vector<16x64xf32>
    %103 = arith.subf %99, %102 : vector<16x64xf32>
    %104 = math.exp %103 : vector<16x64xf32>
    %cst_49 = arith.constant dense<0.000000e+00> : vector<16xf32>
    %105 = vector.multi_reduction <add>, %104, %cst_49 [1] : vector<16x64xf32> to vector<16xf32>
    %106 = vector.shape_cast %105 : vector<16xf32> to vector<16x1xf32>
    %107 = tpu.reciprocal %106 {approx = true} : vector<16x1xf32> -> vector<16x1xf32>
    %108 = vector.broadcast %107 : vector<16x1xf32> to vector<16x64xf32>
    %109 = arith.mulf %104, %108 : vector<16x64xf32>
    %110 = arith.truncf %109 : vector<16x64xf32> to vector<16x64xbf16>
    %111 = arith.truncf %94 : vector<64x16xf32> to vector<64x16xbf16>
    %cst_50 = arith.constant dense<0.000000e+00> : vector<16x16xf32>
    %112 = tpu.matmul %110, %111, %cst_50 {dimension_numbers = #tpu.dot_dimension_numbers<[1], [0], [0], [1], [0, 0, 1, 1], [], []>} : vector<16x64xbf16>, vector<64x16xbf16>, vector<16x16xf32> -> vector<16x16xf32>
    %113 = arith.truncf %112 : vector<16x16xf32> to vector<16x16xbf16>
    %114 = arith.truncf %91 : vector<16x32xf32> to vector<16x32xbf16>
    %cst_51 = arith.constant dense<0.000000e+00> : vector<16x32xf32>
    %115 = tpu.matmul %113, %114, %cst_51 {dimension_numbers = #tpu.dot_dimension_numbers<[1], [0], [0], [1], [0, 0, 1, 1], [], []>} : vector<16x16xbf16>, vector<16x32xbf16>, vector<16x32xf32> -> vector<16x32xf32>
    %116 = vector.extract_strided_slice %76 {offsets = [16, 0], sizes = [16, 16], strides = [1, 1]} : vector<32x16xf32> to vector<16x16xf32>
    %117 = vector.extract_strided_slice %88 {offsets = [64, 0], sizes = [64, 16], strides = [1, 1]} : vector<128x16xf32> to vector<64x16xf32>
    %118 = vector.extract_strided_slice %89 {offsets = [64, 0], sizes = [64, 16], strides = [1, 1]} : vector<128x16xf32> to vector<64x16xf32>
    %119 = arith.truncf %116 : vector<16x16xf32> to vector<16x16xbf16>
    %120 = arith.truncf %117 : vector<64x16xf32> to vector<64x16xbf16>
    %cst_52 = arith.constant dense<0.000000e+00> : vector<16x64xf32>
    %121 = tpu.matmul %119, %120, %cst_52 {dimension_numbers = #tpu.dot_dimension_numbers<[1], [1], [0], [0], [0, 0, 1, 0], [], []>} : vector<16x16xbf16>, vector<64x16xbf16>, vector<16x64xf32> -> vector<16x64xf32>
    %cst_53 = arith.constant 2.500000e-01 : f32
    %122 = vector.broadcast %cst_53 : f32 to vector<16x64xf32>
    %123 = arith.mulf %121, %122 : vector<16x64xf32>
    %cst_54 = arith.constant dense<0xFF800000> : vector<16xf32>
    %124 = vector.multi_reduction <maximumf>, %123, %cst_54 [1] : vector<16x64xf32> to vector<16xf32>
    %125 = vector.shape_cast %124 : vector<16xf32> to vector<16x1xf32>
    %126 = vector.broadcast %125 : vector<16x1xf32> to vector<16x64xf32>
    %127 = arith.subf %123, %126 : vector<16x64xf32>
    %128 = math.exp %127 : vector<16x64xf32>
    %cst_55 = arith.constant dense<0.000000e+00> : vector<16xf32>
    %129 = vector.multi_reduction <add>, %128, %cst_55 [1] : vector<16x64xf32> to vector<16xf32>
    %130 = vector.shape_cast %129 : vector<16xf32> to vector<16x1xf32>
    %131 = tpu.reciprocal %130 {approx = true} : vector<16x1xf32> -> vector<16x1xf32>
    %132 = vector.broadcast %131 : vector<16x1xf32> to vector<16x64xf32>
    %133 = arith.mulf %128, %132 : vector<16x64xf32>
    %134 = arith.truncf %133 : vector<16x64xf32> to vector<16x64xbf16>
    %135 = arith.truncf %118 : vector<64x16xf32> to vector<64x16xbf16>
    %cst_56 = arith.constant dense<0.000000e+00> : vector<16x16xf32>
    %136 = tpu.matmul %134, %135, %cst_56 {dimension_numbers = #tpu.dot_dimension_numbers<[1], [0], [0], [1], [0, 0, 1, 1], [], []>} : vector<16x64xbf16>, vector<64x16xbf16>, vector<16x16xf32> -> vector<16x16xf32>
    %137 = arith.truncf %136 : vector<16x16xf32> to vector<16x16xbf16>
    %138 = arith.truncf %91 : vector<16x32xf32> to vector<16x32xbf16>
    %cst_57 = arith.constant dense<0.000000e+00> : vector<16x32xf32>
    %139 = tpu.matmul %137, %138, %cst_57 {dimension_numbers = #tpu.dot_dimension_numbers<[1], [0], [0], [1], [0, 0, 1, 1], [], []>} : vector<16x16xbf16>, vector<16x32xbf16>, vector<16x32xf32> -> vector<16x32xf32>
    %140 = tpu.concatenate %115, %139 in 0 : vector<16x32xf32>, vector<16x32xf32> -> vector<32x32xf32>
    %141 = arith.addf %35, %140 : vector<32x32xf32>
    %c0_58 = arith.constant 0 : index
    %c0_59 = arith.constant 0 : index
    %142 = vector.load %arg15[%c0_58, %c0_59] : memref<2x32xf32, #tpu.memory_space<vmem>>, vector<1x32xf32>
    %143 = vector.broadcast %142 : vector<1x32xf32> to vector<32x32xf32>
    %144 = arith.addf %141, %143 : vector<32x32xf32>
    %c0_60 = arith.constant 0 : index
    %c0_61 = arith.constant 0 : index
    %145 = vector.load %arg16[%c0_60, %c0_61] : memref<2x32xf32, #tpu.memory_space<vmem>>, vector<1x32xf32>
    %c0_62 = arith.constant 0 : index
    %c0_63 = arith.constant 0 : index
    %146 = vector.load %arg17[%c0_62, %c0_63] : memref<2x32xf32, #tpu.memory_space<vmem>>, vector<1x32xf32>
    %c0_64 = arith.constant 0 : index
    %c0_65 = arith.constant 0 : index
    %c0_66 = arith.constant 0 : index
    %147 = vector.load %arg18[%c0_64, %c0_65, %c0_66] : memref<2x32x256xf32, #tpu.memory_space<vmem>>, vector<1x32x256xf32>
    %148 = vector.shape_cast %147 : vector<1x32x256xf32> to vector<32x256xf32>
    %c0_67 = arith.constant 0 : index
    %c0_68 = arith.constant 0 : index
    %149 = vector.load %arg19[%c0_67, %c0_68] : memref<2x256xf32, #tpu.memory_space<vmem>>, vector<1x256xf32>
    %c0_69 = arith.constant 0 : index
    %c0_70 = arith.constant 0 : index
    %c0_71 = arith.constant 0 : index
    %150 = vector.load %arg20[%c0_69, %c0_70, %c0_71] : memref<2x128x32xf32, #tpu.memory_space<vmem>>, vector<1x128x32xf32>
    %151 = vector.shape_cast %150 : vector<1x128x32xf32> to vector<128x32xf32>
    %c0_72 = arith.constant 0 : index
    %c0_73 = arith.constant 0 : index
    %152 = vector.load %arg21[%c0_72, %c0_73] : memref<2x32xf32, #tpu.memory_space<vmem>>, vector<1x32xf32>
    %cst_74 = arith.constant dense<0.000000e+00> : vector<32xf32>
    %153 = vector.multi_reduction <add>, %144, %cst_74 [1] : vector<32x32xf32> to vector<32xf32>
    %154 = vector.shape_cast %153 : vector<32xf32> to vector<32x1xf32>
    %cst_75 = arith.constant 3.200000e+01 : f32
    %155 = vector.broadcast %cst_75 : f32 to vector<32x1xf32>
    %156 = arith.divf %154, %155 : vector<32x1xf32>
    %157 = vector.broadcast %156 : vector<32x1xf32> to vector<32x32xf32>
    %158 = arith.subf %144, %157 : vector<32x32xf32>
    %159 = arith.mulf %158, %158 : vector<32x32xf32>
    %cst_76 = arith.constant dense<0.000000e+00> : vector<32xf32>
    %160 = vector.multi_reduction <add>, %159, %cst_76 [1] : vector<32x32xf32> to vector<32xf32>
    %161 = vector.shape_cast %160 : vector<32xf32> to vector<32x1xf32>
    %cst_77 = arith.constant 3.200000e+01 : f32
    %162 = vector.broadcast %cst_77 : f32 to vector<32x1xf32>
    %163 = arith.divf %161, %162 : vector<32x1xf32>
    %164 = vector.broadcast %156 : vector<32x1xf32> to vector<32x32xf32>
    %165 = arith.subf %144, %164 : vector<32x32xf32>
    %cst_78 = arith.constant 9.99999974E-6 : f32
    %166 = vector.broadcast %cst_78 : f32 to vector<32x1xf32>
    %167 = arith.addf %163, %166 : vector<32x1xf32>
    %168 = math.rsqrt %167 : vector<32x1xf32>
    %169 = vector.broadcast %168 : vector<32x1xf32> to vector<32x32xf32>
    %170 = arith.mulf %165, %169 : vector<32x32xf32>
    %171 = vector.broadcast %145 : vector<1x32xf32> to vector<32x32xf32>
    %172 = arith.mulf %170, %171 : vector<32x32xf32>
    %173 = vector.broadcast %146 : vector<1x32xf32> to vector<32x32xf32>
    %174 = arith.addf %172, %173 : vector<32x32xf32>
    %175 = arith.truncf %174 : vector<32x32xf32> to vector<32x32xbf16>
    %176 = arith.truncf %148 : vector<32x256xf32> to vector<32x256xbf16>
    %cst_79 = arith.constant dense<0.000000e+00> : vector<32x256xf32>
    %177 = tpu.matmul %175, %176, %cst_79 {dimension_numbers = #tpu.dot_dimension_numbers<[1], [0], [0], [1], [0, 0, 1, 1], [], []>} : vector<32x32xbf16>, vector<32x256xbf16>, vector<32x256xf32> -> vector<32x256xf32>
    %178 = vector.broadcast %149 : vector<1x256xf32> to vector<32x256xf32>
    %179 = arith.addf %177, %178 : vector<32x256xf32>
    %180 = vector.extract_strided_slice %179 {offsets = [0, 0], sizes = [32, 128], strides = [1, 1]} : vector<32x256xf32> to vector<32x128xf32>
    %181 = vector.extract_strided_slice %179 {offsets = [0, 128], sizes = [32, 128], strides = [1, 1]} : vector<32x256xf32> to vector<32x128xf32>
    %cst_80 = arith.constant 5.000000e-01 : f32
    %182 = vector.broadcast %cst_80 : f32 to vector<32x128xf32>
    %183 = arith.mulf %182, %181 : vector<32x128xf32>
    %cst_81 = arith.constant 0.707106769 : f32
    %184 = vector.broadcast %cst_81 : f32 to vector<32x128xf32>
    %185 = arith.mulf %181, %184 : vector<32x128xf32>
    %186 = math.absf %185 : vector<32x128xf32>
    %cst_82 = arith.constant 0.327591091 : f32
    %187 = vector.broadcast %cst_82 : f32 to vector<32x128xf32>
    %188 = arith.mulf %187, %186 : vector<32x128xf32>
    %cst_83 = arith.constant 1.000000e+00 : f32
    %189 = vector.broadcast %cst_83 : f32 to vector<32x128xf32>
    %190 = arith.addf %189, %188 : vector<32x128xf32>
    %cst_84 = arith.constant 1.000000e+00 : f32
    %191 = vector.broadcast %cst_84 : f32 to vector<32x128xf32>
    %192 = arith.divf %191, %190 : vector<32x128xf32>
    %cst_85 = arith.constant 1.06140542 : f32
    %193 = vector.broadcast %cst_85 : f32 to vector<32x128xf32>
    %194 = arith.mulf %193, %192 : vector<32x128xf32>
    %cst_86 = arith.constant -1.45315206 : f32
    %195 = vector.broadcast %cst_86 : f32 to vector<32x128xf32>
    %196 = arith.addf %194, %195 : vector<32x128xf32>
    %197 = arith.mulf %196, %192 : vector<32x128xf32>
    %cst_87 = arith.constant 1.42141378 : f32
    %198 = vector.broadcast %cst_87 : f32 to vector<32x128xf32>
    %199 = arith.addf %197, %198 : vector<32x128xf32>
    %200 = arith.mulf %199, %192 : vector<32x128xf32>
    %cst_88 = arith.constant -0.284496725 : f32
    %201 = vector.broadcast %cst_88 : f32 to vector<32x128xf32>
    %202 = arith.addf %200, %201 : vector<32x128xf32>
    %203 = arith.mulf %202, %192 : vector<32x128xf32>
    %cst_89 = arith.constant 0.254829586 : f32
    %204 = vector.broadcast %cst_89 : f32 to vector<32x128xf32>
    %205 = arith.addf %203, %204 : vector<32x128xf32>
    %206 = arith.mulf %205, %192 : vector<32x128xf32>
    %cst_90 = arith.constant 0.000000e+00 : f32
    %207 = vector.broadcast %cst_90 : f32 to vector<32x128xf32>
    %208 = arith.subf %207, %186 : vector<32x128xf32>
    %209 = arith.mulf %208, %186 : vector<32x128xf32>
    %210 = math.exp %209 : vector<32x128xf32>
    %211 = arith.mulf %206, %210 : vector<32x128xf32>
    %cst_91 = arith.constant 1.000000e+00 : f32
    %212 = vector.broadcast %cst_91 : f32 to vector<32x128xf32>
    %213 = arith.subf %212, %211 : vector<32x128xf32>
    %cst_92 = arith.constant 0.000000e+00 : f32
    %214 = vector.broadcast %cst_92 : f32 to vector<32x128xf32>
    %215 = arith.cmpf olt, %185, %214 : vector<32x128xf32>
    %cst_93 = arith.constant 0.000000e+00 : f32
    %216 = vector.broadcast %cst_93 : f32 to vector<32x128xf32>
    %217 = arith.subf %216, %213 : vector<32x128xf32>
    %218 = arith.select %215, %217, %213 : vector<32x128xi1>, vector<32x128xf32>
    %cst_94 = arith.constant 1.000000e+00 : f32
    %219 = vector.broadcast %cst_94 : f32 to vector<32x128xf32>
    %220 = arith.addf %219, %218 : vector<32x128xf32>
    %221 = arith.mulf %183, %220 : vector<32x128xf32>
    %222 = arith.mulf %180, %221 : vector<32x128xf32>
    %223 = arith.truncf %222 : vector<32x128xf32> to vector<32x128xbf16>
    %224 = arith.truncf %151 : vector<128x32xf32> to vector<128x32xbf16>
    %cst_95 = arith.constant dense<0.000000e+00> : vector<32x32xf32>
    %225 = tpu.matmul %223, %224, %cst_95 {dimension_numbers = #tpu.dot_dimension_numbers<[1], [0], [0], [1], [0, 0, 1, 1], [], []>} : vector<32x128xbf16>, vector<128x32xbf16>, vector<32x32xf32> -> vector<32x32xf32>
    %226 = vector.broadcast %152 : vector<1x32xf32> to vector<32x32xf32>
    %227 = arith.addf %225, %226 : vector<32x32xf32>
    %228 = arith.addf %144, %227 : vector<32x32xf32>
    %c0_96 = arith.constant 0 : index
    %c0_97 = arith.constant 0 : index
    %229 = vector.load %arg22[%c0_96, %c0_97] : memref<2x32xf32, #tpu.memory_space<vmem>>, vector<1x32xf32>
    %c0_98 = arith.constant 0 : index
    %c0_99 = arith.constant 0 : index
    %230 = vector.load %arg23[%c0_98, %c0_99] : memref<2x32xf32, #tpu.memory_space<vmem>>, vector<1x32xf32>
    %cst_100 = arith.constant dense<0.000000e+00> : vector<32xf32>
    %231 = vector.multi_reduction <add>, %228, %cst_100 [1] : vector<32x32xf32> to vector<32xf32>
    %232 = vector.shape_cast %231 : vector<32xf32> to vector<32x1xf32>
    %cst_101 = arith.constant 3.200000e+01 : f32
    %233 = vector.broadcast %cst_101 : f32 to vector<32x1xf32>
    %234 = arith.divf %232, %233 : vector<32x1xf32>
    %235 = vector.broadcast %234 : vector<32x1xf32> to vector<32x32xf32>
    %236 = arith.subf %228, %235 : vector<32x32xf32>
    %237 = arith.mulf %236, %236 : vector<32x32xf32>
    %cst_102 = arith.constant dense<0.000000e+00> : vector<32xf32>
    %238 = vector.multi_reduction <add>, %237, %cst_102 [1] : vector<32x32xf32> to vector<32xf32>
    %239 = vector.shape_cast %238 : vector<32xf32> to vector<32x1xf32>
    %cst_103 = arith.constant 3.200000e+01 : f32
    %240 = vector.broadcast %cst_103 : f32 to vector<32x1xf32>
    %241 = arith.divf %239, %240 : vector<32x1xf32>
    %242 = vector.broadcast %234 : vector<32x1xf32> to vector<32x32xf32>
    %243 = arith.subf %228, %242 : vector<32x32xf32>
    %cst_104 = arith.constant 9.99999974E-6 : f32
    %244 = vector.broadcast %cst_104 : f32 to vector<32x1xf32>
    %245 = arith.addf %241, %244 : vector<32x1xf32>
    %246 = math.rsqrt %245 : vector<32x1xf32>
    %247 = vector.broadcast %246 : vector<32x1xf32> to vector<32x32xf32>
    %248 = arith.mulf %243, %247 : vector<32x32xf32>
    %249 = vector.broadcast %229 : vector<1x32xf32> to vector<32x32xf32>
    %250 = arith.mulf %248, %249 : vector<32x32xf32>
    %251 = vector.broadcast %230 : vector<1x32xf32> to vector<32x32xf32>
    %252 = arith.addf %250, %251 : vector<32x32xf32>
    %c0_105 = arith.constant 0 : index
    %c0_106 = arith.constant 0 : index
    %c0_107 = arith.constant 0 : index
    %253 = vector.load %arg24[%c0_105, %c0_106, %c0_107] : memref<2x32x32xf32, #tpu.memory_space<vmem>>, vector<1x32x32xf32>
    %254 = vector.shape_cast %253 : vector<1x32x32xf32> to vector<32x32xf32>
    %255 = arith.truncf %252 : vector<32x32xf32> to vector<32x32xbf16>
    %256 = arith.truncf %254 : vector<32x32xf32> to vector<32x32xbf16>
    %cst_108 = arith.constant dense<0.000000e+00> : vector<32x32xf32>
    %257 = tpu.matmul %255, %256, %cst_108 {dimension_numbers = #tpu.dot_dimension_numbers<[1], [0], [0], [1], [0, 0, 1, 1], [], []>} : vector<32x32xbf16>, vector<32x32xbf16>, vector<32x32xf32> -> vector<32x32xf32>
    %c0_109 = arith.constant 0 : index
    %c0_110 = arith.constant 0 : index
    %c0_111 = arith.constant 0 : index
    %258 = vector.load %arg25[%c0_109, %c0_110, %c0_111] : memref<2x32x64xf32, #tpu.memory_space<vmem>>, vector<1x32x64xf32>
    %259 = vector.shape_cast %258 : vector<1x32x64xf32> to vector<32x64xf32>
    %260 = arith.truncf %252 : vector<32x32xf32> to vector<32x32xbf16>
    %261 = arith.truncf %259 : vector<32x64xf32> to vector<32x64xbf16>
    %cst_112 = arith.constant dense<0.000000e+00> : vector<32x64xf32>
    %262 = tpu.matmul %260, %261, %cst_112 {dimension_numbers = #tpu.dot_dimension_numbers<[1], [0], [0], [1], [0, 0, 1, 1], [], []>} : vector<32x32xbf16>, vector<32x64xbf16>, vector<32x64xf32> -> vector<32x64xf32>
    %263 = vector.extract_strided_slice %262 {offsets = [0, 0], sizes = [32, 32], strides = [1, 1]} : vector<32x64xf32> to vector<32x32xf32>
    %264 = vector.extract_strided_slice %262 {offsets = [0, 32], sizes = [32, 32], strides = [1, 1]} : vector<32x64xf32> to vector<32x32xf32>
    %c0_113 = arith.constant 0 : index
    %c0_114 = arith.constant 0 : index
    %c0_115 = arith.constant 0 : index
    %265 = vector.load %arg26[%c0_113, %c0_114, %c0_115] : memref<2x32x32xf32, #tpu.memory_space<vmem>>, vector<1x32x32xf32>
    %266 = vector.shape_cast %265 : vector<1x32x32xf32> to vector<32x32xf32>
    %267 = vector.extract_strided_slice %257 {offsets = [0, 0], sizes = [16, 32], strides = [1, 1]} : vector<32x32xf32> to vector<16x32xf32>
    %268 = vector.extract_strided_slice %263 {offsets = [0, 0], sizes = [16, 32], strides = [1, 1]} : vector<32x32xf32> to vector<16x32xf32>
    %269 = vector.extract_strided_slice %264 {offsets = [0, 0], sizes = [16, 32], strides = [1, 1]} : vector<32x32xf32> to vector<16x32xf32>
    %270 = vector.extract_strided_slice %267 {offsets = [0, 0], sizes = [16, 8], strides = [1, 1]} : vector<16x32xf32> to vector<16x8xf32>
    %271 = arith.truncf %270 : vector<16x8xf32> to vector<16x8xbf16>
    %272 = vector.extract_strided_slice %268 {offsets = [0, 0], sizes = [16, 8], strides = [1, 1]} : vector<16x32xf32> to vector<16x8xf32>
    %273 = arith.truncf %272 : vector<16x8xf32> to vector<16x8xbf16>
    %cst_116 = arith.constant dense<0.000000e+00> : vector<16x16xf32>
    %274 = tpu.matmul %271, %273, %cst_116 {dimension_numbers = #tpu.dot_dimension_numbers<[1], [1], [0], [0], [0, 0, 1, 0], [], []>} : vector<16x8xbf16>, vector<16x8xbf16>, vector<16x16xf32> -> vector<16x16xf32>
    %cst_117 = arith.constant 0.353553385 : f32
    %275 = vector.broadcast %cst_117 : f32 to vector<16x16xf32>
    %276 = arith.mulf %274, %275 : vector<16x16xf32>
    %cst_118 = arith.constant dense<0xFF800000> : vector<16xf32>
    %277 = vector.multi_reduction <maximumf>, %276, %cst_118 [1] : vector<16x16xf32> to vector<16xf32>
    %278 = vector.shape_cast %277 : vector<16xf32> to vector<16x1xf32>
    %279 = vector.broadcast %278 : vector<16x1xf32> to vector<16x16xf32>
    %280 = arith.subf %276, %279 : vector<16x16xf32>
    %281 = math.exp %280 : vector<16x16xf32>
    %cst_119 = arith.constant dense<0.000000e+00> : vector<16xf32>
    %282 = vector.multi_reduction <add>, %281, %cst_119 [1] : vector<16x16xf32> to vector<16xf32>
    %283 = vector.shape_cast %282 : vector<16xf32> to vector<16x1xf32>
    %284 = tpu.reciprocal %283 {approx = true} : vector<16x1xf32> -> vector<16x1xf32>
    %285 = vector.broadcast %284 : vector<16x1xf32> to vector<16x16xf32>
    %286 = arith.mulf %281, %285 : vector<16x16xf32>
    %287 = vector.extract_strided_slice %269 {offsets = [0, 0], sizes = [16, 8], strides = [1, 1]} : vector<16x32xf32> to vector<16x8xf32>
    %288 = arith.truncf %286 : vector<16x16xf32> to vector<16x16xbf16>
    %289 = arith.truncf %287 : vector<16x8xf32> to vector<16x8xbf16>
    %cst_120 = arith.constant dense<0.000000e+00> : vector<16x8xf32>
    %290 = tpu.matmul %288, %289, %cst_120 {dimension_numbers = #tpu.dot_dimension_numbers<[1], [0], [0], [1], [0, 0, 1, 1], [], []>} : vector<16x16xbf16>, vector<16x8xbf16>, vector<16x8xf32> -> vector<16x8xf32>
    %291 = vector.extract_strided_slice %266 {offsets = [0, 0], sizes = [8, 32], strides = [1, 1]} : vector<32x32xf32> to vector<8x32xf32>
    %292 = arith.truncf %290 : vector<16x8xf32> to vector<16x8xbf16>
    %293 = arith.truncf %291 : vector<8x32xf32> to vector<8x32xbf16>
    %cst_121 = arith.constant dense<0.000000e+00> : vector<16x32xf32>
    %294 = tpu.matmul %292, %293, %cst_121 {dimension_numbers = #tpu.dot_dimension_numbers<[1], [0], [0], [1], [0, 0, 1, 1], [], []>} : vector<16x8xbf16>, vector<8x32xbf16>, vector<16x32xf32> -> vector<16x32xf32>
    %295 = vector.extract_strided_slice %267 {offsets = [0, 8], sizes = [16, 8], strides = [1, 1]} : vector<16x32xf32> to vector<16x8xf32>
    %296 = arith.truncf %295 : vector<16x8xf32> to vector<16x8xbf16>
    %297 = vector.extract_strided_slice %268 {offsets = [0, 8], sizes = [16, 8], strides = [1, 1]} : vector<16x32xf32> to vector<16x8xf32>
    %298 = arith.truncf %297 : vector<16x8xf32> to vector<16x8xbf16>
    %cst_122 = arith.constant dense<0.000000e+00> : vector<16x16xf32>
    %299 = tpu.matmul %296, %298, %cst_122 {dimension_numbers = #tpu.dot_dimension_numbers<[1], [1], [0], [0], [0, 0, 1, 0], [], []>} : vector<16x8xbf16>, vector<16x8xbf16>, vector<16x16xf32> -> vector<16x16xf32>
    %cst_123 = arith.constant 0.353553385 : f32
    %300 = vector.broadcast %cst_123 : f32 to vector<16x16xf32>
    %301 = arith.mulf %299, %300 : vector<16x16xf32>
    %cst_124 = arith.constant dense<0xFF800000> : vector<16xf32>
    %302 = vector.multi_reduction <maximumf>, %301, %cst_124 [1] : vector<16x16xf32> to vector<16xf32>
    %303 = vector.shape_cast %302 : vector<16xf32> to vector<16x1xf32>
    %304 = vector.broadcast %303 : vector<16x1xf32> to vector<16x16xf32>
    %305 = arith.subf %301, %304 : vector<16x16xf32>
    %306 = math.exp %305 : vector<16x16xf32>
    %cst_125 = arith.constant dense<0.000000e+00> : vector<16xf32>
    %307 = vector.multi_reduction <add>, %306, %cst_125 [1] : vector<16x16xf32> to vector<16xf32>
    %308 = vector.shape_cast %307 : vector<16xf32> to vector<16x1xf32>
    %309 = tpu.reciprocal %308 {approx = true} : vector<16x1xf32> -> vector<16x1xf32>
    %310 = vector.broadcast %309 : vector<16x1xf32> to vector<16x16xf32>
    %311 = arith.mulf %306, %310 : vector<16x16xf32>
    %312 = vector.extract_strided_slice %269 {offsets = [0, 8], sizes = [16, 8], strides = [1, 1]} : vector<16x32xf32> to vector<16x8xf32>
    %313 = arith.truncf %311 : vector<16x16xf32> to vector<16x16xbf16>
    %314 = arith.truncf %312 : vector<16x8xf32> to vector<16x8xbf16>
    %cst_126 = arith.constant dense<0.000000e+00> : vector<16x8xf32>
    %315 = tpu.matmul %313, %314, %cst_126 {dimension_numbers = #tpu.dot_dimension_numbers<[1], [0], [0], [1], [0, 0, 1, 1], [], []>} : vector<16x16xbf16>, vector<16x8xbf16>, vector<16x8xf32> -> vector<16x8xf32>
    %316 = vector.extract_strided_slice %266 {offsets = [8, 0], sizes = [8, 32], strides = [1, 1]} : vector<32x32xf32> to vector<8x32xf32>
    %317 = arith.truncf %315 : vector<16x8xf32> to vector<16x8xbf16>
    %318 = arith.truncf %316 : vector<8x32xf32> to vector<8x32xbf16>
    %cst_127 = arith.constant dense<0.000000e+00> : vector<16x32xf32>
    %319 = tpu.matmul %317, %318, %cst_127 {dimension_numbers = #tpu.dot_dimension_numbers<[1], [0], [0], [1], [0, 0, 1, 1], [], []>} : vector<16x8xbf16>, vector<8x32xbf16>, vector<16x32xf32> -> vector<16x32xf32>
    %320 = arith.addf %294, %319 : vector<16x32xf32>
    %321 = vector.extract_strided_slice %267 {offsets = [0, 16], sizes = [16, 8], strides = [1, 1]} : vector<16x32xf32> to vector<16x8xf32>
    %322 = arith.truncf %321 : vector<16x8xf32> to vector<16x8xbf16>
    %323 = vector.extract_strided_slice %268 {offsets = [0, 16], sizes = [16, 8], strides = [1, 1]} : vector<16x32xf32> to vector<16x8xf32>
    %324 = arith.truncf %323 : vector<16x8xf32> to vector<16x8xbf16>
    %cst_128 = arith.constant dense<0.000000e+00> : vector<16x16xf32>
    %325 = tpu.matmul %322, %324, %cst_128 {dimension_numbers = #tpu.dot_dimension_numbers<[1], [1], [0], [0], [0, 0, 1, 0], [], []>} : vector<16x8xbf16>, vector<16x8xbf16>, vector<16x16xf32> -> vector<16x16xf32>
    %cst_129 = arith.constant 0.353553385 : f32
    %326 = vector.broadcast %cst_129 : f32 to vector<16x16xf32>
    %327 = arith.mulf %325, %326 : vector<16x16xf32>
    %cst_130 = arith.constant dense<0xFF800000> : vector<16xf32>
    %328 = vector.multi_reduction <maximumf>, %327, %cst_130 [1] : vector<16x16xf32> to vector<16xf32>
    %329 = vector.shape_cast %328 : vector<16xf32> to vector<16x1xf32>
    %330 = vector.broadcast %329 : vector<16x1xf32> to vector<16x16xf32>
    %331 = arith.subf %327, %330 : vector<16x16xf32>
    %332 = math.exp %331 : vector<16x16xf32>
    %cst_131 = arith.constant dense<0.000000e+00> : vector<16xf32>
    %333 = vector.multi_reduction <add>, %332, %cst_131 [1] : vector<16x16xf32> to vector<16xf32>
    %334 = vector.shape_cast %333 : vector<16xf32> to vector<16x1xf32>
    %335 = tpu.reciprocal %334 {approx = true} : vector<16x1xf32> -> vector<16x1xf32>
    %336 = vector.broadcast %335 : vector<16x1xf32> to vector<16x16xf32>
    %337 = arith.mulf %332, %336 : vector<16x16xf32>
    %338 = vector.extract_strided_slice %269 {offsets = [0, 16], sizes = [16, 8], strides = [1, 1]} : vector<16x32xf32> to vector<16x8xf32>
    %339 = arith.truncf %337 : vector<16x16xf32> to vector<16x16xbf16>
    %340 = arith.truncf %338 : vector<16x8xf32> to vector<16x8xbf16>
    %cst_132 = arith.constant dense<0.000000e+00> : vector<16x8xf32>
    %341 = tpu.matmul %339, %340, %cst_132 {dimension_numbers = #tpu.dot_dimension_numbers<[1], [0], [0], [1], [0, 0, 1, 1], [], []>} : vector<16x16xbf16>, vector<16x8xbf16>, vector<16x8xf32> -> vector<16x8xf32>
    %342 = vector.extract_strided_slice %266 {offsets = [16, 0], sizes = [8, 32], strides = [1, 1]} : vector<32x32xf32> to vector<8x32xf32>
    %343 = arith.truncf %341 : vector<16x8xf32> to vector<16x8xbf16>
    %344 = arith.truncf %342 : vector<8x32xf32> to vector<8x32xbf16>
    %cst_133 = arith.constant dense<0.000000e+00> : vector<16x32xf32>
    %345 = tpu.matmul %343, %344, %cst_133 {dimension_numbers = #tpu.dot_dimension_numbers<[1], [0], [0], [1], [0, 0, 1, 1], [], []>} : vector<16x8xbf16>, vector<8x32xbf16>, vector<16x32xf32> -> vector<16x32xf32>
    %346 = arith.addf %320, %345 : vector<16x32xf32>
    %347 = vector.extract_strided_slice %267 {offsets = [0, 24], sizes = [16, 8], strides = [1, 1]} : vector<16x32xf32> to vector<16x8xf32>
    %348 = arith.truncf %347 : vector<16x8xf32> to vector<16x8xbf16>
    %349 = vector.extract_strided_slice %268 {offsets = [0, 24], sizes = [16, 8], strides = [1, 1]} : vector<16x32xf32> to vector<16x8xf32>
    %350 = arith.truncf %349 : vector<16x8xf32> to vector<16x8xbf16>
    %cst_134 = arith.constant dense<0.000000e+00> : vector<16x16xf32>
    %351 = tpu.matmul %348, %350, %cst_134 {dimension_numbers = #tpu.dot_dimension_numbers<[1], [1], [0], [0], [0, 0, 1, 0], [], []>} : vector<16x8xbf16>, vector<16x8xbf16>, vector<16x16xf32> -> vector<16x16xf32>
    %cst_135 = arith.constant 0.353553385 : f32
    %352 = vector.broadcast %cst_135 : f32 to vector<16x16xf32>
    %353 = arith.mulf %351, %352 : vector<16x16xf32>
    %cst_136 = arith.constant dense<0xFF800000> : vector<16xf32>
    %354 = vector.multi_reduction <maximumf>, %353, %cst_136 [1] : vector<16x16xf32> to vector<16xf32>
    %355 = vector.shape_cast %354 : vector<16xf32> to vector<16x1xf32>
    %356 = vector.broadcast %355 : vector<16x1xf32> to vector<16x16xf32>
    %357 = arith.subf %353, %356 : vector<16x16xf32>
    %358 = math.exp %357 : vector<16x16xf32>
    %cst_137 = arith.constant dense<0.000000e+00> : vector<16xf32>
    %359 = vector.multi_reduction <add>, %358, %cst_137 [1] : vector<16x16xf32> to vector<16xf32>
    %360 = vector.shape_cast %359 : vector<16xf32> to vector<16x1xf32>
    %361 = tpu.reciprocal %360 {approx = true} : vector<16x1xf32> -> vector<16x1xf32>
    %362 = vector.broadcast %361 : vector<16x1xf32> to vector<16x16xf32>
    %363 = arith.mulf %358, %362 : vector<16x16xf32>
    %364 = vector.extract_strided_slice %269 {offsets = [0, 24], sizes = [16, 8], strides = [1, 1]} : vector<16x32xf32> to vector<16x8xf32>
    %365 = arith.truncf %363 : vector<16x16xf32> to vector<16x16xbf16>
    %366 = arith.truncf %364 : vector<16x8xf32> to vector<16x8xbf16>
    %cst_138 = arith.constant dense<0.000000e+00> : vector<16x8xf32>
    %367 = tpu.matmul %365, %366, %cst_138 {dimension_numbers = #tpu.dot_dimension_numbers<[1], [0], [0], [1], [0, 0, 1, 1], [], []>} : vector<16x16xbf16>, vector<16x8xbf16>, vector<16x8xf32> -> vector<16x8xf32>
    %368 = vector.extract_strided_slice %266 {offsets = [24, 0], sizes = [8, 32], strides = [1, 1]} : vector<32x32xf32> to vector<8x32xf32>
    %369 = arith.truncf %367 : vector<16x8xf32> to vector<16x8xbf16>
    %370 = arith.truncf %368 : vector<8x32xf32> to vector<8x32xbf16>
    %cst_139 = arith.constant dense<0.000000e+00> : vector<16x32xf32>
    %371 = tpu.matmul %369, %370, %cst_139 {dimension_numbers = #tpu.dot_dimension_numbers<[1], [0], [0], [1], [0, 0, 1, 1], [], []>} : vector<16x8xbf16>, vector<8x32xbf16>, vector<16x32xf32> -> vector<16x32xf32>
    %372 = arith.addf %346, %371 : vector<16x32xf32>
    %373 = vector.extract_strided_slice %257 {offsets = [16, 0], sizes = [16, 32], strides = [1, 1]} : vector<32x32xf32> to vector<16x32xf32>
    %374 = vector.extract_strided_slice %263 {offsets = [16, 0], sizes = [16, 32], strides = [1, 1]} : vector<32x32xf32> to vector<16x32xf32>
    %375 = vector.extract_strided_slice %264 {offsets = [16, 0], sizes = [16, 32], strides = [1, 1]} : vector<32x32xf32> to vector<16x32xf32>
    %376 = vector.extract_strided_slice %373 {offsets = [0, 0], sizes = [16, 8], strides = [1, 1]} : vector<16x32xf32> to vector<16x8xf32>
    %377 = arith.truncf %376 : vector<16x8xf32> to vector<16x8xbf16>
    %378 = vector.extract_strided_slice %374 {offsets = [0, 0], sizes = [16, 8], strides = [1, 1]} : vector<16x32xf32> to vector<16x8xf32>
    %379 = arith.truncf %378 : vector<16x8xf32> to vector<16x8xbf16>
    %cst_140 = arith.constant dense<0.000000e+00> : vector<16x16xf32>
    %380 = tpu.matmul %377, %379, %cst_140 {dimension_numbers = #tpu.dot_dimension_numbers<[1], [1], [0], [0], [0, 0, 1, 0], [], []>} : vector<16x8xbf16>, vector<16x8xbf16>, vector<16x16xf32> -> vector<16x16xf32>
    %cst_141 = arith.constant 0.353553385 : f32
    %381 = vector.broadcast %cst_141 : f32 to vector<16x16xf32>
    %382 = arith.mulf %380, %381 : vector<16x16xf32>
    %cst_142 = arith.constant dense<0xFF800000> : vector<16xf32>
    %383 = vector.multi_reduction <maximumf>, %382, %cst_142 [1] : vector<16x16xf32> to vector<16xf32>
    %384 = vector.shape_cast %383 : vector<16xf32> to vector<16x1xf32>
    %385 = vector.broadcast %384 : vector<16x1xf32> to vector<16x16xf32>
    %386 = arith.subf %382, %385 : vector<16x16xf32>
    %387 = math.exp %386 : vector<16x16xf32>
    %cst_143 = arith.constant dense<0.000000e+00> : vector<16xf32>
    %388 = vector.multi_reduction <add>, %387, %cst_143 [1] : vector<16x16xf32> to vector<16xf32>
    %389 = vector.shape_cast %388 : vector<16xf32> to vector<16x1xf32>
    %390 = tpu.reciprocal %389 {approx = true} : vector<16x1xf32> -> vector<16x1xf32>
    %391 = vector.broadcast %390 : vector<16x1xf32> to vector<16x16xf32>
    %392 = arith.mulf %387, %391 : vector<16x16xf32>
    %393 = vector.extract_strided_slice %375 {offsets = [0, 0], sizes = [16, 8], strides = [1, 1]} : vector<16x32xf32> to vector<16x8xf32>
    %394 = arith.truncf %392 : vector<16x16xf32> to vector<16x16xbf16>
    %395 = arith.truncf %393 : vector<16x8xf32> to vector<16x8xbf16>
    %cst_144 = arith.constant dense<0.000000e+00> : vector<16x8xf32>
    %396 = tpu.matmul %394, %395, %cst_144 {dimension_numbers = #tpu.dot_dimension_numbers<[1], [0], [0], [1], [0, 0, 1, 1], [], []>} : vector<16x16xbf16>, vector<16x8xbf16>, vector<16x8xf32> -> vector<16x8xf32>
    %397 = vector.extract_strided_slice %266 {offsets = [0, 0], sizes = [8, 32], strides = [1, 1]} : vector<32x32xf32> to vector<8x32xf32>
    %398 = arith.truncf %396 : vector<16x8xf32> to vector<16x8xbf16>
    %399 = arith.truncf %397 : vector<8x32xf32> to vector<8x32xbf16>
    %cst_145 = arith.constant dense<0.000000e+00> : vector<16x32xf32>
    %400 = tpu.matmul %398, %399, %cst_145 {dimension_numbers = #tpu.dot_dimension_numbers<[1], [0], [0], [1], [0, 0, 1, 1], [], []>} : vector<16x8xbf16>, vector<8x32xbf16>, vector<16x32xf32> -> vector<16x32xf32>
    %401 = vector.extract_strided_slice %373 {offsets = [0, 8], sizes = [16, 8], strides = [1, 1]} : vector<16x32xf32> to vector<16x8xf32>
    %402 = arith.truncf %401 : vector<16x8xf32> to vector<16x8xbf16>
    %403 = vector.extract_strided_slice %374 {offsets = [0, 8], sizes = [16, 8], strides = [1, 1]} : vector<16x32xf32> to vector<16x8xf32>
    %404 = arith.truncf %403 : vector<16x8xf32> to vector<16x8xbf16>
    %cst_146 = arith.constant dense<0.000000e+00> : vector<16x16xf32>
    %405 = tpu.matmul %402, %404, %cst_146 {dimension_numbers = #tpu.dot_dimension_numbers<[1], [1], [0], [0], [0, 0, 1, 0], [], []>} : vector<16x8xbf16>, vector<16x8xbf16>, vector<16x16xf32> -> vector<16x16xf32>
    %cst_147 = arith.constant 0.353553385 : f32
    %406 = vector.broadcast %cst_147 : f32 to vector<16x16xf32>
    %407 = arith.mulf %405, %406 : vector<16x16xf32>
    %cst_148 = arith.constant dense<0xFF800000> : vector<16xf32>
    %408 = vector.multi_reduction <maximumf>, %407, %cst_148 [1] : vector<16x16xf32> to vector<16xf32>
    %409 = vector.shape_cast %408 : vector<16xf32> to vector<16x1xf32>
    %410 = vector.broadcast %409 : vector<16x1xf32> to vector<16x16xf32>
    %411 = arith.subf %407, %410 : vector<16x16xf32>
    %412 = math.exp %411 : vector<16x16xf32>
    %cst_149 = arith.constant dense<0.000000e+00> : vector<16xf32>
    %413 = vector.multi_reduction <add>, %412, %cst_149 [1] : vector<16x16xf32> to vector<16xf32>
    %414 = vector.shape_cast %413 : vector<16xf32> to vector<16x1xf32>
    %415 = tpu.reciprocal %414 {approx = true} : vector<16x1xf32> -> vector<16x1xf32>
    %416 = vector.broadcast %415 : vector<16x1xf32> to vector<16x16xf32>
    %417 = arith.mulf %412, %416 : vector<16x16xf32>
    %418 = vector.extract_strided_slice %375 {offsets = [0, 8], sizes = [16, 8], strides = [1, 1]} : vector<16x32xf32> to vector<16x8xf32>
    %419 = arith.truncf %417 : vector<16x16xf32> to vector<16x16xbf16>
    %420 = arith.truncf %418 : vector<16x8xf32> to vector<16x8xbf16>
    %cst_150 = arith.constant dense<0.000000e+00> : vector<16x8xf32>
    %421 = tpu.matmul %419, %420, %cst_150 {dimension_numbers = #tpu.dot_dimension_numbers<[1], [0], [0], [1], [0, 0, 1, 1], [], []>} : vector<16x16xbf16>, vector<16x8xbf16>, vector<16x8xf32> -> vector<16x8xf32>
    %422 = vector.extract_strided_slice %266 {offsets = [8, 0], sizes = [8, 32], strides = [1, 1]} : vector<32x32xf32> to vector<8x32xf32>
    %423 = arith.truncf %421 : vector<16x8xf32> to vector<16x8xbf16>
    %424 = arith.truncf %422 : vector<8x32xf32> to vector<8x32xbf16>
    %cst_151 = arith.constant dense<0.000000e+00> : vector<16x32xf32>
    %425 = tpu.matmul %423, %424, %cst_151 {dimension_numbers = #tpu.dot_dimension_numbers<[1], [0], [0], [1], [0, 0, 1, 1], [], []>} : vector<16x8xbf16>, vector<8x32xbf16>, vector<16x32xf32> -> vector<16x32xf32>
    %426 = arith.addf %400, %425 : vector<16x32xf32>
    %427 = vector.extract_strided_slice %373 {offsets = [0, 16], sizes = [16, 8], strides = [1, 1]} : vector<16x32xf32> to vector<16x8xf32>
    %428 = arith.truncf %427 : vector<16x8xf32> to vector<16x8xbf16>
    %429 = vector.extract_strided_slice %374 {offsets = [0, 16], sizes = [16, 8], strides = [1, 1]} : vector<16x32xf32> to vector<16x8xf32>
    %430 = arith.truncf %429 : vector<16x8xf32> to vector<16x8xbf16>
    %cst_152 = arith.constant dense<0.000000e+00> : vector<16x16xf32>
    %431 = tpu.matmul %428, %430, %cst_152 {dimension_numbers = #tpu.dot_dimension_numbers<[1], [1], [0], [0], [0, 0, 1, 0], [], []>} : vector<16x8xbf16>, vector<16x8xbf16>, vector<16x16xf32> -> vector<16x16xf32>
    %cst_153 = arith.constant 0.353553385 : f32
    %432 = vector.broadcast %cst_153 : f32 to vector<16x16xf32>
    %433 = arith.mulf %431, %432 : vector<16x16xf32>
    %cst_154 = arith.constant dense<0xFF800000> : vector<16xf32>
    %434 = vector.multi_reduction <maximumf>, %433, %cst_154 [1] : vector<16x16xf32> to vector<16xf32>
    %435 = vector.shape_cast %434 : vector<16xf32> to vector<16x1xf32>
    %436 = vector.broadcast %435 : vector<16x1xf32> to vector<16x16xf32>
    %437 = arith.subf %433, %436 : vector<16x16xf32>
    %438 = math.exp %437 : vector<16x16xf32>
    %cst_155 = arith.constant dense<0.000000e+00> : vector<16xf32>
    %439 = vector.multi_reduction <add>, %438, %cst_155 [1] : vector<16x16xf32> to vector<16xf32>
    %440 = vector.shape_cast %439 : vector<16xf32> to vector<16x1xf32>
    %441 = tpu.reciprocal %440 {approx = true} : vector<16x1xf32> -> vector<16x1xf32>
    %442 = vector.broadcast %441 : vector<16x1xf32> to vector<16x16xf32>
    %443 = arith.mulf %438, %442 : vector<16x16xf32>
    %444 = vector.extract_strided_slice %375 {offsets = [0, 16], sizes = [16, 8], strides = [1, 1]} : vector<16x32xf32> to vector<16x8xf32>
    %445 = arith.truncf %443 : vector<16x16xf32> to vector<16x16xbf16>
    %446 = arith.truncf %444 : vector<16x8xf32> to vector<16x8xbf16>
    %cst_156 = arith.constant dense<0.000000e+00> : vector<16x8xf32>
    %447 = tpu.matmul %445, %446, %cst_156 {dimension_numbers = #tpu.dot_dimension_numbers<[1], [0], [0], [1], [0, 0, 1, 1], [], []>} : vector<16x16xbf16>, vector<16x8xbf16>, vector<16x8xf32> -> vector<16x8xf32>
    %448 = vector.extract_strided_slice %266 {offsets = [16, 0], sizes = [8, 32], strides = [1, 1]} : vector<32x32xf32> to vector<8x32xf32>
    %449 = arith.truncf %447 : vector<16x8xf32> to vector<16x8xbf16>
    %450 = arith.truncf %448 : vector<8x32xf32> to vector<8x32xbf16>
    %cst_157 = arith.constant dense<0.000000e+00> : vector<16x32xf32>
    %451 = tpu.matmul %449, %450, %cst_157 {dimension_numbers = #tpu.dot_dimension_numbers<[1], [0], [0], [1], [0, 0, 1, 1], [], []>} : vector<16x8xbf16>, vector<8x32xbf16>, vector<16x32xf32> -> vector<16x32xf32>
    %452 = arith.addf %426, %451 : vector<16x32xf32>
    %453 = vector.extract_strided_slice %373 {offsets = [0, 24], sizes = [16, 8], strides = [1, 1]} : vector<16x32xf32> to vector<16x8xf32>
    %454 = arith.truncf %453 : vector<16x8xf32> to vector<16x8xbf16>
    %455 = vector.extract_strided_slice %374 {offsets = [0, 24], sizes = [16, 8], strides = [1, 1]} : vector<16x32xf32> to vector<16x8xf32>
    %456 = arith.truncf %455 : vector<16x8xf32> to vector<16x8xbf16>
    %cst_158 = arith.constant dense<0.000000e+00> : vector<16x16xf32>
    %457 = tpu.matmul %454, %456, %cst_158 {dimension_numbers = #tpu.dot_dimension_numbers<[1], [1], [0], [0], [0, 0, 1, 0], [], []>} : vector<16x8xbf16>, vector<16x8xbf16>, vector<16x16xf32> -> vector<16x16xf32>
    %cst_159 = arith.constant 0.353553385 : f32
    %458 = vector.broadcast %cst_159 : f32 to vector<16x16xf32>
    %459 = arith.mulf %457, %458 : vector<16x16xf32>
    %cst_160 = arith.constant dense<0xFF800000> : vector<16xf32>
    %460 = vector.multi_reduction <maximumf>, %459, %cst_160 [1] : vector<16x16xf32> to vector<16xf32>
    %461 = vector.shape_cast %460 : vector<16xf32> to vector<16x1xf32>
    %462 = vector.broadcast %461 : vector<16x1xf32> to vector<16x16xf32>
    %463 = arith.subf %459, %462 : vector<16x16xf32>
    %464 = math.exp %463 : vector<16x16xf32>
    %cst_161 = arith.constant dense<0.000000e+00> : vector<16xf32>
    %465 = vector.multi_reduction <add>, %464, %cst_161 [1] : vector<16x16xf32> to vector<16xf32>
    %466 = vector.shape_cast %465 : vector<16xf32> to vector<16x1xf32>
    %467 = tpu.reciprocal %466 {approx = true} : vector<16x1xf32> -> vector<16x1xf32>
    %468 = vector.broadcast %467 : vector<16x1xf32> to vector<16x16xf32>
    %469 = arith.mulf %464, %468 : vector<16x16xf32>
    %470 = vector.extract_strided_slice %375 {offsets = [0, 24], sizes = [16, 8], strides = [1, 1]} : vector<16x32xf32> to vector<16x8xf32>
    %471 = arith.truncf %469 : vector<16x16xf32> to vector<16x16xbf16>
    %472 = arith.truncf %470 : vector<16x8xf32> to vector<16x8xbf16>
    %cst_162 = arith.constant dense<0.000000e+00> : vector<16x8xf32>
    %473 = tpu.matmul %471, %472, %cst_162 {dimension_numbers = #tpu.dot_dimension_numbers<[1], [0], [0], [1], [0, 0, 1, 1], [], []>} : vector<16x16xbf16>, vector<16x8xbf16>, vector<16x8xf32> -> vector<16x8xf32>
    %474 = vector.extract_strided_slice %266 {offsets = [24, 0], sizes = [8, 32], strides = [1, 1]} : vector<32x32xf32> to vector<8x32xf32>
    %475 = arith.truncf %473 : vector<16x8xf32> to vector<16x8xbf16>
    %476 = arith.truncf %474 : vector<8x32xf32> to vector<8x32xbf16>
    %cst_163 = arith.constant dense<0.000000e+00> : vector<16x32xf32>
    %477 = tpu.matmul %475, %476, %cst_163 {dimension_numbers = #tpu.dot_dimension_numbers<[1], [0], [0], [1], [0, 0, 1, 1], [], []>} : vector<16x8xbf16>, vector<8x32xbf16>, vector<16x32xf32> -> vector<16x32xf32>
    %478 = arith.addf %452, %477 : vector<16x32xf32>
    %479 = tpu.concatenate %372, %478 in 0 : vector<16x32xf32>, vector<16x32xf32> -> vector<32x32xf32>
    %480 = arith.addf %228, %479 : vector<32x32xf32>
    %c0_164 = arith.constant 0 : index
    %c0_165 = arith.constant 0 : index
    %481 = vector.load %arg27[%c0_164, %c0_165] : memref<2x32xf32, #tpu.memory_space<vmem>>, vector<1x32xf32>
    %482 = vector.broadcast %481 : vector<1x32xf32> to vector<32x32xf32>
    %483 = arith.addf %480, %482 : vector<32x32xf32>
    %c0_166 = arith.constant 0 : index
    %c0_167 = arith.constant 0 : index
    %484 = vector.load %arg28[%c0_166, %c0_167] : memref<2x32xf32, #tpu.memory_space<vmem>>, vector<1x32xf32>
    %c0_168 = arith.constant 0 : index
    %c0_169 = arith.constant 0 : index
    %485 = vector.load %arg29[%c0_168, %c0_169] : memref<2x32xf32, #tpu.memory_space<vmem>>, vector<1x32xf32>
    %c0_170 = arith.constant 0 : index
    %c0_171 = arith.constant 0 : index
    %c0_172 = arith.constant 0 : index
    %486 = vector.load %arg30[%c0_170, %c0_171, %c0_172] : memref<2x32x256xf32, #tpu.memory_space<vmem>>, vector<1x32x256xf32>
    %487 = vector.shape_cast %486 : vector<1x32x256xf32> to vector<32x256xf32>
    %c0_173 = arith.constant 0 : index
    %c0_174 = arith.constant 0 : index
    %488 = vector.load %arg31[%c0_173, %c0_174] : memref<2x256xf32, #tpu.memory_space<vmem>>, vector<1x256xf32>
    %c0_175 = arith.constant 0 : index
    %c0_176 = arith.constant 0 : index
    %c0_177 = arith.constant 0 : index
    %489 = vector.load %arg32[%c0_175, %c0_176, %c0_177] : memref<2x128x32xf32, #tpu.memory_space<vmem>>, vector<1x128x32xf32>
    %490 = vector.shape_cast %489 : vector<1x128x32xf32> to vector<128x32xf32>
    %c0_178 = arith.constant 0 : index
    %c0_179 = arith.constant 0 : index
    %491 = vector.load %arg33[%c0_178, %c0_179] : memref<2x32xf32, #tpu.memory_space<vmem>>, vector<1x32xf32>
    %cst_180 = arith.constant dense<0.000000e+00> : vector<32xf32>
    %492 = vector.multi_reduction <add>, %483, %cst_180 [1] : vector<32x32xf32> to vector<32xf32>
    %493 = vector.shape_cast %492 : vector<32xf32> to vector<32x1xf32>
    %cst_181 = arith.constant 3.200000e+01 : f32
    %494 = vector.broadcast %cst_181 : f32 to vector<32x1xf32>
    %495 = arith.divf %493, %494 : vector<32x1xf32>
    %496 = vector.broadcast %495 : vector<32x1xf32> to vector<32x32xf32>
    %497 = arith.subf %483, %496 : vector<32x32xf32>
    %498 = arith.mulf %497, %497 : vector<32x32xf32>
    %cst_182 = arith.constant dense<0.000000e+00> : vector<32xf32>
    %499 = vector.multi_reduction <add>, %498, %cst_182 [1] : vector<32x32xf32> to vector<32xf32>
    %500 = vector.shape_cast %499 : vector<32xf32> to vector<32x1xf32>
    %cst_183 = arith.constant 3.200000e+01 : f32
    %501 = vector.broadcast %cst_183 : f32 to vector<32x1xf32>
    %502 = arith.divf %500, %501 : vector<32x1xf32>
    %503 = vector.broadcast %495 : vector<32x1xf32> to vector<32x32xf32>
    %504 = arith.subf %483, %503 : vector<32x32xf32>
    %cst_184 = arith.constant 9.99999974E-6 : f32
    %505 = vector.broadcast %cst_184 : f32 to vector<32x1xf32>
    %506 = arith.addf %502, %505 : vector<32x1xf32>
    %507 = math.rsqrt %506 : vector<32x1xf32>
    %508 = vector.broadcast %507 : vector<32x1xf32> to vector<32x32xf32>
    %509 = arith.mulf %504, %508 : vector<32x32xf32>
    %510 = vector.broadcast %484 : vector<1x32xf32> to vector<32x32xf32>
    %511 = arith.mulf %509, %510 : vector<32x32xf32>
    %512 = vector.broadcast %485 : vector<1x32xf32> to vector<32x32xf32>
    %513 = arith.addf %511, %512 : vector<32x32xf32>
    %514 = arith.truncf %513 : vector<32x32xf32> to vector<32x32xbf16>
    %515 = arith.truncf %487 : vector<32x256xf32> to vector<32x256xbf16>
    %cst_185 = arith.constant dense<0.000000e+00> : vector<32x256xf32>
    %516 = tpu.matmul %514, %515, %cst_185 {dimension_numbers = #tpu.dot_dimension_numbers<[1], [0], [0], [1], [0, 0, 1, 1], [], []>} : vector<32x32xbf16>, vector<32x256xbf16>, vector<32x256xf32> -> vector<32x256xf32>
    %517 = vector.broadcast %488 : vector<1x256xf32> to vector<32x256xf32>
    %518 = arith.addf %516, %517 : vector<32x256xf32>
    %519 = vector.extract_strided_slice %518 {offsets = [0, 0], sizes = [32, 128], strides = [1, 1]} : vector<32x256xf32> to vector<32x128xf32>
    %520 = vector.extract_strided_slice %518 {offsets = [0, 128], sizes = [32, 128], strides = [1, 1]} : vector<32x256xf32> to vector<32x128xf32>
    %cst_186 = arith.constant 5.000000e-01 : f32
    %521 = vector.broadcast %cst_186 : f32 to vector<32x128xf32>
    %522 = arith.mulf %521, %520 : vector<32x128xf32>
    %cst_187 = arith.constant 0.707106769 : f32
    %523 = vector.broadcast %cst_187 : f32 to vector<32x128xf32>
    %524 = arith.mulf %520, %523 : vector<32x128xf32>
    %525 = math.absf %524 : vector<32x128xf32>
    %cst_188 = arith.constant 0.327591091 : f32
    %526 = vector.broadcast %cst_188 : f32 to vector<32x128xf32>
    %527 = arith.mulf %526, %525 : vector<32x128xf32>
    %cst_189 = arith.constant 1.000000e+00 : f32
    %528 = vector.broadcast %cst_189 : f32 to vector<32x128xf32>
    %529 = arith.addf %528, %527 : vector<32x128xf32>
    %cst_190 = arith.constant 1.000000e+00 : f32
    %530 = vector.broadcast %cst_190 : f32 to vector<32x128xf32>
    %531 = arith.divf %530, %529 : vector<32x128xf32>
    %cst_191 = arith.constant 1.06140542 : f32
    %532 = vector.broadcast %cst_191 : f32 to vector<32x128xf32>
    %533 = arith.mulf %532, %531 : vector<32x128xf32>
    %cst_192 = arith.constant -1.45315206 : f32
    %534 = vector.broadcast %cst_192 : f32 to vector<32x128xf32>
    %535 = arith.addf %533, %534 : vector<32x128xf32>
    %536 = arith.mulf %535, %531 : vector<32x128xf32>
    %cst_193 = arith.constant 1.42141378 : f32
    %537 = vector.broadcast %cst_193 : f32 to vector<32x128xf32>
    %538 = arith.addf %536, %537 : vector<32x128xf32>
    %539 = arith.mulf %538, %531 : vector<32x128xf32>
    %cst_194 = arith.constant -0.284496725 : f32
    %540 = vector.broadcast %cst_194 : f32 to vector<32x128xf32>
    %541 = arith.addf %539, %540 : vector<32x128xf32>
    %542 = arith.mulf %541, %531 : vector<32x128xf32>
    %cst_195 = arith.constant 0.254829586 : f32
    %543 = vector.broadcast %cst_195 : f32 to vector<32x128xf32>
    %544 = arith.addf %542, %543 : vector<32x128xf32>
    %545 = arith.mulf %544, %531 : vector<32x128xf32>
    %cst_196 = arith.constant 0.000000e+00 : f32
    %546 = vector.broadcast %cst_196 : f32 to vector<32x128xf32>
    %547 = arith.subf %546, %525 : vector<32x128xf32>
    %548 = arith.mulf %547, %525 : vector<32x128xf32>
    %549 = math.exp %548 : vector<32x128xf32>
    %550 = arith.mulf %545, %549 : vector<32x128xf32>
    %cst_197 = arith.constant 1.000000e+00 : f32
    %551 = vector.broadcast %cst_197 : f32 to vector<32x128xf32>
    %552 = arith.subf %551, %550 : vector<32x128xf32>
    %cst_198 = arith.constant 0.000000e+00 : f32
    %553 = vector.broadcast %cst_198 : f32 to vector<32x128xf32>
    %554 = arith.cmpf olt, %524, %553 : vector<32x128xf32>
    %cst_199 = arith.constant 0.000000e+00 : f32
    %555 = vector.broadcast %cst_199 : f32 to vector<32x128xf32>
    %556 = arith.subf %555, %552 : vector<32x128xf32>
    %557 = arith.select %554, %556, %552 : vector<32x128xi1>, vector<32x128xf32>
    %cst_200 = arith.constant 1.000000e+00 : f32
    %558 = vector.broadcast %cst_200 : f32 to vector<32x128xf32>
    %559 = arith.addf %558, %557 : vector<32x128xf32>
    %560 = arith.mulf %522, %559 : vector<32x128xf32>
    %561 = arith.mulf %519, %560 : vector<32x128xf32>
    %562 = arith.truncf %561 : vector<32x128xf32> to vector<32x128xbf16>
    %563 = arith.truncf %490 : vector<128x32xf32> to vector<128x32xbf16>
    %cst_201 = arith.constant dense<0.000000e+00> : vector<32x32xf32>
    %564 = tpu.matmul %562, %563, %cst_201 {dimension_numbers = #tpu.dot_dimension_numbers<[1], [0], [0], [1], [0, 0, 1, 1], [], []>} : vector<32x128xbf16>, vector<128x32xbf16>, vector<32x32xf32> -> vector<32x32xf32>
    %565 = vector.broadcast %491 : vector<1x32xf32> to vector<32x32xf32>
    %566 = arith.addf %564, %565 : vector<32x32xf32>
    %567 = arith.addf %483, %566 : vector<32x32xf32>
    %c1 = arith.constant 1 : index
    %c0_202 = arith.constant 0 : index
    %568 = vector.load %arg5[%c1, %c0_202] : memref<2x32xf32, #tpu.memory_space<vmem>>, vector<1x32xf32>
    %c1_203 = arith.constant 1 : index
    %c0_204 = arith.constant 0 : index
    %569 = vector.load %arg6[%c1_203, %c0_204] : memref<2x32xf32, #tpu.memory_space<vmem>>, vector<1x32xf32>
    %cst_205 = arith.constant dense<0.000000e+00> : vector<32xf32>
    %570 = vector.multi_reduction <add>, %567, %cst_205 [1] : vector<32x32xf32> to vector<32xf32>
    %571 = vector.shape_cast %570 : vector<32xf32> to vector<32x1xf32>
    %cst_206 = arith.constant 3.200000e+01 : f32
    %572 = vector.broadcast %cst_206 : f32 to vector<32x1xf32>
    %573 = arith.divf %571, %572 : vector<32x1xf32>
    %574 = vector.broadcast %573 : vector<32x1xf32> to vector<32x32xf32>
    %575 = arith.subf %567, %574 : vector<32x32xf32>
    %576 = arith.mulf %575, %575 : vector<32x32xf32>
    %cst_207 = arith.constant dense<0.000000e+00> : vector<32xf32>
    %577 = vector.multi_reduction <add>, %576, %cst_207 [1] : vector<32x32xf32> to vector<32xf32>
    %578 = vector.shape_cast %577 : vector<32xf32> to vector<32x1xf32>
    %cst_208 = arith.constant 3.200000e+01 : f32
    %579 = vector.broadcast %cst_208 : f32 to vector<32x1xf32>
    %580 = arith.divf %578, %579 : vector<32x1xf32>
    %581 = vector.broadcast %573 : vector<32x1xf32> to vector<32x32xf32>
    %582 = arith.subf %567, %581 : vector<32x32xf32>
    %cst_209 = arith.constant 9.99999974E-6 : f32
    %583 = vector.broadcast %cst_209 : f32 to vector<32x1xf32>
    %584 = arith.addf %580, %583 : vector<32x1xf32>
    %585 = math.rsqrt %584 : vector<32x1xf32>
    %586 = vector.broadcast %585 : vector<32x1xf32> to vector<32x32xf32>
    %587 = arith.mulf %582, %586 : vector<32x32xf32>
    %588 = vector.broadcast %568 : vector<1x32xf32> to vector<32x32xf32>
    %589 = arith.mulf %587, %588 : vector<32x32xf32>
    %590 = vector.broadcast %569 : vector<1x32xf32> to vector<32x32xf32>
    %591 = arith.addf %589, %590 : vector<32x32xf32>
    %c1_210 = arith.constant 1 : index
    %c0_211 = arith.constant 0 : index
    %592 = vector.load %arg7[%c1_210, %c0_211] : memref<2x4xf32, #tpu.memory_space<vmem>>, vector<1x4xf32>
    %593 = vector.broadcast %592 : vector<1x4xf32> to vector<128x4xf32>
    %594 = arith.mulf %31, %593 : vector<128x4xf32>
    %c1_212 = arith.constant 1 : index
    %c0_213 = arith.constant 0 : index
    %595 = vector.load %arg8[%c1_212, %c0_213] : memref<2x4xf32, #tpu.memory_space<vmem>>, vector<1x4xf32>
    %596 = vector.broadcast %595 : vector<1x4xf32> to vector<128x4xf32>
    %597 = arith.addf %594, %596 : vector<128x4xf32>
    %c1_214 = arith.constant 1 : index
    %c0_215 = arith.constant 0 : index
    %598 = vector.load %arg9[%c1_214, %c0_215] : memref<2x15xf32, #tpu.memory_space<vmem>>, vector<1x15xf32>
    %599 = vector.broadcast %598 : vector<1x15xf32> to vector<128x15xf32>
    %600 = arith.mulf %33, %599 : vector<128x15xf32>
    %c1_216 = arith.constant 1 : index
    %c0_217 = arith.constant 0 : index
    %601 = vector.load %arg10[%c1_216, %c0_217] : memref<2x15xf32, #tpu.memory_space<vmem>>, vector<1x15xf32>
    %602 = vector.broadcast %601 : vector<1x15xf32> to vector<128x15xf32>
    %603 = arith.addf %600, %602 : vector<128x15xf32>
    %c1_218 = arith.constant 1 : index
    %c0_219 = arith.constant 0 : index
    %c0_220 = arith.constant 0 : index
    %604 = vector.load %arg11[%c1_218, %c0_219, %c0_220] : memref<2x32x16xf32, #tpu.memory_space<vmem>>, vector<1x32x16xf32>
    %605 = vector.shape_cast %604 : vector<1x32x16xf32> to vector<32x16xf32>
    %606 = arith.truncf %591 : vector<32x32xf32> to vector<32x32xbf16>
    %607 = arith.truncf %605 : vector<32x16xf32> to vector<32x16xbf16>
    %cst_221 = arith.constant dense<0.000000e+00> : vector<32x16xf32>
    %608 = tpu.matmul %606, %607, %cst_221 {dimension_numbers = #tpu.dot_dimension_numbers<[1], [0], [0], [1], [0, 0, 1, 1], [], []>} : vector<32x32xbf16>, vector<32x16xbf16>, vector<32x16xf32> -> vector<32x16xf32>
    %c1_222 = arith.constant 1 : index
    %c0_223 = arith.constant 0 : index
    %c0_224 = arith.constant 0 : index
    %609 = vector.load %arg12[%c1_222, %c0_223, %c0_224] : memref<2x4x32xf32, #tpu.memory_space<vmem>>, vector<1x4x32xf32>
    %610 = vector.shape_cast %609 : vector<1x4x32xf32> to vector<4x32xf32>
    %611 = arith.truncf %597 : vector<128x4xf32> to vector<128x4xbf16>
    %612 = arith.truncf %610 : vector<4x32xf32> to vector<4x32xbf16>
    %cst_225 = arith.constant dense<0.000000e+00> : vector<128x32xf32>
    %613 = tpu.matmul %611, %612, %cst_225 {dimension_numbers = #tpu.dot_dimension_numbers<[1], [0], [0], [1], [0, 0, 1, 1], [], []>} : vector<128x4xbf16>, vector<4x32xbf16>, vector<128x32xf32> -> vector<128x32xf32>
    %c1_226 = arith.constant 1 : index
    %c0_227 = arith.constant 0 : index
    %c0_228 = arith.constant 0 : index
    %614 = vector.load %arg13[%c1_226, %c0_227, %c0_228] : memref<2x15x32xf32, #tpu.memory_space<vmem>>, vector<1x15x32xf32>
    %615 = vector.shape_cast %614 : vector<1x15x32xf32> to vector<15x32xf32>
    %616 = arith.truncf %603 : vector<128x15xf32> to vector<128x15xbf16>
    %617 = arith.truncf %615 : vector<15x32xf32> to vector<15x32xbf16>
    %cst_229 = arith.constant dense<0.000000e+00> : vector<128x32xf32>
    %618 = tpu.matmul %616, %617, %cst_229 {dimension_numbers = #tpu.dot_dimension_numbers<[1], [0], [0], [1], [0, 0, 1, 1], [], []>} : vector<128x15xbf16>, vector<15x32xbf16>, vector<128x32xf32> -> vector<128x32xf32>
    %619 = arith.addf %613, %618 : vector<128x32xf32>
    %620 = vector.extract_strided_slice %619 {offsets = [0, 0], sizes = [128, 16], strides = [1, 1]} : vector<128x32xf32> to vector<128x16xf32>
    %621 = vector.extract_strided_slice %619 {offsets = [0, 16], sizes = [128, 16], strides = [1, 1]} : vector<128x32xf32> to vector<128x16xf32>
    %c1_230 = arith.constant 1 : index
    %c0_231 = arith.constant 0 : index
    %c0_232 = arith.constant 0 : index
    %622 = vector.load %arg14[%c1_230, %c0_231, %c0_232] : memref<2x16x32xf32, #tpu.memory_space<vmem>>, vector<1x16x32xf32>
    %623 = vector.shape_cast %622 : vector<1x16x32xf32> to vector<16x32xf32>
    %624 = vector.extract_strided_slice %608 {offsets = [0, 0], sizes = [16, 16], strides = [1, 1]} : vector<32x16xf32> to vector<16x16xf32>
    %625 = vector.extract_strided_slice %620 {offsets = [0, 0], sizes = [64, 16], strides = [1, 1]} : vector<128x16xf32> to vector<64x16xf32>
    %626 = vector.extract_strided_slice %621 {offsets = [0, 0], sizes = [64, 16], strides = [1, 1]} : vector<128x16xf32> to vector<64x16xf32>
    %627 = arith.truncf %624 : vector<16x16xf32> to vector<16x16xbf16>
    %628 = arith.truncf %625 : vector<64x16xf32> to vector<64x16xbf16>
    %cst_233 = arith.constant dense<0.000000e+00> : vector<16x64xf32>
    %629 = tpu.matmul %627, %628, %cst_233 {dimension_numbers = #tpu.dot_dimension_numbers<[1], [1], [0], [0], [0, 0, 1, 0], [], []>} : vector<16x16xbf16>, vector<64x16xbf16>, vector<16x64xf32> -> vector<16x64xf32>
    %cst_234 = arith.constant 2.500000e-01 : f32
    %630 = vector.broadcast %cst_234 : f32 to vector<16x64xf32>
    %631 = arith.mulf %629, %630 : vector<16x64xf32>
    %cst_235 = arith.constant dense<0xFF800000> : vector<16xf32>
    %632 = vector.multi_reduction <maximumf>, %631, %cst_235 [1] : vector<16x64xf32> to vector<16xf32>
    %633 = vector.shape_cast %632 : vector<16xf32> to vector<16x1xf32>
    %634 = vector.broadcast %633 : vector<16x1xf32> to vector<16x64xf32>
    %635 = arith.subf %631, %634 : vector<16x64xf32>
    %636 = math.exp %635 : vector<16x64xf32>
    %cst_236 = arith.constant dense<0.000000e+00> : vector<16xf32>
    %637 = vector.multi_reduction <add>, %636, %cst_236 [1] : vector<16x64xf32> to vector<16xf32>
    %638 = vector.shape_cast %637 : vector<16xf32> to vector<16x1xf32>
    %639 = tpu.reciprocal %638 {approx = true} : vector<16x1xf32> -> vector<16x1xf32>
    %640 = vector.broadcast %639 : vector<16x1xf32> to vector<16x64xf32>
    %641 = arith.mulf %636, %640 : vector<16x64xf32>
    %642 = arith.truncf %641 : vector<16x64xf32> to vector<16x64xbf16>
    %643 = arith.truncf %626 : vector<64x16xf32> to vector<64x16xbf16>
    %cst_237 = arith.constant dense<0.000000e+00> : vector<16x16xf32>
    %644 = tpu.matmul %642, %643, %cst_237 {dimension_numbers = #tpu.dot_dimension_numbers<[1], [0], [0], [1], [0, 0, 1, 1], [], []>} : vector<16x64xbf16>, vector<64x16xbf16>, vector<16x16xf32> -> vector<16x16xf32>
    %645 = arith.truncf %644 : vector<16x16xf32> to vector<16x16xbf16>
    %646 = arith.truncf %623 : vector<16x32xf32> to vector<16x32xbf16>
    %cst_238 = arith.constant dense<0.000000e+00> : vector<16x32xf32>
    %647 = tpu.matmul %645, %646, %cst_238 {dimension_numbers = #tpu.dot_dimension_numbers<[1], [0], [0], [1], [0, 0, 1, 1], [], []>} : vector<16x16xbf16>, vector<16x32xbf16>, vector<16x32xf32> -> vector<16x32xf32>
    %648 = vector.extract_strided_slice %608 {offsets = [16, 0], sizes = [16, 16], strides = [1, 1]} : vector<32x16xf32> to vector<16x16xf32>
    %649 = vector.extract_strided_slice %620 {offsets = [64, 0], sizes = [64, 16], strides = [1, 1]} : vector<128x16xf32> to vector<64x16xf32>
    %650 = vector.extract_strided_slice %621 {offsets = [64, 0], sizes = [64, 16], strides = [1, 1]} : vector<128x16xf32> to vector<64x16xf32>
    %651 = arith.truncf %648 : vector<16x16xf32> to vector<16x16xbf16>
    %652 = arith.truncf %649 : vector<64x16xf32> to vector<64x16xbf16>
    %cst_239 = arith.constant dense<0.000000e+00> : vector<16x64xf32>
    %653 = tpu.matmul %651, %652, %cst_239 {dimension_numbers = #tpu.dot_dimension_numbers<[1], [1], [0], [0], [0, 0, 1, 0], [], []>} : vector<16x16xbf16>, vector<64x16xbf16>, vector<16x64xf32> -> vector<16x64xf32>
    %cst_240 = arith.constant 2.500000e-01 : f32
    %654 = vector.broadcast %cst_240 : f32 to vector<16x64xf32>
    %655 = arith.mulf %653, %654 : vector<16x64xf32>
    %cst_241 = arith.constant dense<0xFF800000> : vector<16xf32>
    %656 = vector.multi_reduction <maximumf>, %655, %cst_241 [1] : vector<16x64xf32> to vector<16xf32>
    %657 = vector.shape_cast %656 : vector<16xf32> to vector<16x1xf32>
    %658 = vector.broadcast %657 : vector<16x1xf32> to vector<16x64xf32>
    %659 = arith.subf %655, %658 : vector<16x64xf32>
    %660 = math.exp %659 : vector<16x64xf32>
    %cst_242 = arith.constant dense<0.000000e+00> : vector<16xf32>
    %661 = vector.multi_reduction <add>, %660, %cst_242 [1] : vector<16x64xf32> to vector<16xf32>
    %662 = vector.shape_cast %661 : vector<16xf32> to vector<16x1xf32>
    %663 = tpu.reciprocal %662 {approx = true} : vector<16x1xf32> -> vector<16x1xf32>
    %664 = vector.broadcast %663 : vector<16x1xf32> to vector<16x64xf32>
    %665 = arith.mulf %660, %664 : vector<16x64xf32>
    %666 = arith.truncf %665 : vector<16x64xf32> to vector<16x64xbf16>
    %667 = arith.truncf %650 : vector<64x16xf32> to vector<64x16xbf16>
    %cst_243 = arith.constant dense<0.000000e+00> : vector<16x16xf32>
    %668 = tpu.matmul %666, %667, %cst_243 {dimension_numbers = #tpu.dot_dimension_numbers<[1], [0], [0], [1], [0, 0, 1, 1], [], []>} : vector<16x64xbf16>, vector<64x16xbf16>, vector<16x16xf32> -> vector<16x16xf32>
    %669 = arith.truncf %668 : vector<16x16xf32> to vector<16x16xbf16>
    %670 = arith.truncf %623 : vector<16x32xf32> to vector<16x32xbf16>
    %cst_244 = arith.constant dense<0.000000e+00> : vector<16x32xf32>
    %671 = tpu.matmul %669, %670, %cst_244 {dimension_numbers = #tpu.dot_dimension_numbers<[1], [0], [0], [1], [0, 0, 1, 1], [], []>} : vector<16x16xbf16>, vector<16x32xbf16>, vector<16x32xf32> -> vector<16x32xf32>
    %672 = tpu.concatenate %647, %671 in 0 : vector<16x32xf32>, vector<16x32xf32> -> vector<32x32xf32>
    %673 = arith.addf %567, %672 : vector<32x32xf32>
    %c1_245 = arith.constant 1 : index
    %c0_246 = arith.constant 0 : index
    %674 = vector.load %arg15[%c1_245, %c0_246] : memref<2x32xf32, #tpu.memory_space<vmem>>, vector<1x32xf32>
    %675 = vector.broadcast %674 : vector<1x32xf32> to vector<32x32xf32>
    %676 = arith.addf %673, %675 : vector<32x32xf32>
    %c1_247 = arith.constant 1 : index
    %c0_248 = arith.constant 0 : index
    %677 = vector.load %arg16[%c1_247, %c0_248] : memref<2x32xf32, #tpu.memory_space<vmem>>, vector<1x32xf32>
    %c1_249 = arith.constant 1 : index
    %c0_250 = arith.constant 0 : index
    %678 = vector.load %arg17[%c1_249, %c0_250] : memref<2x32xf32, #tpu.memory_space<vmem>>, vector<1x32xf32>
    %c1_251 = arith.constant 1 : index
    %c0_252 = arith.constant 0 : index
    %c0_253 = arith.constant 0 : index
    %679 = vector.load %arg18[%c1_251, %c0_252, %c0_253] : memref<2x32x256xf32, #tpu.memory_space<vmem>>, vector<1x32x256xf32>
    %680 = vector.shape_cast %679 : vector<1x32x256xf32> to vector<32x256xf32>
    %c1_254 = arith.constant 1 : index
    %c0_255 = arith.constant 0 : index
    %681 = vector.load %arg19[%c1_254, %c0_255] : memref<2x256xf32, #tpu.memory_space<vmem>>, vector<1x256xf32>
    %c1_256 = arith.constant 1 : index
    %c0_257 = arith.constant 0 : index
    %c0_258 = arith.constant 0 : index
    %682 = vector.load %arg20[%c1_256, %c0_257, %c0_258] : memref<2x128x32xf32, #tpu.memory_space<vmem>>, vector<1x128x32xf32>
    %683 = vector.shape_cast %682 : vector<1x128x32xf32> to vector<128x32xf32>
    %c1_259 = arith.constant 1 : index
    %c0_260 = arith.constant 0 : index
    %684 = vector.load %arg21[%c1_259, %c0_260] : memref<2x32xf32, #tpu.memory_space<vmem>>, vector<1x32xf32>
    %cst_261 = arith.constant dense<0.000000e+00> : vector<32xf32>
    %685 = vector.multi_reduction <add>, %676, %cst_261 [1] : vector<32x32xf32> to vector<32xf32>
    %686 = vector.shape_cast %685 : vector<32xf32> to vector<32x1xf32>
    %cst_262 = arith.constant 3.200000e+01 : f32
    %687 = vector.broadcast %cst_262 : f32 to vector<32x1xf32>
    %688 = arith.divf %686, %687 : vector<32x1xf32>
    %689 = vector.broadcast %688 : vector<32x1xf32> to vector<32x32xf32>
    %690 = arith.subf %676, %689 : vector<32x32xf32>
    %691 = arith.mulf %690, %690 : vector<32x32xf32>
    %cst_263 = arith.constant dense<0.000000e+00> : vector<32xf32>
    %692 = vector.multi_reduction <add>, %691, %cst_263 [1] : vector<32x32xf32> to vector<32xf32>
    %693 = vector.shape_cast %692 : vector<32xf32> to vector<32x1xf32>
    %cst_264 = arith.constant 3.200000e+01 : f32
    %694 = vector.broadcast %cst_264 : f32 to vector<32x1xf32>
    %695 = arith.divf %693, %694 : vector<32x1xf32>
    %696 = vector.broadcast %688 : vector<32x1xf32> to vector<32x32xf32>
    %697 = arith.subf %676, %696 : vector<32x32xf32>
    %cst_265 = arith.constant 9.99999974E-6 : f32
    %698 = vector.broadcast %cst_265 : f32 to vector<32x1xf32>
    %699 = arith.addf %695, %698 : vector<32x1xf32>
    %700 = math.rsqrt %699 : vector<32x1xf32>
    %701 = vector.broadcast %700 : vector<32x1xf32> to vector<32x32xf32>
    %702 = arith.mulf %697, %701 : vector<32x32xf32>
    %703 = vector.broadcast %677 : vector<1x32xf32> to vector<32x32xf32>
    %704 = arith.mulf %702, %703 : vector<32x32xf32>
    %705 = vector.broadcast %678 : vector<1x32xf32> to vector<32x32xf32>
    %706 = arith.addf %704, %705 : vector<32x32xf32>
    %707 = arith.truncf %706 : vector<32x32xf32> to vector<32x32xbf16>
    %708 = arith.truncf %680 : vector<32x256xf32> to vector<32x256xbf16>
    %cst_266 = arith.constant dense<0.000000e+00> : vector<32x256xf32>
    %709 = tpu.matmul %707, %708, %cst_266 {dimension_numbers = #tpu.dot_dimension_numbers<[1], [0], [0], [1], [0, 0, 1, 1], [], []>} : vector<32x32xbf16>, vector<32x256xbf16>, vector<32x256xf32> -> vector<32x256xf32>
    %710 = vector.broadcast %681 : vector<1x256xf32> to vector<32x256xf32>
    %711 = arith.addf %709, %710 : vector<32x256xf32>
    %712 = vector.extract_strided_slice %711 {offsets = [0, 0], sizes = [32, 128], strides = [1, 1]} : vector<32x256xf32> to vector<32x128xf32>
    %713 = vector.extract_strided_slice %711 {offsets = [0, 128], sizes = [32, 128], strides = [1, 1]} : vector<32x256xf32> to vector<32x128xf32>
    %cst_267 = arith.constant 5.000000e-01 : f32
    %714 = vector.broadcast %cst_267 : f32 to vector<32x128xf32>
    %715 = arith.mulf %714, %713 : vector<32x128xf32>
    %cst_268 = arith.constant 0.707106769 : f32
    %716 = vector.broadcast %cst_268 : f32 to vector<32x128xf32>
    %717 = arith.mulf %713, %716 : vector<32x128xf32>
    %718 = math.absf %717 : vector<32x128xf32>
    %cst_269 = arith.constant 0.327591091 : f32
    %719 = vector.broadcast %cst_269 : f32 to vector<32x128xf32>
    %720 = arith.mulf %719, %718 : vector<32x128xf32>
    %cst_270 = arith.constant 1.000000e+00 : f32
    %721 = vector.broadcast %cst_270 : f32 to vector<32x128xf32>
    %722 = arith.addf %721, %720 : vector<32x128xf32>
    %cst_271 = arith.constant 1.000000e+00 : f32
    %723 = vector.broadcast %cst_271 : f32 to vector<32x128xf32>
    %724 = arith.divf %723, %722 : vector<32x128xf32>
    %cst_272 = arith.constant 1.06140542 : f32
    %725 = vector.broadcast %cst_272 : f32 to vector<32x128xf32>
    %726 = arith.mulf %725, %724 : vector<32x128xf32>
    %cst_273 = arith.constant -1.45315206 : f32
    %727 = vector.broadcast %cst_273 : f32 to vector<32x128xf32>
    %728 = arith.addf %726, %727 : vector<32x128xf32>
    %729 = arith.mulf %728, %724 : vector<32x128xf32>
    %cst_274 = arith.constant 1.42141378 : f32
    %730 = vector.broadcast %cst_274 : f32 to vector<32x128xf32>
    %731 = arith.addf %729, %730 : vector<32x128xf32>
    %732 = arith.mulf %731, %724 : vector<32x128xf32>
    %cst_275 = arith.constant -0.284496725 : f32
    %733 = vector.broadcast %cst_275 : f32 to vector<32x128xf32>
    %734 = arith.addf %732, %733 : vector<32x128xf32>
    %735 = arith.mulf %734, %724 : vector<32x128xf32>
    %cst_276 = arith.constant 0.254829586 : f32
    %736 = vector.broadcast %cst_276 : f32 to vector<32x128xf32>
    %737 = arith.addf %735, %736 : vector<32x128xf32>
    %738 = arith.mulf %737, %724 : vector<32x128xf32>
    %cst_277 = arith.constant 0.000000e+00 : f32
    %739 = vector.broadcast %cst_277 : f32 to vector<32x128xf32>
    %740 = arith.subf %739, %718 : vector<32x128xf32>
    %741 = arith.mulf %740, %718 : vector<32x128xf32>
    %742 = math.exp %741 : vector<32x128xf32>
    %743 = arith.mulf %738, %742 : vector<32x128xf32>
    %cst_278 = arith.constant 1.000000e+00 : f32
    %744 = vector.broadcast %cst_278 : f32 to vector<32x128xf32>
    %745 = arith.subf %744, %743 : vector<32x128xf32>
    %cst_279 = arith.constant 0.000000e+00 : f32
    %746 = vector.broadcast %cst_279 : f32 to vector<32x128xf32>
    %747 = arith.cmpf olt, %717, %746 : vector<32x128xf32>
    %cst_280 = arith.constant 0.000000e+00 : f32
    %748 = vector.broadcast %cst_280 : f32 to vector<32x128xf32>
    %749 = arith.subf %748, %745 : vector<32x128xf32>
    %750 = arith.select %747, %749, %745 : vector<32x128xi1>, vector<32x128xf32>
    %cst_281 = arith.constant 1.000000e+00 : f32
    %751 = vector.broadcast %cst_281 : f32 to vector<32x128xf32>
    %752 = arith.addf %751, %750 : vector<32x128xf32>
    %753 = arith.mulf %715, %752 : vector<32x128xf32>
    %754 = arith.mulf %712, %753 : vector<32x128xf32>
    %755 = arith.truncf %754 : vector<32x128xf32> to vector<32x128xbf16>
    %756 = arith.truncf %683 : vector<128x32xf32> to vector<128x32xbf16>
    %cst_282 = arith.constant dense<0.000000e+00> : vector<32x32xf32>
    %757 = tpu.matmul %755, %756, %cst_282 {dimension_numbers = #tpu.dot_dimension_numbers<[1], [0], [0], [1], [0, 0, 1, 1], [], []>} : vector<32x128xbf16>, vector<128x32xbf16>, vector<32x32xf32> -> vector<32x32xf32>
    %758 = vector.broadcast %684 : vector<1x32xf32> to vector<32x32xf32>
    %759 = arith.addf %757, %758 : vector<32x32xf32>
    %760 = arith.addf %676, %759 : vector<32x32xf32>
    %c1_283 = arith.constant 1 : index
    %c0_284 = arith.constant 0 : index
    %761 = vector.load %arg22[%c1_283, %c0_284] : memref<2x32xf32, #tpu.memory_space<vmem>>, vector<1x32xf32>
    %c1_285 = arith.constant 1 : index
    %c0_286 = arith.constant 0 : index
    %762 = vector.load %arg23[%c1_285, %c0_286] : memref<2x32xf32, #tpu.memory_space<vmem>>, vector<1x32xf32>
    %cst_287 = arith.constant dense<0.000000e+00> : vector<32xf32>
    %763 = vector.multi_reduction <add>, %760, %cst_287 [1] : vector<32x32xf32> to vector<32xf32>
    %764 = vector.shape_cast %763 : vector<32xf32> to vector<32x1xf32>
    %cst_288 = arith.constant 3.200000e+01 : f32
    %765 = vector.broadcast %cst_288 : f32 to vector<32x1xf32>
    %766 = arith.divf %764, %765 : vector<32x1xf32>
    %767 = vector.broadcast %766 : vector<32x1xf32> to vector<32x32xf32>
    %768 = arith.subf %760, %767 : vector<32x32xf32>
    %769 = arith.mulf %768, %768 : vector<32x32xf32>
    %cst_289 = arith.constant dense<0.000000e+00> : vector<32xf32>
    %770 = vector.multi_reduction <add>, %769, %cst_289 [1] : vector<32x32xf32> to vector<32xf32>
    %771 = vector.shape_cast %770 : vector<32xf32> to vector<32x1xf32>
    %cst_290 = arith.constant 3.200000e+01 : f32
    %772 = vector.broadcast %cst_290 : f32 to vector<32x1xf32>
    %773 = arith.divf %771, %772 : vector<32x1xf32>
    %774 = vector.broadcast %766 : vector<32x1xf32> to vector<32x32xf32>
    %775 = arith.subf %760, %774 : vector<32x32xf32>
    %cst_291 = arith.constant 9.99999974E-6 : f32
    %776 = vector.broadcast %cst_291 : f32 to vector<32x1xf32>
    %777 = arith.addf %773, %776 : vector<32x1xf32>
    %778 = math.rsqrt %777 : vector<32x1xf32>
    %779 = vector.broadcast %778 : vector<32x1xf32> to vector<32x32xf32>
    %780 = arith.mulf %775, %779 : vector<32x32xf32>
    %781 = vector.broadcast %761 : vector<1x32xf32> to vector<32x32xf32>
    %782 = arith.mulf %780, %781 : vector<32x32xf32>
    %783 = vector.broadcast %762 : vector<1x32xf32> to vector<32x32xf32>
    %784 = arith.addf %782, %783 : vector<32x32xf32>
    %c1_292 = arith.constant 1 : index
    %c0_293 = arith.constant 0 : index
    %c0_294 = arith.constant 0 : index
    %785 = vector.load %arg24[%c1_292, %c0_293, %c0_294] : memref<2x32x32xf32, #tpu.memory_space<vmem>>, vector<1x32x32xf32>
    %786 = vector.shape_cast %785 : vector<1x32x32xf32> to vector<32x32xf32>
    %787 = arith.truncf %784 : vector<32x32xf32> to vector<32x32xbf16>
    %788 = arith.truncf %786 : vector<32x32xf32> to vector<32x32xbf16>
    %cst_295 = arith.constant dense<0.000000e+00> : vector<32x32xf32>
    %789 = tpu.matmul %787, %788, %cst_295 {dimension_numbers = #tpu.dot_dimension_numbers<[1], [0], [0], [1], [0, 0, 1, 1], [], []>} : vector<32x32xbf16>, vector<32x32xbf16>, vector<32x32xf32> -> vector<32x32xf32>
    %c1_296 = arith.constant 1 : index
    %c0_297 = arith.constant 0 : index
    %c0_298 = arith.constant 0 : index
    %790 = vector.load %arg25[%c1_296, %c0_297, %c0_298] : memref<2x32x64xf32, #tpu.memory_space<vmem>>, vector<1x32x64xf32>
    %791 = vector.shape_cast %790 : vector<1x32x64xf32> to vector<32x64xf32>
    %792 = arith.truncf %784 : vector<32x32xf32> to vector<32x32xbf16>
    %793 = arith.truncf %791 : vector<32x64xf32> to vector<32x64xbf16>
    %cst_299 = arith.constant dense<0.000000e+00> : vector<32x64xf32>
    %794 = tpu.matmul %792, %793, %cst_299 {dimension_numbers = #tpu.dot_dimension_numbers<[1], [0], [0], [1], [0, 0, 1, 1], [], []>} : vector<32x32xbf16>, vector<32x64xbf16>, vector<32x64xf32> -> vector<32x64xf32>
    %795 = vector.extract_strided_slice %794 {offsets = [0, 0], sizes = [32, 32], strides = [1, 1]} : vector<32x64xf32> to vector<32x32xf32>
    %796 = vector.extract_strided_slice %794 {offsets = [0, 32], sizes = [32, 32], strides = [1, 1]} : vector<32x64xf32> to vector<32x32xf32>
    %c1_300 = arith.constant 1 : index
    %c0_301 = arith.constant 0 : index
    %c0_302 = arith.constant 0 : index
    %797 = vector.load %arg26[%c1_300, %c0_301, %c0_302] : memref<2x32x32xf32, #tpu.memory_space<vmem>>, vector<1x32x32xf32>
    %798 = vector.shape_cast %797 : vector<1x32x32xf32> to vector<32x32xf32>
    %799 = vector.extract_strided_slice %789 {offsets = [0, 0], sizes = [16, 32], strides = [1, 1]} : vector<32x32xf32> to vector<16x32xf32>
    %800 = vector.extract_strided_slice %795 {offsets = [0, 0], sizes = [16, 32], strides = [1, 1]} : vector<32x32xf32> to vector<16x32xf32>
    %801 = vector.extract_strided_slice %796 {offsets = [0, 0], sizes = [16, 32], strides = [1, 1]} : vector<32x32xf32> to vector<16x32xf32>
    %802 = vector.extract_strided_slice %799 {offsets = [0, 0], sizes = [16, 8], strides = [1, 1]} : vector<16x32xf32> to vector<16x8xf32>
    %803 = arith.truncf %802 : vector<16x8xf32> to vector<16x8xbf16>
    %804 = vector.extract_strided_slice %800 {offsets = [0, 0], sizes = [16, 8], strides = [1, 1]} : vector<16x32xf32> to vector<16x8xf32>
    %805 = arith.truncf %804 : vector<16x8xf32> to vector<16x8xbf16>
    %cst_303 = arith.constant dense<0.000000e+00> : vector<16x16xf32>
    %806 = tpu.matmul %803, %805, %cst_303 {dimension_numbers = #tpu.dot_dimension_numbers<[1], [1], [0], [0], [0, 0, 1, 0], [], []>} : vector<16x8xbf16>, vector<16x8xbf16>, vector<16x16xf32> -> vector<16x16xf32>
    %cst_304 = arith.constant 0.353553385 : f32
    %807 = vector.broadcast %cst_304 : f32 to vector<16x16xf32>
    %808 = arith.mulf %806, %807 : vector<16x16xf32>
    %cst_305 = arith.constant dense<0xFF800000> : vector<16xf32>
    %809 = vector.multi_reduction <maximumf>, %808, %cst_305 [1] : vector<16x16xf32> to vector<16xf32>
    %810 = vector.shape_cast %809 : vector<16xf32> to vector<16x1xf32>
    %811 = vector.broadcast %810 : vector<16x1xf32> to vector<16x16xf32>
    %812 = arith.subf %808, %811 : vector<16x16xf32>
    %813 = math.exp %812 : vector<16x16xf32>
    %cst_306 = arith.constant dense<0.000000e+00> : vector<16xf32>
    %814 = vector.multi_reduction <add>, %813, %cst_306 [1] : vector<16x16xf32> to vector<16xf32>
    %815 = vector.shape_cast %814 : vector<16xf32> to vector<16x1xf32>
    %816 = tpu.reciprocal %815 {approx = true} : vector<16x1xf32> -> vector<16x1xf32>
    %817 = vector.broadcast %816 : vector<16x1xf32> to vector<16x16xf32>
    %818 = arith.mulf %813, %817 : vector<16x16xf32>
    %819 = vector.extract_strided_slice %801 {offsets = [0, 0], sizes = [16, 8], strides = [1, 1]} : vector<16x32xf32> to vector<16x8xf32>
    %820 = arith.truncf %818 : vector<16x16xf32> to vector<16x16xbf16>
    %821 = arith.truncf %819 : vector<16x8xf32> to vector<16x8xbf16>
    %cst_307 = arith.constant dense<0.000000e+00> : vector<16x8xf32>
    %822 = tpu.matmul %820, %821, %cst_307 {dimension_numbers = #tpu.dot_dimension_numbers<[1], [0], [0], [1], [0, 0, 1, 1], [], []>} : vector<16x16xbf16>, vector<16x8xbf16>, vector<16x8xf32> -> vector<16x8xf32>
    %823 = vector.extract_strided_slice %798 {offsets = [0, 0], sizes = [8, 32], strides = [1, 1]} : vector<32x32xf32> to vector<8x32xf32>
    %824 = arith.truncf %822 : vector<16x8xf32> to vector<16x8xbf16>
    %825 = arith.truncf %823 : vector<8x32xf32> to vector<8x32xbf16>
    %cst_308 = arith.constant dense<0.000000e+00> : vector<16x32xf32>
    %826 = tpu.matmul %824, %825, %cst_308 {dimension_numbers = #tpu.dot_dimension_numbers<[1], [0], [0], [1], [0, 0, 1, 1], [], []>} : vector<16x8xbf16>, vector<8x32xbf16>, vector<16x32xf32> -> vector<16x32xf32>
    %827 = vector.extract_strided_slice %799 {offsets = [0, 8], sizes = [16, 8], strides = [1, 1]} : vector<16x32xf32> to vector<16x8xf32>
    %828 = arith.truncf %827 : vector<16x8xf32> to vector<16x8xbf16>
    %829 = vector.extract_strided_slice %800 {offsets = [0, 8], sizes = [16, 8], strides = [1, 1]} : vector<16x32xf32> to vector<16x8xf32>
    %830 = arith.truncf %829 : vector<16x8xf32> to vector<16x8xbf16>
    %cst_309 = arith.constant dense<0.000000e+00> : vector<16x16xf32>
    %831 = tpu.matmul %828, %830, %cst_309 {dimension_numbers = #tpu.dot_dimension_numbers<[1], [1], [0], [0], [0, 0, 1, 0], [], []>} : vector<16x8xbf16>, vector<16x8xbf16>, vector<16x16xf32> -> vector<16x16xf32>
    %cst_310 = arith.constant 0.353553385 : f32
    %832 = vector.broadcast %cst_310 : f32 to vector<16x16xf32>
    %833 = arith.mulf %831, %832 : vector<16x16xf32>
    %cst_311 = arith.constant dense<0xFF800000> : vector<16xf32>
    %834 = vector.multi_reduction <maximumf>, %833, %cst_311 [1] : vector<16x16xf32> to vector<16xf32>
    %835 = vector.shape_cast %834 : vector<16xf32> to vector<16x1xf32>
    %836 = vector.broadcast %835 : vector<16x1xf32> to vector<16x16xf32>
    %837 = arith.subf %833, %836 : vector<16x16xf32>
    %838 = math.exp %837 : vector<16x16xf32>
    %cst_312 = arith.constant dense<0.000000e+00> : vector<16xf32>
    %839 = vector.multi_reduction <add>, %838, %cst_312 [1] : vector<16x16xf32> to vector<16xf32>
    %840 = vector.shape_cast %839 : vector<16xf32> to vector<16x1xf32>
    %841 = tpu.reciprocal %840 {approx = true} : vector<16x1xf32> -> vector<16x1xf32>
    %842 = vector.broadcast %841 : vector<16x1xf32> to vector<16x16xf32>
    %843 = arith.mulf %838, %842 : vector<16x16xf32>
    %844 = vector.extract_strided_slice %801 {offsets = [0, 8], sizes = [16, 8], strides = [1, 1]} : vector<16x32xf32> to vector<16x8xf32>
    %845 = arith.truncf %843 : vector<16x16xf32> to vector<16x16xbf16>
    %846 = arith.truncf %844 : vector<16x8xf32> to vector<16x8xbf16>
    %cst_313 = arith.constant dense<0.000000e+00> : vector<16x8xf32>
    %847 = tpu.matmul %845, %846, %cst_313 {dimension_numbers = #tpu.dot_dimension_numbers<[1], [0], [0], [1], [0, 0, 1, 1], [], []>} : vector<16x16xbf16>, vector<16x8xbf16>, vector<16x8xf32> -> vector<16x8xf32>
    %848 = vector.extract_strided_slice %798 {offsets = [8, 0], sizes = [8, 32], strides = [1, 1]} : vector<32x32xf32> to vector<8x32xf32>
    %849 = arith.truncf %847 : vector<16x8xf32> to vector<16x8xbf16>
    %850 = arith.truncf %848 : vector<8x32xf32> to vector<8x32xbf16>
    %cst_314 = arith.constant dense<0.000000e+00> : vector<16x32xf32>
    %851 = tpu.matmul %849, %850, %cst_314 {dimension_numbers = #tpu.dot_dimension_numbers<[1], [0], [0], [1], [0, 0, 1, 1], [], []>} : vector<16x8xbf16>, vector<8x32xbf16>, vector<16x32xf32> -> vector<16x32xf32>
    %852 = arith.addf %826, %851 : vector<16x32xf32>
    %853 = vector.extract_strided_slice %799 {offsets = [0, 16], sizes = [16, 8], strides = [1, 1]} : vector<16x32xf32> to vector<16x8xf32>
    %854 = arith.truncf %853 : vector<16x8xf32> to vector<16x8xbf16>
    %855 = vector.extract_strided_slice %800 {offsets = [0, 16], sizes = [16, 8], strides = [1, 1]} : vector<16x32xf32> to vector<16x8xf32>
    %856 = arith.truncf %855 : vector<16x8xf32> to vector<16x8xbf16>
    %cst_315 = arith.constant dense<0.000000e+00> : vector<16x16xf32>
    %857 = tpu.matmul %854, %856, %cst_315 {dimension_numbers = #tpu.dot_dimension_numbers<[1], [1], [0], [0], [0, 0, 1, 0], [], []>} : vector<16x8xbf16>, vector<16x8xbf16>, vector<16x16xf32> -> vector<16x16xf32>
    %cst_316 = arith.constant 0.353553385 : f32
    %858 = vector.broadcast %cst_316 : f32 to vector<16x16xf32>
    %859 = arith.mulf %857, %858 : vector<16x16xf32>
    %cst_317 = arith.constant dense<0xFF800000> : vector<16xf32>
    %860 = vector.multi_reduction <maximumf>, %859, %cst_317 [1] : vector<16x16xf32> to vector<16xf32>
    %861 = vector.shape_cast %860 : vector<16xf32> to vector<16x1xf32>
    %862 = vector.broadcast %861 : vector<16x1xf32> to vector<16x16xf32>
    %863 = arith.subf %859, %862 : vector<16x16xf32>
    %864 = math.exp %863 : vector<16x16xf32>
    %cst_318 = arith.constant dense<0.000000e+00> : vector<16xf32>
    %865 = vector.multi_reduction <add>, %864, %cst_318 [1] : vector<16x16xf32> to vector<16xf32>
    %866 = vector.shape_cast %865 : vector<16xf32> to vector<16x1xf32>
    %867 = tpu.reciprocal %866 {approx = true} : vector<16x1xf32> -> vector<16x1xf32>
    %868 = vector.broadcast %867 : vector<16x1xf32> to vector<16x16xf32>
    %869 = arith.mulf %864, %868 : vector<16x16xf32>
    %870 = vector.extract_strided_slice %801 {offsets = [0, 16], sizes = [16, 8], strides = [1, 1]} : vector<16x32xf32> to vector<16x8xf32>
    %871 = arith.truncf %869 : vector<16x16xf32> to vector<16x16xbf16>
    %872 = arith.truncf %870 : vector<16x8xf32> to vector<16x8xbf16>
    %cst_319 = arith.constant dense<0.000000e+00> : vector<16x8xf32>
    %873 = tpu.matmul %871, %872, %cst_319 {dimension_numbers = #tpu.dot_dimension_numbers<[1], [0], [0], [1], [0, 0, 1, 1], [], []>} : vector<16x16xbf16>, vector<16x8xbf16>, vector<16x8xf32> -> vector<16x8xf32>
    %874 = vector.extract_strided_slice %798 {offsets = [16, 0], sizes = [8, 32], strides = [1, 1]} : vector<32x32xf32> to vector<8x32xf32>
    %875 = arith.truncf %873 : vector<16x8xf32> to vector<16x8xbf16>
    %876 = arith.truncf %874 : vector<8x32xf32> to vector<8x32xbf16>
    %cst_320 = arith.constant dense<0.000000e+00> : vector<16x32xf32>
    %877 = tpu.matmul %875, %876, %cst_320 {dimension_numbers = #tpu.dot_dimension_numbers<[1], [0], [0], [1], [0, 0, 1, 1], [], []>} : vector<16x8xbf16>, vector<8x32xbf16>, vector<16x32xf32> -> vector<16x32xf32>
    %878 = arith.addf %852, %877 : vector<16x32xf32>
    %879 = vector.extract_strided_slice %799 {offsets = [0, 24], sizes = [16, 8], strides = [1, 1]} : vector<16x32xf32> to vector<16x8xf32>
    %880 = arith.truncf %879 : vector<16x8xf32> to vector<16x8xbf16>
    %881 = vector.extract_strided_slice %800 {offsets = [0, 24], sizes = [16, 8], strides = [1, 1]} : vector<16x32xf32> to vector<16x8xf32>
    %882 = arith.truncf %881 : vector<16x8xf32> to vector<16x8xbf16>
    %cst_321 = arith.constant dense<0.000000e+00> : vector<16x16xf32>
    %883 = tpu.matmul %880, %882, %cst_321 {dimension_numbers = #tpu.dot_dimension_numbers<[1], [1], [0], [0], [0, 0, 1, 0], [], []>} : vector<16x8xbf16>, vector<16x8xbf16>, vector<16x16xf32> -> vector<16x16xf32>
    %cst_322 = arith.constant 0.353553385 : f32
    %884 = vector.broadcast %cst_322 : f32 to vector<16x16xf32>
    %885 = arith.mulf %883, %884 : vector<16x16xf32>
    %cst_323 = arith.constant dense<0xFF800000> : vector<16xf32>
    %886 = vector.multi_reduction <maximumf>, %885, %cst_323 [1] : vector<16x16xf32> to vector<16xf32>
    %887 = vector.shape_cast %886 : vector<16xf32> to vector<16x1xf32>
    %888 = vector.broadcast %887 : vector<16x1xf32> to vector<16x16xf32>
    %889 = arith.subf %885, %888 : vector<16x16xf32>
    %890 = math.exp %889 : vector<16x16xf32>
    %cst_324 = arith.constant dense<0.000000e+00> : vector<16xf32>
    %891 = vector.multi_reduction <add>, %890, %cst_324 [1] : vector<16x16xf32> to vector<16xf32>
    %892 = vector.shape_cast %891 : vector<16xf32> to vector<16x1xf32>
    %893 = tpu.reciprocal %892 {approx = true} : vector<16x1xf32> -> vector<16x1xf32>
    %894 = vector.broadcast %893 : vector<16x1xf32> to vector<16x16xf32>
    %895 = arith.mulf %890, %894 : vector<16x16xf32>
    %896 = vector.extract_strided_slice %801 {offsets = [0, 24], sizes = [16, 8], strides = [1, 1]} : vector<16x32xf32> to vector<16x8xf32>
    %897 = arith.truncf %895 : vector<16x16xf32> to vector<16x16xbf16>
    %898 = arith.truncf %896 : vector<16x8xf32> to vector<16x8xbf16>
    %cst_325 = arith.constant dense<0.000000e+00> : vector<16x8xf32>
    %899 = tpu.matmul %897, %898, %cst_325 {dimension_numbers = #tpu.dot_dimension_numbers<[1], [0], [0], [1], [0, 0, 1, 1], [], []>} : vector<16x16xbf16>, vector<16x8xbf16>, vector<16x8xf32> -> vector<16x8xf32>
    %900 = vector.extract_strided_slice %798 {offsets = [24, 0], sizes = [8, 32], strides = [1, 1]} : vector<32x32xf32> to vector<8x32xf32>
    %901 = arith.truncf %899 : vector<16x8xf32> to vector<16x8xbf16>
    %902 = arith.truncf %900 : vector<8x32xf32> to vector<8x32xbf16>
    %cst_326 = arith.constant dense<0.000000e+00> : vector<16x32xf32>
    %903 = tpu.matmul %901, %902, %cst_326 {dimension_numbers = #tpu.dot_dimension_numbers<[1], [0], [0], [1], [0, 0, 1, 1], [], []>} : vector<16x8xbf16>, vector<8x32xbf16>, vector<16x32xf32> -> vector<16x32xf32>
    %904 = arith.addf %878, %903 : vector<16x32xf32>
    %905 = vector.extract_strided_slice %789 {offsets = [16, 0], sizes = [16, 32], strides = [1, 1]} : vector<32x32xf32> to vector<16x32xf32>
    %906 = vector.extract_strided_slice %795 {offsets = [16, 0], sizes = [16, 32], strides = [1, 1]} : vector<32x32xf32> to vector<16x32xf32>
    %907 = vector.extract_strided_slice %796 {offsets = [16, 0], sizes = [16, 32], strides = [1, 1]} : vector<32x32xf32> to vector<16x32xf32>
    %908 = vector.extract_strided_slice %905 {offsets = [0, 0], sizes = [16, 8], strides = [1, 1]} : vector<16x32xf32> to vector<16x8xf32>
    %909 = arith.truncf %908 : vector<16x8xf32> to vector<16x8xbf16>
    %910 = vector.extract_strided_slice %906 {offsets = [0, 0], sizes = [16, 8], strides = [1, 1]} : vector<16x32xf32> to vector<16x8xf32>
    %911 = arith.truncf %910 : vector<16x8xf32> to vector<16x8xbf16>
    %cst_327 = arith.constant dense<0.000000e+00> : vector<16x16xf32>
    %912 = tpu.matmul %909, %911, %cst_327 {dimension_numbers = #tpu.dot_dimension_numbers<[1], [1], [0], [0], [0, 0, 1, 0], [], []>} : vector<16x8xbf16>, vector<16x8xbf16>, vector<16x16xf32> -> vector<16x16xf32>
    %cst_328 = arith.constant 0.353553385 : f32
    %913 = vector.broadcast %cst_328 : f32 to vector<16x16xf32>
    %914 = arith.mulf %912, %913 : vector<16x16xf32>
    %cst_329 = arith.constant dense<0xFF800000> : vector<16xf32>
    %915 = vector.multi_reduction <maximumf>, %914, %cst_329 [1] : vector<16x16xf32> to vector<16xf32>
    %916 = vector.shape_cast %915 : vector<16xf32> to vector<16x1xf32>
    %917 = vector.broadcast %916 : vector<16x1xf32> to vector<16x16xf32>
    %918 = arith.subf %914, %917 : vector<16x16xf32>
    %919 = math.exp %918 : vector<16x16xf32>
    %cst_330 = arith.constant dense<0.000000e+00> : vector<16xf32>
    %920 = vector.multi_reduction <add>, %919, %cst_330 [1] : vector<16x16xf32> to vector<16xf32>
    %921 = vector.shape_cast %920 : vector<16xf32> to vector<16x1xf32>
    %922 = tpu.reciprocal %921 {approx = true} : vector<16x1xf32> -> vector<16x1xf32>
    %923 = vector.broadcast %922 : vector<16x1xf32> to vector<16x16xf32>
    %924 = arith.mulf %919, %923 : vector<16x16xf32>
    %925 = vector.extract_strided_slice %907 {offsets = [0, 0], sizes = [16, 8], strides = [1, 1]} : vector<16x32xf32> to vector<16x8xf32>
    %926 = arith.truncf %924 : vector<16x16xf32> to vector<16x16xbf16>
    %927 = arith.truncf %925 : vector<16x8xf32> to vector<16x8xbf16>
    %cst_331 = arith.constant dense<0.000000e+00> : vector<16x8xf32>
    %928 = tpu.matmul %926, %927, %cst_331 {dimension_numbers = #tpu.dot_dimension_numbers<[1], [0], [0], [1], [0, 0, 1, 1], [], []>} : vector<16x16xbf16>, vector<16x8xbf16>, vector<16x8xf32> -> vector<16x8xf32>
    %929 = vector.extract_strided_slice %798 {offsets = [0, 0], sizes = [8, 32], strides = [1, 1]} : vector<32x32xf32> to vector<8x32xf32>
    %930 = arith.truncf %928 : vector<16x8xf32> to vector<16x8xbf16>
    %931 = arith.truncf %929 : vector<8x32xf32> to vector<8x32xbf16>
    %cst_332 = arith.constant dense<0.000000e+00> : vector<16x32xf32>
    %932 = tpu.matmul %930, %931, %cst_332 {dimension_numbers = #tpu.dot_dimension_numbers<[1], [0], [0], [1], [0, 0, 1, 1], [], []>} : vector<16x8xbf16>, vector<8x32xbf16>, vector<16x32xf32> -> vector<16x32xf32>
    %933 = vector.extract_strided_slice %905 {offsets = [0, 8], sizes = [16, 8], strides = [1, 1]} : vector<16x32xf32> to vector<16x8xf32>
    %934 = arith.truncf %933 : vector<16x8xf32> to vector<16x8xbf16>
    %935 = vector.extract_strided_slice %906 {offsets = [0, 8], sizes = [16, 8], strides = [1, 1]} : vector<16x32xf32> to vector<16x8xf32>
    %936 = arith.truncf %935 : vector<16x8xf32> to vector<16x8xbf16>
    %cst_333 = arith.constant dense<0.000000e+00> : vector<16x16xf32>
    %937 = tpu.matmul %934, %936, %cst_333 {dimension_numbers = #tpu.dot_dimension_numbers<[1], [1], [0], [0], [0, 0, 1, 0], [], []>} : vector<16x8xbf16>, vector<16x8xbf16>, vector<16x16xf32> -> vector<16x16xf32>
    %cst_334 = arith.constant 0.353553385 : f32
    %938 = vector.broadcast %cst_334 : f32 to vector<16x16xf32>
    %939 = arith.mulf %937, %938 : vector<16x16xf32>
    %cst_335 = arith.constant dense<0xFF800000> : vector<16xf32>
    %940 = vector.multi_reduction <maximumf>, %939, %cst_335 [1] : vector<16x16xf32> to vector<16xf32>
    %941 = vector.shape_cast %940 : vector<16xf32> to vector<16x1xf32>
    %942 = vector.broadcast %941 : vector<16x1xf32> to vector<16x16xf32>
    %943 = arith.subf %939, %942 : vector<16x16xf32>
    %944 = math.exp %943 : vector<16x16xf32>
    %cst_336 = arith.constant dense<0.000000e+00> : vector<16xf32>
    %945 = vector.multi_reduction <add>, %944, %cst_336 [1] : vector<16x16xf32> to vector<16xf32>
    %946 = vector.shape_cast %945 : vector<16xf32> to vector<16x1xf32>
    %947 = tpu.reciprocal %946 {approx = true} : vector<16x1xf32> -> vector<16x1xf32>
    %948 = vector.broadcast %947 : vector<16x1xf32> to vector<16x16xf32>
    %949 = arith.mulf %944, %948 : vector<16x16xf32>
    %950 = vector.extract_strided_slice %907 {offsets = [0, 8], sizes = [16, 8], strides = [1, 1]} : vector<16x32xf32> to vector<16x8xf32>
    %951 = arith.truncf %949 : vector<16x16xf32> to vector<16x16xbf16>
    %952 = arith.truncf %950 : vector<16x8xf32> to vector<16x8xbf16>
    %cst_337 = arith.constant dense<0.000000e+00> : vector<16x8xf32>
    %953 = tpu.matmul %951, %952, %cst_337 {dimension_numbers = #tpu.dot_dimension_numbers<[1], [0], [0], [1], [0, 0, 1, 1], [], []>} : vector<16x16xbf16>, vector<16x8xbf16>, vector<16x8xf32> -> vector<16x8xf32>
    %954 = vector.extract_strided_slice %798 {offsets = [8, 0], sizes = [8, 32], strides = [1, 1]} : vector<32x32xf32> to vector<8x32xf32>
    %955 = arith.truncf %953 : vector<16x8xf32> to vector<16x8xbf16>
    %956 = arith.truncf %954 : vector<8x32xf32> to vector<8x32xbf16>
    %cst_338 = arith.constant dense<0.000000e+00> : vector<16x32xf32>
    %957 = tpu.matmul %955, %956, %cst_338 {dimension_numbers = #tpu.dot_dimension_numbers<[1], [0], [0], [1], [0, 0, 1, 1], [], []>} : vector<16x8xbf16>, vector<8x32xbf16>, vector<16x32xf32> -> vector<16x32xf32>
    %958 = arith.addf %932, %957 : vector<16x32xf32>
    %959 = vector.extract_strided_slice %905 {offsets = [0, 16], sizes = [16, 8], strides = [1, 1]} : vector<16x32xf32> to vector<16x8xf32>
    %960 = arith.truncf %959 : vector<16x8xf32> to vector<16x8xbf16>
    %961 = vector.extract_strided_slice %906 {offsets = [0, 16], sizes = [16, 8], strides = [1, 1]} : vector<16x32xf32> to vector<16x8xf32>
    %962 = arith.truncf %961 : vector<16x8xf32> to vector<16x8xbf16>
    %cst_339 = arith.constant dense<0.000000e+00> : vector<16x16xf32>
    %963 = tpu.matmul %960, %962, %cst_339 {dimension_numbers = #tpu.dot_dimension_numbers<[1], [1], [0], [0], [0, 0, 1, 0], [], []>} : vector<16x8xbf16>, vector<16x8xbf16>, vector<16x16xf32> -> vector<16x16xf32>
    %cst_340 = arith.constant 0.353553385 : f32
    %964 = vector.broadcast %cst_340 : f32 to vector<16x16xf32>
    %965 = arith.mulf %963, %964 : vector<16x16xf32>
    %cst_341 = arith.constant dense<0xFF800000> : vector<16xf32>
    %966 = vector.multi_reduction <maximumf>, %965, %cst_341 [1] : vector<16x16xf32> to vector<16xf32>
    %967 = vector.shape_cast %966 : vector<16xf32> to vector<16x1xf32>
    %968 = vector.broadcast %967 : vector<16x1xf32> to vector<16x16xf32>
    %969 = arith.subf %965, %968 : vector<16x16xf32>
    %970 = math.exp %969 : vector<16x16xf32>
    %cst_342 = arith.constant dense<0.000000e+00> : vector<16xf32>
    %971 = vector.multi_reduction <add>, %970, %cst_342 [1] : vector<16x16xf32> to vector<16xf32>
    %972 = vector.shape_cast %971 : vector<16xf32> to vector<16x1xf32>
    %973 = tpu.reciprocal %972 {approx = true} : vector<16x1xf32> -> vector<16x1xf32>
    %974 = vector.broadcast %973 : vector<16x1xf32> to vector<16x16xf32>
    %975 = arith.mulf %970, %974 : vector<16x16xf32>
    %976 = vector.extract_strided_slice %907 {offsets = [0, 16], sizes = [16, 8], strides = [1, 1]} : vector<16x32xf32> to vector<16x8xf32>
    %977 = arith.truncf %975 : vector<16x16xf32> to vector<16x16xbf16>
    %978 = arith.truncf %976 : vector<16x8xf32> to vector<16x8xbf16>
    %cst_343 = arith.constant dense<0.000000e+00> : vector<16x8xf32>
    %979 = tpu.matmul %977, %978, %cst_343 {dimension_numbers = #tpu.dot_dimension_numbers<[1], [0], [0], [1], [0, 0, 1, 1], [], []>} : vector<16x16xbf16>, vector<16x8xbf16>, vector<16x8xf32> -> vector<16x8xf32>
    %980 = vector.extract_strided_slice %798 {offsets = [16, 0], sizes = [8, 32], strides = [1, 1]} : vector<32x32xf32> to vector<8x32xf32>
    %981 = arith.truncf %979 : vector<16x8xf32> to vector<16x8xbf16>
    %982 = arith.truncf %980 : vector<8x32xf32> to vector<8x32xbf16>
    %cst_344 = arith.constant dense<0.000000e+00> : vector<16x32xf32>
    %983 = tpu.matmul %981, %982, %cst_344 {dimension_numbers = #tpu.dot_dimension_numbers<[1], [0], [0], [1], [0, 0, 1, 1], [], []>} : vector<16x8xbf16>, vector<8x32xbf16>, vector<16x32xf32> -> vector<16x32xf32>
    %984 = arith.addf %958, %983 : vector<16x32xf32>
    %985 = vector.extract_strided_slice %905 {offsets = [0, 24], sizes = [16, 8], strides = [1, 1]} : vector<16x32xf32> to vector<16x8xf32>
    %986 = arith.truncf %985 : vector<16x8xf32> to vector<16x8xbf16>
    %987 = vector.extract_strided_slice %906 {offsets = [0, 24], sizes = [16, 8], strides = [1, 1]} : vector<16x32xf32> to vector<16x8xf32>
    %988 = arith.truncf %987 : vector<16x8xf32> to vector<16x8xbf16>
    %cst_345 = arith.constant dense<0.000000e+00> : vector<16x16xf32>
    %989 = tpu.matmul %986, %988, %cst_345 {dimension_numbers = #tpu.dot_dimension_numbers<[1], [1], [0], [0], [0, 0, 1, 0], [], []>} : vector<16x8xbf16>, vector<16x8xbf16>, vector<16x16xf32> -> vector<16x16xf32>
    %cst_346 = arith.constant 0.353553385 : f32
    %990 = vector.broadcast %cst_346 : f32 to vector<16x16xf32>
    %991 = arith.mulf %989, %990 : vector<16x16xf32>
    %cst_347 = arith.constant dense<0xFF800000> : vector<16xf32>
    %992 = vector.multi_reduction <maximumf>, %991, %cst_347 [1] : vector<16x16xf32> to vector<16xf32>
    %993 = vector.shape_cast %992 : vector<16xf32> to vector<16x1xf32>
    %994 = vector.broadcast %993 : vector<16x1xf32> to vector<16x16xf32>
    %995 = arith.subf %991, %994 : vector<16x16xf32>
    %996 = math.exp %995 : vector<16x16xf32>
    %cst_348 = arith.constant dense<0.000000e+00> : vector<16xf32>
    %997 = vector.multi_reduction <add>, %996, %cst_348 [1] : vector<16x16xf32> to vector<16xf32>
    %998 = vector.shape_cast %997 : vector<16xf32> to vector<16x1xf32>
    %999 = tpu.reciprocal %998 {approx = true} : vector<16x1xf32> -> vector<16x1xf32>
    %1000 = vector.broadcast %999 : vector<16x1xf32> to vector<16x16xf32>
    %1001 = arith.mulf %996, %1000 : vector<16x16xf32>
    %1002 = vector.extract_strided_slice %907 {offsets = [0, 24], sizes = [16, 8], strides = [1, 1]} : vector<16x32xf32> to vector<16x8xf32>
    %1003 = arith.truncf %1001 : vector<16x16xf32> to vector<16x16xbf16>
    %1004 = arith.truncf %1002 : vector<16x8xf32> to vector<16x8xbf16>
    %cst_349 = arith.constant dense<0.000000e+00> : vector<16x8xf32>
    %1005 = tpu.matmul %1003, %1004, %cst_349 {dimension_numbers = #tpu.dot_dimension_numbers<[1], [0], [0], [1], [0, 0, 1, 1], [], []>} : vector<16x16xbf16>, vector<16x8xbf16>, vector<16x8xf32> -> vector<16x8xf32>
    %1006 = vector.extract_strided_slice %798 {offsets = [24, 0], sizes = [8, 32], strides = [1, 1]} : vector<32x32xf32> to vector<8x32xf32>
    %1007 = arith.truncf %1005 : vector<16x8xf32> to vector<16x8xbf16>
    %1008 = arith.truncf %1006 : vector<8x32xf32> to vector<8x32xbf16>
    %cst_350 = arith.constant dense<0.000000e+00> : vector<16x32xf32>
    %1009 = tpu.matmul %1007, %1008, %cst_350 {dimension_numbers = #tpu.dot_dimension_numbers<[1], [0], [0], [1], [0, 0, 1, 1], [], []>} : vector<16x8xbf16>, vector<8x32xbf16>, vector<16x32xf32> -> vector<16x32xf32>
    %1010 = arith.addf %984, %1009 : vector<16x32xf32>
    %1011 = tpu.concatenate %904, %1010 in 0 : vector<16x32xf32>, vector<16x32xf32> -> vector<32x32xf32>
    %1012 = arith.addf %760, %1011 : vector<32x32xf32>
    %c1_351 = arith.constant 1 : index
    %c0_352 = arith.constant 0 : index
    %1013 = vector.load %arg27[%c1_351, %c0_352] : memref<2x32xf32, #tpu.memory_space<vmem>>, vector<1x32xf32>
    %1014 = vector.broadcast %1013 : vector<1x32xf32> to vector<32x32xf32>
    %1015 = arith.addf %1012, %1014 : vector<32x32xf32>
    %c1_353 = arith.constant 1 : index
    %c0_354 = arith.constant 0 : index
    %1016 = vector.load %arg28[%c1_353, %c0_354] : memref<2x32xf32, #tpu.memory_space<vmem>>, vector<1x32xf32>
    %c1_355 = arith.constant 1 : index
    %c0_356 = arith.constant 0 : index
    %1017 = vector.load %arg29[%c1_355, %c0_356] : memref<2x32xf32, #tpu.memory_space<vmem>>, vector<1x32xf32>
    %c1_357 = arith.constant 1 : index
    %c0_358 = arith.constant 0 : index
    %c0_359 = arith.constant 0 : index
    %1018 = vector.load %arg30[%c1_357, %c0_358, %c0_359] : memref<2x32x256xf32, #tpu.memory_space<vmem>>, vector<1x32x256xf32>
    %1019 = vector.shape_cast %1018 : vector<1x32x256xf32> to vector<32x256xf32>
    %c1_360 = arith.constant 1 : index
    %c0_361 = arith.constant 0 : index
    %1020 = vector.load %arg31[%c1_360, %c0_361] : memref<2x256xf32, #tpu.memory_space<vmem>>, vector<1x256xf32>
    %c1_362 = arith.constant 1 : index
    %c0_363 = arith.constant 0 : index
    %c0_364 = arith.constant 0 : index
    %1021 = vector.load %arg32[%c1_362, %c0_363, %c0_364] : memref<2x128x32xf32, #tpu.memory_space<vmem>>, vector<1x128x32xf32>
    %1022 = vector.shape_cast %1021 : vector<1x128x32xf32> to vector<128x32xf32>
    %c1_365 = arith.constant 1 : index
    %c0_366 = arith.constant 0 : index
    %1023 = vector.load %arg33[%c1_365, %c0_366] : memref<2x32xf32, #tpu.memory_space<vmem>>, vector<1x32xf32>
    %cst_367 = arith.constant dense<0.000000e+00> : vector<32xf32>
    %1024 = vector.multi_reduction <add>, %1015, %cst_367 [1] : vector<32x32xf32> to vector<32xf32>
    %1025 = vector.shape_cast %1024 : vector<32xf32> to vector<32x1xf32>
    %cst_368 = arith.constant 3.200000e+01 : f32
    %1026 = vector.broadcast %cst_368 : f32 to vector<32x1xf32>
    %1027 = arith.divf %1025, %1026 : vector<32x1xf32>
    %1028 = vector.broadcast %1027 : vector<32x1xf32> to vector<32x32xf32>
    %1029 = arith.subf %1015, %1028 : vector<32x32xf32>
    %1030 = arith.mulf %1029, %1029 : vector<32x32xf32>
    %cst_369 = arith.constant dense<0.000000e+00> : vector<32xf32>
    %1031 = vector.multi_reduction <add>, %1030, %cst_369 [1] : vector<32x32xf32> to vector<32xf32>
    %1032 = vector.shape_cast %1031 : vector<32xf32> to vector<32x1xf32>
    %cst_370 = arith.constant 3.200000e+01 : f32
    %1033 = vector.broadcast %cst_370 : f32 to vector<32x1xf32>
    %1034 = arith.divf %1032, %1033 : vector<32x1xf32>
    %1035 = vector.broadcast %1027 : vector<32x1xf32> to vector<32x32xf32>
    %1036 = arith.subf %1015, %1035 : vector<32x32xf32>
    %cst_371 = arith.constant 9.99999974E-6 : f32
    %1037 = vector.broadcast %cst_371 : f32 to vector<32x1xf32>
    %1038 = arith.addf %1034, %1037 : vector<32x1xf32>
    %1039 = math.rsqrt %1038 : vector<32x1xf32>
    %1040 = vector.broadcast %1039 : vector<32x1xf32> to vector<32x32xf32>
    %1041 = arith.mulf %1036, %1040 : vector<32x32xf32>
    %1042 = vector.broadcast %1016 : vector<1x32xf32> to vector<32x32xf32>
    %1043 = arith.mulf %1041, %1042 : vector<32x32xf32>
    %1044 = vector.broadcast %1017 : vector<1x32xf32> to vector<32x32xf32>
    %1045 = arith.addf %1043, %1044 : vector<32x32xf32>
    %1046 = arith.truncf %1045 : vector<32x32xf32> to vector<32x32xbf16>
    %1047 = arith.truncf %1019 : vector<32x256xf32> to vector<32x256xbf16>
    %cst_372 = arith.constant dense<0.000000e+00> : vector<32x256xf32>
    %1048 = tpu.matmul %1046, %1047, %cst_372 {dimension_numbers = #tpu.dot_dimension_numbers<[1], [0], [0], [1], [0, 0, 1, 1], [], []>} : vector<32x32xbf16>, vector<32x256xbf16>, vector<32x256xf32> -> vector<32x256xf32>
    %1049 = vector.broadcast %1020 : vector<1x256xf32> to vector<32x256xf32>
    %1050 = arith.addf %1048, %1049 : vector<32x256xf32>
    %1051 = vector.extract_strided_slice %1050 {offsets = [0, 0], sizes = [32, 128], strides = [1, 1]} : vector<32x256xf32> to vector<32x128xf32>
    %1052 = vector.extract_strided_slice %1050 {offsets = [0, 128], sizes = [32, 128], strides = [1, 1]} : vector<32x256xf32> to vector<32x128xf32>
    %cst_373 = arith.constant 5.000000e-01 : f32
    %1053 = vector.broadcast %cst_373 : f32 to vector<32x128xf32>
    %1054 = arith.mulf %1053, %1052 : vector<32x128xf32>
    %cst_374 = arith.constant 0.707106769 : f32
    %1055 = vector.broadcast %cst_374 : f32 to vector<32x128xf32>
    %1056 = arith.mulf %1052, %1055 : vector<32x128xf32>
    %1057 = math.absf %1056 : vector<32x128xf32>
    %cst_375 = arith.constant 0.327591091 : f32
    %1058 = vector.broadcast %cst_375 : f32 to vector<32x128xf32>
    %1059 = arith.mulf %1058, %1057 : vector<32x128xf32>
    %cst_376 = arith.constant 1.000000e+00 : f32
    %1060 = vector.broadcast %cst_376 : f32 to vector<32x128xf32>
    %1061 = arith.addf %1060, %1059 : vector<32x128xf32>
    %cst_377 = arith.constant 1.000000e+00 : f32
    %1062 = vector.broadcast %cst_377 : f32 to vector<32x128xf32>
    %1063 = arith.divf %1062, %1061 : vector<32x128xf32>
    %cst_378 = arith.constant 1.06140542 : f32
    %1064 = vector.broadcast %cst_378 : f32 to vector<32x128xf32>
    %1065 = arith.mulf %1064, %1063 : vector<32x128xf32>
    %cst_379 = arith.constant -1.45315206 : f32
    %1066 = vector.broadcast %cst_379 : f32 to vector<32x128xf32>
    %1067 = arith.addf %1065, %1066 : vector<32x128xf32>
    %1068 = arith.mulf %1067, %1063 : vector<32x128xf32>
    %cst_380 = arith.constant 1.42141378 : f32
    %1069 = vector.broadcast %cst_380 : f32 to vector<32x128xf32>
    %1070 = arith.addf %1068, %1069 : vector<32x128xf32>
    %1071 = arith.mulf %1070, %1063 : vector<32x128xf32>
    %cst_381 = arith.constant -0.284496725 : f32
    %1072 = vector.broadcast %cst_381 : f32 to vector<32x128xf32>
    %1073 = arith.addf %1071, %1072 : vector<32x128xf32>
    %1074 = arith.mulf %1073, %1063 : vector<32x128xf32>
    %cst_382 = arith.constant 0.254829586 : f32
    %1075 = vector.broadcast %cst_382 : f32 to vector<32x128xf32>
    %1076 = arith.addf %1074, %1075 : vector<32x128xf32>
    %1077 = arith.mulf %1076, %1063 : vector<32x128xf32>
    %cst_383 = arith.constant 0.000000e+00 : f32
    %1078 = vector.broadcast %cst_383 : f32 to vector<32x128xf32>
    %1079 = arith.subf %1078, %1057 : vector<32x128xf32>
    %1080 = arith.mulf %1079, %1057 : vector<32x128xf32>
    %1081 = math.exp %1080 : vector<32x128xf32>
    %1082 = arith.mulf %1077, %1081 : vector<32x128xf32>
    %cst_384 = arith.constant 1.000000e+00 : f32
    %1083 = vector.broadcast %cst_384 : f32 to vector<32x128xf32>
    %1084 = arith.subf %1083, %1082 : vector<32x128xf32>
    %cst_385 = arith.constant 0.000000e+00 : f32
    %1085 = vector.broadcast %cst_385 : f32 to vector<32x128xf32>
    %1086 = arith.cmpf olt, %1056, %1085 : vector<32x128xf32>
    %cst_386 = arith.constant 0.000000e+00 : f32
    %1087 = vector.broadcast %cst_386 : f32 to vector<32x128xf32>
    %1088 = arith.subf %1087, %1084 : vector<32x128xf32>
    %1089 = arith.select %1086, %1088, %1084 : vector<32x128xi1>, vector<32x128xf32>
    %cst_387 = arith.constant 1.000000e+00 : f32
    %1090 = vector.broadcast %cst_387 : f32 to vector<32x128xf32>
    %1091 = arith.addf %1090, %1089 : vector<32x128xf32>
    %1092 = arith.mulf %1054, %1091 : vector<32x128xf32>
    %1093 = arith.mulf %1051, %1092 : vector<32x128xf32>
    %1094 = arith.truncf %1093 : vector<32x128xf32> to vector<32x128xbf16>
    %1095 = arith.truncf %1022 : vector<128x32xf32> to vector<128x32xbf16>
    %cst_388 = arith.constant dense<0.000000e+00> : vector<32x32xf32>
    %1096 = tpu.matmul %1094, %1095, %cst_388 {dimension_numbers = #tpu.dot_dimension_numbers<[1], [0], [0], [1], [0, 0, 1, 1], [], []>} : vector<32x128xbf16>, vector<128x32xbf16>, vector<32x32xf32> -> vector<32x32xf32>
    %1097 = vector.broadcast %1023 : vector<1x32xf32> to vector<32x32xf32>
    %1098 = arith.addf %1096, %1097 : vector<32x32xf32>
    %1099 = arith.addf %1015, %1098 : vector<32x32xf32>
    %c0_389 = arith.constant 0 : index
    %c0_390 = arith.constant 0 : index
    %1100 = vector.load %arg4[%c0_389, %c0_390] : memref<2x32xf32, #tpu.memory_space<vmem>>, vector<2x32xf32>
    %cst_391 = arith.constant dense<0.000000e+00> : vector<2x32xf32>
    %1101 = tpu.matmul %1100, %1099, %cst_391 {dimension_numbers = #tpu.dot_dimension_numbers<[1], [0], [0], [1], [0, 0, 1, 1], [], []>} : vector<2x32xf32>, vector<32x32xf32>, vector<2x32xf32> -> vector<2x32xf32>
    %c0_392 = arith.constant 0 : index
    %c0_393 = arith.constant 0 : index
    %1102 = vector.load %arg34[%c0_392, %c0_393] : memref<1x32xf32, #tpu.memory_space<vmem>>, vector<1x32xf32>
    %c0_394 = arith.constant 0 : index
    %c0_395 = arith.constant 0 : index
    %1103 = vector.load %arg35[%c0_394, %c0_395] : memref<1x32xf32, #tpu.memory_space<vmem>>, vector<1x32xf32>
    %cst_396 = arith.constant dense<0.000000e+00> : vector<2xf32>
    %1104 = vector.multi_reduction <add>, %1101, %cst_396 [1] : vector<2x32xf32> to vector<2xf32>
    %1105 = vector.shape_cast %1104 : vector<2xf32> to vector<2x1xf32>
    %cst_397 = arith.constant 3.200000e+01 : f32
    %1106 = vector.broadcast %cst_397 : f32 to vector<2x1xf32>
    %1107 = arith.divf %1105, %1106 : vector<2x1xf32>
    %1108 = vector.broadcast %1107 : vector<2x1xf32> to vector<2x32xf32>
    %1109 = arith.subf %1101, %1108 : vector<2x32xf32>
    %1110 = arith.mulf %1109, %1109 : vector<2x32xf32>
    %cst_398 = arith.constant dense<0.000000e+00> : vector<2xf32>
    %1111 = vector.multi_reduction <add>, %1110, %cst_398 [1] : vector<2x32xf32> to vector<2xf32>
    %1112 = vector.shape_cast %1111 : vector<2xf32> to vector<2x1xf32>
    %cst_399 = arith.constant 3.200000e+01 : f32
    %1113 = vector.broadcast %cst_399 : f32 to vector<2x1xf32>
    %1114 = arith.divf %1112, %1113 : vector<2x1xf32>
    %1115 = vector.broadcast %1107 : vector<2x1xf32> to vector<2x32xf32>
    %1116 = arith.subf %1101, %1115 : vector<2x32xf32>
    %cst_400 = arith.constant 9.99999974E-6 : f32
    %1117 = vector.broadcast %cst_400 : f32 to vector<2x1xf32>
    %1118 = arith.addf %1114, %1117 : vector<2x1xf32>
    %1119 = math.rsqrt %1118 : vector<2x1xf32>
    %1120 = vector.broadcast %1119 : vector<2x1xf32> to vector<2x32xf32>
    %1121 = arith.mulf %1116, %1120 : vector<2x32xf32>
    %1122 = vector.broadcast %1102 : vector<1x32xf32> to vector<2x32xf32>
    %1123 = arith.mulf %1121, %1122 : vector<2x32xf32>
    %1124 = vector.broadcast %1103 : vector<1x32xf32> to vector<2x32xf32>
    %1125 = arith.addf %1123, %1124 : vector<2x32xf32>
    %c0_401 = arith.constant 0 : index
    %c0_402 = arith.constant 0 : index
    %1126 = vector.load %arg36[%c0_401, %c0_402] : memref<32x10xf32, #tpu.memory_space<vmem>>, vector<32x10xf32>
    %1127 = arith.truncf %1125 : vector<2x32xf32> to vector<2x32xbf16>
    %1128 = arith.truncf %1126 : vector<32x10xf32> to vector<32x10xbf16>
    %cst_403 = arith.constant dense<0.000000e+00> : vector<2x10xf32>
    %1129 = tpu.matmul %1127, %1128, %cst_403 {dimension_numbers = #tpu.dot_dimension_numbers<[1], [0], [0], [1], [0, 0, 1, 1], [], []>} : vector<2x32xbf16>, vector<32x10xbf16>, vector<2x10xf32> -> vector<2x10xf32>
    %c0_404 = arith.constant 0 : index
    %c0_405 = arith.constant 0 : index
    %1130 = vector.load %arg37[%c0_404, %c0_405] : memref<1x10xf32, #tpu.memory_space<vmem>>, vector<1x10xf32>
    %1131 = vector.broadcast %1130 : vector<1x10xf32> to vector<2x10xf32>
    %1132 = arith.addf %1129, %1131 : vector<2x10xf32>
    %c0_406 = arith.constant 0 : index
    %c0_407 = arith.constant 0 : index
    %1133 = vector.load %arg38[%c0_406, %c0_407] : memref<2x10xf32, #tpu.memory_space<vmem>>, vector<2x10xf32>
    tpu.vector_store %arg38[%c0_406, %c0_407], %1132 {strides = array<i32>} : memref<2x10xf32, #tpu.memory_space<vmem>>, vector<2x10xf32>,
    return
  }
}

</mosaic_0001>

<bundles_post_ra>
// kernel: perceiver_forward.1
= control target key start
LH: loop header
LB: loop body
LE: loop exit
PB: predicated region body
PF: predicated region fallthrough
CT: control target
= control target key end

     0   :  { %s8776_s6 = smov 1   ;;  %s8777_s10 = smov 2   ;;  %s10974_s0 = inlined_call_operand.smem [shape: u32[39], index: -1, kind: input, shape index: {}] }
   0x1   :  { %s8835_s5 = sld [smem:[%s10974_s0]]   ;;  %s8778_s14 = smov 3  }
   0x2   :  { %s8840_s9 = sld [smem:[%s10974_s0 + %s8776_s6]]   ;;  %s8779_s18 = smov 4  }
   0x3   :  { %s8845_s13 = sld [smem:[%s10974_s0 + %s8777_s10]]   ;;  %s8780_s22 = smov 5  }
   0x4   :  { %s8850_s17 = sld [smem:[%s10974_s0 + %s8778_s14]]   ;;  %s8781_s26 = smov 6  }
   0x5   :  { %s8855_s21 = sld [smem:[%s10974_s0 + %s8779_s18]]   ;;  %s8782_s30 = smov 7  }
   0x6   :  { %s8860_s25 = sld [smem:[%s10974_s0 + %s8780_s22]]   ;;  %s8783_s4 = smov 8  }
   0x7   :  { %s8865_s29 = sld [smem:[%s10974_s0 + %s8781_s26]]   ;;  %s8784_s10 = smov 9  }
   0x8   :  { %s8870_s3 = sld [smem:[%s10974_s0 + %s8782_s30]]   ;;  %s8785_s15 = smov 10  }
   0x9   :  { %s8875_s8 = sld [smem:[%s10974_s0 + %s8783_s4]]   ;;  %s8786_s20 = smov 11  }
   0xa   :  { %s8880_s14 = sld [smem:[%s10974_s0 + %s8784_s10]]   ;;  %s8787_s26 = smov 12  }
   0xb   :  { %11017 = sst [smem:[#allocation5_spill]] %s8855_s21  ;;  %s8788_s1 = smov 13  }
   0xc   :  { %s8885_s19 = sld [smem:[%s10974_s0 + %s8785_s15]]   ;;  %s8789_s7 = smov 14  }
   0xd   :  { %s8890_s24 = sld [smem:[%s10974_s0 + %s8786_s20]]   ;;  %s8790_s15 = smov 15  }
   0xe   :  { %s8895_s30 = sld [smem:[%s10974_s0 + %s8787_s26]]   ;;  %s8791_s22 = smov 16  }
   0xf   :  { %s8900_s6 = sld [smem:[%s10974_s0 + %s8788_s1]]   ;;  %s8792_s28 = smov 17  }
  0x10   :  { %s8905_s12 = sld [smem:[%s10974_s0 + %s8789_s7]]   ;;  %s8793_s7 = smov 18  }
  0x11   :  { %s8910_s20 = sld [smem:[%s10974_s0 + %s8790_s15]]   ;;  %s8794_s15 = smov 19  }
  0x12   :  { %s8915_s27 = sld [smem:[%s10974_s0 + %s8791_s22]]   ;;  %s8795_s22 = smov 20  }
  0x13   :  { %s8920_s4 = sld [smem:[%s10974_s0 + %s8792_s28]]   ;;  %s8796_s28 = smov 21  }
  0x14   :  { %s8925_s21 = sld [smem:[%s10974_s0 + %s8793_s7]]   ;;  %s8797_s7 = smov 22  }
  0x17   :  { %11018 = sst [smem:[#allocation6_spill]] %s8910_s20 }
  0x18   :  { %11019 = sst [smem:[#allocation7_spill]] %s8915_s27 }
  0x19   :  { %11020 = sst [smem:[#allocation8_spill]] %s8920_s4 }
  0x1a   :  { %11021 = sst [smem:[#allocation9_spill]] %s8925_s21 }
  0x1b   :  { %s8930_s20 = sld [smem:[%s10974_s0 + %s8794_s15]]   ;;  %s8798_s15 = smov 23  }
  0x1c   :  { %s8935_s27 = sld [smem:[%s10974_s0 + %s8795_s22]]   ;;  %s8799_s22 = smov 24  }
  0x1d   :  { %s8940_s4 = sld [smem:[%s10974_s0 + %s8796_s28]]   ;;  %s8800_s28 = smov 25  }
  0x1e   :  { %s8945_s21 = sld [smem:[%s10974_s0 + %s8797_s7]]   ;;  %s8801_s7 = smov 26  }
  0x21   :  { %11022 = sst [smem:[#allocation10_spill]] %s8930_s20 }
  0x22   :  { %11023 = sst [smem:[#allocation11_spill]] %s8935_s27 }
  0x23   :  { %11024 = sst [smem:[#allocation12_spill]] %s8940_s4 }
  0x24   :  { %11025 = sst [smem:[#allocation13_spill]] %s8945_s21 }
  0x25   :  { %s8950_s20 = sld [smem:[%s10974_s0 + %s8798_s15]]   ;;  %s8802_s15 = smov 27  }
  0x26   :  { %s8955_s27 = sld [smem:[%s10974_s0 + %s8799_s22]]   ;;  %s8803_s22 = smov 28  }
  0x27   :  { %s8960_s4 = sld [smem:[%s10974_s0 + %s8800_s28]]   ;;  %s8804_s28 = smov 29  }
  0x28   :  { %s8965_s21 = sld [smem:[%s10974_s0 + %s8801_s7]]   ;;  %s8805_s7 = smov 30  }
  0x2b   :  { %11026 = sst [smem:[#allocation14_spill]] %s8950_s20 }
  0x2c   :  { %11027 = sst [smem:[#allocation15_spill]] %s8955_s27 }
  0x2d   :  { %11028 = sst [smem:[#allocation16_spill]] %s8960_s4 }
  0x2e   :  { %11029 = sst [smem:[#allocation17_spill]] %s8965_s21 }
  0x2f   :  { %s8970_s20 = sld [smem:[%s10974_s0 + %s8802_s15]]   ;;  %s8806_s15 = smov 31  }
  0x30   :  { %s8975_s27 = sld [smem:[%s10974_s0 + %s8803_s22]]   ;;  %s8807_s22 = smov 32  }
  0x31   :  { %s8980_s4 = sld [smem:[%s10974_s0 + %s8804_s28]]   ;;  %s8808_s28 = smov 33  }
  0x32   :  { %s8985_s21 = sld [smem:[%s10974_s0 + %s8805_s7]]   ;;  %s8809_s7 = smov 34  }
  0x35   :  { %11030 = sst [smem:[#allocation18_spill]] %s8970_s20 }
  0x36   :  { %11031 = sst [smem:[#allocation19_spill]] %s8975_s27 }
  0x37   :  { %11032 = sst [smem:[#allocation20_spill]] %s8980_s4 }
  0x38   :  { %11033 = sst [smem:[#allocation21_spill]] %s8985_s21 }
  0x39   :  { %s8990_s20 = sld [smem:[%s10974_s0 + %s8806_s15]]   ;;  %s8810_s15 = smov 35  }
  0x3a   :  { %s8995_s27 = sld [smem:[%s10974_s0 + %s8807_s22]]   ;;  %s8811_s22 = smov 36  }
  0x3b   :  { %s9000_s4 = sld [smem:[%s10974_s0 + %s8808_s28]]   ;;  %s8812_s28 = smov 37  }
  0x3c   :  { %s9005_s21 = sld [smem:[%s10974_s0 + %s8809_s7]]   ;;  %s8813_s7 = smov 38  }
  0x3f   :  { %11034 = sst [smem:[#allocation22_spill]] %s8990_s20 }
  0x40   :  { %11035 = sst [smem:[#allocation23_spill]] %s8995_s27 }
  0x41   :  { %11036 = sst [smem:[#allocation24_spill]] %s9000_s4 }
  0x42   :  { %11037 = sst [smem:[#allocation25_spill]] %s9005_s21 }
  0x43   :  { %s9010_s20 = sld [smem:[%s10974_s0 + %s8810_s15]]  }
  0x44   :  { %s9015_s27 = sld [smem:[%s10974_s0 + %s8811_s22]]  }
  0x45   :  { %s9020_s4 = sld [smem:[%s10974_s0 + %s8812_s28]]  }
  0x46   :  { %s9025_s21 = sld [smem:[%s10974_s0 + %s8813_s7]]  }
  0x47   :  { %v176_v0 = vld [vmem:[%s8840_s9] sm:$0xff]  ;;  %vm211_vm0 = vcmask 1043456   ;;  %v161_v2 = vld [vmem:[%s8835_s5 + $0x8] sm:$0xff]  ;;  %vm186_vm1 = vcmask 64512   ;;  %v162_v5 = vld [vmem:[%s8835_s5 + $0x10] sm:$0xff]  ;;  %vm687_vm2 = vcmask 261120  }
  0x48   :  { %v160_v1 = vld [vmem:[%s8835_s5] sm:$0xff]  ;;  %v185_v3 = vpack.c.bf16 %v176_v0, %v176_v0  ;;  %v163_v6 = vld [vmem:[%s8835_s5 + $0x18] sm:$0xff]  ;;  %v165_v8 = vld [vmem:[%s8835_s5 + $0x28] sm:$0xff]  ;;  %vm369_vm3 = vcmask 121856  }
  0x49   :  { %v177_v4 = vpack.c.bf16 %v161_v2, %v160_v1  ;;  %v164_v7 = vld [vmem:[%s8835_s5 + $0x20] sm:$0xff]  ;;  %v178_v10 = vpack.c.bf16 %v163_v6, %v162_v5  ;;  %v9043_v14 = vld [vmem:[%s8850_s17 + $0x8] sm:$0xff]  ;;  %v9052_v17 = vld [vmem:[%s8845_s13 + $0x18] sm:$0xff] }
  0x4a   :  { %8378 = vmatprep.subr.msk.bf16.mxu0 %vm211_vm0, %v185_v3  ;;  %v213_v9 = vsel %vm211_vm0, %v185_v3, 0  ;;  %v179_v11 = vpack.c.bf16 %v165_v8, %v164_v7  ;;  %v9038_v12 = vld [vmem:[%s8850_s17] sm:$0xff]  ;;  %v9046_v15 = vld [vmem:[%s8845_s13 + $0x8] sm:$0xff]  ;;  %v166_v18 = vld [vmem:[%s8835_s5 + $0x30] sm:$0xff]  ;;  %v691_v20 = vsel %vm687_vm2, %v9043_v14, 0.0 }
  0x4b   :  { %7697 = vmatprep.mubr.msk.bf16.mxu0 %vm186_vm1, %v177_v4  ;;  %7696 = vmatpush3.bf16.msra.mxu0 %v213_v9  ;;  %v688_v13 = vsel %vm687_vm2, %v9038_v12, 0.0  ;;  %v373_v16 = vsel %vm369_vm3, %v9046_v15, 0.0  ;;  %v167_v19 = vld [vmem:[%s8835_s5 + $0x38] sm:$0xff] }
  0x4c   :  { %689 = vadd.xlane.f32.xlu0 %v688_v13  ;;  %374 = vadd.xlane.f32.xlu1 %v373_v16 }
  0x4e   :  { %7698 = vmatmul.mubr.msk.bf16.vlgmr.msra.gmra.mrb[0].mxu0 %vm186_vm1, %v178_v10 }
  0x4f   :  { %7701 = vmatprep.mubr.msk.bf16.mxu0 %vm186_vm1, %v179_v11 }
  0x50   :  { %82 = vsyncpa [#allocation3], 0  ;;  %v168_v21 = vld [vmem:[%s8835_s5 + $0x40] sm:$0xff]  ;;  %v169_v22 = vld [vmem:[%s8835_s5 + $0x48] sm:$0xff]  ;;  %v379_v24 = vsel %vm369_vm3, %v9052_v17, 0.0  ;;  %v180_v26 = vpack.c.bf16 %v167_v19, %v166_v18  ;;  %692 = vadd.xlane.f32.xlu0 %v691_v20  ;;  %vm320_vm4 = vcmask 31744  }
  0x51   :  { %v9062_v23 = vld [vmem:[%s8845_s13] sm:$0xff]  ;;  %v9067_v25 = vld [vmem:[%s8845_s13 + $0x28] sm:$0xff]  ;;  %v181_v27 = vpack.c.bf16 %v169_v22, %v168_v21  ;;  %380 = vadd.xlane.f32.xlu1 %v379_v24  ;;  %v9072_v29 = vld [vmem:[%s8845_s13 + $0x10] sm:$0xff]  ;;  %vm915_vm5 = vcmask 1046528   ;;  %vm916_vm6 = vcmask 1047552   ;;  %vm1043_vm7 = vcmask 1041408  }
  0x52   :  { %v370_v28 = vsel %vm369_vm3, %v9062_v23, 0.0  ;;  %v385_v30 = vsel %vm369_vm3, %v9067_v25, 0.0  ;;  %v170_v31 = vld [vmem:[%s8835_s5 + $0x50] sm:$0xff]  ;;  %v171_v32 = vld [vmem:[%s8835_s5 + $0x58] sm:$0xff]  ;;  %v376_v33 = vsel %vm369_vm3, %v9072_v29, 0.0  ;;  %v172_v34 = vld [vmem:[%s8835_s5 + $0x60] sm:$0xff] }
  0x53   :  { %v173_v35 = vld [vmem:[%s8835_s5 + $0x68] sm:$0xff]  ;;  %v9085_v36 = vld [vmem:[%s8845_s13 + $0x20] sm:$0xff]  ;;  %v182_v37 = vpack.c.bf16 %v171_v32, %v170_v31  ;;  %v174_v40 = vld [vmem:[%s8835_s5 + $0x70] sm:$0xff]  ;;  %vm8816_vm8 = vmmov 0   ;;  %vm1151_vm9 = vcmask 130048   ;;  %vm1210_vm10 = vcmask 523264  }
  0x54   :  { %371 = vadd.xlane.f32.xlu0 %v370_v28  ;;  %v183_v38 = vpack.c.bf16 %v173_v35, %v172_v34  ;;  %v382_v39 = vsel %vm369_vm3, %v9085_v36, 0.0  ;;  %v175_v41 = vld [vmem:[%s8835_s5 + $0x78] sm:$0xff]  ;;  %v9123_v57 = vld [vmem:[%s8845_s13 + $0x30] sm:$0xff]  ;;  %v812_v31 = vld [vmem:[%s8890_s24 + $0x8] sm:$0xff]  ;;  %s8817_s0 = smov 112   ;;  %s11046_s5 = sld [smem:[#allocation6_spill]] }
  0x55   :  { %386 = vadd.xlane.f32.xlu1 %v385_v30  ;;  %v184_v42 = vpack.c.bf16 %v175_v41, %v174_v40  ;;  %v388_v59 = vsel %vm369_vm3, %v9123_v57, 0.0  ;;  %v9134_v62 = vld [vmem:[%s8845_s13 + $0x38] sm:$0xff]  ;;  %v811_v30 = vld [vmem:[%s8890_s24] sm:$0xff]  ;;  %s11047_s9 = sld [smem:[#allocation9_spill]]  ;;  %s11048_s13 = sld [smem:[#allocation7_spill]] }
  0x56   :  { %7702 = vmatmul.mubr.msk.bf16.gmra.mrb[4].mxu0 %vm186_vm1, %v180_v26  ;;  %v391_v4 = vsel %vm369_vm3, %v9134_v62, 0.0  ;;  %v816_v32 = vpack.c.bf16 %v812_v31, %v811_v30  ;;  %v814_v34 = vld [vmem:[%s8890_s24 + $0x18] sm:$0xff]  ;;  %s11056_s15 = sld [smem:[#allocation16_spill]]  ;;  %s11057_s16 = sld [smem:[#allocation13_spill]] }
  0x57   :  { %7705 = vmatprep.mubr.msk.bf16.mxu0 %vm186_vm1, %v181_v27  ;;  %s11058_s18 = sld [smem:[#allocation14_spill]]  ;;  %s8819_s22 = smov 120  }
  0x58   :  { %377 = vadd.xlane.f32.xlu0 %v376_v33  ;;  %7713 = vmatprep.subr.bf16.mxu1 %v816_v32  ;;  %v813_v33 = vld [vmem:[%s8890_s24 + $0x10] sm:$0xff]  ;;  %s11011_s23 = smov 88   ;;  %s11015_s26 = smov 96  }
  0x59   :  { %7714 = vmatpush3.bf16.msra.mxu1 %v816_v32  ;;  %v817_v35 = vpack.c.bf16 %v814_v34, %v813_v33  ;;  %s11059_s28 = sld [smem:[#allocation17_spill]]  ;;  %s11007_s1 = smov 104  }
  0x5a   :  { %s11009_s2 = smov 80   ;;  %s11005_s7 = smov 72  }
  0x5b   :  { %7715 = vmatprep.subr.bf16.mxu1 %v817_v35  ;;  %s11060_s10 = sld [smem:[#allocation18_spill]]  ;;  %s11062_s11 = sld [smem:[#allocation21_spill]] }
  0x5c   :  { %383 = vadd.xlane.f32.xlu0 %v382_v39 }
  0x5d   :  { %7716 = vmatpush3.bf16.msra.mxu1 %v817_v35 }
  0x5e   :  { %7706 = vmatmul.mubr.msk.bf16.gmra.mrb[8].mxu0 %vm186_vm1, %v182_v37 }
  0x5f   :  { %7709 = vmatprep.mubr.msk.bf16.mxu0 %vm186_vm1, %v183_v38 }
  0x66   :  { %7710 = vmatmul.mubr.msk.bf16.gmra.mrb[12].mxu0 %vm186_vm1, %v184_v42 }
  0xd9   :  { %v690_v3 = vpop.xlane.xlu0 %689  ;;  %v9186_v38 = vpop.xlane.xlu1 %374 }
  0xda   :  { %v695_v6 = vmul.f32 0.03125, %v690_v3 }
  0xdc   :  { %v9157_v13 = vsub.f32 %v9038_v12, %v695_v6 }
  0xdd   :  { %v693_v10 = vpop.xlane.xlu0 %692 }
  0xde   :  { %v696_v20 = vmul.f32 0.03125, %v693_v10  ;;  %v699_v12 = vmul.f32 %v9157_v13, %v9157_v13  ;;  %v9190_v40 = vpop.xlane.xlu1 %380 }
  0xe0   :  { %v9170_v22 = vsub.f32 %v9043_v14, %v696_v20  ;;  %v701_v26 = vsel %vm687_vm2, %v699_v12, 0.0 }
  0xe1   :  { %v9184_v37 = vpop.xlane.xlu0 %371 }
  0xe2   :  { %v700_v28 = vmul.f32 %v9170_v22, %v9170_v22  ;;  %v9194_v42 = vpop.xlane.xlu1 %386 }
  0xe4   :  { %v704_v14 = vsel %vm687_vm2, %v700_v28, 0.0 }
  0xe5   :  { %v9188_v39 = vpop.xlane.xlu0 %377 }
  0xe9   :  { %v9192_v41 = vpop.xlane.xlu0 %383 }
 0x121   :  { %v9094_v43 = vpop.f32.mrb[0].mxu0 }
 0x122   :  { %v9096_v44 = vpop.f32.mrb[1].mxu0  ;;  %v327_v45 = vsel %vm320_vm4, %v9094_v43, 0.0 }
 0x123   :  { %328 = vadd.xlane.f32.xlu0 %v327_v45  ;;  %v9100_v46 = vpop.f32.mrb[2].mxu0  ;;  %v321_v47 = vsel %vm320_vm4, %v9096_v44, 0.0 }
 0x124   :  { %322 = vadd.xlane.f32.xlu1 %v321_v47  ;;  %v9104_v48 = vpop.f32.mrb[3].mxu0  ;;  %v330_v49 = vsel %vm320_vm4, %v9100_v46, 0.0 }
 0x125   :  { %v324_v54 = vsel %vm320_vm4, %v9104_v48, 0.0 }
 0x128   :  { %331 = vadd.xlane.f32.xlu1 %v330_v49 }
 0x129   :  { %v9108_v50 = vpop.f32.mrb[4].mxu0 }
 0x12a   :  { %v9110_v51 = vpop.f32.mrb[5].mxu0  ;;  %v339_v52 = vsel %vm320_vm4, %v9108_v50, 0.0 }
 0x12b   :  { %340 = vadd.xlane.f32.xlu0 %v339_v52  ;;  %v9114_v53 = vpop.f32.mrb[6].mxu0  ;;  %v333_v56 = vsel %vm320_vm4, %v9110_v51, 0.0 }
 0x12c   :  { %325 = vadd.xlane.f32.xlu1 %v324_v54  ;;  %v9118_v55 = vpop.f32.mrb[7].mxu0  ;;  %v342_v58 = vsel %vm320_vm4, %v9114_v53, 0.0 }
 0x12d   :  { %v336_v63 = vsel %vm320_vm4, %v9118_v55, 0.0 }
 0x12f   :  { %334 = vadd.xlane.f32.xlu0 %v333_v56 }
 0x130   :  { %343 = vadd.xlane.f32.xlu1 %v342_v58 }
 0x131   :  { %v9129_v60 = vpop.f32.mrb[8].mxu0 }
 0x132   :  { %v9131_v61 = vpop.f32.mrb[9].mxu0  ;;  %v351_v5 = vsel %vm320_vm4, %v9129_v60, 0.0 }
 0x133   :  { %389 = vadd.xlane.f32.xlu0 %v388_v59  ;;  %v9138_v0 = vpop.f32.mrb[10].mxu0  ;;  %v345_v1 = vsel %vm320_vm4, %v9131_v61, 0.0 }
 0x134   :  { %337 = vadd.xlane.f32.xlu1 %v336_v63  ;;  %v9142_v2 = vpop.f32.mrb[11].mxu0  ;;  %v354_v19 = vsel %vm320_vm4, %v9138_v0, 0.0 }
 0x135   :  { %v348_v7 = vsel %vm320_vm4, %v9142_v2, 0.0 }
 0x137   :  { %346 = vadd.xlane.f32.xlu0 %v345_v1 }
 0x138   :  { %392 = vadd.xlane.f32.xlu1 %v391_v4 }
 0x139   :  { %v9150_v8 = vpop.f32.mrb[12].mxu0 }
 0x13a   :  { %v9152_v9 = vpop.f32.mrb[13].mxu0  ;;  %v363_v21 = vsel %vm320_vm4, %v9150_v8, 0.0 }
 0x13b   :  { %352 = vadd.xlane.f32.xlu0 %v351_v5  ;;  %v9154_v11 = vpop.f32.mrb[14].mxu0  ;;  %v357_v16 = vsel %vm320_vm4, %v9152_v9, 0.0 }
 0x13c   :  { %349 = vadd.xlane.f32.xlu1 %v348_v7  ;;  %v9161_v18 = vpop.f32.mrb[15].mxu0  ;;  %v366_v27 = vsel %vm320_vm4, %v9154_v11, 0.0 }
 0x13d   :  { %v360_v24 = vsel %vm320_vm4, %v9161_v18, 0.0 }
 0x13f   :  { %358 = vadd.xlane.f32.xlu0 %v357_v16 }
 0x140   :  { %355 = vadd.xlane.f32.xlu1 %v354_v19 }
 0x143   :  { %364 = vadd.xlane.f32.xlu0 %v363_v21 }
 0x144   :  { %361 = vadd.xlane.f32.xlu1 %v360_v24 }
 0x147   :  { %702 = vadd.xlane.f32.xlu0 %v701_v26 }
 0x148   :  { %367 = vadd.xlane.f32.xlu1 %v366_v27 }
 0x14c   :  { %705 = vadd.xlane.f32.xlu1 %v704_v14 }
 0x1b0   :  { %v329_v45 = vpop.xlane.xlu0 %328 }
 0x1b1   :  { %v396_v47 = vadd.f32 %v9188_v39, %v329_v45  ;;  %v323_v49 = vpop.xlane.xlu1 %322 }
 0x1b2   :  { %v394_v52 = vadd.f32 %v9184_v37, %v323_v49 }
 0x1b3   :  { %v413_v54 = vmul.f32 0.05263158, %v396_v47 }
 0x1b4   :  { %v411_v59 = vmul.f32 0.05263158, %v394_v52 }
 0x1b5   :  { %v9199_v56 = vsub.f32 %v9094_v43, %v413_v54  ;;  %v9202_v58 = vsub.f32 %v9072_v29, %v413_v54  ;;  %v332_v63 = vpop.xlane.xlu1 %331 }
 0x1b6   :  { %v397_v1 = vadd.f32 %v9190_v40, %v332_v63  ;;  %v9208_v6 = vsub.f32 %v9096_v44, %v411_v59  ;;  %v9223_v24 = vsub.f32 %v9062_v23, %v411_v59 }
 0x1b7   :  { %v461_v3 = vmul.f32 %v9199_v56, %v9199_v56  ;;  %v525_v43 = vmul.f32 %v9202_v58, %v9202_v58 }
 0x1b8   :  { %v414_v4 = vmul.f32 0.05263158, %v397_v1  ;;  %v341_v5 = vpop.xlane.xlu0 %340 }
 0x1b9   :  { %v326_v7 = vpop.xlane.xlu1 %325  ;;  %v481_v10 = vsel %vm320_vm4, %v461_v3, 0.0  ;;  %v545_v27 = vsel %vm369_vm3, %v525_v43, 0.0 }
 0x1ba   :  { %v9214_v16 = vsub.f32 %v9100_v46, %v414_v4  ;;  %v9217_v19 = vsub.f32 %v9052_v17, %v414_v4  ;;  %v395_v20 = vadd.f32 %v9186_v38, %v326_v7  ;;  %482 = vadd.xlane.f32.xlu0 %v481_v10  ;;  %v459_v46 = vmul.f32 %v9208_v6, %v9208_v6 }
 0x1bc   :  { %v412_v21 = vmul.f32 0.05263158, %v395_v20  ;;  %v335_v12 = vpop.xlane.xlu0 %334  ;;  %v462_v44 = vmul.f32 %v9214_v16, %v9214_v16  ;;  %v526_v30 = vmul.f32 %v9217_v19, %v9217_v19  ;;  %v475_v35 = vsel %vm320_vm4, %v459_v46, 0.0 }
 0x1bd   :  { %v344_v26 = vpop.xlane.xlu1 %343  ;;  %v398_v32 = vadd.f32 %v9192_v41, %v335_v12 }
 0x1be   :  { %v9229_v28 = vsub.f32 %v9104_v48, %v412_v21  ;;  %546 = vadd.xlane.f32.xlu0 %v545_v27  ;;  %v484_v14 = vsel %vm320_vm4, %v462_v44, 0.0  ;;  %v523_v48 = vmul.f32 %v9223_v24, %v9223_v24  ;;  %v9242_v45 = vsub.f32 %v9046_v15, %v412_v21 }
 0x1bf   :  { %485 = vadd.xlane.f32.xlu1 %v484_v14  ;;  %v548_v47 = vsel %vm369_vm3, %v526_v30, 0.0  ;;  %v415_v59 = vmul.f32 0.05263158, %v398_v32 }
 0x1c0   :  { %v9234_v31 = vpop.xlane.xlu0 %389  ;;  %v460_v49 = vmul.f32 %v9229_v28, %v9229_v28  ;;  %v539_v1 = vsel %vm369_vm3, %v523_v48, 0.0  ;;  %v524_v43 = vmul.f32 %v9242_v45, %v9242_v45 }
 0x1c1   :  { %v400_v33 = vadd.f32 %v9234_v31, %v341_v5  ;;  %v338_v34 = vpop.xlane.xlu1 %337  ;;  %v9264_v12 = vsub.f32 %v9110_v51, %v415_v59 }
 0x1c2   :  { %476 = vadd.xlane.f32.xlu0 %v475_v35  ;;  %v399_v5 = vadd.f32 %v9194_v42, %v338_v34  ;;  %v478_v10 = vsel %vm320_vm4, %v460_v49, 0.0  ;;  %v542_v30 = vsel %vm369_vm3, %v524_v43, 0.0  ;;  %v9280_v34 = vsub.f32 %v9085_v36, %v415_v59 }
 0x1c3   :  { %v417_v52 = vmul.f32 0.05263158, %v400_v33  ;;  %549 = vadd.xlane.f32.xlu1 %v548_v47  ;;  %v463_v49 = vmul.f32 %v9264_v12, %v9264_v12 }
 0x1c4   :  { %v347_v54 = vpop.xlane.xlu0 %346  ;;  %v416_v14 = vmul.f32 0.05263158, %v399_v5 }
 0x1c5   :  { %v9247_v63 = vpop.xlane.xlu1 %392  ;;  %v9251_v3 = vsub.f32 %v9108_v50, %v417_v52  ;;  %v9254_v4 = vsub.f32 %v9123_v57, %v417_v52  ;;  %v402_v59 = vadd.f32 %v9184_v37, %v347_v54 }
 0x1c6   :  { %v401_v7 = vadd.f32 %v9247_v63, %v344_v26  ;;  %540 = vadd.xlane.f32.xlu0 %v539_v1 }
 0x1c7   :  { %479 = vadd.xlane.f32.xlu1 %v478_v10  ;;  %v465_v20 = vmul.f32 %v9251_v3, %v9251_v3  ;;  %v529_v46 = vmul.f32 %v9254_v4, %v9254_v4  ;;  %v419_v54 = vmul.f32 0.05263158, %v402_v59 }
 0x1c8   :  { %v418_v21 = vmul.f32 0.05263158, %v401_v7  ;;  %v353_v50 = vpop.xlane.xlu0 %352 }
 0x1c9   :  { %v404_v44 = vadd.f32 %v9188_v39, %v353_v50  ;;  %v350_v27 = vpop.xlane.xlu1 %349  ;;  %v493_v26 = vsel %vm320_vm4, %v465_v20, 0.0  ;;  %v557_v47 = vsel %vm369_vm3, %v529_v46, 0.0  ;;  %v487_v20 = vsel %vm320_vm4, %v463_v49, 0.0 }
 0x1ca   :  { %494 = vadd.xlane.f32.xlu0 %v493_v26  ;;  %v9272_v32 = vsub.f32 %v9114_v53, %v418_v21  ;;  %v9275_v33 = vsub.f32 %v9134_v62, %v418_v21  ;;  %v9286_v53 = vsub.f32 %v9118_v55, %v416_v14  ;;  %v527_v55 = vmul.f32 %v9280_v34, %v9280_v34 }
 0x1cb   :  { %543 = vadd.xlane.f32.xlu1 %v542_v30  ;;  %v421_v35 = vmul.f32 0.05263158, %v404_v44 }
 0x1cc   :  { %v359_v51 = vpop.xlane.xlu0 %358  ;;  %v466_v39 = vmul.f32 %v9272_v32, %v9272_v32  ;;  %v530_v5 = vmul.f32 %v9275_v33, %v9275_v33  ;;  %v464_v37 = vmul.f32 %v9286_v53, %v9286_v53 }
 0x1cd   :  { %v356_v48 = vpop.xlane.xlu1 %355  ;;  %v9294_v10 = vsub.f32 %v9129_v60, %v421_v35  ;;  %v403_v60 = vadd.f32 %v9186_v38, %v350_v27  ;;  %v9307_v26 = vsub.f32 %v9072_v29, %v421_v35  ;;  %v9319_v29 = vsub.f32 %v9131_v61, %v419_v54 }
 0x1ce   :  { %v405_v52 = vadd.f32 %v9190_v40, %v356_v48  ;;  %558 = vadd.xlane.f32.xlu0 %v557_v47  ;;  %v496_v1 = vsel %vm320_vm4, %v466_v39, 0.0  ;;  %v9300_v40 = vsub.f32 %v9067_v25, %v416_v14  ;;  %v560_v50 = vsel %vm369_vm3, %v530_v5, 0.0 }
 0x1cf   :  { %497 = vadd.xlane.f32.xlu1 %v496_v1  ;;  %v551_v14 = vsel %vm369_vm3, %v527_v55, 0.0  ;;  %v469_v39 = vmul.f32 %v9294_v10, %v9294_v10  ;;  %v490_v47 = vsel %vm320_vm4, %v464_v37, 0.0  ;;  %v420_v35 = vmul.f32 0.05263158, %v403_v60 }
 0x1d0   :  { %v365_v7 = vpop.xlane.xlu0 %364  ;;  %v422_v21 = vmul.f32 0.05263158, %v405_v52  ;;  %v528_v38 = vmul.f32 %v9300_v40, %v9300_v40 }
 0x1d1   :  { %v362_v43 = vpop.xlane.xlu1 %361  ;;  %v408_v49 = vadd.f32 %v9234_v31, %v365_v7  ;;  %v505_v1 = vsel %vm320_vm4, %v469_v39, 0.0  ;;  %v9332_v31 = vsub.f32 %v9062_v23, %v419_v54  ;;  %v406_v7 = vadd.f32 %v9192_v41, %v359_v51 }
 0x1d2   :  { %488 = vadd.xlane.f32.xlu0 %v487_v20  ;;  %v9313_v48 = vsub.f32 %v9138_v0, %v422_v21  ;;  %v533_v0 = vmul.f32 %v9307_v26, %v9307_v26  ;;  %v9326_v5 = vsub.f32 %v9052_v17, %v422_v21  ;;  %v554_v20 = vsel %vm369_vm3, %v528_v38, 0.0 }
 0x1d3   :  { %561 = vadd.xlane.f32.xlu1 %v560_v50  ;;  %v9336_v50 = vsub.f32 %v9142_v2, %v420_v35  ;;  %v425_v37 = vmul.f32 0.05263158, %v408_v49  ;;  %v467_v21 = vmul.f32 %v9319_v29, %v9319_v29  ;;  %v423_v41 = vmul.f32 0.05263158, %v406_v7  ;;  %v7215_v7 = vld [vmem:[%s8865_s29] ss:$0 sm:$0xff] }
 0x1d4   :  { %v703_v44 = vpop.xlane.xlu0 %702  ;;  %v470_v61 = vmul.f32 %v9313_v48, %v9313_v48  ;;  %v569_v17 = vsel %vm369_vm3, %v533_v0, 0.0  ;;  %v534_v23 = vmul.f32 %v9326_v5, %v9326_v5  ;;  %v407_v2 = vadd.f32 %v9194_v42, %v362_v43 }
 0x1d5   :  { %v707_v46 = vmul.f32 0.03125, %v703_v44  ;;  %v368_v30 = vpop.xlane.xlu1 %367  ;;  %v9347_v51 = vsub.f32 %v9150_v8, %v425_v37  ;;  %v499_v54 = vsel %vm320_vm4, %v467_v21, 0.0  ;;  %v468_v39 = vmul.f32 %v9336_v50, %v9336_v50 }
 0x1d6   :  { %552 = vadd.xlane.f32.xlu0 %v551_v14  ;;  %v409_v60 = vadd.f32 %v9247_v63, %v368_v30  ;;  %v508_v44 = vsel %vm320_vm4, %v470_v61, 0.0  ;;  %v9353_v63 = vsub.f32 %v9046_v15, %v420_v35  ;;  %v572_v14 = vsel %vm369_vm3, %v534_v23, 0.0 }
 0x1d7   :  { %v709_v27 = vadd.f32 1e-05, %v707_v46  ;;  %491 = vadd.xlane.f32.xlu1 %v490_v47  ;;  %v531_v46 = vmul.f32 %v9332_v31, %v9332_v31  ;;  %v9359_v8 = vsub.f32 %v9152_v9, %v423_v41  ;;  %v424_v43 = vmul.f32 0.05263158, %v407_v2  ;;  %v7214_v9 = vld [vmem:[%s8860_s25] ss:$0 sm:$0xff] }
 0x1d8   :  { %v426_v30 = vmul.f32 0.05263158, %v409_v60  ;;  %v473_v15 = vmul.f32 %v9347_v51, %v9347_v51  ;;  %v502_v35 = vsel %vm320_vm4, %v468_v39, 0.0  ;;  %v532_v49 = vmul.f32 %v9353_v63, %v9353_v63  ;;  %v881_v2 = vld [vmem:[%s8900_s6 + $0x8] sm:$0x7f] }
 0x1d9   :  { %8432 = vrsqrt.f32 %v709_v27  ;;  %v706_v52 = vpop.xlane.xlu1 %705  ;;  %v563_v47 = vsel %vm369_vm3, %v531_v46, 0.0  ;;  %v9376_v0 = vsub.f32 %v9161_v18, %v424_v43  ;;  %v9392_v21 = vsub.f32 %v9067_v25, %v424_v43 }
 0x1da   :  { %v708_v59 = vmul.f32 0.03125, %v706_v52  ;;  %506 = vadd.xlane.f32.xlu0 %v505_v1  ;;  %v9366_v27 = vsub.f32 %v9154_v11, %v426_v30  ;;  %v9373_v52 = vsub.f32 %v9085_v36, %v423_v41  ;;  %v471_v11 = vmul.f32 %v9359_v8, %v9359_v8  ;;  %v880_v41 = vld [vmem:[%s8900_s6] sm:$0xff] }
 0x1db   :  { %555 = vadd.xlane.f32.xlu1 %v554_v20  ;;  %v566_v61 = vsel %vm369_vm3, %v532_v49, 0.0  ;;  %v472_v60 = vmul.f32 %v9376_v0, %v9376_v0  ;;  %v890_v46 = vpack.c.bf16 %v881_v2, %v880_v41 }
 0x1dc   :  { %v710_v55 = vadd.f32 1e-05, %v708_v59  ;;  %v474_v36 = vmul.f32 %v9366_v27, %v9366_v27 }
 0x1de   :  { %8434 = vrsqrt.f32 %v710_v55  ;;  %570 = vadd.xlane.f32.xlu0 %v569_v17  ;;  %v535_v55 = vmul.f32 %v9373_v52, %v9373_v52  ;;  %v9389_v17 = vsub.f32 %v9123_v57, %v425_v37  ;;  %v8814_v57 = vmov 65535  }
 0x1df   :  { %509 = vadd.xlane.f32.xlu1 %v508_v44  ;;  %v917_v37 = vsel %vm915_vm5, 4294967295, %v8814_v57 }
 0x1e0   :  { %v537_v43 = vmul.f32 %v9389_v17, %v9389_v17 }
 0x1e2   :  { %500 = vadd.xlane.f32.xlu0 %v499_v54  ;;  %v520_v54 = vsel %vm320_vm4, %v474_v36, 0.0 }
 0x1e3   :  { %v8433_v42 = vpop.eup %8432  ;;  %573 = vadd.xlane.f32.xlu1 %v572_v14  ;;  %v9400_v14 = vsel %vm916_vm6, %v917_v37, 0 }
 0x1e4   :  { %v713_v38 = vmul.f32 %v8433_v42, %v9157_v13  ;;  %v517_v13 = vsel %vm320_vm4, %v473_v15, 0.0  ;;  %v920_v39 = vand.u32 %v9400_v14, %v890_v46  ;;  %v575_v42 = vsel %vm369_vm3, %v535_v55, 0.0 }
 0x1e5   :  { %v514_v15 = vsel %vm320_vm4, %v472_v60, 0.0 }
 0x1e6   :  { %564 = vadd.xlane.f32.xlu0 %v563_v47  ;;  %v719_v20 = vmul.f32 %v7214_v9, %v713_v38  ;;  %v9408_v47 = vsub.f32 %v9134_v62, %v426_v30  ;;  %v536_v38 = vmul.f32 %v9392_v21, %v9392_v21  ;;  %7721 = vmatprep.subr.bf16.mxu1 %v920_v39 }
 0x1e7   :  { %503 = vadd.xlane.f32.xlu1 %v502_v35  ;;  %v581_v35 = vsel %vm369_vm3, %v537_v43, 0.0 }
 0x1e8   :  { %v8435_v1 = vpop.eup %8434  ;;  %v725_v44 = vadd.f32 %v7215_v7, %v719_v20  ;;  %v578_v49 = vsel %vm369_vm3, %v536_v38, 0.0  ;;  %v538_v62 = vmul.f32 %v9408_v47, %v9408_v47 }
 0x1e9   :  { %v714_v59 = vmul.f32 %v8435_v1, %v9170_v22  ;;  %v511_v22 = vsel %vm320_vm4, %v471_v11, 0.0 }
 0x1ea   :  { %518 = vadd.xlane.f32.xlu0 %v517_v13  ;;  %v584_v30 = vsel %vm369_vm3, %v538_v62, 0.0  ;;  %v9426_v62 = vld [vmem:[%s8870_s3] ss:$0 sm:$0xff] }
 0x1eb   :  { %567 = vadd.xlane.f32.xlu1 %v566_v61  ;;  %v720_v18 = vmul.f32 %v7214_v9, %v714_v59  ;;  %v870_v9 = vld [vmem:[%s8895_s30] sm:$0xf] }
 0x1ec   :  { %v9420_v1 = vpack.c.bf16 %v870_v9, %v870_v9  ;;  %v9429_v9 = vld [vmem:[%s8870_s3 + $0x1] ss:$0 sm:$0xff]  ;;  %s11050_s3 = sld [smem:[#allocation10_spill]] }
 0x1ed   :  { %v726_v23 = vadd.f32 %v7215_v7, %v720_v18 }
 0x1ee   :  { %512 = vadd.xlane.f32.xlu0 %v511_v22 }
 0x1ef   :  { %521 = vadd.xlane.f32.xlu1 %v520_v54  ;;  %v815_v25 = vpack.c.bf16 %v726_v23, %v725_v44 }
 0x1f1   :  { %7717 = vmatprep.mubr.msk.bf16.mxu1 %vm687_vm2, %v815_v25 }
 0x1f2   :  { %576 = vadd.xlane.f32.xlu0 %v575_v42  ;;  %7718 = vmatmul.mubr.msk.bf16.vlgmr.msra.gmra.mrb[0].mxu1 %vm687_vm2, %v815_v25 }
 0x1f3   :  { %515 = vadd.xlane.f32.xlu1 %v514_v15  ;;  %7722 = vmatpush3.bf16.msra.mxu1 %v920_v39 }
 0x1f4   :  { %8379 = vmatprep.subr.msk.bf16.mxu1 %vm1043_vm7, %v9420_v1 }
 0x1f6   :  { %582 = vadd.xlane.f32.xlu0 %v581_v35 }
 0x1f7   :  { %579 = vadd.xlane.f32.xlu1 %v578_v49 }
 0x1fb   :  { %585 = vadd.xlane.f32.xlu1 %v584_v30 }
 0x247   :  { %v483_v11 = vpop.xlane.xlu0 %482 }
 0x24b   :  { %v547_v13 = vpop.xlane.xlu0 %546 }
 0x24c   :  { %v589_v59 = vadd.f32 %v547_v13, %v483_v11  ;;  %v486_v20 = vpop.xlane.xlu1 %485 }
 0x24e   :  { %v605_v61 = vmul.f32 0.05263158, %v589_v59 }
 0x24f   :  { %v477_v36 = vpop.xlane.xlu0 %476 }
 0x250   :  { %v621_v7 = vadd.f32 1e-05, %v605_v61  ;;  %v550_v18 = vpop.xlane.xlu1 %549 }
 0x251   :  { %v590_v55 = vadd.f32 %v550_v18, %v486_v20 }
 0x252   :  { %8436 = vrsqrt.f32 %v621_v7 }
 0x253   :  { %v606_v22 = vmul.f32 0.05263158, %v590_v55  ;;  %v541_v60 = vpop.xlane.xlu0 %540  ;;  %v9439_v55 = vld [vmem:[%s8875_s8] ss:$0 sm:$0xff] }
 0x254   :  { %v587_v44 = vadd.f32 %v541_v60, %v477_v36  ;;  %v480_v23 = vpop.xlane.xlu1 %479  ;;  %v9433_v36 = vld [vmem:[%s8880_s14 + $0x1] ss:$0 sm:$0xff] }
 0x255   :  { %v622_v41 = vadd.f32 1e-05, %v606_v22 }
 0x256   :  { %v603_v2 = vmul.f32 0.05263158, %v587_v44 }
 0x257   :  { %8438 = vrsqrt.f32 %v622_v41  ;;  %v495_v54 = vpop.xlane.xlu0 %494 }
 0x258   :  { %v619_v46 = vadd.f32 1e-05, %v603_v2  ;;  %v544_v57 = vpop.xlane.xlu1 %543 }
 0x259   :  { %v588_v37 = vadd.f32 %v544_v57, %v480_v23  ;;  %v9443_v23 = vld [vmem:[%s8875_s8 + $0x1] ss:$0 sm:$0xff]  ;;  %s11051_s8 = sld [smem:[#allocation11_spill]] }
 0x25a   :  { %8440 = vrsqrt.f32 %v619_v46 }
 0x25b   :  { %v604_v25 = vmul.f32 0.05263158, %v588_v37  ;;  %v559_v39 = vpop.xlane.xlu0 %558  ;;  %v9450_v37 = vld [vmem:[%s8885_s19 + $0x1] ss:$0 sm:$0xff] }
 0x25c   :  { %v8437_v42 = vpop.eup %8436  ;;  %v593_v43 = vadd.f32 %v559_v39, %v495_v54  ;;  %v498_v15 = vpop.xlane.xlu1 %497 }
 0x25d   :  { %v620_v38 = vadd.f32 1e-05, %v604_v25  ;;  %v653_v35 = vmul.f32 %v8437_v42, %v9199_v56  ;;  %v669_v11 = vmul.f32 %v8437_v42, %v9202_v58 }
 0x25e   :  { %v609_v49 = vmul.f32 0.05263158, %v593_v43 }
 0x25f   :  { %8442 = vrsqrt.f32 %v620_v38  ;;  %v489_v30 = vpop.xlane.xlu0 %488  ;;  %v734_v7 = vmul.f32 %v9426_v62, %v653_v35  ;;  %v3896_v22 = vmul.f32 %v9429_v9, %v653_v35  ;;  %v3938_v46 = vmul.f32 %v9433_v36, %v669_v11 }
 0x260   :  { %v625_v13 = vadd.f32 1e-05, %v609_v49  ;;  %v562_v59 = vpop.xlane.xlu1 %561 }
 0x261   :  { %v8439_v20 = vpop.eup %8438  ;;  %v594_v61 = vadd.f32 %v562_v59, %v498_v15  ;;  %v9454_v39 = vadd.f32 %v9439_v55, %v734_v7  ;;  %v9460_v15 = vadd.f32 %v9443_v23, %v3896_v22  ;;  %v9471_v59 = vadd.f32 %v9450_v37, %v3938_v46 }
 0x262   :  { %v654_v56 = vmul.f32 %v8439_v20, %v9214_v16  ;;  %v670_v18 = vmul.f32 %v8439_v20, %v9217_v19  ;;  %8444 = vrsqrt.f32 %v625_v13 }
 0x263   :  { %v610_v60 = vmul.f32 0.05263158, %v594_v61  ;;  %v553_v58 = vpop.xlane.xlu0 %552  ;;  %11038 = vst [vmem:[#allocation26_spill] sm:$0xff] %v9460_v15 }
 0x264   :  { %v8441_v44 = vpop.eup %8440  ;;  %v735_v41 = vmul.f32 %v9426_v62, %v654_v56  ;;  %v3897_v2 = vmul.f32 %v9429_v9, %v654_v56  ;;  %v591_v54 = vadd.f32 %v553_v58, %v489_v30  ;;  %v492_v16 = vpop.xlane.xlu1 %491  ;;  %v3939_v25 = vmul.f32 %v9433_v36, %v670_v18 }
 0x265   :  { %v626_v19 = vadd.f32 1e-05, %v610_v60  ;;  %v667_v57 = vmul.f32 %v8441_v44, %v9223_v24  ;;  %v9466_v24 = vld [vmem:[%s8880_s14] ss:$0 sm:$0xff]  ;;  %s11054_s14 = sld [smem:[#allocation12_spill]] }
 0x266   :  { %v9457_v42 = vadd.f32 %v9439_v55, %v735_v41  ;;  %v607_v43 = vmul.f32 0.05263158, %v591_v54  ;;  %v9463_v38 = vadd.f32 %v9443_v23, %v3897_v2  ;;  %v9474_v20 = vadd.f32 %v9450_v37, %v3939_v25 }
 0x267   :  { %8446 = vrsqrt.f32 %v626_v19  ;;  %v507_v35 = vpop.xlane.xlu0 %506  ;;  %v774_v56 = vmul.f32 %v9466_v24, %v667_v57  ;;  %v777_v22 = vmul.f32 %v9466_v24, %v670_v18  ;;  %v3936_v60 = vmul.f32 %v9433_v36, %v667_v57 }
 0x268   :  { %11039 = vst [vmem:[#allocation27_spill] sm:$0xff] %v9463_v38  ;;  %v623_v49 = vadd.f32 1e-05, %v607_v43  ;;  %v556_v30 = vpop.xlane.xlu1 %555  ;;  %v776_v41 = vmul.f32 %v9466_v24, %v669_v11  ;;  %v9484_v19 = vmul.f32 %v8441_v44, %v9208_v6  ;;  %v9495_v43 = vld [vmem:[%s8885_s19] ss:$0 sm:$0xff]  ;;  %s11055_s19 = sld [smem:[#allocation15_spill]] }
 0x269   :  { %v8443_v61 = vpop.eup %8442  ;;  %v592_v7 = vadd.f32 %v556_v30, %v492_v16  ;;  %v795_v6 = vadd.f32 %v9495_v43, %v774_v56  ;;  %v798_v44 = vadd.f32 %v9495_v43, %v777_v22 }
 0x26a   :  { %8448 = vrsqrt.f32 %v623_v49  ;;  %v668_v58 = vmul.f32 %v8443_v61, %v9242_v45  ;;  %v9487_v16 = vmul.f32 %v8443_v61, %v9229_v28  ;;  %v9501_v28 = vadd.f32 %v9450_v37, %v3936_v60 }
 0x26b   :  { %v608_v54 = vmul.f32 0.05263158, %v592_v7  ;;  %v571_v46 = vpop.xlane.xlu0 %570  ;;  %v3894_v56 = vmul.f32 %v9429_v9, %v9484_v19 }
 0x26c   :  { %v9491_v57 = vpop.eup %8444  ;;  %v597_v25 = vadd.f32 %v571_v46, %v507_v35  ;;  %v510_v45 = vpop.xlane.xlu1 %509  ;;  %v775_v11 = vmul.f32 %v9466_v24, %v668_v58  ;;  %v3937_v49 = vmul.f32 %v9433_v36, %v668_v58  ;;  %v797_v58 = vadd.f32 %v9495_v43, %v776_v41 }
 0x26d   :  { %v624_v30 = vadd.f32 1e-05, %v608_v54  ;;  %v673_v35 = vmul.f32 %v9491_v57, %v9254_v4  ;;  %v3895_v22 = vmul.f32 %v9429_v9, %v9487_v16 }
 0x26e   :  { %v613_v61 = vmul.f32 0.05263158, %v597_v25  ;;  %v796_v7 = vadd.f32 %v9495_v43, %v775_v11  ;;  %v9507_v46 = vadd.f32 %v9450_v37, %v3937_v49  ;;  %v883_v49 = vpack.c.bf16 %v798_v44, %v797_v58 }
 0x26f   :  { %8450 = vrsqrt.f32 %v624_v30  ;;  %v501_v18 = vpop.xlane.xlu0 %500  ;;  %v1045_v30 = vsel %vm1043_vm7, %v9420_v1, 0  ;;  %v3942_v13 = vmul.f32 %v9433_v36, %v673_v35 }
 0x270   :  { %v629_v60 = vadd.f32 1e-05, %v613_v61  ;;  %v574_v54 = vpop.xlane.xlu1 %573  ;;  %v882_v25 = vpack.c.bf16 %v796_v7, %v795_v6  ;;  %v9523_v6 = vadd.f32 %v9443_v23, %v3894_v56 }
 0x271   :  { %v8447_v4 = vpop.eup %8446  ;;  %v598_v2 = vadd.f32 %v574_v54, %v510_v45  ;;  %v9526_v45 = vadd.f32 %v9443_v23, %v3895_v22 }
 0x272   :  { %8452 = vrsqrt.f32 %v629_v60  ;;  %7723 = vmatprep.mubr.msk.bf16.mxu1 %vm369_vm3, %v882_v25  ;;  %v674_v41 = vmul.f32 %v8447_v4, %v9275_v33  ;;  %11040 = vst [vmem:[#allocation28_spill] sm:$0xff] %v9523_v6  ;;  %v9533_v25 = vadd.f32 %v9450_v37, %v3942_v13 }
 0x273   :  { %v614_v15 = vmul.f32 0.05263158, %v598_v2  ;;  %v565_v61 = vpop.xlane.xlu0 %564  ;;  %7724 = vmatmul.mubr.msk.bf16.vlgmr.msra.gmra.mrb[4].mxu1 %vm369_vm3, %v883_v49  ;;  %11041 = vst [vmem:[#allocation29_spill] sm:$0xff] %v9526_v45 }
 0x274   :  { %v8449_v44 = vpop.eup %8448  ;;  %v595_v7 = vadd.f32 %v565_v61, %v501_v18  ;;  %v504_v1 = vpop.xlane.xlu1 %503  ;;  %7740 = vmatpush3.bf16.msra.mxu1 %v1045_v30  ;;  %v3943_v58 = vmul.f32 %v9433_v36, %v674_v41  ;;  %v781_v13 = vmul.f32 %v9466_v24, %v674_v41  ;;  %v9556_v41 = vmul.f32 %v9491_v57, %v9251_v3 }
 0x275   :  { %v630_v60 = vadd.f32 1e-05, %v614_v15  ;;  %v671_v33 = vmul.f32 %v8449_v44, %v9280_v34  ;;  %v9539_v18 = vmul.f32 %v8449_v44, %v9264_v12 }
 0x276   :  { %v611_v54 = vmul.f32 0.05263158, %v595_v7  ;;  %v9536_v56 = vadd.f32 %v9450_v37, %v3943_v58 }
 0x277   :  { %8454 = vrsqrt.f32 %v630_v60  ;;  %v519_v22 = vpop.xlane.xlu0 %518  ;;  %v778_v7 = vmul.f32 %v9466_v24, %v671_v33  ;;  %v3940_v2 = vmul.f32 %v9433_v36, %v671_v33  ;;  %v3898_v34 = vmul.f32 %v9429_v9, %v9539_v18 }
 0x278   :  { %v627_v49 = vadd.f32 1e-05, %v611_v54  ;;  %v568_v30 = vpop.xlane.xlu1 %567  ;;  %v780_v54 = vmul.f32 %v9466_v24, %v673_v35  ;;  %v802_v35 = vadd.f32 %v9495_v43, %v781_v13 }
 0x279   :  { %v8451_v15 = vpop.eup %8450  ;;  %v596_v61 = vadd.f32 %v568_v30, %v504_v1 }
 0x27a   :  { %8456 = vrsqrt.f32 %v627_v49  ;;  %v672_v58 = vmul.f32 %v8451_v15, %v9300_v40  ;;  %v9548_v60 = vmul.f32 %v8451_v15, %v9286_v53  ;;  %v799_v49 = vadd.f32 %v9495_v43, %v778_v7 }
 0x27b   :  { %v612_v12 = vmul.f32 0.05263158, %v596_v61  ;;  %v513_v44 = vpop.xlane.xlu0 %512  ;;  %v9564_v15 = vadd.f32 %v9450_v37, %v3940_v2  ;;  %v9576_v7 = vmul.f32 %v8447_v4, %v9272_v32  ;;  %v9579_v2 = vadd.f32 %v9443_v23, %v3898_v34 }
 0x27c   :  { %v8453_v1 = vpop.eup %8452  ;;  %v522_v30 = vpop.xlane.xlu1 %521  ;;  %v779_v11 = vmul.f32 %v9466_v24, %v672_v58  ;;  %v3941_v40 = vmul.f32 %v9433_v36, %v672_v58  ;;  %v3899_v53 = vmul.f32 %v9429_v9, %v9548_v60  ;;  %v3900_v34 = vmul.f32 %v9429_v9, %v9556_v41 }
 0x27d   :  { %v628_v33 = vadd.f32 1e-05, %v612_v12  ;;  %v677_v38 = vmul.f32 %v8453_v1, %v9307_v26  ;;  %v801_v12 = vadd.f32 %v9495_v43, %v780_v54  ;;  %11042 = vst [vmem:[#allocation30_spill] sm:$0xff] %v9579_v2 }
 0x27e   :  { %v800_v61 = vadd.f32 %v9495_v43, %v779_v11  ;;  %v9569_v3 = vadd.f32 %v9450_v37, %v3941_v40  ;;  %v9572_v57 = vadd.f32 %v9443_v23, %v3899_v53 }
 0x27f   :  { %8458 = vrsqrt.f32 %v628_v33  ;;  %v577_v58 = vpop.xlane.xlu0 %576  ;;  %v885_v45 = vpack.c.bf16 %v802_v35, %v801_v12  ;;  %v784_v4 = vmul.f32 %v9466_v24, %v677_v38  ;;  %v3946_v54 = vmul.f32 %v9433_v36, %v677_v38 }
 0x280   :  { %v599_v13 = vadd.f32 %v577_v58, %v513_v44  ;;  %v516_v11 = vpop.xlane.xlu1 %515  ;;  %v884_v6 = vpack.c.bf16 %v800_v61, %v799_v49  ;;  %v3901_v49 = vmul.f32 %v9429_v9, %v9576_v7  ;;  %v9601_v38 = vadd.f32 %v9443_v23, %v3900_v34 }
 0x281   :  { %v8455_v40 = vpop.eup %8454 }
 0x282   :  { %v615_v33 = vmul.f32 0.05263158, %v599_v13  ;;  %7727 = vmatprep.mubr.msk.bf16.mxu1 %vm369_vm3, %v884_v6  ;;  %v678_v32 = vmul.f32 %v8455_v40, %v9326_v5  ;;  %v9596_v13 = vmul.f32 %v8453_v1, %v9294_v10 }
 0x283   :  { %v583_v44 = vpop.xlane.xlu0 %582  ;;  %7728 = vmatmul.mubr.msk.bf16.gmra.mrb[8].mxu1 %vm369_vm3, %v885_v45  ;;  %v805_v45 = vadd.f32 %v9495_v43, %v784_v4 }
 0x284   :  { %v8457_v35 = vpop.eup %8456  ;;  %v631_v61 = vadd.f32 1e-05, %v615_v33  ;;  %v601_v58 = vadd.f32 %v583_v44, %v519_v22  ;;  %v580_v12 = vpop.xlane.xlu1 %579  ;;  %v3947_v53 = vmul.f32 %v9433_v36, %v678_v32  ;;  %v9604_v33 = vmul.f32 %v8455_v40, %v9313_v48 }
 0x285   :  { %v600_v6 = vadd.f32 %v580_v12, %v516_v11  ;;  %v675_v5 = vmul.f32 %v8457_v35, %v9332_v31  ;;  %v9607_v22 = vadd.f32 %v9450_v37, %v3946_v54  ;;  %v9610_v31 = vadd.f32 %v9443_v23, %v3901_v49 }
 0x286   :  { %8460 = vrsqrt.f32 %v631_v61  ;;  %v617_v26 = vmul.f32 0.05263158, %v601_v58  ;;  %v785_v11 = vmul.f32 %v9466_v24, %v678_v32  ;;  %v9614_v44 = vmul.f32 %v8457_v35, %v9319_v29 }
 0x287   :  { %v616_v2 = vmul.f32 0.05263158, %v600_v6  ;;  %v9617_v4 = vadd.f32 %v9450_v37, %v3947_v53  ;;  %v782_v40 = vmul.f32 %v9466_v24, %v675_v5  ;;  %v3904_v54 = vmul.f32 %v9429_v9, %v9596_v13 }
 0x288   :  { %v633_v10 = vadd.f32 1e-05, %v617_v26  ;;  %v586_v1 = vpop.xlane.xlu1 %585  ;;  %v3944_v29 = vmul.f32 %v9433_v36, %v675_v5  ;;  %v806_v35 = vadd.f32 %v9495_v43, %v785_v11  ;;  %v3905_v5 = vmul.f32 %v9429_v9, %v9604_v33 }
 0x289   :  { %v8459_v34 = vpop.eup %8458  ;;  %v632_v61 = vadd.f32 1e-05, %v616_v2  ;;  %v602_v48 = vadd.f32 %v586_v1, %v522_v30  ;;  %v803_v12 = vadd.f32 %v9495_v43, %v782_v40 }
 0x28a   :  { %8462 = vrsqrt.f32 %v633_v10  ;;  %v676_v26 = vmul.f32 %v8459_v34, %v9353_v63  ;;  %v9624_v49 = vmul.f32 %v8459_v34, %v9336_v50  ;;  %v3902_v50 = vmul.f32 %v9429_v9, %v9614_v44 }
 0x28b   :  { %8464 = vrsqrt.f32 %v632_v61  ;;  %v618_v32 = vmul.f32 0.05263158, %v602_v48  ;;  %v9643_v1 = vadd.f32 %v9450_v37, %v3944_v29  ;;  %v9649_v34 = vadd.f32 %v9443_v23, %v3904_v54 }
 0x28c   :  { %v783_v2 = vmul.f32 %v9466_v24, %v676_v26  ;;  %v3945_v58 = vmul.f32 %v9433_v36, %v676_v26  ;;  %v3903_v6 = vmul.f32 %v9429_v9, %v9624_v49  ;;  %v9652_v61 = vadd.f32 %v9443_v23, %v3902_v50 }
 0x28d   :  { %v634_v63 = vadd.f32 1e-05, %v618_v32  ;;  %v9658_v40 = vadd.f32 %v9443_v23, %v3905_v5  ;;  %v887_v29 = vpack.c.bf16 %v806_v35, %v805_v45 }
 0x28e   :  { %v804_v10 = vadd.f32 %v9495_v43, %v783_v2  ;;  %v9646_v11 = vadd.f32 %v9450_v37, %v3945_v58  ;;  %v9655_v48 = vadd.f32 %v9443_v23, %v3903_v6 }
 0x28f   :  { %8466 = vrsqrt.f32 %v634_v63 }
 0x290   :  { %v8461_v26 = vpop.eup %8460  ;;  %v886_v32 = vpack.c.bf16 %v804_v10, %v803_v12 }
 0x291   :  { %v679_v58 = vmul.f32 %v8461_v26, %v9373_v52  ;;  %v9664_v54 = vmul.f32 %v8461_v26, %v9359_v8 }
 0x292   :  { %7731 = vmatprep.mubr.msk.bf16.mxu1 %vm369_vm3, %v886_v32 }
 0x293   :  { %7732 = vmatmul.mubr.msk.bf16.gmra.mrb[12].mxu1 %vm369_vm3, %v887_v29  ;;  %v786_v35 = vmul.f32 %v9466_v24, %v679_v58  ;;  %v3948_v6 = vmul.f32 %v9433_v36, %v679_v58  ;;  %v3906_v8 = vmul.f32 %v9429_v9, %v9664_v54  ;;  %v733_v29 = vmul.f32 %v9426_v62, %v9487_v16 }
 0x294   :  { %v8463_v12 = vpop.eup %8462 }
 0x295   :  { %v8465_v45 = vpop.eup %8464  ;;  %v681_v5 = vmul.f32 %v8463_v12, %v9389_v17  ;;  %v9680_v26 = vmul.f32 %v8463_v12, %v9347_v51  ;;  %v807_v30 = vadd.f32 %v9495_v43, %v786_v35  ;;  %v732_v17 = vmul.f32 %v9426_v62, %v9484_v19 }
 0x296   :  { %v680_v52 = vmul.f32 %v8465_v45, %v9392_v21  ;;  %v664_v10 = vmul.f32 %v8465_v45, %v9376_v0  ;;  %v9691_v0 = vadd.f32 %v9450_v37, %v3948_v6  ;;  %v9694_v51 = vadd.f32 %v9443_v23, %v3906_v8 }
 0x297   :  { %v788_v12 = vmul.f32 %v9466_v24, %v681_v5  ;;  %v3950_v35 = vmul.f32 %v9433_v36, %v681_v5  ;;  %v3908_v6 = vmul.f32 %v9429_v9, %v9680_v26 }
 0x298   :  { %v787_v32 = vmul.f32 %v9466_v24, %v680_v52  ;;  %v3949_v63 = vmul.f32 %v9433_v36, %v680_v52  ;;  %v3907_v58 = vmul.f32 %v9429_v9, %v664_v10 }
 0x299   :  { %v8467_v50 = vpop.eup %8466  ;;  %v809_v5 = vadd.f32 %v9495_v43, %v788_v12  ;;  %v737_v12 = vmul.f32 %v9426_v62, %v9548_v60  ;;  %v739_v60 = vmul.f32 %v9426_v62, %v9576_v7 }
 0x29a   :  { %v808_v21 = vadd.f32 %v9495_v43, %v787_v32  ;;  %v682_v16 = vmul.f32 %v8467_v50, %v9408_v47  ;;  %v666_v45 = vmul.f32 %v8467_v50, %v9366_v27  ;;  %v9701_v52 = vadd.f32 %v9450_v37, %v3949_v63 }
 0x29b   :  { %v9705_v19 = vadd.f32 %v9443_v23, %v3907_v58  ;;  %v754_v47 = vadd.f32 %v9439_v55, %v733_v29  ;;  %v9722_v29 = vadd.f32 %v9450_v37, %v3950_v35 }
 0x29c   :  { %v888_v8 = vpack.c.bf16 %v808_v21, %v807_v30  ;;  %v789_v32 = vmul.f32 %v9466_v24, %v682_v16  ;;  %v3951_v27 = vmul.f32 %v9433_v36, %v682_v16  ;;  %v3909_v63 = vmul.f32 %v9429_v9, %v666_v45 }
 0x29d   :  { %v753_v24 = vadd.f32 %v9439_v55, %v732_v17  ;;  %v9728_v36 = vadd.f32 %v9443_v23, %v3908_v6 }
 0x29e   :  { %7735 = vmatprep.mubr.msk.bf16.mxu1 %vm369_vm3, %v888_v8  ;;  %v810_v30 = vadd.f32 %v9495_v43, %v789_v32  ;;  %v9725_v58 = vadd.f32 %v9450_v37, %v3951_v27  ;;  %v9731_v21 = vadd.f32 %v9443_v23, %v3909_v63  ;;  %v736_v37 = vmul.f32 %v9426_v62, %v9539_v18 }
 0x29f   :  { %11043 = vst [vmem:[#allocation31_spill] sm:$0xff] %v9728_v36  ;;  %v871_v16 = vpack.c.bf16 %v754_v47, %v753_v24  ;;  %v758_v23 = vadd.f32 %v9439_v55, %v737_v12  ;;  %v741_v8 = vmul.f32 %v9426_v62, %v9624_v49  ;;  %v11045_v32 = vpack.c.bf16 %v9457_v42, %v9454_v39 }
 0x2a0   :  { %11044 = vst [vmem:[#allocation32_spill] sm:$0xff] %v9731_v21  ;;  %v889_v9 = vpack.c.bf16 %v810_v30, %v809_v5  ;;  %v757_v35 = vadd.f32 %v9439_v55, %v736_v37  ;;  %v738_v47 = vmul.f32 %v9426_v62, %v9556_v41  ;;  %v740_v18 = vmul.f32 %v9426_v62, %v9614_v44 }
 0x2a1   :  { %v760_v27 = vadd.f32 %v9439_v55, %v739_v60  ;;  %v762_v7 = vadd.f32 %v9439_v55, %v741_v8  ;;  %v743_v39 = vmul.f32 %v9426_v62, %v9604_v33  ;;  %v745_v41 = vmul.f32 %v9426_v62, %v664_v10 }
 0x2a2   :  { %7736 = vmatmul.mubr.msk.bf16.gmra.mrb[16].mxu1 %vm369_vm3, %v889_v9  ;;  %v873_v6 = vpack.c.bf16 %v758_v23, %v757_v35  ;;  %v759_v63 = vadd.f32 %v9439_v55, %v738_v47  ;;  %v761_v49 = vadd.f32 %v9439_v55, %v740_v18  ;;  %v742_v44 = vmul.f32 %v9426_v62, %v9596_v13 }
 0x2a3   :  { %7741 = vmatprep.mubr.msk.bf16.mxu1 %vm320_vm4, %v871_v16  ;;  %v744_v30 = vmul.f32 %v9426_v62, %v9664_v54  ;;  %v764_v24 = vadd.f32 %v9439_v55, %v743_v39  ;;  %v766_v9 = vadd.f32 %v9439_v55, %v745_v41  ;;  %v747_v10 = vmul.f32 %v9426_v62, %v666_v45 }
 0x2a4   :  { %v874_v5 = vpack.c.bf16 %v760_v27, %v759_v63  ;;  %v875_v42 = vpack.c.bf16 %v762_v7, %v761_v49  ;;  %v763_v16 = vadd.f32 %v9439_v55, %v742_v44  ;;  %v746_v13 = vmul.f32 %v9426_v62, %v9680_v26 }
 0x2a5   :  { %v765_v33 = vadd.f32 %v9439_v55, %v744_v30  ;;  %v768_v54 = vadd.f32 %v9439_v55, %v747_v10  ;;  %v11001_v18 = vmov 0.0  }
 0x2a6   :  { %v876_v12 = vpack.c.bf16 %v764_v24, %v763_v16  ;;  %v767_v23 = vadd.f32 %v9439_v55, %v746_v13  ;;  %7757 = vmatprep.subr.bf16.mxu0 %v11001_v18  ;;  %7787 = vmatprep.subr.bf16.mxu1 %v11001_v18 }
 0x2a7   :  { %v877_v37 = vpack.c.bf16 %v766_v9, %v765_v33  ;;  %7765 = vmatprep.mubr.msk.bf16.mxu0 %vm8816_vm8, %v11001_v18 }
 0x2a8   :  { %v878_v35 = vpack.c.bf16 %v768_v54, %v767_v23 }
 0x2aa   :  { %7742 = vmatmul.mubr.msk.bf16.vlgmr.msra.gmra.mrb[4].mxu1 %vm320_vm4, %v11045_v32 }
 0x2ab   :  { %7745 = vmatprep.mubr.msk.bf16.mxu1 %vm320_vm4, %v873_v6 }
 0x2b2   :  { %7746 = vmatmul.mubr.msk.bf16.gmra.mrb[8].mxu1 %vm320_vm4, %v874_v5 }
 0x2b3   :  { %7749 = vmatprep.mubr.msk.bf16.mxu1 %vm320_vm4, %v875_v42 }
 0x2ba   :  { %7750 = vmatmul.mubr.msk.bf16.gmra.mrb[12].mxu1 %vm320_vm4, %v876_v12 }
 0x2bb   :  { %7753 = vmatprep.mubr.msk.bf16.mxu1 %vm320_vm4, %v877_v37 }
 0x2c2   :  { %7754 = vmatmul.mubr.msk.bf16.gmra.mrb[16].mxu1 %vm320_vm4, %v878_v35 }
 0x2c3   :  { %7795 = vmatprep.mubr.msk.bf16.mxu1 %vm8816_vm8, %v11001_v18 }
 0x2c5   :  { %v9783_v60 = vpop.f32.mrb[0].mxu1 }
 0x2c6   :  { %v855_v6 = vpop.f32.mrb[1].mxu1 }
 0x2c7   :  { %v7720_v8 = vpop.f32.mrb[2].mxu1 }
 0x2c8   :  { %v1340_v45 = vpack.c.bf16 %v7720_v8, %v9783_v60  ;;  %v858_v32 = vpop.f32.mrb[3].mxu1 }
 0x2c9   :  { %v1146_v47 = vpack.c.bf16 %v858_v32, %v855_v6 }
 0x37d   :  { %v7743_v62 = vpop.f32.mrb[4].mxu1 }
 0x37e   :  { %v1081_v55 = vpop.f32.mrb[5].mxu1 }
 0x37f   :  { %v7744_v26 = vpop.f32.mrb[6].mxu1 }
 0x380   :  { %v9792_v27 = vpack.c.bf16 %v7744_v26, %v7743_v62  ;;  %v1084_v7 = vpop.f32.mrb[7].mxu1 }
 0x381   :  { %v9794_v63 = vpack.c.bf16 %v1084_v7, %v1081_v55 }
 0x382   :  { %v1159_v24 = vsel %vm1151_vm9, %v9792_v27, 0 }
 0x383   :  { %v1156_v49 = vsel %vm1151_vm9, %v9794_v63, 0 }
 0x384   :  { %7758 = vmatpush3.bf16.xpose.msra.mxu0 %v1156_v49 }
 0x385   :  { %v7747_v5 = vpop.f32.mrb[8].mxu1  ;;  %7759 = vmatprep.subr.bf16.mxu0 %v11001_v18 }
 0x386   :  { %v1097_v39 = vpop.f32.mrb[9].mxu1 }
 0x387   :  { %v7748_v42 = vpop.f32.mrb[10].mxu1 }
 0x388   :  { %v9799_v41 = vpack.c.bf16 %v7748_v42, %v7747_v5  ;;  %v1100_v44 = vpop.f32.mrb[11].mxu1 }
 0x389   :  { %v1149_v30 = vpack.c.bf16 %v1100_v44, %v1097_v39 }
 0x38a   :  { %v1165_v62 = vsel %vm1151_vm9, %v9799_v41, 0 }
 0x38b   :  { %v1162_v13 = vsel %vm1151_vm9, %v1149_v30, 0 }
 0x38c   :  { %7760 = vmatpush3.bf16.xpose.msra.mxu0 %v1159_v24 }
 0x38d   :  { %v7751_v9 = vpop.f32.mrb[12].mxu1  ;;  %7761 = vmatprep.subr.bf16.mxu0 %v11001_v18 }
 0x38e   :  { %v1113_v16 = vpop.f32.mrb[13].mxu1 }
 0x38f   :  { %v7752_v33 = vpop.f32.mrb[14].mxu1 }
 0x390   :  { %v9804_v12 = vpack.c.bf16 %v7752_v33, %v7751_v9  ;;  %v1116_v10 = vpop.f32.mrb[15].mxu1 }
 0x391   :  { %v9806_v37 = vpack.c.bf16 %v1116_v10, %v1113_v16 }
 0x392   :  { %v1352_v55 = vsel %vm1151_vm9, %v9804_v12, 0 }
 0x393   :  { %v1349_v54 = vsel %vm1151_vm9, %v9806_v37, 0 }
 0x394   :  { %7762 = vmatpush3.bf16.xpose.msra.mxu0 %v1162_v13  ;;  %7788 = vmatpush3.bf16.xpose.msra.mxu1 %v1349_v54 }
 0x395   :  { %v7755_v23 = vpop.f32.mrb[16].mxu1  ;;  %7763 = vmatprep.subr.bf16.mxu0 %v11001_v18  ;;  %7789 = vmatprep.subr.bf16.mxu1 %v11001_v18 }
 0x396   :  { %v1129_v35 = vpop.f32.mrb[17].mxu1 }
 0x397   :  { %v7756_v60 = vpop.f32.mrb[18].mxu1 }
 0x398   :  { %v1344_v6 = vpack.c.bf16 %v7756_v60, %v7755_v23  ;;  %v1132_v8 = vpop.f32.mrb[19].mxu1 }
 0x399   :  { %v1343_v32 = vpack.c.bf16 %v1132_v8, %v1129_v35 }
 0x39a   :  { %v1358_v7 = vsel %vm1151_vm9, %v1344_v6, 0 }
 0x39b   :  { %v1355_v26 = vsel %vm1151_vm9, %v1343_v32, 0 }
 0x39c   :  { %7764 = vmatpush3.bf16.xpose.msra.mxu0 %v1165_v62  ;;  %7790 = vmatpush3.bf16.xpose.msra.mxu1 %v1352_v55 }
 0x39d   :  { %7791 = vmatprep.subr.bf16.mxu1 %v11001_v18  ;;  %7769 = vmatprep.subr.bf16.mxu0 %v11001_v18 }
 0x3a3   :  { %7766 = vmatmul.mubr.msk.bf16.vlgmr.msra.gmra.mrb[16].mxu0 %vm1151_vm9, %v1146_v47 }
 0x3a4   :  { %7792 = vmatpush3.bf16.xpose.msra.mxu1 %v1355_v26  ;;  %7777 = vmatprep.mubr.msk.bf16.mxu0 %vm8816_vm8, %v11001_v18 }
 0x3a5   :  { %7793 = vmatprep.subr.bf16.mxu1 %v11001_v18 }
 0x3ac   :  { %7794 = vmatpush3.bf16.xpose.msra.mxu1 %v1358_v7 }
 0x3b3   :  { %7796 = vmatmul.mubr.msk.bf16.vlgmr.msra.gmra.mrb[20].mxu1 %vm1151_vm9, %v1340_v45 }
 0x476   :  { %v1201_v49 = vpop.f32.mrb[16].mxu0 }
 0x477   :  { %v1208_v5 = vmul.f32 0.25, %v1201_v49  ;;  %v7767_v39 = vpop.f32.mrb[17].mxu0 }
 0x478   :  { %v1204_v42 = vpop.f32.mrb[18].mxu0 }
 0x479   :  { %v1209_v44 = vmul.f32 0.25, %v1204_v42  ;;  %v7768_v24 = vpop.f32.mrb[19].mxu0  ;;  %v1211_v47 = vsel %vm1210_vm10, %v1208_v5, -inf }
 0x47a   :  { %1212 = vmax.xlane.f32.xlu0 %v1211_v47 }
 0x47b   :  { %v1214_v9 = vsel %vm1210_vm10, %v1209_v44, -inf }
 0x47c   :  { %1215 = vmax.xlane.f32.xlu1 %v1214_v9 }
 0x486   :  { %v1394_v16 = vpop.f32.mrb[20].mxu1 }
 0x487   :  { %v7797_v33 = vpop.f32.mrb[21].mxu1 }
 0x488   :  { %v1397_v10 = vpop.f32.mrb[22].mxu1 }
 0x489   :  { %v7798_v13 = vpop.f32.mrb[23].mxu1 }
 0x48d   :  { %1240 = vrot.lane.b32.xlu1 %v9792_v27, %s8817_s0  ;;  %v1401_v27 = vmul.f32 0.25, %v1394_v16 }
 0x48f   :  { %v1403_v49 = vsel %vm1210_vm10, %v1401_v27, -inf }
 0x491   :  { %1242 = vrot.lane.b32.xlu1 %v1149_v30, %s8817_s0  ;;  %v1402_v30 = vmul.f32 0.25, %v1397_v10 }
 0x507   :  { %v1213_v45 = vpop.xlane.xlu0 %1212 }
 0x508   :  { %v1217_v54 = vsub.f32 %v1208_v5, %v1213_v45  ;;  %v1406_v5 = vsel %vm1210_vm10, %v1402_v30, -inf }
 0x509   :  { %v1216_v23 = vpop.xlane.xlu1 %1215 }
 0x50a   :  { %v1219_v35 = vmul.f32 1.442695, %v1217_v54  ;;  %v1218_v60 = vsub.f32 %v1209_v44, %v1216_v23 }
 0x50c   :  { %8468 = vpow2.f32 %v1219_v35  ;;  %v1221_v8 = vmul.f32 1.442695, %v1218_v60 }
 0x50d   :  { %v1241_v39 = vpop.permute.xlu1 %1240 }
 0x50e   :  { %8470 = vpow2.f32 %v1221_v8 }
 0x516   :  { %v8469_v62 = vpop.eup %8468 }
 0x517   :  { %v1223_v55 = vsel %vm1210_vm10, %v8469_v62, 0.0 }
 0x518   :  { %v8471_v26 = vpop.eup %8470  ;;  %1224 = vadd.xlane.f32.xlu0 %v1223_v55  ;;  %v1145_v55 = vld [vmem:[%s8905_s12 + $0x8] sm:$0xff] }
 0x519   :  { %v1226_v7 = vsel %vm1210_vm10, %v8471_v26, 0.0 }
 0x51a   :  { %1227 = vadd.xlane.f32.xlu1 %v1226_v7 }
 0x52b   :  { %1244 = vrot.lane.b32.xlu1 %v9799_v41, %s8817_s0  ;;  %v1243_v41 = vpop.permute.xlu1 %1242 }
 0x52e   :  { %1238 = vrot.lane.b32.xlu0 %v9794_v63, %s8817_s0 }
 0x54d   :  { %1404 = vmax.xlane.f32.xlu0 %v1403_v49 }
 0x54f   :  { %1407 = vmax.xlane.f32.xlu1 %v1406_v5 }
 0x560   :  { %1432 = vrot.lane.b32.xlu1 %v9804_v12, %s8817_s0 }
 0x564   :  { %1434 = vrot.lane.b32.xlu1 %v1343_v32, %s8817_s0 }
 0x568   :  { %1436 = vrot.lane.b32.xlu1 %v1344_v6, %s8817_s0 }
 0x5a5   :  { %v1225_v42 = vpop.xlane.xlu0 %1224 }
 0x5a6   :  { %8472 = vrcp.f32 %v1225_v42 }
 0x5a7   :  { %v1228_v63 = vpop.xlane.xlu1 %1227 }
 0x5a8   :  { %8474 = vrcp.f32 %v1228_v63 }
 0x5a9   :  { %v1239_v44 = vpop.permute.xlu0 %1238 }
 0x5aa   :  { %7770 = vmatpush3.bf16.msra.mxu0 %v1239_v44 }
 0x5ab   :  { %7771 = vmatprep.subr.bf16.mxu0 %v11001_v18  ;;  %v1245_v32 = vpop.permute.xlu1 %1244 }
 0x5ae   :  { %7772 = vmatpush3.bf16.msra.mxu0 %v1241_v39 }
 0x5af   :  { %7773 = vmatprep.subr.bf16.mxu0 %v11001_v18 }
 0x5b0   :  { %v8473_v24 = vpop.eup %8472 }
 0x5b1   :  { %v1231_v6 = vmul.f32 %v8473_v24, %v8469_v62  ;;  %v1144_v62 = vld [vmem:[%s8905_s12] sm:$0xff] }
 0x5b2   :  { %v8475_v47 = vpop.eup %8474  ;;  %7774 = vmatpush3.bf16.msra.mxu0 %v1243_v41 }
 0x5b3   :  { %v1232_v12 = vmul.f32 %v8475_v47, %v8471_v26  ;;  %7775 = vmatprep.subr.bf16.mxu0 %v11001_v18  ;;  %v1295_v26 = vpack.c.bf16 %v1145_v55, %v1144_v62 }
 0x5b5   :  { %v1233_v9 = vpack.c.bf16 %v1232_v12, %v1231_v6 }
 0x5b6   :  { %7776 = vmatpush3.bf16.msra.mxu0 %v1245_v32 }
 0x5b7   :  { %7781 = vmatprep.subr.bf16.mxu0 %v11001_v18 }
 0x5b9   :  { %7778 = vmatmul.mubr.msk.bf16.vlgmr.msra.gmra.mrb[20].mxu0 %vm1210_vm10, %v1233_v9 }
 0x5ba   :  { %7783 = vmatprep.mubr.msk.bf16.mxu0 %vm8816_vm8, %v11001_v18  ;;  %7782 = vmatpush3.bf16.msra.mxu0 %v1295_v26 }
 0x5bb   :  { %7799 = vmatprep.subr.bf16.mxu0 %v11001_v18 }
 0x5da   :  { %v1405_v16 = vpop.xlane.xlu0 %1404 }
 0x5db   :  { %v1409_v33 = vsub.f32 %v1401_v27, %v1405_v16  ;;  %v7244_v16 = vld [vmem:[%s11046_s5] ss:$0 sm:$0xff] }
 0x5dc   :  { %v1408_v10 = vpop.xlane.xlu1 %1407 }
 0x5dd   :  { %v1411_v13 = vmul.f32 1.442695, %v1409_v33  ;;  %v1410_v45 = vsub.f32 %v1402_v30, %v1408_v10  ;;  %v8750_v33 = vld [vmem:[%s8850_s17] sm:$0xff] }
 0x5df   :  { %8476 = vpow2.f32 %v1411_v13  ;;  %v1413_v54 = vmul.f32 1.442695, %v1410_v45 }
 0x5e0   :  { %v1433_v42 = vpop.permute.xlu1 %1432 }
 0x5e1   :  { %8478 = vpow2.f32 %v1413_v54 }
 0x5e9   :  { %v8477_v23 = vpop.eup %8476 }
 0x5ea   :  { %v1415_v35 = vsel %vm1210_vm10, %v8477_v23, 0.0 }
 0x5eb   :  { %v8479_v60 = vpop.eup %8478  ;;  %1416 = vadd.xlane.f32.xlu0 %v1415_v35  ;;  %v8751_v35 = vld [vmem:[%s8850_s17 + $0x8] sm:$0xff]  ;;  %s11049_s17 = sld [smem:[#allocation8_spill]] }
 0x5ec   :  { %v1418_v8 = vsel %vm1210_vm10, %v8479_v60, 0.0 }
 0x5ef   :  { %1419 = vadd.xlane.f32.xlu0 %v1418_v8 }
 0x605   :  { %1430 = vrot.lane.b32.xlu0 %v9806_v37, %s8817_s0  ;;  %v1435_v37 = vpop.permute.xlu1 %1434 }
 0x609   :  { %v1437_v12 = vpop.permute.xlu1 %1436 }
 0x678   :  { %v1417_v7 = vpop.xlane.xlu0 %1416 }
 0x67c   :  { %v1420_v27 = vpop.xlane.xlu0 %1419 }
 0x67d   :  { %8480 = vrcp.f32 %v1420_v27 }
 0x67e   :  { %8482 = vrcp.f32 %v1417_v7 }
 0x680   :  { %v1431_v63 = vpop.permute.xlu0 %1430 }
 0x687   :  { %v8481_v44 = vpop.eup %8480 }
 0x688   :  { %v8483_v24 = vpop.eup %8482  ;;  %v1424_v47 = vmul.f32 %v8481_v44, %v8479_v60 }
 0x689   :  { %v1423_v6 = vmul.f32 %v8483_v24, %v8477_v23 }
 0x68b   :  { %v1425_v32 = vpack.c.bf16 %v1424_v47, %v1423_v6 }
 0x68c   :  { %v1287_v30 = vpop.f32.mrb[20].mxu0 }
 0x68d   :  { %v7779_v49 = vpop.f32.mrb[21].mxu0 }
 0x68e   :  { %v1290_v5 = vpop.f32.mrb[22].mxu0 }
 0x68f   :  { %v1294_v39 = vpack.c.bf16 %v1290_v5, %v1287_v30  ;;  %v7780_v41 = vpop.f32.mrb[23].mxu0 }
 0x691   :  { %7784 = vmatmul.mubr.msk.bf16.vlgmr.msra.gmra.mrb[24].mxu0 %vm1151_vm9, %v1294_v39 }
 0x692   :  { %7800 = vmatpush3.bf16.msra.mxu0 %v1431_v63  ;;  %7807 = vmatprep.mubr.msk.bf16.mxu0 %vm8816_vm8, %v11001_v18 }
 0x693   :  { %7801 = vmatprep.subr.bf16.mxu0 %v11001_v18 }
 0x696   :  { %7802 = vmatpush3.bf16.msra.mxu0 %v1433_v42 }
 0x697   :  { %7803 = vmatprep.subr.bf16.mxu0 %v11001_v18 }
 0x69a   :  { %7804 = vmatpush3.bf16.msra.mxu0 %v1435_v37 }
 0x69b   :  { %7805 = vmatprep.subr.bf16.mxu0 %v11001_v18 }
 0x69e   :  { %7806 = vmatpush3.bf16.msra.mxu0 %v1437_v12 }
 0x69f   :  { %7811 = vmatprep.subr.bf16.mxu0 %v11001_v18 }
 0x6a1   :  { %7808 = vmatmul.mubr.msk.bf16.vlgmr.msra.gmra.mrb[28].mxu0 %vm1210_vm10, %v1425_v32 }
 0x6a2   :  { %7812 = vmatpush3.bf16.msra.mxu0 %v1295_v26  ;;  %7813 = vmatprep.mubr.msk.bf16.mxu0 %vm8816_vm8, %v11001_v18 }
 0x764   :  { %v1333_v9 = vpop.f32.mrb[24].mxu0 }
 0x765   :  { %v1531_v10 = vadd.f32 %v8750_v33, %v1333_v9  ;;  %v7785_v13 = vpop.f32.mrb[25].mxu0 }
 0x766   :  { %v1336_v45 = vpop.f32.mrb[26].mxu0 }
 0x767   :  { %v9869_v54 = vadd.f32 %v7244_v16, %v1531_v10  ;;  %v1532_v23 = vadd.f32 %v8751_v35, %v1336_v45  ;;  %v7786_v60 = vpop.f32.mrb[27].mxu0 }
 0x769   :  { %v9872_v8 = vadd.f32 %v7244_v16, %v1532_v23  ;;  %v1572_v62 = vsel %vm687_vm2, %v9869_v54, 0.0 }
 0x76a   :  { %1573 = vadd.xlane.f32.xlu0 %v1572_v62  ;;  %v1547_v62 = vld [vmem:[%s11047_s9 + $0x8] sm:$0xff] }
 0x76b   :  { %v1575_v55 = vsel %vm687_vm2, %v9872_v8, 0.0 }
 0x76c   :  { %1576 = vadd.xlane.f32.xlu1 %v1575_v55  ;;  %v1549_v55 = vld [vmem:[%s11047_s9 + $0x18] sm:$0xff] }
 0x774   :  { %v1479_v26 = vpop.f32.mrb[28].mxu0 }
 0x775   :  { %v7809_v7 = vpop.f32.mrb[29].mxu0 }
 0x776   :  { %v1482_v27 = vpop.f32.mrb[30].mxu0  ;;  %v1548_v7 = vld [vmem:[%s11047_s9 + $0x10] sm:$0xff] }
 0x777   :  { %v1486_v30 = vpack.c.bf16 %v1482_v27, %v1479_v26  ;;  %v7810_v49 = vpop.f32.mrb[31].mxu0  ;;  %v1643_v26 = vpack.c.bf16 %v1549_v55, %v1547_v62 }
 0x778   :  { %v1553_v49 = vld [vmem:[%s11047_s9 + $0x38] sm:$0xff] }
 0x779   :  { %7814 = vmatmul.mubr.msk.bf16.vlgmr.msra.gmra.mrb[32].mxu0 %vm1151_vm9, %v1486_v30  ;;  %1663 = vmatprep.subr.bf16.mxu1 %v1643_v26  ;;  %v1551_v30 = vld [vmem:[%s11047_s9 + $0x28] sm:$0xff] }
 0x7f7   :  { %v1574_v37 = vpop.xlane.xlu0 %1573 }
 0x7f8   :  { %v1584_v24 = vmul.f32 0.03125, %v1574_v37 }
 0x7f9   :  { %v1577_v5 = vpop.xlane.xlu1 %1576 }
 0x7fa   :  { %v1585_v39 = vmul.f32 0.03125, %v1577_v5  ;;  %v1588_v13 = vsub.f32 %v9869_v54, %v1584_v24  ;;  %v1550_v5 = vld [vmem:[%s11047_s9 + $0x20] sm:$0xff] }
 0x7fc   :  { %v1589_v41 = vsub.f32 %v9872_v8, %v1585_v39  ;;  %v1592_v60 = vmul.f32 %v1588_v13, %v1588_v13  ;;  %v1645_v39 = vpack.c.bf16 %v1553_v49, %v1551_v30  ;;  %v7245_v49 = vld [vmem:[%s11048_s13] ss:$0 sm:$0xff] }
 0x7fe   :  { %v1593_v42 = vmul.f32 %v1589_v41, %v1589_v41 }
 0x800   :  { %v1599_v63 = vsel %vm687_vm2, %v1593_v42, 0.0  ;;  %v1552_v42 = vld [vmem:[%s11047_s9 + $0x30] sm:$0xff] }
 0x801   :  { %1600 = vadd.xlane.f32.xlu1 %v1599_v63  ;;  %v10999_v63 = vmov 0   ;;  %v1644_v37 = vpack.c.bf16 %v1552_v42, %v1550_v5 }
 0x802   :  { %1695 = vmatprep.mubr.bf16.mxu1 %v10999_v63 }
 0x84c   :  { %v1524_v44 = vpop.f32.mrb[32].mxu0 }
 0x84d   :  { %v1533_v47 = vadd.f32 %v8750_v33, %v1524_v44  ;;  %v7815_v12 = vpop.f32.mrb[33].mxu0 }
 0x84e   :  { %v1527_v6 = vpop.f32.mrb[34].mxu0 }
 0x84f   :  { %v9881_v32 = vadd.f32 %v7244_v16, %v1533_v47  ;;  %v1534_v9 = vadd.f32 %v8751_v35, %v1527_v6  ;;  %v7816_v10 = vpop.f32.mrb[35].mxu0  ;;  %v1596_v35 = vsel %vm687_vm2, %v1592_v60, 0.0 }
 0x851   :  { %v9884_v45 = vadd.f32 %v7244_v16, %v1534_v9  ;;  %v1578_v23 = vsel %vm687_vm2, %v9881_v32, 0.0  ;;  %v1546_v16 = vld [vmem:[%s11047_s9] sm:$0xff] }
 0x852   :  { %1579 = vadd.xlane.f32.xlu0 %v1578_v23  ;;  %v1642_v27 = vpack.c.bf16 %v1548_v7, %v1546_v16 }
 0x853   :  { %v1581_v33 = vsel %vm687_vm2, %v9884_v45, 0.0 }
 0x854   :  { %1664 = vmatpush1.bf16.msra.mxu1 %v1642_v27 }
 0x855   :  { %1665 = vmatprep.subr.bf16.mxu1 %v1645_v39 }
 0x856   :  { %1582 = vadd.xlane.f32.xlu0 %v1581_v33 }
 0x858   :  { %1666 = vmatpush1.bf16.msra.mxu1 %v1644_v37  ;;  %v7246_v37 = vld [vmem:[%s11049_s17] ss:$0 sm:$0xff] }
 0x85a   :  { %1597 = vadd.xlane.f32.xlu0 %v1596_v35 }
 0x88e   :  { %v1601_v44 = vpop.xlane.xlu1 %1600 }
 0x88f   :  { %v1609_v24 = vmul.f32 0.03125, %v1601_v44 }
 0x891   :  { %v1613_v6 = vadd.f32 1e-05, %v1609_v24 }
 0x893   :  { %8484 = vrsqrt.f32 %v1613_v6 }
 0x89d   :  { %v8485_v27 = vpop.eup %8484 }
 0x89e   :  { %v1621_v30 = vmul.f32 %v8485_v27, %v1589_v41 }
 0x8a0   :  { %v1629_v39 = vmul.f32 %v7245_v49, %v1621_v30 }
 0x8df   :  { %v1580_v47 = vpop.xlane.xlu0 %1579 }
 0x8e0   :  { %v1586_v12 = vmul.f32 0.03125, %v1580_v47  ;;  %v1637_v47 = vadd.f32 %v7246_v37, %v1629_v39  ;;  %v1647_v39 = vlaneseq }
 0x8e2   :  { %v1590_v9 = vsub.f32 %v9881_v32, %v1586_v12 }
 0x8e3   :  { %v1583_v10 = vpop.xlane.xlu0 %1582 }
 0x8e4   :  { %v1587_v23 = vmul.f32 0.03125, %v1583_v10  ;;  %v1594_v33 = vmul.f32 %v1590_v9, %v1590_v9 }
 0x8e6   :  { %v1591_v60 = vsub.f32 %v9884_v45, %v1587_v23  ;;  %v1602_v35 = vsel %vm687_vm2, %v1594_v33, 0.0 }
 0x8e7   :  { %1603 = vadd.xlane.f32.xlu0 %v1602_v35  ;;  %v1598_v62 = vpop.xlane.xlu0 %1597 }
 0x8e8   :  { %v1608_v55 = vmul.f32 0.03125, %v1598_v62  ;;  %v1595_v26 = vmul.f32 %v1591_v60, %v1591_v60 }
 0x8ea   :  { %v1612_v16 = vadd.f32 1e-05, %v1608_v55  ;;  %v1605_v7 = vsel %vm687_vm2, %v1595_v26, 0.0 }
 0x8eb   :  { %1606 = vadd.xlane.f32.xlu1 %v1605_v7 }
 0x8ec   :  { %8486 = vrsqrt.f32 %v1612_v16 }
 0x8f6   :  { %v8487_v5 = vpop.eup %8486 }
 0x8f7   :  { %v1620_v42 = vmul.f32 %v8487_v5, %v1588_v13 }
 0x8f9   :  { %v1628_v44 = vmul.f32 %v7245_v49, %v1620_v42  ;;  %v1648_v42 = vshrl.u32 %v1647_v39, 7 }
 0x8fb   :  { %v1636_v24 = vadd.f32 %v7246_v37, %v1628_v44  ;;  %v9909_v44 = vsub.s32 1, %v1648_v42 }
 0x8fd   :  { %v1640_v12 = vpack.c.bf16 %v1637_v47, %v1636_v24  ;;  %v1554_v24 = vld [vmem:[%s11050_s3] ss:$2 sm:$0x3] }
 0x8fe   :  { %v9913_v47 = vrot.slane %v1554_v24, %v9909_v44 }
 0x8ff   :  { %7247 = vmatmul.mubr.msk.bf16.vlgmr.msra.gmra.mrb[24].mxu1 %vm687_vm2, %v1640_v12 }
 0x900   :  { %1705 = vmatprep.mubr.bf16.mxu1 %v10999_v63 }
 0x974   :  { %v1604_v6 = vpop.xlane.xlu0 %1603 }
 0x975   :  { %v1610_v10 = vmul.f32 0.03125, %v1604_v6 }
 0x977   :  { %v1614_v23 = vadd.f32 1e-05, %v1610_v10 }
 0x978   :  { %v1607_v33 = vpop.xlane.xlu1 %1606 }
 0x979   :  { %8488 = vrsqrt.f32 %v1614_v23  ;;  %v1611_v35 = vmul.f32 0.03125, %v1607_v33 }
 0x97b   :  { %v1615_v41 = vadd.f32 1e-05, %v1611_v35 }
 0x97d   :  { %8490 = vrsqrt.f32 %v1615_v41 }
 0x983   :  { %v8489_v62 = vpop.eup %8488 }
 0x984   :  { %v1622_v13 = vmul.f32 %v8489_v62, %v1590_v9 }
 0x986   :  { %v1630_v16 = vmul.f32 %v7245_v49, %v1622_v13 }
 0x987   :  { %v8491_v55 = vpop.eup %8490 }
 0x988   :  { %v1623_v26 = vmul.f32 %v8491_v55, %v1591_v60  ;;  %v1638_v27 = vadd.f32 %v7246_v37, %v1630_v16 }
 0x98a   :  { %v1631_v7 = vmul.f32 %v7245_v49, %v1623_v26 }
 0x98c   :  { %v1639_v30 = vadd.f32 %v7246_v37, %v1631_v7 }
 0x98e   :  { %v1641_v5 = vpack.c.bf16 %v1639_v30, %v1638_v27 }
 0x990   :  { %7248 = vmatmul.mubr.msk.bf16.gmra.mrb[28].mxu1 %vm687_vm2, %v1641_v5 }
 0x9d2   :  { %v9915_v12 = vpop.f32.mrb[24].mxu1 }
 0x9d3   :  { %v1699_v9 = vpop.f32.mrb[25].mxu1 }
 0x9d4   :  { %v1700_v60 = vadd.f32 %v1699_v9, %v9913_v47  ;;  %v9918_v6 = vpop.f32.mrb[26].mxu1 }
 0x9d5   :  { %v1703_v49 = vpop.f32.mrb[27].mxu1 }
 0x9d6   :  { %v1720_v37 = vmul.f32 0.70710677, %v1700_v60  ;;  %v9921_v10 = vadd.f32 %v1703_v49, %v9913_v47 }
 0x9d8   :  { %v1724_v23 = vand.u32 2147483647, %v1720_v37  ;;  %v9924_v33 = vmul.f32 0.70710677, %v9921_v10  ;;  %vm1804_vm11 = vcmp.lt.f32.partialorder %v1720_v37, 0.0 }
 0x9da   :  { %v1728_v35 = vmul.f32 0.3275911, %v1724_v23  ;;  %v1725_v41 = vand.u32 2147483647, %v9924_v33  ;;  %v1780_v26 = vsub.f32 0.0, %v1724_v23  ;;  %vm1805_vm12 = vcmp.lt.f32.partialorder %v9924_v33, 0.0 }
 0x9dc   :  { %v1732_v62 = vadd.f32 1.0, %v1728_v35  ;;  %v1729_v13 = vmul.f32 0.3275911, %v1725_v41  ;;  %v1781_v16 = vsub.f32 0.0, %v1725_v41  ;;  %v1784_v27 = vmul.f32 %v1780_v26, %v1724_v23 }
 0x9de   :  { %8492 = vrcp.f32 %v1732_v62  ;;  %v1733_v55 = vadd.f32 1.0, %v1729_v13  ;;  %v1785_v9 = vmul.f32 %v1781_v16, %v1725_v41  ;;  %v1788_v49 = vmul.f32 1.442695, %v1784_v27 }
 0x9e0   :  { %8494 = vrcp.f32 %v1733_v55  ;;  %v1790_v2 = vmul.f32 1.442695, %v1785_v9 }
 0x9e1   :  { %8496 = vpow2.f32 %v1788_v49 }
 0x9e2   :  { %8498 = vpow2.f32 %v1790_v2 }
 0x9e8   :  { %v8493_v7 = vpop.eup %8492 }
 0x9e9   :  { %v1744_v30 = vmul.f32 1.0614054, %v8493_v7 }
 0x9ea   :  { %v8495_v5 = vpop.eup %8494 }
 0x9eb   :  { %v1748_v39 = vadd.f32 -1.4531521, %v1744_v30  ;;  %v1745_v17 = vmul.f32 1.0614054, %v8495_v5  ;;  %v8497_v16 = vpop.eup %8496 }
 0x9ec   :  { %v8499_v9 = vpop.eup %8498 }
 0x9ed   :  { %v1752_v50 = vmul.f32 %v8493_v7, %v1748_v39  ;;  %v1749_v43 = vadd.f32 -1.4531521, %v1745_v17  ;;  %v1555_v39 = vld [vmem:[%s11051_s8] sm:$0xff] }
 0x9ef   :  { %v1756_v53 = vadd.f32 1.4214138, %v1752_v50  ;;  %v1753_v35 = vmul.f32 %v8495_v5, %v1749_v43  ;;  %v9927_v50 = vsub.s32 0, %v1648_v42  ;;  %v1558_v42 = vld [vmem:[%s11051_s8 + $0x18] sm:$0xff] }
 0x9f1   :  { %v1760_v62 = vmul.f32 %v8493_v7, %v1756_v53  ;;  %v1757_v13 = vadd.f32 1.4214138, %v1753_v35  ;;  %11052 = vst [vmem:[#allocation33_spill] sm:$0xff] %v9927_v50  ;;  %v1556_v53 = vld [vmem:[%s11051_s8 + $0x8] sm:$0xff] }
 0x9f2   :  { %v1830_v35 = vpack.c.bf16 %v1556_v53, %v1555_v39  ;;  %v1562_v53 = vld [vmem:[%s11051_s8 + $0x38] sm:$0xff] }
 0x9f3   :  { %v1764_v55 = vadd.f32 -0.28449672, %v1760_v62  ;;  %v1761_v63 = vmul.f32 %v8495_v5, %v1757_v13 }
 0x9f4   :  { %7817 = vmatprep.subr.bf16.mxu0 %v1830_v35 }
 0x9f5   :  { %v1768_v23 = vmul.f32 %v8493_v7, %v1764_v55  ;;  %v1765_v26 = vadd.f32 -0.28449672, %v1761_v63  ;;  %v9932_v63 = vrot.slane %v1554_v24, %v9927_v50  ;;  %7818 = vmatpush3.bf16.msra.mxu0 %v1830_v35  ;;  %v1716_v55 = vmul.f32 0.5, %v1700_v60 }
 0x9f7   :  { %v1772_v18 = vadd.f32 0.2548296, %v1768_v23  ;;  %v1769_v30 = vmul.f32 %v8495_v5, %v1765_v26  ;;  %v1698_v24 = vadd.f32 %v9915_v12, %v9932_v63  ;;  %v1702_v33 = vadd.f32 %v9918_v6, %v9932_v63  ;;  %v1561_v12 = vld [vmem:[%s11051_s8 + $0x30] sm:$0xff] }
 0x9f9   :  { %v1776_v41 = vmul.f32 %v8493_v7, %v1772_v18  ;;  %v1773_v27 = vadd.f32 0.2548296, %v1769_v30  ;;  %v1557_v7 = vld [vmem:[%s11051_s8 + $0x10] sm:$0xff] }
 0x9fb   :  { %v1796_v17 = vmul.f32 %v8497_v16, %v1776_v41  ;;  %v1777_v43 = vmul.f32 %v8495_v5, %v1773_v27  ;;  %v1831_v5 = vpack.c.bf16 %v1558_v42, %v1557_v7  ;;  %v1559_v41 = vld [vmem:[%s11051_s8 + $0x20] sm:$0xff]  ;;  %v1560_v16 = vld [vmem:[%s11051_s8 + $0x28] sm:$0xff]  ;;  %v1717_v27 = vmul.f32 0.5, %v9921_v10 }
 0x9fc   :  { %v1563_v10 = vld [vmem:[%s11051_s8 + $0x40] sm:$0xff] }
 0x9fd   :  { %v1800_v49 = vsub.f32 1.0, %v1796_v17  ;;  %v1797_v2 = vmul.f32 %v8499_v9, %v1777_v43  ;;  %7819 = vmatprep.subr.bf16.mxu0 %v1831_v5  ;;  %v1832_v17 = vpack.c.bf16 %v1560_v16, %v1559_v41  ;;  %v1567_v42 = vld [vmem:[%s11051_s8 + $0x60] sm:$0xff] }
 0x9fe   :  { %7820 = vmatpush3.bf16.msra.mxu0 %v1831_v5 }
 0x9ff   :  { %v1808_v62 = vsub.f32 0.0, %v1800_v49  ;;  %v1801_v18 = vsub.f32 1.0, %v1797_v2  ;;  %7821 = vmatprep.subr.bf16.mxu0 %v1832_v17  ;;  %v1564_v2 = vld [vmem:[%s11051_s8 + $0x48] sm:$0xff] }
 0xa00   :  { %v1834_v6 = vpack.c.bf16 %v1564_v2, %v1563_v10 }
 0xa01   :  { %v1812_v13 = vsel %vm1804_vm11, %v1808_v62, %v1800_v49  ;;  %v1809_v26 = vsub.f32 0.0, %v1801_v18  ;;  %v1833_v49 = vpack.c.bf16 %v1562_v53, %v1561_v12  ;;  %v1565_v62 = vld [vmem:[%s11051_s8 + $0x50] sm:$0xff] }
 0xa02   :  { %v1816_v23 = vadd.f32 1.0, %v1812_v13  ;;  %7822 = vmatpush3.bf16.msra.mxu0 %v1832_v17  ;;  %v1568_v13 = vld [vmem:[%s11051_s8 + $0x68] sm:$0xff] }
 0xa03   :  { %v1813_v30 = vsel %vm1805_vm12, %v1809_v26, %v1801_v18  ;;  %7823 = vmatprep.subr.bf16.mxu0 %v1833_v49  ;;  %v1566_v18 = vld [vmem:[%s11051_s8 + $0x58] sm:$0xff]  ;;  %v1836_v5 = vpack.c.bf16 %v1568_v13, %v1567_v42 }
 0xa04   :  { %v1820_v37 = vmul.f32 %v1816_v23, %v1716_v55  ;;  %v1817_v60 = vadd.f32 1.0, %v1813_v30  ;;  %v1835_v7 = vpack.c.bf16 %v1566_v18, %v1565_v62  ;;  %v1569_v55 = vld [vmem:[%s11051_s8 + $0x70] sm:$0xff]  ;;  %v1570_v23 = vld [vmem:[%s11051_s8 + $0x78] sm:$0xff] }
 0xa05   :  { %v1837_v26 = vpack.c.bf16 %v1570_v23, %v1569_v55 }
 0xa06   :  { %v1824_v43 = vmul.f32 %v1820_v37, %v1698_v24  ;;  %v1821_v39 = vmul.f32 %v1817_v60, %v1717_v27  ;;  %7824 = vmatpush3.bf16.msra.mxu0 %v1833_v49  ;;  %v11053_v24 = vmov 0.0  }
 0xa07   :  { %7825 = vmatprep.subr.bf16.mxu0 %v1834_v6 }
 0xa08   :  { %v1825_v9 = vmul.f32 %v1821_v39, %v1702_v33 }
 0xa0a   :  { %v1828_v35 = vpack.c.bf16 %v1825_v9, %v1824_v43  ;;  %7826 = vmatpush3.bf16.msra.mxu0 %v1834_v6 }
 0xa0b   :  { %7827 = vmatprep.subr.bf16.mxu0 %v1835_v7 }
 0xa0c   :  { %7833 = vmatprep.mubr.bf16.mxu0 %v1828_v35 }
 0xa0e   :  { %7828 = vmatpush3.bf16.msra.mxu0 %v1835_v7 }
 0xa0f   :  { %7829 = vmatprep.subr.bf16.mxu0 %v1836_v5 }
 0xa12   :  { %7830 = vmatpush3.bf16.msra.mxu0 %v1836_v5 }
 0xa13   :  { %7831 = vmatprep.subr.bf16.mxu0 %v1837_v26 }
 0xa16   :  { %7832 = vmatpush3.bf16.msra.mxu0 %v1837_v26 }
 0xa17   :  { %7859 = vmatprep.subr.bf16.mxu0 %v11053_v24 }
 0xa63   :  { %v1707_v37 = vpop.f32.mrb[28].mxu1 }
 0xa64   :  { %v1709_v30 = vpop.f32.mrb[29].mxu1 }
 0xa65   :  { %v1710_v41 = vadd.f32 %v1709_v30, %v9913_v47  ;;  %v1711_v16 = vpop.f32.mrb[30].mxu1 }
 0xa66   :  { %v1713_v27 = vpop.f32.mrb[31].mxu1 }
 0xa67   :  { %v1722_v60 = vmul.f32 0.70710677, %v1710_v41  ;;  %v1714_v17 = vadd.f32 %v1713_v27, %v9913_v47 }
 0xa69   :  { %v1726_v43 = vand.u32 2147483647, %v1722_v60  ;;  %v1723_v33 = vmul.f32 0.70710677, %v1714_v17  ;;  %vm1806_vm13 = vcmp.lt.f32.partialorder %v1722_v60, 0.0 }
 0xa6b   :  { %v1730_v39 = vmul.f32 0.3275911, %v1726_v43  ;;  %v1727_v12 = vand.u32 2147483647, %v1723_v33  ;;  %v1782_v35 = vsub.f32 0.0, %v1726_v43  ;;  %vm1807_vm14 = vcmp.lt.f32.partialorder %v1723_v33, 0.0 }
 0xa6d   :  { %v1734_v53 = vadd.f32 1.0, %v1730_v39  ;;  %v1731_v9 = vmul.f32 0.3275911, %v1727_v12  ;;  %v1783_v10 = vsub.f32 0.0, %v1727_v12  ;;  %v1786_v6 = vmul.f32 %v1782_v35, %v1726_v43 }
 0xa6f   :  { %8500 = vrcp.f32 %v1734_v53  ;;  %v1735_v49 = vadd.f32 1.0, %v1731_v9  ;;  %v1787_v42 = vmul.f32 %v1783_v10, %v1727_v12  ;;  %v1792_v13 = vmul.f32 1.442695, %v1786_v6 }
 0xa71   :  { %8502 = vrcp.f32 %v1735_v49  ;;  %v1794_v26 = vmul.f32 1.442695, %v1787_v42 }
 0xa72   :  { %8504 = vpow2.f32 %v1792_v13 }
 0xa73   :  { %8506 = vpow2.f32 %v1794_v26 }
 0xa79   :  { %v8501_v2 = vpop.eup %8500 }
 0xa7a   :  { %v1746_v62 = vmul.f32 1.0614054, %v8501_v2 }
 0xa7b   :  { %v8503_v18 = vpop.eup %8502 }
 0xa7c   :  { %v1750_v7 = vadd.f32 -1.4531521, %v1746_v62  ;;  %v1747_v5 = vmul.f32 1.0614054, %v8503_v18  ;;  %v8505_v62 = vpop.eup %8504 }
 0xa7e   :  { %v1754_v47 = vmul.f32 %v8501_v2, %v1750_v7  ;;  %v1751_v55 = vadd.f32 -1.4531521, %v1747_v5  ;;  %v8507_v7 = vpop.eup %8506 }
 0xa80   :  { %v1758_v23 = vadd.f32 1.4214138, %v1754_v47  ;;  %v1755_v30 = vmul.f32 %v8503_v18, %v1751_v55 }
 0xa82   :  { %v1762_v27 = vmul.f32 %v8501_v2, %v1758_v23  ;;  %v1759_v39 = vadd.f32 1.4214138, %v1755_v30  ;;  %v1718_v23 = vmul.f32 0.5, %v1710_v41  ;;  %v7249_v41 = vld [vmem:[%s11054_s14] ss:$0 sm:$0xff] }
 0xa84   :  { %v1766_v53 = vadd.f32 -0.28449672, %v1762_v27  ;;  %v1763_v9 = vmul.f32 %v8503_v18, %v1759_v39  ;;  %v1708_v27 = vadd.f32 %v1707_v37, %v9932_v63  ;;  %v1719_v39 = vmul.f32 0.5, %v1714_v17 }
 0xa86   :  { %v1770_v49 = vmul.f32 %v8501_v2, %v1766_v53  ;;  %v1767_v36 = vadd.f32 -0.28449672, %v1763_v9 }
 0xa88   :  { %v1774_v43 = vadd.f32 0.2548296, %v1770_v49  ;;  %v1771_v35 = vmul.f32 %v8503_v18, %v1767_v36 }
 0xa8a   :  { %v1778_v21 = vmul.f32 %v8501_v2, %v1774_v43  ;;  %v1775_v12 = vadd.f32 0.2548296, %v1771_v35 }
 0xa8c   :  { %v1798_v10 = vmul.f32 %v8505_v62, %v1778_v21  ;;  %v1779_v6 = vmul.f32 %v8503_v18, %v1775_v12  ;;  %v1712_v18 = vadd.f32 %v1711_v16, %v9932_v63 }
 0xa8e   :  { %v1802_v5 = vsub.f32 1.0, %v1798_v10  ;;  %v1799_v47 = vmul.f32 %v8507_v7, %v1779_v6 }
 0xa90   :  { %v1810_v42 = vsub.f32 0.0, %v1802_v5  ;;  %v1803_v13 = vsub.f32 1.0, %v1799_v47 }
 0xa92   :  { %v1814_v55 = vsel %vm1806_vm13, %v1810_v42, %v1802_v5  ;;  %v1811_v30 = vsub.f32 0.0, %v1803_v13  ;;  %vm7067_vm13 = vcmask 254976  }
 0xa93   :  { %v1818_v26 = vadd.f32 1.0, %v1814_v55 }
 0xa94   :  { %v1815_v2 = vsel %vm1807_vm14, %v1811_v30, %v1803_v13 }
 0xa95   :  { %v1822_v36 = vmul.f32 %v1818_v26, %v1718_v23  ;;  %v1819_v53 = vadd.f32 1.0, %v1815_v2 }
 0xa97   :  { %v1826_v21 = vmul.f32 %v1822_v36, %v1708_v27  ;;  %v1823_v9 = vmul.f32 %v1819_v53, %v1719_v39 }
 0xa99   :  { %v1827_v49 = vmul.f32 %v1823_v9, %v1712_v18 }
 0xa9b   :  { %v1829_v43 = vpack.c.bf16 %v1827_v49, %v1826_v21 }
 0xa9d   :  { %7834 = vmatmul.mubr.bf16.vlgmr.msra.gmra.mrb[36].mxu0 %v1829_v43 }
 0xa9e   :  { %7861 = vmatprep.mubr.msk.bf16.mxu0 %vm8816_vm8, %v11053_v24 }
 0xb70   :  { %v7835_v60 = vpop.f32.mrb[36].mxu0 }
 0xb71   :  { %v1876_v35 = vpop.f32.mrb[37].mxu0  ;;  %v1885_v33 = vadd.f32 %v7835_v60, %v7249_v41 }
 0xb72   :  { %v1877_v62 = vadd.f32 %v7249_v41, %v1876_v35  ;;  %v7836_v37 = vpop.f32.mrb[38].mxu0  ;;  %v1965_v35 = vld [vmem:[%s11055_s19] sm:$0xff] }
 0xb73   :  { %v1879_v12 = vpop.f32.mrb[39].mxu0  ;;  %v1888_v10 = vadd.f32 %v7836_v37, %v7249_v41  ;;  %v9966_v63 = vadd.f32 %v1885_v33, %v9881_v32  ;;  %v1966_v33 = vld [vmem:[%s11055_s19 + $0x8] sm:$0xff]  ;;  %v1967_v37 = vld [vmem:[%s11055_s19 + $0x10] sm:$0xff] }
 0xb74   :  { %v9963_v17 = vadd.f32 %v1877_v62, %v9869_v54  ;;  %v1880_v6 = vadd.f32 %v7249_v41, %v1879_v12  ;;  %v1971_v62 = vpack.c.bf16 %v1966_v33, %v1965_v35  ;;  %v1968_v12 = vld [vmem:[%s11055_s19 + $0x18] sm:$0xff]  ;;  %v7251_v33 = vld [vmem:[%s11058_s18] ss:$0 sm:$0xff] }
 0xb75   :  { %v9974_v5 = vadd.f32 %v1888_v10, %v9884_v45  ;;  %v1903_v54 = vsel %vm687_vm2, %v9966_v63, 0.0  ;;  %v1972_v10 = vpack.c.bf16 %v1968_v12, %v1967_v37 }
 0xb76   :  { %v9969_v16 = vadd.f32 %v1880_v6, %v9872_v8  ;;  %v1897_v7 = vsel %vm687_vm2, %v9963_v17, 0.0  ;;  %7837 = vmatprep.subr.bf16.mxu1 %v1971_v62  ;;  %v2028_v6 = vld [vmem:[%s11056_s15] sm:$0xff] }
 0xb77   :  { %1898 = vadd.xlane.f32.xlu0 %v1897_v7  ;;  %v1906_v32 = vsel %vm687_vm2, %v9974_v5, 0.0  ;;  %7838 = vmatpush3.bf16.msra.mxu1 %v1971_v62  ;;  %v2029_v7 = vld [vmem:[%s11056_s15 + $0x8] sm:$0xff] }
 0xb78   :  { %v1900_v47 = vsel %vm687_vm2, %v9969_v16, 0.0  ;;  %7839 = vmatprep.subr.bf16.mxu1 %v1972_v10 }
 0xb79   :  { %1901 = vadd.xlane.f32.xlu1 %v1900_v47  ;;  %v2032_v47 = vpack.c.bf16 %v2029_v7, %v2028_v6 }
 0xb7b   :  { %1904 = vadd.xlane.f32.xlu0 %v1903_v54  ;;  %7840 = vmatpush3.bf16.msra.mxu1 %v1972_v10 }
 0xb7c   :  { %7845 = vmatprep.subr.bf16.mxu1 %v2032_v47 }
 0xb7d   :  { %1907 = vadd.xlane.f32.xlu1 %v1906_v32 }
 0xc04   :  { %v1899_v8 = vpop.xlane.xlu0 %1898 }
 0xc05   :  { %v1909_v42 = vmul.f32 0.03125, %v1899_v8 }
 0xc06   :  { %v1902_v13 = vpop.xlane.xlu1 %1901 }
 0xc07   :  { %v1913_v55 = vsub.f32 %v9963_v17, %v1909_v42  ;;  %v1910_v23 = vmul.f32 0.03125, %v1902_v13 }
 0xc08   :  { %v1905_v45 = vpop.xlane.xlu0 %1904 }
 0xc09   :  { %v1914_v26 = vsub.f32 %v9969_v16, %v1910_v23  ;;  %v1911_v30 = vmul.f32 0.03125, %v1905_v45  ;;  %v1917_v27 = vmul.f32 %v1913_v55, %v1913_v55 }
 0xc0a   :  { %v1908_v36 = vpop.xlane.xlu1 %1907 }
 0xc0b   :  { %v1915_v2 = vsub.f32 %v9966_v63, %v1911_v30  ;;  %v1912_v39 = vmul.f32 0.03125, %v1908_v36  ;;  %v1921_v53 = vsel %vm687_vm2, %v1917_v27, 0.0  ;;  %v1918_v21 = vmul.f32 %v1914_v26, %v1914_v26 }
 0xc0c   :  { %1922 = vadd.xlane.f32.xlu0 %v1921_v53 }
 0xc0d   :  { %v1916_v18 = vsub.f32 %v9974_v5, %v1912_v39  ;;  %v1924_v9 = vsel %vm687_vm2, %v1918_v21, 0.0  ;;  %v1919_v49 = vmul.f32 %v1915_v2, %v1915_v2 }
 0xc0e   :  { %1925 = vadd.xlane.f32.xlu1 %v1924_v9  ;;  %v7250_v9 = vld [vmem:[%s11057_s16] ss:$0 sm:$0xff] }
 0xc0f   :  { %v1927_v43 = vsel %vm687_vm2, %v1919_v49, 0.0  ;;  %v1920_v41 = vmul.f32 %v1916_v18, %v1916_v18 }
 0xc10   :  { %1928 = vadd.xlane.f32.xlu0 %v1927_v43 }
 0xc11   :  { %v1930_v60 = vsel %vm687_vm2, %v1920_v41, 0.0 }
 0xc12   :  { %1931 = vadd.xlane.f32.xlu1 %v1930_v60 }
 0xc99   :  { %v1923_v54 = vpop.xlane.xlu0 %1922 }
 0xc9a   :  { %v1933_v32 = vmul.f32 0.03125, %v1923_v54 }
 0xc9b   :  { %v1926_v8 = vpop.xlane.xlu1 %1925 }
 0xc9c   :  { %v1937_v42 = vadd.f32 1e-05, %v1933_v32  ;;  %v1934_v13 = vmul.f32 0.03125, %v1926_v8 }
 0xc9d   :  { %v1929_v23 = vpop.xlane.xlu0 %1928 }
 0xc9e   :  { %8508 = vrsqrt.f32 %v1937_v42  ;;  %v1938_v45 = vadd.f32 1e-05, %v1934_v13  ;;  %v1935_v30 = vmul.f32 0.03125, %v1929_v23  ;;  %v2030_v42 = vld [vmem:[%s11056_s15 + $0x10] sm:$0xff]  ;;  %v2031_v13 = vld [vmem:[%s11056_s15 + $0x18] sm:$0xff] }
 0xc9f   :  { %v1932_v27 = vpop.xlane.xlu1 %1931 }
 0xca0   :  { %8510 = vrsqrt.f32 %v1938_v45  ;;  %v1939_v36 = vadd.f32 1e-05, %v1935_v30  ;;  %v1936_v39 = vmul.f32 0.03125, %v1932_v27 }
 0xca2   :  { %8512 = vrsqrt.f32 %v1939_v36  ;;  %v1940_v53 = vadd.f32 1e-05, %v1936_v39 }
 0xca4   :  { %8514 = vrsqrt.f32 %v1940_v53 }
 0xca8   :  { %v8509_v21 = vpop.eup %8508 }
 0xca9   :  { %v1945_v49 = vmul.f32 %v8509_v21, %v1913_v55 }
 0xcaa   :  { %v8511_v43 = vpop.eup %8510 }
 0xcab   :  { %v1946_v41 = vmul.f32 %v8511_v43, %v1914_v26  ;;  %v1953_v60 = vmul.f32 %v7250_v9, %v1945_v49  ;;  %v2033_v26 = vpack.c.bf16 %v2031_v13, %v2030_v42 }
 0xcac   :  { %v8513_v35 = vpop.eup %8512 }
 0xcad   :  { %v1947_v62 = vmul.f32 %v8513_v35, %v1915_v2  ;;  %v1954_v37 = vmul.f32 %v7250_v9, %v1946_v41  ;;  %v1961_v7 = vadd.f32 %v7251_v33, %v1953_v60 }
 0xcae   :  { %v8515_v12 = vpop.eup %8514 }
 0xcaf   :  { %v1948_v10 = vmul.f32 %v8515_v12, %v1916_v18  ;;  %v1955_v6 = vmul.f32 %v7250_v9, %v1947_v62  ;;  %v1962_v54 = vadd.f32 %v7251_v33, %v1954_v37 }
 0xcb1   :  { %v1956_v32 = vmul.f32 %v7250_v9, %v1948_v10  ;;  %v1969_v8 = vpack.c.bf16 %v1962_v54, %v1961_v7  ;;  %v1963_v23 = vadd.f32 %v7251_v33, %v1955_v6 }
 0xcb3   :  { %v1964_v45 = vadd.f32 %v7251_v33, %v1956_v32  ;;  %7841 = vmatprep.mubr.msk.bf16.mxu1 %vm687_vm2, %v1969_v8 }
 0xcb5   :  { %v1970_v55 = vpack.c.bf16 %v1964_v45, %v1963_v23 }
 0xcb7   :  { %7842 = vmatmul.mubr.msk.bf16.vlgmr.msra.gmra.mrb[32].mxu1 %vm687_vm2, %v1970_v55 }
 0xcb8   :  { %7846 = vmatpush3.bf16.msra.mxu1 %v2032_v47  ;;  %7849 = vmatprep.mubr.msk.bf16.mxu1 %vm687_vm2, %v1969_v8 }
 0xcb9   :  { %7847 = vmatprep.subr.bf16.mxu1 %v2033_v26 }
 0xcbc   :  { %7848 = vmatpush3.bf16.msra.mxu1 %v2033_v26 }
 0xcbd   :  { %7853 = vmatprep.subr.bf16.mxu1 %v11053_v24 }
 0xcbf   :  { %7850 = vmatmul.mubr.msk.bf16.vlgmr.msra.gmra.mrb[36].mxu1 %vm687_vm2, %v1970_v55 }
 0xcc0   :  { %7855 = vmatprep.mubr.msk.bf16.mxu1 %vm8816_vm8, %v11053_v24 }
 0xd8a   :  { %v7843_v2 = vpop.f32.mrb[32].mxu1 }
 0xd8b   :  { %v2013_v18 = vpop.f32.mrb[33].mxu1 }
 0xd8c   :  { %v7844_v30 = vpop.f32.mrb[34].mxu1 }
 0xd8d   :  { %v10007_v27 = vpack.c.bf16 %v7844_v30, %v7843_v2  ;;  %v2016_v36 = vpop.f32.mrb[35].mxu1 }
 0xd8e   :  { %v10009_v39 = vpack.c.bf16 %v2016_v36, %v2013_v18 }
 0xd90   :  { %2212 = vrot.lane.b32.xlu1 %v10009_v39, %s8819_s22 }
 0xd92   :  { %v7851_v47 = vpop.f32.mrb[36].mxu1 }
 0xd93   :  { %v2068_v53 = vpop.f32.mrb[37].mxu1 }
 0xd94   :  { %v7852_v21 = vpop.f32.mrb[38].mxu1 }
 0xd95   :  { %v10013_v9 = vpack.c.bf16 %v7852_v21, %v7851_v47  ;;  %v2071_v49 = vpop.f32.mrb[39].mxu1 }
 0xd96   :  { %v10015_v43 = vpack.c.bf16 %v2071_v49, %v2068_v53 }
 0xd98   :  { %2214 = vrot.lane.b32.xlu0 %v10015_v43, %s8819_s22  ;;  %v2093_v41 = vsel %vm186_vm1, %v10015_v43, 0 }
 0xd99   :  { %7854 = vmatpush3.bf16.xpose.msra.mxu1 %v2093_v41 }
 0xd9a   :  { %7865 = vmatprep.subr.bf16.mxu1 %v11053_v24 }
 0xda0   :  { %7856 = vmatmul.mubr.msk.bf16.vlgmr.msra.gmra.mrb[40].mxu1 %vm186_vm1, %v10009_v39 }
 0xda1   :  { %7867 = vmatprep.mubr.msk.bf16.mxu1 %vm8816_vm8, %v11053_v24 }
 0xe02   :  { %v2213_v33 = vpop.permute.xlu1 %2212 }
 0xe0a   :  { %v2215_v60 = vpop.permute.xlu0 %2214 }
 0xe0b   :  { %v2220_v35 = vsel %vm186_vm1, %v2215_v60, 0 }
 0xe0c   :  { %7866 = vmatpush3.bf16.xpose.msra.mxu1 %v2220_v35 }
 0xe0d   :  { %7877 = vmatprep.subr.bf16.mxu1 %v11053_v24 }
 0xe13   :  { %7868 = vmatmul.mubr.msk.bf16.vlgmr.msra.gmra.mrb[44].mxu1 %vm186_vm1, %v2213_v33 }
 0xe14   :  { %7879 = vmatprep.mubr.msk.bf16.mxu1 %vm8816_vm8, %v11053_v24 }
 0xe73   :  { %v2129_v62 = vpop.f32.mrb[40].mxu1 }
 0xe74   :  { %v2136_v37 = vmul.f32 0.35355338, %v2129_v62  ;;  %v7857_v12 = vpop.f32.mrb[41].mxu1 }
 0xe75   :  { %v2132_v10 = vpop.f32.mrb[42].mxu1 }
 0xe76   :  { %v2137_v6 = vmul.f32 0.35355338, %v2132_v10  ;;  %v7858_v7 = vpop.f32.mrb[43].mxu1  ;;  %v2138_v54 = vsel %vm1151_vm9, %v2136_v37, -inf }
 0xe77   :  { %2139 = vmax.xlane.f32.xlu1 %v2138_v54 }
 0xe78   :  { %v2141_v32 = vsel %vm1151_vm9, %v2137_v6, -inf }
 0xe79   :  { %2142 = vmax.xlane.f32.xlu0 %v2141_v32 }
 0xee6   :  { %v2256_v8 = vpop.f32.mrb[44].mxu1 }
 0xee7   :  { %v2263_v42 = vmul.f32 0.35355338, %v2256_v8  ;;  %v7869_v13 = vpop.f32.mrb[45].mxu1 }
 0xee8   :  { %v2259_v23 = vpop.f32.mrb[46].mxu1 }
 0xee9   :  { %v2264_v45 = vmul.f32 0.35355338, %v2259_v23  ;;  %v7870_v55 = vpop.f32.mrb[47].mxu1  ;;  %v2265_v26 = vsel %vm1151_vm9, %v2263_v42, -inf }
 0xeea   :  { %2266 = vmax.xlane.f32.xlu0 %v2265_v26 }
 0xeeb   :  { %v2268_v2 = vsel %vm1151_vm9, %v2264_v45, -inf }
 0xeec   :  { %2269 = vmax.xlane.f32.xlu1 %v2268_v2 }
 0xf04   :  { %v2140_v18 = vpop.xlane.xlu1 %2139 }
 0xf05   :  { %v2144_v30 = vsub.f32 %v2136_v37, %v2140_v18 }
 0xf06   :  { %v2143_v36 = vpop.xlane.xlu0 %2142 }
 0xf07   :  { %v2146_v47 = vmul.f32 1.442695, %v2144_v30  ;;  %v2145_v53 = vsub.f32 %v2137_v6, %v2143_v36 }
 0xf09   :  { %8516 = vpow2.f32 %v2146_v47  ;;  %v2148_v21 = vmul.f32 1.442695, %v2145_v53 }
 0xf0b   :  { %8518 = vpow2.f32 %v2148_v21 }
 0xf13   :  { %v8517_v49 = vpop.eup %8516 }
 0xf14   :  { %v2150_v41 = vsel %vm1151_vm9, %v8517_v49, 0.0 }
 0xf15   :  { %v8519_v60 = vpop.eup %8518  ;;  %2151 = vadd.xlane.f32.xlu0 %v2150_v41 }
 0xf16   :  { %v2153_v35 = vsel %vm1151_vm9, %v8519_v60, 0.0 }
 0xf17   :  { %2154 = vadd.xlane.f32.xlu1 %v2153_v35  ;;  %v2083_v35 = vld [vmem:[%s11059_s28] sm:$0xff] }
 0xf77   :  { %v2267_v33 = vpop.xlane.xlu0 %2266 }
 0xf78   :  { %v2271_v62 = vsub.f32 %v2263_v42, %v2267_v33  ;;  %v2210_v33 = vpack.c.bf16 %v2083_v35, %v2083_v35 }
 0xf79   :  { %v2270_v12 = vpop.xlane.xlu1 %2269 }
 0xf7a   :  { %v2273_v10 = vmul.f32 1.442695, %v2271_v62  ;;  %v2272_v7 = vsub.f32 %v2264_v45, %v2270_v12  ;;  %v10057_v62 = vsel %vm211_vm0, %v2210_v33, 0  ;;  %v2084_v12 = vld [vmem:[%s11059_s28 + $0x8] sm:$0xff] }
 0xf7c   :  { %8520 = vpow2.f32 %v2273_v10  ;;  %v2275_v37 = vmul.f32 1.442695, %v2272_v7  ;;  %v2336_v10 = vpack.c.bf16 %v2084_v12, %v2084_v12 }
 0xf7e   :  { %8522 = vpow2.f32 %v2275_v37  ;;  %v10063_v7 = vsel %vm211_vm0, %v2336_v10, 0 }
 0xf7f   :  { %7878 = vmatpush3.bf16.msra.mxu1 %v10063_v7 }
 0xf80   :  { %7889 = vmatprep.subr.bf16.mxu1 %v11053_v24 }
 0xf86   :  { %v8521_v6 = vpop.eup %8520 }
 0xf87   :  { %v2277_v54 = vsel %vm1151_vm9, %v8521_v6, 0.0 }
 0xf88   :  { %v8523_v32 = vpop.eup %8522  ;;  %2278 = vadd.xlane.f32.xlu0 %v2277_v54 }
 0xf89   :  { %v2280_v8 = vsel %vm1151_vm9, %v8523_v32, 0.0 }
 0xf8a   :  { %2281 = vadd.xlane.f32.xlu1 %v2280_v8 }
 0xf9b   :  { %2288 = vrot.lane.b32.xlu1 %v10015_v43, %s11011_s23 }
 0xf9e   :  { %2162 = vrot.lane.b32.xlu0 %v10015_v43, %s11015_s26 }
 0xf9f   :  { %2433 = vrot.lane.b32.xlu1 %v10015_v43, %s8817_s0 }
 0xfa2   :  { %v2152_v13 = vpop.xlane.xlu0 %2151 }
 0xfa3   :  { %2431 = vrot.lane.b32.xlu1 %v10009_v39, %s8817_s0 }
 0xfa4   :  { %v2155_v42 = vpop.xlane.xlu1 %2154 }
 0xfa5   :  { %8524 = vrcp.f32 %v2155_v42 }
 0xfa6   :  { %8526 = vrcp.f32 %v2152_v13 }
 0xfaf   :  { %v8525_v23 = vpop.eup %8524 }
 0xfb0   :  { %v8527_v55 = vpop.eup %8526  ;;  %v2159_v26 = vmul.f32 %v8525_v23, %v8519_v60 }
 0xfb1   :  { %v2158_v18 = vmul.f32 %v8527_v55, %v8517_v49 }
 0xfb3   :  { %v2160_v36 = vpack.c.bf16 %v2159_v26, %v2158_v18 }
0x1015   :  { %v2279_v45 = vpop.xlane.xlu0 %2278 }
0x1016   :  { %8528 = vrcp.f32 %v2279_v45 }
0x1017   :  { %v2282_v2 = vpop.xlane.xlu1 %2281 }
0x1018   :  { %8530 = vrcp.f32 %v2282_v2 }
0x1019   :  { %v2163_v30 = vpop.permute.xlu0 %2162 }
0x101a   :  { %7860 = vmatpush3.bf16.msra.mxu0 %v2163_v30 }
0x101b   :  { %7871 = vmatprep.subr.bf16.mxu0 %v11053_v24  ;;  %v2289_v47 = vpop.permute.xlu1 %2288 }
0x101d   :  { %7862 = vmatmul.mubr.msk.bf16.vlgmr.msra.gmra.mrb[40].mxu0 %vm1151_vm9, %v2160_v36 }
0x101e   :  { %7872 = vmatpush3.bf16.msra.mxu0 %v2289_v47  ;;  %7873 = vmatprep.mubr.msk.bf16.mxu0 %vm8816_vm8, %v11053_v24 }
0x101f   :  { %7883 = vmatprep.subr.bf16.mxu0 %v11053_v24  ;;  %v2434_v23 = vpop.permute.xlu1 %2433 }
0x1020   :  { %v8529_v53 = vpop.eup %8528  ;;  %v2439_v2 = vsel %vm186_vm1, %v2434_v23, 0 }
0x1021   :  { %v2285_v41 = vmul.f32 %v8529_v53, %v8521_v6 }
0x1022   :  { %v8531_v21 = vpop.eup %8530 }
0x1023   :  { %v2286_v49 = vmul.f32 %v8531_v21, %v8523_v32  ;;  %v2432_v18 = vpop.permute.xlu1 %2431 }
0x1025   :  { %v2287_v60 = vpack.c.bf16 %v2286_v49, %v2285_v41 }
0x1027   :  { %7874 = vmatmul.mubr.msk.bf16.vlgmr.msra.gmra.mrb[44].mxu0 %vm1151_vm9, %v2287_v60 }
0x1028   :  { %7885 = vmatprep.mubr.msk.bf16.mxu0 %vm8816_vm8, %v11053_v24  ;;  %7884 = vmatpush3.bf16.msra.mxu0 %v10057_v62 }
0x1029   :  { %7895 = vmatprep.subr.bf16.mxu0 %v11053_v24 }
0x10f0   :  { %v2202_v37 = vpop.f32.mrb[40].mxu0 }
0x10f1   :  { %v7863_v6 = vpop.f32.mrb[41].mxu0 }
0x10f2   :  { %v2205_v54 = vpop.f32.mrb[42].mxu0 }
0x10f3   :  { %v2209_v32 = vpack.c.bf16 %v2205_v54, %v2202_v37  ;;  %v7864_v8 = vpop.f32.mrb[43].mxu0 }
0x10f5   :  { %7886 = vmatmul.mubr.msk.bf16.vlgmr.msra.gmra.mrb[48].mxu0 %vm186_vm1, %v2209_v32 }
0x10f6   :  { %7897 = vmatprep.mubr.msk.bf16.mxu0 %vm8816_vm8, %v11053_v24 }
0x10fa   :  { %v2328_v42 = vpop.f32.mrb[44].mxu0 }
0x10fb   :  { %v7875_v13 = vpop.f32.mrb[45].mxu0 }
0x10fc   :  { %v2331_v45 = vpop.f32.mrb[46].mxu0 }
0x10fd   :  { %v2335_v55 = vpack.c.bf16 %v2331_v45, %v2328_v42  ;;  %v7876_v26 = vpop.f32.mrb[47].mxu0 }
0x10ff   :  { %7880 = vmatmul.mubr.msk.bf16.vlgmr.msra.gmra.mrb[48].mxu1 %vm186_vm1, %v2335_v55 }
0x1100   :  { %7890 = vmatpush3.bf16.xpose.msra.mxu1 %v2439_v2  ;;  %7891 = vmatprep.mubr.msk.bf16.mxu1 %vm8816_vm8, %v11053_v24 }
0x1101   :  { %7901 = vmatprep.subr.bf16.mxu1 %v11053_v24 }
0x1107   :  { %7892 = vmatmul.mubr.msk.bf16.vlgmr.msra.gmra.mrb[52].mxu1 %vm186_vm1, %v2432_v18 }
0x1108   :  { %7903 = vmatprep.mubr.msk.bf16.mxu1 %vm8816_vm8, %v11053_v24 }
0x11c8   :  { %v2424_v30 = vpop.f32.mrb[48].mxu0 }
0x11c9   :  { %v7887_v36 = vpop.f32.mrb[49].mxu0 }
0x11ca   :  { %v2427_v47 = vpop.f32.mrb[50].mxu0 }
0x11cb   :  { %v7888_v53 = vpop.f32.mrb[51].mxu0 }
0x11d2   :  { %v2377_v21 = vpop.f32.mrb[48].mxu1 }
0x11d3   :  { %v10078_v41 = vadd.f32 %v2424_v30, %v2377_v21  ;;  %v7881_v49 = vpop.f32.mrb[49].mxu1 }
0x11d4   :  { %v2380_v60 = vpop.f32.mrb[50].mxu1 }
0x11d5   :  { %v10080_v35 = vadd.f32 %v2427_v47, %v2380_v60  ;;  %v7882_v33 = vpop.f32.mrb[51].mxu1 }
0x11da   :  { %v2475_v12 = vpop.f32.mrb[52].mxu1 }
0x11db   :  { %v2482_v10 = vmul.f32 0.35355338, %v2475_v12  ;;  %v7893_v37 = vpop.f32.mrb[53].mxu1 }
0x11dc   :  { %v2478_v6 = vpop.f32.mrb[54].mxu1 }
0x11dd   :  { %v2483_v54 = vmul.f32 0.35355338, %v2478_v6  ;;  %v7894_v32 = vpop.f32.mrb[55].mxu1  ;;  %v2484_v8 = vsel %vm1151_vm9, %v2482_v10, -inf }
0x11de   :  { %2485 = vmax.xlane.f32.xlu0 %v2484_v8  ;;  %v2085_v32 = vld [vmem:[%s11059_s28 + $0x10] sm:$0xff] }
0x11df   :  { %v2487_v42 = vsel %vm1151_vm9, %v2483_v54, -inf  ;;  %v2555_v8 = vpack.c.bf16 %v2085_v32, %v2085_v32 }
0x11e0   :  { %2488 = vmax.xlane.f32.xlu1 %v2487_v42 }
0x11e1   :  { %v10103_v42 = vsel %vm211_vm0, %v2555_v8, 0 }
0x11e2   :  { %7902 = vmatpush3.bf16.msra.mxu1 %v10103_v42 }
0x11e3   :  { %7913 = vmatprep.subr.bf16.mxu1 %v11053_v24 }
0x11f1   :  { %2607 = vrot.lane.b32.xlu1 %v10015_v43, %s11007_s1 }
0x11f5   :  { %2605 = vrot.lane.b32.xlu1 %v10009_v39, %s11007_s1 }
0x126b   :  { %v2486_v13 = vpop.xlane.xlu0 %2485 }
0x126c   :  { %v2490_v23 = vsub.f32 %v2482_v10, %v2486_v13 }
0x126d   :  { %v2489_v45 = vpop.xlane.xlu1 %2488 }
0x126e   :  { %v2492_v55 = vmul.f32 1.442695, %v2490_v23  ;;  %v2491_v26 = vsub.f32 %v2483_v54, %v2489_v45 }
0x1270   :  { %8532 = vpow2.f32 %v2492_v55  ;;  %v2494_v2 = vmul.f32 1.442695, %v2491_v26 }
0x1271   :  { %v2608_v10 = vpop.permute.xlu1 %2607 }
0x1272   :  { %8534 = vpow2.f32 %v2494_v2  ;;  %v2613_v6 = vsel %vm186_vm1, %v2608_v10, 0 }
0x1275   :  { %v2606_v54 = vpop.permute.xlu1 %2605 }
0x127a   :  { %v8533_v18 = vpop.eup %8532 }
0x127b   :  { %v2496_v30 = vsel %vm1151_vm9, %v8533_v18, 0.0 }
0x127c   :  { %v8535_v36 = vpop.eup %8534  ;;  %2497 = vadd.xlane.f32.xlu0 %v2496_v30 }
0x127d   :  { %v2499_v47 = vsel %vm1151_vm9, %v8535_v36, 0.0 }
0x1280   :  { %2500 = vadd.xlane.f32.xlu0 %v2499_v47 }
0x1296   :  { %2507 = vrot.lane.b32.xlu0 %v10015_v43, %s11009_s2 }
0x1309   :  { %v2498_v39 = vpop.xlane.xlu0 %2497 }
0x130a   :  { %8536 = vrcp.f32 %v2498_v39 }
0x130d   :  { %v2501_v53 = vpop.xlane.xlu0 %2500 }
0x130e   :  { %8538 = vrcp.f32 %v2501_v53 }
0x1311   :  { %v2508_v21 = vpop.permute.xlu0 %2507 }
0x1312   :  { %7896 = vmatpush3.bf16.msra.mxu0 %v2508_v21 }
0x1313   :  { %7907 = vmatprep.subr.bf16.mxu0 %v11053_v24 }
0x1314   :  { %v8537_v49 = vpop.eup %8536 }
0x1315   :  { %v2504_v33 = vmul.f32 %v8537_v49, %v8533_v18 }
0x1318   :  { %v8539_v60 = vpop.eup %8538 }
0x1319   :  { %v2505_v12 = vmul.f32 %v8539_v60, %v8535_v36 }
0x131b   :  { %v2506_v37 = vpack.c.bf16 %v2505_v12, %v2504_v33 }
0x131d   :  { %7898 = vmatmul.mubr.msk.bf16.vlgmr.msra.gmra.mrb[52].mxu0 %vm1151_vm9, %v2506_v37 }
0x131e   :  { %7908 = vmatpush3.bf16.xpose.msra.mxu0 %v2613_v6  ;;  %7909 = vmatprep.mubr.msk.bf16.mxu0 %vm8816_vm8, %v11053_v24 }
0x131f   :  { %7919 = vmatprep.subr.bf16.mxu0 %v11053_v24 }
0x1325   :  { %7910 = vmatmul.mubr.msk.bf16.vlgmr.msra.gmra.mrb[56].mxu0 %vm186_vm1, %v2606_v54 }
0x1326   :  { %7921 = vmatprep.mubr.msk.bf16.mxu0 %vm8816_vm8, %v11053_v24 }
0x13f0   :  { %v2547_v13 = vpop.f32.mrb[52].mxu0 }
0x13f1   :  { %v7899_v23 = vpop.f32.mrb[53].mxu0 }
0x13f2   :  { %v2550_v45 = vpop.f32.mrb[54].mxu0 }
0x13f3   :  { %v2554_v55 = vpack.c.bf16 %v2550_v45, %v2547_v13  ;;  %v7900_v26 = vpop.f32.mrb[55].mxu0 }
0x13f5   :  { %7904 = vmatmul.mubr.msk.bf16.vlgmr.msra.gmra.mrb[56].mxu1 %vm186_vm1, %v2554_v55 }
0x13f6   :  { %7915 = vmatprep.mubr.msk.bf16.mxu1 %vm8816_vm8, %v11053_v24 }
0x13f8   :  { %v2649_v2 = vpop.f32.mrb[56].mxu0 }
0x13f9   :  { %v2656_v18 = vmul.f32 0.35355338, %v2649_v2  ;;  %v7911_v30 = vpop.f32.mrb[57].mxu0 }
0x13fa   :  { %v2652_v36 = vpop.f32.mrb[58].mxu0 }
0x13fb   :  { %v2657_v47 = vmul.f32 0.35355338, %v2652_v36  ;;  %v7912_v39 = vpop.f32.mrb[59].mxu0  ;;  %v2658_v53 = vsel %vm1151_vm9, %v2656_v18, -inf }
0x13fc   :  { %2659 = vmax.xlane.f32.xlu1 %v2658_v53 }
0x13fd   :  { %v2661_v21 = vsel %vm1151_vm9, %v2657_v47, -inf }
0x13fe   :  { %2662 = vmax.xlane.f32.xlu0 %v2661_v21 }
0x140d   :  { %2681 = vrot.lane.b32.xlu1 %v10015_v43, %s11005_s7 }
0x1411   :  { %2903 = vrot.lane.b32.xlu1 %v10007_v27, %s8819_s22 }
0x1489   :  { %v2660_v49 = vpop.xlane.xlu1 %2659 }
0x148a   :  { %v2664_v60 = vsub.f32 %v2656_v18, %v2660_v49 }
0x148b   :  { %v2663_v33 = vpop.xlane.xlu0 %2662 }
0x148c   :  { %v2666_v12 = vmul.f32 1.442695, %v2664_v60  ;;  %v2665_v10 = vsub.f32 %v2657_v47, %v2663_v33  ;;  %v2086_v33 = vld [vmem:[%s11059_s28 + $0x18] sm:$0xff] }
0x148d   :  { %v2682_v37 = vpop.permute.xlu1 %2681 }
0x148e   :  { %8540 = vpow2.f32 %v2666_v12  ;;  %v2668_v6 = vmul.f32 1.442695, %v2665_v10  ;;  %7914 = vmatpush3.bf16.msra.mxu1 %v2682_v37  ;;  %v2729_v12 = vpack.c.bf16 %v2086_v33, %v2086_v33 }
0x148f   :  { %7925 = vmatprep.subr.bf16.mxu1 %v11053_v24 }
0x1490   :  { %8542 = vpow2.f32 %v2668_v6  ;;  %v10146_v10 = vsel %vm211_vm0, %v2729_v12, 0 }
0x1491   :  { %v2904_v60 = vpop.permute.xlu1 %2903  ;;  %7920 = vmatpush3.bf16.msra.mxu0 %v10146_v10 }
0x1492   :  { %7931 = vmatprep.subr.bf16.mxu0 %v11053_v24 }
0x1498   :  { %v8541_v54 = vpop.eup %8540 }
0x1499   :  { %v2670_v32 = vsel %vm1151_vm9, %v8541_v54, 0.0 }
0x149a   :  { %v8543_v8 = vpop.eup %8542  ;;  %2671 = vadd.xlane.f32.xlu0 %v2670_v32 }
0x149b   :  { %v2673_v43 = vsel %vm1151_vm9, %v8543_v8, 0.0 }
0x149e   :  { %2674 = vadd.xlane.f32.xlu0 %v2673_v43 }
0x14b4   :  { %2905 = vrot.lane.b32.xlu0 %v10013_v9, %s8819_s22 }
0x14c8   :  { %v2596_v13 = vpop.f32.mrb[56].mxu1 }
0x14c9   :  { %v10122_v23 = vadd.f32 %v2596_v13, %v10078_v41  ;;  %v7905_v45 = vpop.f32.mrb[57].mxu1  ;;  %v2785_v41 = vsel %vm186_vm1, %v10013_v9, 0 }
0x14ca   :  { %v2599_v55 = vpop.f32.mrb[58].mxu1 }
0x14cb   :  { %v10125_v26 = vadd.f32 %v2599_v55, %v10080_v35  ;;  %v7906_v2 = vpop.f32.mrb[59].mxu1 }
0x1527   :  { %v2672_v18 = vpop.xlane.xlu0 %2671 }
0x1528   :  { %8544 = vrcp.f32 %v2672_v18 }
0x152b   :  { %v2675_v30 = vpop.xlane.xlu0 %2674 }
0x152c   :  { %8546 = vrcp.f32 %v2675_v30 }
0x152f   :  { %v2906_v35 = vpop.permute.xlu0 %2905 }
0x1530   :  { %v2911_v49 = vsel %vm186_vm1, %v2906_v35, 0 }
0x1532   :  { %v8545_v36 = vpop.eup %8544 }
0x1533   :  { %v2678_v39 = vmul.f32 %v8545_v36, %v8541_v54 }
0x1536   :  { %v8547_v47 = vpop.eup %8546 }
0x1537   :  { %v2679_v53 = vmul.f32 %v8547_v47, %v8543_v8 }
0x1539   :  { %v2680_v21 = vpack.c.bf16 %v2679_v53, %v2678_v39 }
0x153b   :  { %7916 = vmatmul.mubr.msk.bf16.vlgmr.msra.gmra.mrb[60].mxu1 %vm1151_vm9, %v2680_v21 }
0x153c   :  { %7926 = vmatpush3.bf16.xpose.msra.mxu1 %v2785_v41  ;;  %7927 = vmatprep.mubr.msk.bf16.mxu1 %vm8816_vm8, %v11053_v24 }
0x153d   :  { %7937 = vmatprep.subr.bf16.mxu1 %v11053_v24 }
0x1543   :  { %7928 = vmatmul.mubr.msk.bf16.vlgmr.msra.gmra.mrb[64].mxu1 %vm186_vm1, %v10007_v27 }
0x1544   :  { %7938 = vmatpush3.bf16.xpose.msra.mxu1 %v2911_v49  ;;  %7939 = vmatprep.mubr.msk.bf16.mxu1 %vm8816_vm8, %v11053_v24 }
0x1545   :  { %7949 = vmatprep.subr.bf16.mxu1 %v11053_v24 }
0x154b   :  { %7940 = vmatmul.mubr.msk.bf16.vlgmr.msra.gmra.mrb[68].mxu1 %vm186_vm1, %v2904_v60 }
0x154c   :  { %7950 = vmatpush3.bf16.msra.mxu1 %v10063_v7  ;;  %7951 = vmatprep.mubr.msk.bf16.mxu1 %vm8816_vm8, %v11053_v24 }
0x154d   :  { %7961 = vmatprep.subr.bf16.mxu1 %v11053_v24 }
0x160e   :  { %v2721_v37 = vpop.f32.mrb[60].mxu1 }
0x160f   :  { %v7917_v6 = vpop.f32.mrb[61].mxu1 }
0x1610   :  { %v2724_v54 = vpop.f32.mrb[62].mxu1 }
0x1611   :  { %v2728_v32 = vpack.c.bf16 %v2724_v54, %v2721_v37  ;;  %v7918_v8 = vpop.f32.mrb[63].mxu1 }
0x1613   :  { %7922 = vmatmul.mubr.msk.bf16.vlgmr.msra.gmra.mrb[60].mxu0 %vm186_vm1, %v2728_v32 }
0x1614   :  { %7933 = vmatprep.mubr.msk.bf16.mxu0 %vm8816_vm8, %v11053_v24 }
0x1616   :  { %v2821_v7 = vpop.f32.mrb[64].mxu1 }
0x1617   :  { %v2828_v43 = vmul.f32 0.35355338, %v2821_v7  ;;  %v7929_v13 = vpop.f32.mrb[65].mxu1 }
0x1618   :  { %v2824_v45 = vpop.f32.mrb[66].mxu1 }
0x1619   :  { %v2829_v55 = vmul.f32 0.35355338, %v2824_v45  ;;  %v7930_v2 = vpop.f32.mrb[67].mxu1  ;;  %v2830_v18 = vsel %vm1151_vm9, %v2828_v43, -inf }
0x161a   :  { %2831 = vmax.xlane.f32.xlu1 %v2830_v18 }
0x161b   :  { %v2833_v30 = vsel %vm1151_vm9, %v2829_v55, -inf }
0x161c   :  { %2834 = vmax.xlane.f32.xlu0 %v2833_v30 }
0x161e   :  { %v2947_v36 = vpop.f32.mrb[68].mxu1 }
0x161f   :  { %v2954_v47 = vmul.f32 0.35355338, %v2947_v36  ;;  %v7941_v39 = vpop.f32.mrb[69].mxu1 }
0x1620   :  { %v2950_v53 = vpop.f32.mrb[70].mxu1 }
0x1621   :  { %v2955_v21 = vmul.f32 0.35355338, %v2950_v53  ;;  %v7942_v41 = vpop.f32.mrb[71].mxu1  ;;  %v2956_v35 = vsel %vm1151_vm9, %v2954_v47, -inf }
0x1622   :  { %2957 = vmax.xlane.f32.xlu0 %v2956_v35 }
0x1623   :  { %v2959_v49 = vsel %vm1151_vm9, %v2955_v21, -inf }
0x1624   :  { %2960 = vmax.xlane.f32.xlu1 %v2959_v49 }
0x16a7   :  { %v2832_v60 = vpop.xlane.xlu1 %2831 }
0x16a8   :  { %v2836_v33 = vsub.f32 %v2828_v43, %v2832_v60 }
0x16a9   :  { %v2835_v12 = vpop.xlane.xlu0 %2834 }
0x16aa   :  { %v2838_v37 = vmul.f32 1.442695, %v2836_v33  ;;  %v2837_v6 = vsub.f32 %v2829_v55, %v2835_v12 }
0x16ac   :  { %8548 = vpow2.f32 %v2838_v37  ;;  %v2840_v54 = vmul.f32 1.442695, %v2837_v6 }
0x16ae   :  { %8550 = vpow2.f32 %v2840_v54 }
0x16af   :  { %v2958_v32 = vpop.xlane.xlu0 %2957 }
0x16b0   :  { %v2962_v8 = vsub.f32 %v2954_v47, %v2958_v32 }
0x16b1   :  { %v2961_v7 = vpop.xlane.xlu1 %2960 }
0x16b2   :  { %v2964_v13 = vmul.f32 1.442695, %v2962_v8  ;;  %v2963_v45 = vsub.f32 %v2955_v21, %v2961_v7 }
0x16b4   :  { %8552 = vpow2.f32 %v2964_v13  ;;  %v2966_v2 = vmul.f32 1.442695, %v2963_v45 }
0x16b6   :  { %v8549_v18 = vpop.eup %8548  ;;  %8554 = vpow2.f32 %v2966_v2 }
0x16b7   :  { %v2842_v30 = vsel %vm1151_vm9, %v8549_v18, 0.0 }
0x16b8   :  { %v8551_v36 = vpop.eup %8550  ;;  %2843 = vadd.xlane.f32.xlu0 %v2842_v30 }
0x16b9   :  { %v2845_v43 = vsel %vm1151_vm9, %v8551_v36, 0.0 }
0x16ba   :  { %2846 = vadd.xlane.f32.xlu1 %v2845_v43 }
0x16be   :  { %v8553_v55 = vpop.eup %8552 }
0x16bf   :  { %v2968_v39 = vsel %vm1151_vm9, %v8553_v55, 0.0 }
0x16c0   :  { %v8555_v53 = vpop.eup %8554  ;;  %2969 = vadd.xlane.f32.xlu0 %v2968_v39 }
0x16c1   :  { %v2971_v47 = vsel %vm1151_vm9, %v8555_v53, 0.0 }
0x16c2   :  { %2972 = vadd.xlane.f32.xlu1 %v2971_v47 }
0x16d3   :  { %2979 = vrot.lane.b32.xlu1 %v10013_v9, %s11011_s23  ;;  %s11066_s23 = sld [smem:[#allocation23_spill]] }
0x16d6   :  { %2854 = vrot.lane.b32.xlu0 %v10013_v9, %s11015_s26  ;;  %s11067_s26 = sld [smem:[#allocation24_spill]] }
0x16d7   :  { %3117 = vrot.lane.b32.xlu1 %v10013_v9, %s8817_s0 }
0x16db   :  { %3115 = vrot.lane.b32.xlu1 %v10007_v27, %s8817_s0 }
0x16e6   :  { %v2770_v21 = vpop.f32.mrb[60].mxu0 }
0x16e7   :  { %v10170_v41 = vadd.f32 %v2770_v21, %v10122_v23  ;;  %v7923_v35 = vpop.f32.mrb[61].mxu0 }
0x16e8   :  { %v2773_v49 = vpop.f32.mrb[62].mxu0 }
0x16e9   :  { %v10173_v60 = vadd.f32 %v2773_v49, %v10125_v26  ;;  %v7924_v33 = vpop.f32.mrb[63].mxu0 }
0x1745   :  { %v2844_v12 = vpop.xlane.xlu0 %2843 }
0x1746   :  { %8556 = vrcp.f32 %v2844_v12 }
0x1747   :  { %v2847_v37 = vpop.xlane.xlu1 %2846 }
0x1748   :  { %8558 = vrcp.f32 %v2847_v37 }
0x174d   :  { %v2970_v6 = vpop.xlane.xlu0 %2969 }
0x174e   :  { %8560 = vrcp.f32 %v2970_v6 }
0x174f   :  { %v2973_v54 = vpop.xlane.xlu1 %2972 }
0x1750   :  { %v8557_v32 = vpop.eup %8556  ;;  %8562 = vrcp.f32 %v2973_v54 }
0x1751   :  { %v2855_v8 = vpop.permute.xlu0 %2854  ;;  %v2850_v23 = vmul.f32 %v8557_v32, %v8549_v18 }
0x1752   :  { %v8559_v7 = vpop.eup %8558  ;;  %7932 = vmatpush3.bf16.msra.mxu0 %v2855_v8 }
0x1753   :  { %v2851_v13 = vmul.f32 %v8559_v7, %v8551_v36  ;;  %7943 = vmatprep.subr.bf16.mxu0 %v11053_v24  ;;  %v2980_v26 = vpop.permute.xlu1 %2979 }
0x1755   :  { %v2852_v45 = vpack.c.bf16 %v2851_v13, %v2850_v23 }
0x1757   :  { %7934 = vmatmul.mubr.msk.bf16.vlgmr.msra.gmra.mrb[64].mxu0 %vm1151_vm9, %v2852_v45  ;;  %v3118_v33 = vpop.permute.xlu1 %3117 }
0x1758   :  { %v8561_v2 = vpop.eup %8560  ;;  %7944 = vmatpush3.bf16.msra.mxu0 %v2980_v26  ;;  %7945 = vmatprep.mubr.msk.bf16.mxu0 %vm8816_vm8, %v11053_v24  ;;  %v3123_v6 = vsel %vm186_vm1, %v3118_v33, 0 }
0x1759   :  { %7955 = vmatprep.subr.bf16.mxu0 %v11053_v24  ;;  %v2976_v43 = vmul.f32 %v8561_v2, %v8553_v55 }
0x175a   :  { %v8563_v30 = vpop.eup %8562 }
0x175b   :  { %v2977_v39 = vmul.f32 %v8563_v30, %v8555_v53  ;;  %v3116_v54 = vpop.permute.xlu1 %3115 }
0x175d   :  { %v2978_v47 = vpack.c.bf16 %v2977_v39, %v2976_v43 }
0x175f   :  { %7946 = vmatmul.mubr.msk.bf16.vlgmr.msra.gmra.mrb[68].mxu0 %vm1151_vm9, %v2978_v47 }
0x1760   :  { %7956 = vmatpush3.bf16.msra.mxu0 %v10057_v62  ;;  %7957 = vmatprep.mubr.msk.bf16.mxu0 %vm8816_vm8, %v11053_v24 }
0x1761   :  { %7967 = vmatprep.subr.bf16.mxu0 %v11053_v24 }
0x182a   :  { %v2894_v18 = vpop.f32.mrb[64].mxu0 }
0x182b   :  { %v7935_v36 = vpop.f32.mrb[65].mxu0 }
0x182c   :  { %v2897_v21 = vpop.f32.mrb[66].mxu0 }
0x182d   :  { %v2901_v35 = vpack.c.bf16 %v2897_v21, %v2894_v18  ;;  %v7936_v49 = vpop.f32.mrb[67].mxu0 }
0x182f   :  { %7958 = vmatmul.mubr.msk.bf16.vlgmr.msra.gmra.mrb[72].mxu0 %vm186_vm1, %v2901_v35 }
0x1830   :  { %7969 = vmatprep.mubr.msk.bf16.mxu0 %vm8816_vm8, %v11053_v24 }
0x1832   :  { %v3019_v55 = vpop.f32.mrb[68].mxu0 }
0x1833   :  { %v7947_v53 = vpop.f32.mrb[69].mxu0 }
0x1834   :  { %v3022_v12 = vpop.f32.mrb[70].mxu0 }
0x1835   :  { %v3026_v62 = vpack.c.bf16 %v3022_v12, %v3019_v55  ;;  %v7948_v37 = vpop.f32.mrb[71].mxu0 }
0x1837   :  { %7952 = vmatmul.mubr.msk.bf16.vlgmr.msra.gmra.mrb[72].mxu1 %vm186_vm1, %v3026_v62 }
0x1838   :  { %7962 = vmatpush3.bf16.xpose.msra.mxu1 %v3123_v6  ;;  %7963 = vmatprep.mubr.msk.bf16.mxu1 %vm8816_vm8, %v11053_v24 }
0x1839   :  { %7973 = vmatprep.subr.bf16.mxu1 %v11053_v24 }
0x183f   :  { %7964 = vmatmul.mubr.msk.bf16.vlgmr.msra.gmra.mrb[76].mxu1 %vm186_vm1, %v3116_v54 }
0x1840   :  { %7974 = vmatpush3.bf16.msra.mxu1 %v10103_v42  ;;  %7975 = vmatprep.mubr.msk.bf16.mxu1 %vm8816_vm8, %v11053_v24 }
0x1841   :  { %7985 = vmatprep.subr.bf16.mxu1 %v11053_v24 }
0x1902   :  { %v3108_v32 = vpop.f32.mrb[72].mxu0 }
0x1903   :  { %v7959_v8 = vpop.f32.mrb[73].mxu0 }
0x1904   :  { %v3111_v7 = vpop.f32.mrb[74].mxu0 }
0x1905   :  { %v7960_v23 = vpop.f32.mrb[75].mxu0 }
0x190a   :  { %v3064_v13 = vpop.f32.mrb[72].mxu1 }
0x190b   :  { %v10198_v45 = vadd.f32 %v3108_v32, %v3064_v13  ;;  %v7953_v26 = vpop.f32.mrb[73].mxu1 }
0x190c   :  { %v3067_v2 = vpop.f32.mrb[74].mxu1 }
0x190d   :  { %v10200_v30 = vadd.f32 %v3111_v7, %v3067_v2  ;;  %v7954_v43 = vpop.f32.mrb[75].mxu1 }
0x1912   :  { %v3159_v39 = vpop.f32.mrb[76].mxu1 }
0x1913   :  { %v3166_v47 = vmul.f32 0.35355338, %v3159_v39  ;;  %v7965_v42 = vpop.f32.mrb[77].mxu1 }
0x1914   :  { %v3162_v18 = vpop.f32.mrb[78].mxu1 }
0x1915   :  { %v3167_v36 = vmul.f32 0.35355338, %v3162_v18  ;;  %v7966_v21 = vpop.f32.mrb[79].mxu1  ;;  %v3168_v35 = vsel %vm1151_vm9, %v3166_v47, -inf }
0x1916   :  { %3169 = vmax.xlane.f32.xlu0 %v3168_v35 }
0x1917   :  { %v3171_v49 = vsel %vm1151_vm9, %v3167_v36, -inf }
0x1918   :  { %3172 = vmax.xlane.f32.xlu1 %v3171_v49 }
0x1929   :  { %3287 = vrot.lane.b32.xlu1 %v10013_v9, %s11007_s1 }
0x192d   :  { %3285 = vrot.lane.b32.xlu1 %v10007_v27, %s11007_s1  ;;  %s11064_s1 = sld [smem:[#allocation20_spill]] }
0x19a3   :  { %v3170_v55 = vpop.xlane.xlu0 %3169 }
0x19a4   :  { %v3174_v53 = vsub.f32 %v3166_v47, %v3170_v55 }
0x19a5   :  { %v3173_v33 = vpop.xlane.xlu1 %3172 }
0x19a6   :  { %v3176_v12 = vmul.f32 1.442695, %v3174_v53  ;;  %v3175_v62 = vsub.f32 %v3167_v36, %v3173_v33 }
0x19a8   :  { %8564 = vpow2.f32 %v3176_v12  ;;  %v3178_v37 = vmul.f32 1.442695, %v3175_v62 }
0x19a9   :  { %v3288_v39 = vpop.permute.xlu1 %3287 }
0x19aa   :  { %8566 = vpow2.f32 %v3178_v37  ;;  %v3293_v42 = vsel %vm186_vm1, %v3288_v39, 0 }
0x19ad   :  { %v3286_v18 = vpop.permute.xlu1 %3285 }
0x19b2   :  { %v8565_v6 = vpop.eup %8564 }
0x19b3   :  { %v3180_v54 = vsel %vm1151_vm9, %v8565_v6, 0.0 }
0x19b4   :  { %v8567_v32 = vpop.eup %8566  ;;  %3181 = vadd.xlane.f32.xlu0 %v3180_v54 }
0x19b5   :  { %v3183_v8 = vsel %vm1151_vm9, %v8567_v32, 0.0 }
0x19b8   :  { %3184 = vadd.xlane.f32.xlu0 %v3183_v8 }
0x19ce   :  { %3191 = vrot.lane.b32.xlu0 %v10013_v9, %s11009_s2  ;;  %s11065_s2 = sld [smem:[#allocation22_spill]] }
0x1a41   :  { %v3182_v27 = vpop.xlane.xlu0 %3181 }
0x1a42   :  { %8568 = vrcp.f32 %v3182_v27 }
0x1a45   :  { %v3185_v7 = vpop.xlane.xlu0 %3184 }
0x1a46   :  { %8570 = vrcp.f32 %v3185_v7 }
0x1a49   :  { %v3192_v23 = vpop.permute.xlu0 %3191 }
0x1a4a   :  { %7968 = vmatpush3.bf16.msra.mxu0 %v3192_v23 }
0x1a4b   :  { %7979 = vmatprep.subr.bf16.mxu0 %v11053_v24 }
0x1a4c   :  { %v8569_v13 = vpop.eup %8568 }
0x1a4d   :  { %v3188_v2 = vmul.f32 %v8569_v13, %v8565_v6 }
0x1a50   :  { %v8571_v26 = vpop.eup %8570 }
0x1a51   :  { %v3189_v43 = vmul.f32 %v8571_v26, %v8567_v32 }
0x1a53   :  { %v3190_v47 = vpack.c.bf16 %v3189_v43, %v3188_v2  ;;  %v3455_v43 = vadd.f32 %v10170_v41, %v9963_v17 }
0x1a55   :  { %7970 = vmatmul.mubr.msk.bf16.vlgmr.msra.gmra.mrb[76].mxu0 %vm1151_vm9, %v3190_v47 }
0x1a56   :  { %7980 = vmatpush3.bf16.xpose.msra.mxu0 %v3293_v42  ;;  %7981 = vmatprep.mubr.msk.bf16.mxu0 %vm8816_vm8, %v11053_v24  ;;  %v7280_v42 = vld [vmem:[%s11060_s10] ss:$0 sm:$0xff] }
0x1a57   :  { %7991 = vmatprep.subr.bf16.mxu0 %v11053_v24 }
0x1a5d   :  { %7982 = vmatmul.mubr.msk.bf16.vlgmr.msra.gmra.mrb[80].mxu0 %vm186_vm1, %v3286_v18  ;;  %v3456_v18 = vadd.f32 %v10173_v60, %v9969_v16 }
0x1a5e   :  { %7992 = vmatpush3.bf16.msra.mxu0 %v10146_v10  ;;  %7993 = vmatprep.mubr.msk.bf16.mxu0 %vm8816_vm8, %v11053_v24 }
0x1b28   :  { %v3231_v36 = vpop.f32.mrb[76].mxu0 }
0x1b29   :  { %v7971_v21 = vpop.f32.mrb[77].mxu0 }
0x1b2a   :  { %v3234_v35 = vpop.f32.mrb[78].mxu0  ;;  %v10238_v21 = vadd.f32 %v7280_v42, %v3456_v18 }
0x1b2b   :  { %v3238_v49 = vpack.c.bf16 %v3234_v35, %v3231_v36  ;;  %v7972_v55 = vpop.f32.mrb[79].mxu0 }
0x1b2c   :  { %v3499_v17 = vsel %vm687_vm2, %v10238_v21, 0.0 }
0x1b2d   :  { %7976 = vmatmul.mubr.msk.bf16.vlgmr.msra.gmra.mrb[80].mxu1 %vm186_vm1, %v3238_v49 }
0x1b2e   :  { %7987 = vmatprep.mubr.msk.bf16.mxu1 %vm8816_vm8, %v11053_v24 }
0x1b30   :  { %v3329_v53 = vpop.f32.mrb[80].mxu0 }
0x1b31   :  { %v3336_v33 = vmul.f32 0.35355338, %v3329_v53  ;;  %v7983_v12 = vpop.f32.mrb[81].mxu0 }
0x1b32   :  { %v3332_v62 = vpop.f32.mrb[82].mxu0 }
0x1b33   :  { %v3337_v37 = vmul.f32 0.35355338, %v3332_v62  ;;  %v7984_v6 = vpop.f32.mrb[83].mxu0  ;;  %v3338_v10 = vsel %vm1151_vm9, %v3336_v33, -inf }
0x1b34   :  { %3339 = vmax.xlane.f32.xlu1 %v3338_v10 }
0x1b35   :  { %v3341_v54 = vsel %vm1151_vm9, %v3337_v37, -inf }
0x1b36   :  { %3342 = vmax.xlane.f32.xlu0 %v3341_v54 }
0x1b45   :  { %3361 = vrot.lane.b32.xlu1 %v10013_v9, %s11005_s7  ;;  %v10233_v9 = vadd.f32 %v7280_v42, %v3455_v43  ;;  %s11063_s7 = sld [smem:[#allocation19_spill]] }
0x1b47   :  { %v3496_v35 = vsel %vm687_vm2, %v10233_v9, 0.0 }
0x1bc1   :  { %v3340_v32 = vpop.xlane.xlu1 %3339 }
0x1bc2   :  { %v3344_v8 = vsub.f32 %v3336_v33, %v3340_v32 }
0x1bc3   :  { %v3343_v27 = vpop.xlane.xlu0 %3342 }
0x1bc4   :  { %v3346_v7 = vmul.f32 1.442695, %v3344_v8  ;;  %v3345_v23 = vsub.f32 %v3337_v37, %v3343_v27 }
0x1bc5   :  { %v3362_v13 = vpop.permute.xlu1 %3361 }
0x1bc6   :  { %8572 = vpow2.f32 %v3346_v7  ;;  %v3348_v26 = vmul.f32 1.442695, %v3345_v23  ;;  %7986 = vmatpush3.bf16.msra.mxu1 %v3362_v13  ;;  %v11061_v7 = vmov 0  }
0x1bc8   :  { %8574 = vpow2.f32 %v3348_v26 }
0x1bd0   :  { %v8573_v2 = vpop.eup %8572 }
0x1bd1   :  { %v3350_v39 = vsel %vm1151_vm9, %v8573_v2, 0.0 }
0x1bd2   :  { %v8575_v47 = vpop.eup %8574  ;;  %3351 = vadd.xlane.f32.xlu0 %v3350_v39 }
0x1bd3   :  { %v3353_v36 = vsel %vm1151_vm9, %v8575_v47, 0.0 }
0x1bd6   :  { %3354 = vadd.xlane.f32.xlu0 %v3353_v36 }
0x1bda   :  { %3497 = vadd.xlane.f32.xlu0 %v3496_v35 }
0x1bde   :  { %3500 = vadd.xlane.f32.xlu0 %v3499_v17 }
0x1c00   :  { %v3276_v41 = vpop.f32.mrb[80].mxu1 }
0x1c01   :  { %v3283_v49 = vadd.f32 %v3276_v41, %v10198_v45  ;;  %v7977_v55 = vpop.f32.mrb[81].mxu1 }
0x1c02   :  { %v3279_v53 = vpop.f32.mrb[82].mxu1 }
0x1c03   :  { %v3284_v16 = vadd.f32 %v3279_v53, %v10200_v30  ;;  %v7978_v60 = vpop.f32.mrb[83].mxu1 }
0x1c5f   :  { %v3352_v33 = vpop.xlane.xlu0 %3351 }
0x1c60   :  { %8576 = vrcp.f32 %v3352_v33 }
0x1c63   :  { %v3355_v12 = vpop.xlane.xlu0 %3354 }
0x1c64   :  { %8578 = vrcp.f32 %v3355_v12 }
0x1c67   :  { %v3498_v62 = vpop.xlane.xlu0 %3497 }
0x1c68   :  { %v3508_v37 = vmul.f32 0.03125, %v3498_v62 }
0x1c6a   :  { %v10247_v6 = vsub.f32 %v10233_v9, %v3508_v37  ;;  %v8577_v10 = vpop.eup %8576 }
0x1c6b   :  { %v3358_v8 = vmul.f32 %v8577_v10, %v8573_v2  ;;  %v3501_v18 = vpop.xlane.xlu0 %3500  ;;  %v3473_v10 = vld [vmem:[%s11062_s11 + $0x18] sm:$0xff] }
0x1c6c   :  { %v3516_v54 = vmul.f32 %v10247_v6, %v10247_v6  ;;  %v3509_v2 = vmul.f32 0.03125, %v3501_v18 }
0x1c6e   :  { %v8579_v32 = vpop.eup %8578  ;;  %v3520_v45 = vsel %vm687_vm2, %v3516_v54, 0.0  ;;  %v3513_v12 = vsub.f32 %v10238_v21, %v3509_v2  ;;  %v3470_v54 = vld [vmem:[%s11062_s11] sm:$0xff] }
0x1c6f   :  { %v3359_v27 = vmul.f32 %v8579_v32, %v8575_v47  ;;  %3521 = vadd.xlane.f32.xlu1 %v3520_v45  ;;  %v3472_v32 = vld [vmem:[%s11062_s11 + $0x10] sm:$0xff] }
0x1c70   :  { %v3566_v45 = vpack.c.bf16 %v3472_v32, %v3470_v54 }
0x1c71   :  { %v3360_v30 = vpack.c.bf16 %v3359_v27, %v3358_v8  ;;  %v3475_v8 = vld [vmem:[%s11062_s11 + $0x28] sm:$0xff]  ;;  %v3477_v27 = vld [vmem:[%s11062_s11 + $0x38] sm:$0xff] }
0x1c73   :  { %7988 = vmatmul.mubr.msk.bf16.vlgmr.msra.gmra.mrb[84].mxu1 %vm1151_vm9, %v3360_v30  ;;  %v3474_v30 = vld [vmem:[%s11062_s11 + $0x20] sm:$0xff] }
0x1c74   :  { %3619 = vmatprep.mubr.bf16.mxu1 %v11061_v7 }
0x1d46   :  { %v3401_v23 = vpop.f32.mrb[84].mxu1 }
0x1d47   :  { %v7989_v13 = vpop.f32.mrb[85].mxu1 }
0x1d48   :  { %v3404_v26 = vpop.f32.mrb[86].mxu1  ;;  %v3476_v13 = vld [vmem:[%s11062_s11 + $0x30] sm:$0xff] }
0x1d49   :  { %v3408_v43 = vpack.c.bf16 %v3404_v26, %v3401_v23  ;;  %v7990_v39 = vpop.f32.mrb[87].mxu1  ;;  %v3569_v23 = vpack.c.bf16 %v3477_v27, %v3475_v8  ;;  %v3568_v26 = vpack.c.bf16 %v3476_v13, %v3474_v30  ;;  %v7282_v8 = vld [vmem:[%s11064_s1] ss:$0 sm:$0xff] }
0x1d4b   :  { %7994 = vmatmul.mubr.msk.bf16.vlgmr.msra.gmra.mrb[84].mxu0 %vm186_vm1, %v3408_v43  ;;  %v3522_v43 = vpop.xlane.xlu1 %3521 }
0x1d4c   :  { %v3532_v39 = vmul.f32 0.03125, %v3522_v43 }
0x1e1e   :  { %v3446_v36 = vpop.f32.mrb[84].mxu0 }
0x1e1f   :  { %v3453_v35 = vadd.f32 %v3446_v36, %v3283_v49  ;;  %v7995_v17 = vpop.f32.mrb[85].mxu0 }
0x1e20   :  { %v3449_v41 = vpop.f32.mrb[86].mxu0 }
0x1e21   :  { %v3457_v47 = vadd.f32 %v3453_v35, %v9966_v63  ;;  %v3454_v55 = vadd.f32 %v3449_v41, %v3284_v16  ;;  %v7996_v53 = vpop.f32.mrb[87].mxu0  ;;  %v3517_v16 = vmul.f32 %v3513_v12, %v3513_v12  ;;  %v3536_v35 = vadd.f32 1e-05, %v3532_v39 }
0x1e23   :  { %v10256_v60 = vadd.f32 %v7280_v42, %v3457_v47  ;;  %v3458_v33 = vadd.f32 %v3454_v55, %v9974_v5  ;;  %v3523_v37 = vsel %vm687_vm2, %v3517_v16, 0.0  ;;  %v3471_v5 = vld [vmem:[%s11062_s11 + $0x8] sm:$0xff]  ;;  %8580 = vrsqrt.f32 %v3536_v35 }
0x1e25   :  { %v10260_v62 = vadd.f32 %v7280_v42, %v3458_v33  ;;  %v3502_v49 = vsel %vm687_vm2, %v10256_v60, 0.0  ;;  %v3567_v42 = vpack.c.bf16 %v3473_v10, %v3471_v5 }
0x1e26   :  { %3503 = vadd.xlane.f32.xlu0 %v3502_v49 }
0x1e27   :  { %v3505_v63 = vsel %vm687_vm2, %v10260_v62, 0.0  ;;  %3587 = vmatprep.subr.bf16.mxu1 %v3567_v42  ;;  %v7281_v42 = vld [vmem:[%s11063_s7] ss:$0 sm:$0xff] }
0x1e28   :  { %3588 = vmatpush1.bf16.msra.mxu1 %v3566_v45 }
0x1e29   :  { %3589 = vmatprep.subr.bf16.mxu1 %v3569_v23 }
0x1e2a   :  { %3506 = vadd.xlane.f32.xlu0 %v3505_v63 }
0x1e2c   :  { %3590 = vmatpush1.bf16.msra.mxu1 %v3568_v26 }
0x1e2d   :  { %v8581_v5 = vpop.eup %8580 }
0x1e2e   :  { %3524 = vadd.xlane.f32.xlu0 %v3523_v37  ;;  %v3544_v10 = vmul.f32 %v8581_v5, %v10247_v6 }
0x1e30   :  { %v3552_v32 = vmul.f32 %v7281_v42, %v3544_v10 }
0x1e32   :  { %v3560_v30 = vadd.f32 %v7282_v8, %v3552_v32 }
0x1eb3   :  { %v3504_v18 = vpop.xlane.xlu0 %3503 }
0x1eb4   :  { %v3510_v36 = vmul.f32 0.03125, %v3504_v18 }
0x1eb6   :  { %v3514_v17 = vsub.f32 %v10256_v60, %v3510_v36 }
0x1eb7   :  { %v3507_v41 = vpop.xlane.xlu0 %3506 }
0x1eb8   :  { %v3511_v2 = vmul.f32 0.03125, %v3507_v41  ;;  %v3518_v47 = vmul.f32 %v3514_v17, %v3514_v17 }
0x1eba   :  { %v3515_v55 = vsub.f32 %v10260_v62, %v3511_v2  ;;  %v3526_v53 = vsel %vm687_vm2, %v3518_v47, 0.0 }
0x1ebb   :  { %3527 = vadd.xlane.f32.xlu0 %v3526_v53  ;;  %v3525_v33 = vpop.xlane.xlu0 %3524 }
0x1ebc   :  { %v3533_v49 = vmul.f32 0.03125, %v3525_v33  ;;  %v3519_v63 = vmul.f32 %v3515_v55, %v3515_v55 }
0x1ebe   :  { %v3537_v16 = vadd.f32 1e-05, %v3533_v49  ;;  %v3529_v37 = vsel %vm687_vm2, %v3519_v63, 0.0 }
0x1ebf   :  { %3530 = vadd.xlane.f32.xlu0 %v3529_v37 }
0x1ec0   :  { %8582 = vrsqrt.f32 %v3537_v16  ;;  %v3478_v16 = vld [vmem:[%s11065_s2] ss:$2 sm:$0x3] }
0x1ec1   :  { %v10287_v37 = vrot.slane %v3478_v16, %v9909_v44 }
0x1eca   :  { %v8583_v54 = vpop.eup %8582 }
0x1ecb   :  { %v3545_v45 = vmul.f32 %v8583_v54, %v3513_v12 }
0x1ecd   :  { %v3553_v27 = vmul.f32 %v7281_v42, %v3545_v45 }
0x1ecf   :  { %v3561_v23 = vadd.f32 %v7282_v8, %v3553_v27 }
0x1ed1   :  { %v3564_v13 = vpack.c.bf16 %v3561_v23, %v3560_v30 }
0x1ed3   :  { %7283 = vmatmul.mubr.msk.bf16.vlgmr.msra.gmra.mrb[88].mxu1 %vm687_vm2, %v3564_v13 }
0x1ed4   :  { %3629 = vmatprep.mubr.bf16.mxu1 %v11061_v7 }
0x1f48   :  { %v3528_v26 = vpop.xlane.xlu0 %3527 }
0x1f49   :  { %v3534_v43 = vmul.f32 0.03125, %v3528_v26 }
0x1f4b   :  { %v3538_v39 = vadd.f32 1e-05, %v3534_v43 }
0x1f4c   :  { %v3531_v18 = vpop.xlane.xlu0 %3530 }
0x1f4d   :  { %8584 = vrsqrt.f32 %v3538_v39  ;;  %v3535_v6 = vmul.f32 0.03125, %v3531_v18 }
0x1f4f   :  { %v3539_v36 = vadd.f32 1e-05, %v3535_v6 }
0x1f51   :  { %8586 = vrsqrt.f32 %v3539_v36 }
0x1f57   :  { %v8585_v35 = vpop.eup %8584 }
0x1f58   :  { %v3546_v12 = vmul.f32 %v8585_v35, %v3514_v17 }
0x1f5a   :  { %v3554_v47 = vmul.f32 %v7281_v42, %v3546_v12 }
0x1f5b   :  { %v8587_v41 = vpop.eup %8586 }
0x1f5c   :  { %v3547_v2 = vmul.f32 %v8587_v41, %v3515_v55  ;;  %v3562_v33 = vadd.f32 %v7282_v8, %v3554_v47 }
0x1f5e   :  { %v3555_v53 = vmul.f32 %v7281_v42, %v3547_v2 }
0x1f60   :  { %v3563_v49 = vadd.f32 %v7282_v8, %v3555_v53 }
0x1f62   :  { %v3565_v63 = vpack.c.bf16 %v3563_v49, %v3562_v33 }
0x1f64   :  { %7284 = vmatmul.mubr.msk.bf16.gmra.mrb[92].mxu1 %vm687_vm2, %v3565_v63 }
0x1fa6   :  { %v10289_v5 = vpop.f32.mrb[88].mxu1 }
0x1fa7   :  { %v3623_v10 = vpop.f32.mrb[89].mxu1 }
0x1fa8   :  { %v3624_v54 = vadd.f32 %v3623_v10, %v10287_v37  ;;  %v10292_v32 = vpop.f32.mrb[90].mxu1 }
0x1fa9   :  { %v3627_v17 = vpop.f32.mrb[91].mxu1 }
0x1faa   :  { %v3644_v55 = vmul.f32 0.70710677, %v3624_v54  ;;  %v10295_v42 = vadd.f32 %v3627_v17, %v10287_v37 }
0x1fac   :  { %v3648_v45 = vand.u32 2147483647, %v3644_v55  ;;  %v10298_v8 = vmul.f32 0.70710677, %v10295_v42  ;;  %vm3728_vm15 = vcmp.lt.f32.partialorder %v3644_v55, 0.0 }
0x1fae   :  { %v3652_v27 = vmul.f32 0.3275911, %v3648_v45  ;;  %v3649_v30 = vand.u32 2147483647, %v10298_v8  ;;  %v3704_v43 = vsub.f32 0.0, %v3648_v45  ;;  %vm3729_vm5 = vcmp.lt.f32.partialorder %v10298_v8, 0.0 }
0x1fb0   :  { %v3656_v23 = vadd.f32 1.0, %v3652_v27  ;;  %v3653_v13 = vmul.f32 0.3275911, %v3649_v30  ;;  %v3705_v39 = vsub.f32 0.0, %v3649_v30  ;;  %v3708_v6 = vmul.f32 %v3704_v43, %v3648_v45 }
0x1fb2   :  { %8588 = vrcp.f32 %v3656_v23  ;;  %v3657_v26 = vadd.f32 1.0, %v3653_v13  ;;  %v3709_v41 = vmul.f32 %v3705_v39, %v3649_v30  ;;  %v3712_v2 = vmul.f32 1.442695, %v3708_v6 }
0x1fb4   :  { %8590 = vrcp.f32 %v3657_v26  ;;  %v3714_v63 = vmul.f32 1.442695, %v3709_v41  ;;  %v3479_v41 = vld [vmem:[%s11066_s23] sm:$0xff] }
0x1fb5   :  { %8592 = vpow2.f32 %v3712_v2 }
0x1fb6   :  { %8594 = vpow2.f32 %v3714_v63 }
0x1fbc   :  { %v8589_v18 = vpop.eup %8588 }
0x1fbd   :  { %v3668_v36 = vmul.f32 1.0614054, %v8589_v18 }
0x1fbe   :  { %v8591_v35 = vpop.eup %8590 }
0x1fbf   :  { %v3672_v12 = vadd.f32 -1.4531521, %v3668_v36  ;;  %v3669_v47 = vmul.f32 1.0614054, %v8591_v35  ;;  %v8593_v6 = vpop.eup %8592 }
0x1fc1   :  { %v3676_v53 = vmul.f32 %v8589_v18, %v3672_v12  ;;  %v3673_v33 = vadd.f32 -1.4531521, %v3669_v47  ;;  %v3480_v47 = vld [vmem:[%s11066_s23 + $0x8] sm:$0xff] }
0x1fc3   :  { %v3680_v49 = vadd.f32 1.4214138, %v3676_v53  ;;  %v3677_v10 = vmul.f32 %v8591_v35, %v3673_v33  ;;  %v3754_v53 = vpack.c.bf16 %v3480_v47, %v3479_v41  ;;  %v8595_v33 = vpop.eup %8594 }
0x1fc5   :  { %v3684_v17 = vmul.f32 %v8589_v18, %v3680_v49  ;;  %v3681_v27 = vadd.f32 1.4214138, %v3677_v10  ;;  %7997 = vmatprep.subr.bf16.mxu0 %v3754_v53 }
0x1fc6   :  { %7998 = vmatpush3.bf16.msra.mxu0 %v3754_v53  ;;  %v3486_v53 = vld [vmem:[%s11066_s23 + $0x38] sm:$0xff] }
0x1fc7   :  { %v3688_v23 = vadd.f32 -0.28449672, %v3684_v17  ;;  %v3685_v13 = vmul.f32 %v8591_v35, %v3681_v27  ;;  %v3481_v17 = vld [vmem:[%s11066_s23 + $0x10] sm:$0xff]  ;;  %v3482_v27 = vld [vmem:[%s11066_s23 + $0x18] sm:$0xff] }
0x1fc9   :  { %v3692_v45 = vmul.f32 %v8589_v18, %v3688_v23  ;;  %v3689_v26 = vadd.f32 -0.28449672, %v3685_v13  ;;  %v10306_v23 = vrot.slane %v3478_v16, %v9927_v50  ;;  %v3755_v13 = vpack.c.bf16 %v3482_v27, %v3481_v17  ;;  %v3490_v17 = vld [vmem:[%s11066_s23 + $0x58] sm:$0xff] }
0x1fcb   :  { %v3696_v43 = vadd.f32 0.2548296, %v3692_v45  ;;  %v3693_v30 = vmul.f32 %v8591_v35, %v3689_v26  ;;  %v3640_v26 = vmul.f32 0.5, %v3624_v54  ;;  %7999 = vmatprep.subr.bf16.mxu0 %v3755_v13  ;;  %v3641_v54 = vmul.f32 0.5, %v10295_v42  ;;  %v3487_v42 = vld [vmem:[%s11066_s23 + $0x40] sm:$0xff] }
0x1fcc   :  { %8000 = vmatpush3.bf16.msra.mxu0 %v3755_v13  ;;  %v3626_v8 = vadd.f32 %v10292_v32, %v10306_v23  ;;  %v3489_v32 = vld [vmem:[%s11066_s23 + $0x50] sm:$0xff]  ;;  %v3492_v13 = vld [vmem:[%s11066_s23 + $0x68] sm:$0xff] }
0x1fcd   :  { %v3700_v39 = vmul.f32 %v8589_v18, %v3696_v43  ;;  %v3697_v36 = vadd.f32 0.2548296, %v3693_v30  ;;  %v3483_v30 = vld [vmem:[%s11066_s23 + $0x20] sm:$0xff]  ;;  %v3759_v27 = vpack.c.bf16 %v3490_v17, %v3489_v32 }
0x1fcf   :  { %v3720_v12 = vmul.f32 %v8593_v6, %v3700_v39  ;;  %v3701_v2 = vmul.f32 %v8591_v35, %v3697_v36  ;;  %v3484_v39 = vld [vmem:[%s11066_s23 + $0x28] sm:$0xff]  ;;  %v3622_v6 = vadd.f32 %v10289_v5, %v10306_v23 }
0x1fd0   :  { %v3756_v55 = vpack.c.bf16 %v3484_v39, %v3483_v30 }
0x1fd1   :  { %v3724_v49 = vsub.f32 1.0, %v3720_v12  ;;  %v3721_v10 = vmul.f32 %v8595_v33, %v3701_v2  ;;  %v3485_v2 = vld [vmem:[%s11066_s23 + $0x30] sm:$0xff] }
0x1fd2   :  { %8001 = vmatprep.subr.bf16.mxu0 %v3756_v55  ;;  %v3757_v5 = vpack.c.bf16 %v3486_v53, %v3485_v2 }
0x1fd3   :  { %v3732_v63 = vsub.f32 0.0, %v3724_v49  ;;  %v3725_v18 = vsub.f32 1.0, %v3721_v10  ;;  %8002 = vmatpush3.bf16.msra.mxu0 %v3756_v55  ;;  %v3488_v10 = vld [vmem:[%s11066_s23 + $0x48] sm:$0xff] }
0x1fd4   :  { %8003 = vmatprep.subr.bf16.mxu0 %v3757_v5 }
0x1fd5   :  { %v3736_v45 = vsel %vm3728_vm15, %v3732_v63, %v3724_v49  ;;  %v3733_v43 = vsub.f32 0.0, %v3725_v18  ;;  %v3758_v63 = vpack.c.bf16 %v3488_v10, %v3487_v42 }
0x1fd6   :  { %v3740_v35 = vadd.f32 1.0, %v3736_v45 }
0x1fd7   :  { %v3737_v36 = vsel %vm3729_vm5, %v3733_v43, %v3725_v18  ;;  %8004 = vmatpush3.bf16.msra.mxu0 %v3757_v5  ;;  %v3491_v18 = vld [vmem:[%s11066_s23 + $0x60] sm:$0xff] }
0x1fd8   :  { %v3744_v16 = vmul.f32 %v3740_v35, %v3640_v26  ;;  %v3741_v12 = vadd.f32 1.0, %v3737_v36  ;;  %8005 = vmatprep.subr.bf16.mxu0 %v3758_v63  ;;  %v3760_v45 = vpack.c.bf16 %v3492_v13, %v3491_v18  ;;  %v3493_v26 = vld [vmem:[%s11066_s23 + $0x70] sm:$0xff]  ;;  %v3494_v35 = vld [vmem:[%s11066_s23 + $0x78] sm:$0xff] }
0x1fd9   :  { %v3761_v43 = vpack.c.bf16 %v3494_v35, %v3493_v26 }
0x1fda   :  { %v3748_v41 = vmul.f32 %v3744_v16, %v3622_v6  ;;  %v3745_v47 = vmul.f32 %v3741_v12, %v3641_v54 }
0x1fdb   :  { %8006 = vmatpush3.bf16.msra.mxu0 %v3758_v63 }
0x1fdc   :  { %v3749_v33 = vmul.f32 %v3745_v47, %v3626_v8  ;;  %8007 = vmatprep.subr.bf16.mxu0 %v3759_v27 }
0x1fde   :  { %v3752_v49 = vpack.c.bf16 %v3749_v33, %v3748_v41 }
0x1fdf   :  { %8008 = vmatpush3.bf16.msra.mxu0 %v3759_v27 }
0x1fe0   :  { %8013 = vmatprep.mubr.bf16.mxu0 %v3752_v49  ;;  %8009 = vmatprep.subr.bf16.mxu0 %v3760_v45 }
0x1fe3   :  { %8010 = vmatpush3.bf16.msra.mxu0 %v3760_v45 }
0x1fe4   :  { %8011 = vmatprep.subr.bf16.mxu0 %v3761_v43 }
0x1fe7   :  { %8012 = vmatpush3.bf16.msra.mxu0 %v3761_v43 }
0x1fe8   :  { %8061 = vmatprep.subr.bf16.mxu0 %v11053_v24 }
0x2037   :  { %v3631_v30 = vpop.f32.mrb[92].mxu1 }
0x2038   :  { %v3633_v39 = vpop.f32.mrb[93].mxu1 }
0x2039   :  { %v3634_v6 = vadd.f32 %v3633_v39, %v10287_v37  ;;  %v3635_v16 = vpop.f32.mrb[94].mxu1 }
0x203a   :  { %v3637_v36 = vpop.f32.mrb[95].mxu1 }
0x203b   :  { %v3646_v55 = vmul.f32 0.70710677, %v3634_v6  ;;  %v3638_v54 = vadd.f32 %v3637_v36, %v10287_v37 }
0x203d   :  { %v3650_v12 = vand.u32 2147483647, %v3646_v55  ;;  %v3647_v41 = vmul.f32 0.70710677, %v3638_v54  ;;  %vm3730_vm6 = vcmp.lt.f32.partialorder %v3646_v55, 0.0 }
0x203f   :  { %v3654_v8 = vmul.f32 0.3275911, %v3650_v12  ;;  %v3651_v47 = vand.u32 2147483647, %v3647_v41  ;;  %v3706_v33 = vsub.f32 0.0, %v3650_v12  ;;  %vm3731_vm11 = vcmp.lt.f32.partialorder %v3647_v41, 0.0 }
0x2041   :  { %v3658_v2 = vadd.f32 1.0, %v3654_v8  ;;  %v3655_v53 = vmul.f32 0.3275911, %v3651_v47  ;;  %v3707_v49 = vsub.f32 0.0, %v3651_v47  ;;  %v3710_v10 = vmul.f32 %v3706_v33, %v3650_v12 }
0x2043   :  { %8596 = vrcp.f32 %v3658_v2  ;;  %v3659_v5 = vadd.f32 1.0, %v3655_v53  ;;  %v3711_v27 = vmul.f32 %v3707_v49, %v3651_v47  ;;  %v3716_v18 = vmul.f32 1.442695, %v3710_v10 }
0x2045   :  { %8598 = vrcp.f32 %v3659_v5  ;;  %v3718_v35 = vmul.f32 1.442695, %v3711_v27 }
0x2046   :  { %8600 = vpow2.f32 %v3716_v18 }
0x2047   :  { %8602 = vpow2.f32 %v3718_v35 }
0x204d   :  { %v8597_v42 = vpop.eup %8596 }
0x204e   :  { %v3670_v63 = vmul.f32 1.0614054, %v8597_v42 }
0x204f   :  { %v8599_v32 = vpop.eup %8598 }
0x2050   :  { %v3674_v17 = vadd.f32 -1.4531521, %v3670_v63  ;;  %v3671_v13 = vmul.f32 1.0614054, %v8599_v32  ;;  %v8601_v63 = vpop.eup %8600 }
0x2052   :  { %v3678_v37 = vmul.f32 %v8597_v42, %v3674_v17  ;;  %v3675_v45 = vadd.f32 -1.4531521, %v3671_v13  ;;  %v8603_v17 = vpop.eup %8602 }
0x2054   :  { %v3682_v26 = vadd.f32 1.4214138, %v3678_v37  ;;  %v3679_v43 = vmul.f32 %v8599_v32, %v3675_v45 }
0x2056   :  { %v3686_v39 = vmul.f32 %v8597_v42, %v3682_v26  ;;  %v3683_v36 = vadd.f32 1.4214138, %v3679_v43  ;;  %v3642_v26 = vmul.f32 0.5, %v3634_v6  ;;  %v7285_v6 = vld [vmem:[%s11067_s26] ss:$0 sm:$0xff] }
0x2058   :  { %v3690_v8 = vadd.f32 -0.28449672, %v3686_v39  ;;  %v3687_v2 = vmul.f32 %v8599_v32, %v3683_v36  ;;  %v3632_v39 = vadd.f32 %v3631_v30, %v10306_v23 }
0x205a   :  { %v3694_v53 = vmul.f32 %v8597_v42, %v3690_v8  ;;  %v3691_v5 = vadd.f32 -0.28449672, %v3687_v2  ;;  %v3643_v8 = vmul.f32 0.5, %v3638_v54 }
0x205c   :  { %v3698_v12 = vadd.f32 0.2548296, %v3694_v53  ;;  %v3695_v33 = vmul.f32 %v8599_v32, %v3691_v5 }
0x205e   :  { %v3702_v50 = vmul.f32 %v8597_v42, %v3698_v12  ;;  %v3699_v47 = vadd.f32 0.2548296, %v3695_v33 }
0x2060   :  { %v3722_v49 = vmul.f32 %v8601_v63, %v3702_v50  ;;  %v3703_v10 = vmul.f32 %v8599_v32, %v3699_v47  ;;  %v3636_v32 = vadd.f32 %v3635_v16, %v10306_v23 }
0x2062   :  { %v3726_v13 = vsub.f32 1.0, %v3722_v49  ;;  %v3723_v37 = vmul.f32 %v8603_v17, %v3703_v10 }
0x2064   :  { %v3734_v27 = vsub.f32 0.0, %v3726_v13  ;;  %v3727_v18 = vsub.f32 1.0, %v3723_v37 }
0x2066   :  { %v3738_v45 = vsel %vm3730_vm6, %v3734_v27, %v3726_v13  ;;  %v3735_v43 = vsub.f32 0.0, %v3727_v18 }
0x2067   :  { %v3742_v35 = vadd.f32 1.0, %v3738_v45 }
0x2068   :  { %v3739_v42 = vsel %vm3731_vm11, %v3735_v43, %v3727_v18 }
0x2069   :  { %v3746_v36 = vmul.f32 %v3742_v35, %v3642_v26  ;;  %v3743_v2 = vadd.f32 1.0, %v3739_v42 }
0x206b   :  { %v3750_v50 = vmul.f32 %v3746_v36, %v3632_v39  ;;  %v3747_v53 = vmul.f32 %v3743_v2, %v3643_v8 }
0x206d   :  { %v3751_v5 = vmul.f32 %v3747_v53, %v3636_v32 }
0x206f   :  { %v3753_v12 = vpack.c.bf16 %v3751_v5, %v3750_v50 }
0x2071   :  { %8014 = vmatmul.mubr.bf16.vlgmr.msra.gmra.mrb[88].mxu0 %v3753_v12 }
0x2072   :  { %8069 = vmatprep.mubr.msk.bf16.mxu0 %vm8816_vm8, %v11053_v24 }
0x2144   :  { %v8015_v55 = vpop.f32.mrb[88].mxu0 }
0x2145   :  { %v3809_v33 = vadd.f32 %v8015_v55, %v7285_v6  ;;  %v3800_v41 = vpop.f32.mrb[89].mxu0 }
0x2146   :  { %v3801_v63 = vadd.f32 %v7285_v6, %v3800_v41  ;;  %v8016_v30 = vpop.f32.mrb[90].mxu0  ;;  %v7293_v41 = vld [vmem:[%s8890_s24 + $0x28] sm:$0xff] }
0x2147   :  { %v10335_v47 = vadd.f32 %v3809_v33, %v10256_v60  ;;  %v3803_v54 = vpop.f32.mrb[91].mxu0  ;;  %v3812_v10 = vadd.f32 %v8016_v30, %v7285_v6  ;;  %v7292_v33 = vld [vmem:[%s8890_s24 + $0x20] sm:$0xff]  ;;  %v7294_v30 = vld [vmem:[%s8890_s24 + $0x30] sm:$0xff] }
0x2148   :  { %v10338_v49 = vadd.f32 %v3801_v63, %v10233_v9  ;;  %v3804_v23 = vadd.f32 %v7285_v6, %v3803_v54  ;;  %v3980_v63 = vpack.c.bf16 %v7293_v41, %v7292_v33  ;;  %v7295_v54 = vld [vmem:[%s8890_s24 + $0x38] sm:$0xff]  ;;  %s11094_s24 = smov 80  }
0x2149   :  { %v3827_v16 = vsel %vm687_vm2, %v10335_v47, 0.0  ;;  %v10348_v60 = vadd.f32 %v3812_v10, %v10260_v62  ;;  %v7300_v10 = vld [vmem:[%s8900_s6 + $0x18] sm:$0x7f] }
0x214a   :  { %3828 = vadd.xlane.f32.xlu0 %v3827_v16  ;;  %v10343_v17 = vadd.f32 %v3804_v23, %v10238_v21  ;;  %v3821_v13 = vsel %vm687_vm2, %v10338_v49, 0.0  ;;  %8017 = vmatprep.subr.bf16.mxu1 %v3980_v63  ;;  %v3981_v23 = vpack.c.bf16 %v7295_v54, %v7294_v30  ;;  %v7299_v16 = vld [vmem:[%s8900_s6 + $0x10] sm:$0xff]  ;;  %v7287_v54 = vld [vmem:[%s8865_s29 + $0x1] ss:$0 sm:$0xff]  ;;  %s11093_s29 = smov 88   ;;  %s11096_s6 = smov 72  }
0x214b   :  { %v3830_v37 = vsel %vm687_vm2, %v10348_v60, 0.0  ;;  %8018 = vmatpush3.bf16.msra.mxu1 %v3980_v63 }
0x214c   :  { %v3824_v9 = vsel %vm687_vm2, %v10343_v17, 0.0  ;;  %8019 = vmatprep.subr.bf16.mxu1 %v3981_v23 }
0x214e   :  { %3822 = vadd.xlane.f32.xlu0 %v3821_v13  ;;  %v4059_v13 = vpack.c.bf16 %v7300_v10, %v7299_v16 }
0x214f   :  { %8020 = vmatpush3.bf16.msra.mxu1 %v3981_v23 }
0x2152   :  { %3825 = vadd.xlane.f32.xlu0 %v3824_v9  ;;  %v4085_v9 = vand.u32 %v4059_v13, %v9400_v14 }
0x2154   :  { %8025 = vmatprep.subr.bf16.mxu1 %v4085_v9 }
0x2156   :  { %3831 = vadd.xlane.f32.xlu0 %v3830_v37 }
0x21d7   :  { %v3829_v27 = vpop.xlane.xlu0 %3828 }
0x21d8   :  { %v3835_v18 = vmul.f32 0.03125, %v3829_v27 }
0x21da   :  { %v3839_v21 = vsub.f32 %v10335_v47, %v3835_v18 }
0x21db   :  { %v3823_v45 = vpop.xlane.xlu0 %3822 }
0x21dc   :  { %v3833_v26 = vmul.f32 0.03125, %v3823_v45  ;;  %v3843_v35 = vmul.f32 %v3839_v21, %v3839_v21 }
0x21de   :  { %v3837_v43 = vsub.f32 %v10338_v49, %v3833_v26  ;;  %v3851_v62 = vsel %vm687_vm2, %v3843_v35, 0.0 }
0x21df   :  { %3852 = vadd.xlane.f32.xlu1 %v3851_v62  ;;  %v3826_v39 = vpop.xlane.xlu0 %3825 }
0x21e0   :  { %v3834_v36 = vmul.f32 0.03125, %v3826_v39  ;;  %v3841_v42 = vmul.f32 %v3837_v43, %v3837_v43 }
0x21e2   :  { %v3838_v8 = vsub.f32 %v10343_v17, %v3834_v36  ;;  %v3845_v2 = vsel %vm687_vm2, %v3841_v42, 0.0 }
0x21e3   :  { %3846 = vadd.xlane.f32.xlu0 %v3845_v2  ;;  %v3832_v50 = vpop.xlane.xlu0 %3831 }
0x21e4   :  { %v3836_v32 = vmul.f32 0.03125, %v3832_v50  ;;  %v3842_v53 = vmul.f32 %v3838_v8, %v3838_v8 }
0x21e6   :  { %v3840_v5 = vsub.f32 %v10348_v60, %v3836_v32  ;;  %v3848_v12 = vsel %vm687_vm2, %v3842_v53, 0.0 }
0x21e7   :  { %3849 = vadd.xlane.f32.xlu0 %v3848_v12 }
0x21e8   :  { %v3844_v6 = vmul.f32 %v3840_v5, %v3840_v5 }
0x21ea   :  { %v3854_v55 = vsel %vm687_vm2, %v3844_v6, 0.0  ;;  %v7286_v6 = vld [vmem:[%s8860_s25 + $0x1] ss:$0 sm:$0xff]  ;;  %s11092_s25 = smov 96  }
0x21eb   :  { %3855 = vadd.xlane.f32.xlu0 %v3854_v55 }
0x226c   :  { %v3853_v37 = vpop.xlane.xlu1 %3852 }
0x226d   :  { %v3859_v27 = vmul.f32 0.03125, %v3853_v37 }
0x226f   :  { %v3863_v26 = vadd.f32 1e-05, %v3859_v27 }
0x2270   :  { %v3847_v18 = vpop.xlane.xlu0 %3846 }
0x2271   :  { %v3857_v45 = vmul.f32 0.03125, %v3847_v18  ;;  %v7298_v18 = vld [vmem:[%s8895_s30 + $0x4] sm:$0xf]  ;;  %s11095_s30 = smov 104  }
0x2273   :  { %v3861_v35 = vadd.f32 1e-05, %v3857_v45 }
0x2274   :  { %v3850_v62 = vpop.xlane.xlu0 %3849 }
0x2275   :  { %8604 = vrsqrt.f32 %v3861_v35  ;;  %v3858_v39 = vmul.f32 0.03125, %v3850_v62  ;;  %v4047_v35 = vpack.c.bf16 %v7298_v18, %v7298_v18  ;;  %v11070_v62 = vpack.c.bf16 %v9569_v3, %v9564_v15  ;;  %v11077_v15 = vld [vmem:[#allocation28_spill] sm:$0xff] }
0x2276   :  { %8606 = vrsqrt.f32 %v3863_v26 }
0x2277   :  { %v3862_v36 = vadd.f32 1e-05, %v3858_v39  ;;  %v11089_v39 = vld [vmem:[#allocation31_spill] sm:$0xff] }
0x2278   :  { %v3856_v42 = vpop.xlane.xlu0 %3855 }
0x2279   :  { %8608 = vrsqrt.f32 %v3862_v36  ;;  %v3860_v2 = vmul.f32 0.03125, %v3856_v42 }
0x227b   :  { %v3864_v50 = vadd.f32 1e-05, %v3860_v2 }
0x227d   :  { %8610 = vrsqrt.f32 %v3864_v50 }
0x227f   :  { %v8605_v14 = vpop.eup %8604 }
0x2280   :  { %v3869_v32 = vmul.f32 %v8605_v14, %v3837_v43  ;;  %v8607_v53 = vpop.eup %8606 }
0x2281   :  { %v3871_v55 = vmul.f32 %v8607_v53, %v3839_v21  ;;  %v11068_v21 = vpack.c.bf16 %v9507_v46, %v9501_v28  ;;  %v11071_v28 = vpack.c.bf16 %v9536_v56, %v9533_v25  ;;  %v11072_v46 = vpack.c.bf16 %v9646_v11, %v9643_v1  ;;  %v11076_v56 = vld [vmem:[#allocation29_spill] sm:$0xff]  ;;  %v11079_v1 = vld [vmem:[#allocation27_spill] sm:$0xff]  ;;  %v11080_v11 = vld [vmem:[#allocation26_spill] sm:$0xff] }
0x2282   :  { %v3877_v41 = vmul.f32 %v7286_v6, %v3869_v32  ;;  %v11075_v25 = vpack.c.bf16 %v9725_v58, %v9722_v29  ;;  %v11078_v3 = vpack.c.bf16 %v11076_v56, %v11077_v15  ;;  %v11085_v29 = vpack.c.bf16 %v9655_v48, %v9652_v61 }
0x2283   :  { %v8609_v12 = vpop.eup %8608  ;;  %v3879_v13 = vmul.f32 %v7286_v6, %v3871_v55  ;;  %v11086_v58 = vpack.c.bf16 %v9658_v40, %v9649_v34 }
0x2284   :  { %v3870_v33 = vmul.f32 %v8609_v12, %v3838_v8  ;;  %v3885_v16 = vadd.f32 %v7287_v54, %v3877_v41  ;;  %v4209_v8 = vsel %vm1043_vm7, %v4047_v35, 0 }
0x2285   :  { %v3887_v43 = vadd.f32 %v7287_v54, %v3879_v13 }
0x2286   :  { %v3878_v63 = vmul.f32 %v7286_v6, %v3870_v33 }
0x2287   :  { %v8611_v30 = vpop.eup %8610 }
0x2288   :  { %v3872_v23 = vmul.f32 %v8611_v30, %v3840_v5  ;;  %v3886_v10 = vadd.f32 %v7287_v54, %v3878_v63  ;;  %v11069_v5 = vpack.c.bf16 %v9474_v20, %v9471_v59  ;;  %v11073_v59 = vpack.c.bf16 %v9617_v4, %v9607_v22  ;;  %v11082_v4 = vld [vmem:[#allocation30_spill] sm:$0xff] }
0x2289   :  { %v11074_v20 = vpack.c.bf16 %v9701_v52, %v9691_v0  ;;  %v11081_v22 = vpack.c.bf16 %v11079_v1, %v11080_v11  ;;  %v11083_v0 = vpack.c.bf16 %v9572_v57, %v11082_v4  ;;  %v11084_v52 = vpack.c.bf16 %v9610_v31, %v9601_v38 }
0x228a   :  { %v3880_v37 = vmul.f32 %v7286_v6, %v3872_v23  ;;  %v3978_v27 = vpack.c.bf16 %v3886_v10, %v3885_v16  ;;  %v11087_v57 = vpack.c.bf16 %v9705_v19, %v9694_v51 }
0x228c   :  { %v3888_v45 = vadd.f32 %v7287_v54, %v3880_v37  ;;  %8021 = vmatprep.mubr.msk.bf16.mxu1 %vm687_vm2, %v3978_v27 }
0x228e   :  { %v3979_v26 = vpack.c.bf16 %v3888_v45, %v3887_v43 }
0x2290   :  { %8022 = vmatmul.mubr.msk.bf16.vlgmr.msra.gmra.mrb[96].mxu1 %vm687_vm2, %v3979_v26 }
0x2291   :  { %8027 = vmatprep.mubr.msk.bf16.mxu1 %vm369_vm3, %v11068_v21  ;;  %8026 = vmatpush3.bf16.msra.mxu1 %v4085_v9  ;;  %v11088_v9 = vld [vmem:[#allocation32_spill] sm:$0xff] }
0x2292   :  { %8380 = vmatprep.subr.msk.bf16.mxu1 %vm1043_vm7, %v4047_v35  ;;  %v11090_v38 = vpack.c.bf16 %v11088_v9, %v11089_v39 }
0x2298   :  { %8028 = vmatmul.mubr.msk.bf16.vlgmr.msra.gmra.mrb[100].mxu1 %vm369_vm3, %v11069_v5 }
0x2299   :  { %8031 = vmatprep.mubr.msk.bf16.mxu1 %vm369_vm3, %v11070_v62  ;;  %8044 = vmatpush3.bf16.msra.mxu1 %v4209_v8 }
0x229a   :  { %8091 = vmatprep.subr.bf16.mxu1 %v11053_v24 }
0x22a0   :  { %8032 = vmatmul.mubr.msk.bf16.gmra.mrb[104].mxu1 %vm369_vm3, %v11071_v28 }
0x22a1   :  { %8035 = vmatprep.mubr.msk.bf16.mxu1 %vm369_vm3, %v11072_v46 }
0x22a8   :  { %8036 = vmatmul.mubr.msk.bf16.gmra.mrb[108].mxu1 %vm369_vm3, %v11073_v59 }
0x22a9   :  { %8039 = vmatprep.mubr.msk.bf16.mxu1 %vm369_vm3, %v11074_v20 }
0x22b0   :  { %8040 = vmatmul.mubr.msk.bf16.gmra.mrb[112].mxu1 %vm369_vm3, %v11075_v25 }
0x22b1   :  { %8045 = vmatprep.mubr.msk.bf16.mxu1 %vm320_vm4, %v11078_v3 }
0x22b8   :  { %8046 = vmatmul.mubr.msk.bf16.vlgmr.msra.gmra.mrb[100].mxu1 %vm320_vm4, %v11081_v22 }
0x22b9   :  { %8049 = vmatprep.mubr.msk.bf16.mxu1 %vm320_vm4, %v11083_v0 }
0x22c0   :  { %8050 = vmatmul.mubr.msk.bf16.gmra.mrb[104].mxu1 %vm320_vm4, %v11084_v52 }
0x22c1   :  { %8053 = vmatprep.mubr.msk.bf16.mxu1 %vm320_vm4, %v11085_v29 }
0x22c8   :  { %8054 = vmatmul.mubr.msk.bf16.gmra.mrb[108].mxu1 %vm320_vm4, %v11086_v58 }
0x22c9   :  { %8057 = vmatprep.mubr.msk.bf16.mxu1 %vm320_vm4, %v11087_v57 }
0x22d0   :  { %8058 = vmatmul.mubr.msk.bf16.gmra.mrb[112].mxu1 %vm320_vm4, %v11090_v38 }
0x22d1   :  { %8099 = vmatprep.mubr.msk.bf16.mxu1 %vm8816_vm8, %v11053_v24 }
0x2363   :  { %v8023_v31 = vpop.f32.mrb[96].mxu1 }
0x2364   :  { %v4022_v61 = vpop.f32.mrb[97].mxu1 }
0x2365   :  { %v8024_v48 = vpop.f32.mrb[98].mxu1 }
0x2366   :  { %v4503_v36 = vpack.c.bf16 %v8024_v48, %v8023_v31  ;;  %v4025_v34 = vpop.f32.mrb[99].mxu1 }
0x2367   :  { %v4311_v40 = vpack.c.bf16 %v4025_v34, %v4022_v61 }
0x238b   :  { %v8047_v42 = vpop.f32.mrb[100].mxu1 }
0x238c   :  { %v4245_v2 = vpop.f32.mrb[101].mxu1 }
0x238d   :  { %v8048_v50 = vpop.f32.mrb[102].mxu1 }
0x238e   :  { %v10443_v51 = vpack.c.bf16 %v8048_v50, %v8047_v42  ;;  %v4248_v19 = vpop.f32.mrb[103].mxu1 }
0x238f   :  { %v4312_v14 = vpack.c.bf16 %v4248_v19, %v4245_v2 }
0x2390   :  { %v4323_v63 = vsel %vm1151_vm9, %v10443_v51, 0 }
0x2391   :  { %v4320_v32 = vsel %vm1151_vm9, %v4312_v14, 0 }
0x2392   :  { %8062 = vmatpush3.bf16.xpose.msra.mxu0 %v4320_v32 }
0x2393   :  { %v8051_v53 = vpop.f32.mrb[104].mxu1  ;;  %8063 = vmatprep.subr.bf16.mxu0 %v11053_v24 }
0x2394   :  { %v4261_v12 = vpop.f32.mrb[105].mxu1 }
0x2395   :  { %v8052_v6 = vpop.f32.mrb[106].mxu1 }
0x2396   :  { %v10447_v55 = vpack.c.bf16 %v8052_v6, %v8051_v53  ;;  %v4264_v33 = vpop.f32.mrb[107].mxu1 }
0x2397   :  { %v10449_v41 = vpack.c.bf16 %v4264_v33, %v4261_v12 }
0x2398   :  { %v4329_v8 = vsel %vm1151_vm9, %v10447_v55, 0 }
0x2399   :  { %v4326_v37 = vsel %vm1151_vm9, %v10449_v41, 0 }
0x239a   :  { %8064 = vmatpush3.bf16.xpose.msra.mxu0 %v4323_v63 }
0x239b   :  { %v8055_v30 = vpop.f32.mrb[108].mxu1  ;;  %8065 = vmatprep.subr.bf16.mxu0 %v11053_v24 }
0x239c   :  { %v4277_v54 = vpop.f32.mrb[109].mxu1 }
0x239d   :  { %v8056_v23 = vpop.f32.mrb[110].mxu1 }
0x239e   :  { %v10454_v16 = vpack.c.bf16 %v8056_v23, %v8055_v30  ;;  %v4280_v10 = vpop.f32.mrb[111].mxu1 }
0x239f   :  { %v10456_v13 = vpack.c.bf16 %v4280_v10, %v4277_v54 }
0x23a0   :  { %v4515_v5 = vsel %vm1151_vm9, %v10454_v16, 0 }
0x23a1   :  { %v4512_v27 = vsel %vm1151_vm9, %v10456_v13, 0 }
0x23a2   :  { %8066 = vmatpush3.bf16.xpose.msra.mxu0 %v4326_v37  ;;  %8092 = vmatpush3.bf16.xpose.msra.mxu1 %v4512_v27 }
0x23a3   :  { %v8059_v18 = vpop.f32.mrb[112].mxu1  ;;  %8067 = vmatprep.subr.bf16.mxu0 %v11053_v24  ;;  %8093 = vmatprep.subr.bf16.mxu1 %v11053_v24 }
0x23a4   :  { %v4293_v45 = vpop.f32.mrb[113].mxu1 }
0x23a5   :  { %v8060_v43 = vpop.f32.mrb[114].mxu1 }
0x23a6   :  { %v4507_v26 = vpack.c.bf16 %v8060_v43, %v8059_v18  ;;  %v4296_v35 = vpop.f32.mrb[115].mxu1  ;;  %v7318_v43 = vld [vmem:[%s8905_s12 + $0x18] sm:$0xff] }
0x23a7   :  { %v4506_v21 = vpack.c.bf16 %v4296_v35, %v4293_v45  ;;  %v7317_v45 = vld [vmem:[%s8905_s12 + $0x10] sm:$0xff]  ;;  %s11097_s12 = sld [smem:[#allocation5_spill]] }
0x23a8   :  { %v4521_v28 = vsel %vm1151_vm9, %v4507_v26, 0 }
0x23a9   :  { %v4518_v62 = vsel %vm1151_vm9, %v4506_v21, 0 }
0x23aa   :  { %8068 = vmatpush3.bf16.xpose.msra.mxu0 %v4329_v8  ;;  %8094 = vmatpush3.bf16.xpose.msra.mxu1 %v4515_v5 }
0x23ab   :  { %8095 = vmatprep.subr.bf16.mxu1 %v11053_v24  ;;  %8073 = vmatprep.subr.bf16.mxu0 %v11053_v24 }
0x23b1   :  { %8070 = vmatmul.mubr.msk.bf16.vlgmr.msra.gmra.mrb[92].mxu0 %vm1151_vm9, %v4311_v40 }
0x23b2   :  { %8096 = vmatpush3.bf16.xpose.msra.mxu1 %v4518_v62  ;;  %8081 = vmatprep.mubr.msk.bf16.mxu0 %vm8816_vm8, %v11053_v24 }
0x23b3   :  { %8097 = vmatprep.subr.bf16.mxu1 %v11053_v24 }
0x23ba   :  { %8098 = vmatpush3.bf16.xpose.msra.mxu1 %v4521_v28 }
0x23bb   :  { %8115 = vmatprep.subr.bf16.mxu1 %v11053_v24 }
0x23c1   :  { %8100 = vmatmul.mubr.msk.bf16.vlgmr.msra.gmra.mrb[116].mxu1 %vm1151_vm9, %v4503_v36 }
0x23c2   :  { %8117 = vmatprep.mubr.msk.bf16.mxu1 %vm8816_vm8, %v11053_v24 }
0x2484   :  { %v4365_v46 = vpop.f32.mrb[92].mxu0 }
0x2485   :  { %v4372_v59 = vmul.f32 0.25, %v4365_v46  ;;  %v8071_v20 = vpop.f32.mrb[93].mxu0 }
0x2486   :  { %v4368_v25 = vpop.f32.mrb[94].mxu0 }
0x2487   :  { %v4373_v56 = vmul.f32 0.25, %v4368_v25  ;;  %v8072_v15 = vpop.f32.mrb[95].mxu0  ;;  %v4374_v3 = vsel %vm1210_vm10, %v4372_v59, -inf }
0x2488   :  { %4375 = vmax.xlane.f32.xlu1 %v4374_v3 }
0x2489   :  { %v4377_v1 = vsel %vm1210_vm10, %v4373_v56, -inf }
0x248a   :  { %4378 = vmax.xlane.f32.xlu0 %v4377_v1 }
0x2494   :  { %v4557_v11 = vpop.f32.mrb[116].mxu1 }
0x2495   :  { %v8101_v22 = vpop.f32.mrb[117].mxu1  ;;  %v4564_v34 = vmul.f32 0.25, %v4557_v11 }
0x2496   :  { %v4560_v4 = vpop.f32.mrb[118].mxu1 }
0x2497   :  { %v8102_v0 = vpop.f32.mrb[119].mxu1  ;;  %v4565_v40 = vmul.f32 0.25, %v4560_v4  ;;  %v4566_v42 = vsel %vm1210_vm10, %v4564_v34, -inf  ;;  %v7325_v4 = vld [vmem:[%s11046_s5 + $0x1] ss:$0 sm:$0xff] }
0x2499   :  { %4401 = vrot.lane.b32.xlu1 %v4312_v14, %s8817_s0  ;;  %v4569_v2 = vsel %vm1210_vm10, %v4565_v40, -inf }
0x2515   :  { %v4376_v52 = vpop.xlane.xlu1 %4375 }
0x2516   :  { %v4380_v29 = vsub.f32 %v4372_v59, %v4376_v52 }
0x2517   :  { %v4379_v58 = vpop.xlane.xlu0 %4378 }
0x2518   :  { %v4382_v57 = vmul.f32 1.442695, %v4380_v29  ;;  %v4381_v9 = vsub.f32 %v4373_v56, %v4379_v58 }
0x2519   :  { %v4402_v39 = vpop.permute.xlu1 %4401 }
0x251a   :  { %8612 = vpow2.f32 %v4382_v57  ;;  %v4384_v38 = vmul.f32 1.442695, %v4381_v9  ;;  %8074 = vmatpush3.bf16.msra.mxu0 %v4402_v39 }
0x251b   :  { %8075 = vmatprep.subr.bf16.mxu0 %v11053_v24 }
0x251c   :  { %8614 = vpow2.f32 %v4384_v38 }
0x2524   :  { %v8613_v31 = vpop.eup %8612 }
0x2525   :  { %v4386_v61 = vsel %vm1210_vm10, %v8613_v31, 0.0 }
0x2526   :  { %v8615_v48 = vpop.eup %8614  ;;  %4387 = vadd.xlane.f32.xlu1 %v4386_v61 }
0x2527   :  { %v4389_v36 = vsel %vm1210_vm10, %v8615_v48, 0.0 }
0x2528   :  { %4390 = vadd.xlane.f32.xlu0 %v4389_v36 }
0x2537   :  { %4405 = vrot.lane.b32.xlu1 %v10449_v41, %s8817_s0 }
0x253b   :  { %4407 = vrot.lane.b32.xlu1 %v10447_v55, %s8817_s0 }
0x253e   :  { %4403 = vrot.lane.b32.xlu0 %v10443_v51, %s8817_s0 }
0x255d   :  { %4567 = vmax.xlane.f32.xlu0 %v4566_v42 }
0x255f   :  { %4570 = vmax.xlane.f32.xlu1 %v4569_v2 }
0x2570   :  { %4593 = vrot.lane.b32.xlu1 %v10456_v13, %s8817_s0 }
0x2574   :  { %4597 = vrot.lane.b32.xlu1 %v4506_v21, %s8817_s0 }
0x2578   :  { %4599 = vrot.lane.b32.xlu1 %v4507_v26, %s8817_s0  ;;  %v4458_v26 = vpack.c.bf16 %v7318_v43, %v7317_v45  ;;  %v7333_v45 = vld [vmem:[%s11047_s9 + $0x78] sm:$0xff] }
0x257a   :  { %8116 = vmatpush3.bf16.msra.mxu1 %v4458_v26 }
0x25b3   :  { %v4388_v50 = vpop.xlane.xlu1 %4387 }
0x25b4   :  { %8616 = vrcp.f32 %v4388_v50 }
0x25b5   :  { %v4391_v19 = vpop.xlane.xlu0 %4390 }
0x25b6   :  { %8618 = vrcp.f32 %v4391_v19 }
0x25b7   :  { %v4406_v14 = vpop.permute.xlu1 %4405 }
0x25b9   :  { %v4404_v51 = vpop.permute.xlu0 %4403 }
0x25ba   :  { %8076 = vmatpush3.bf16.msra.mxu0 %v4404_v51 }
0x25bb   :  { %8077 = vmatprep.subr.bf16.mxu0 %v11053_v24  ;;  %v4408_v55 = vpop.permute.xlu1 %4407 }
0x25be   :  { %v8617_v32 = vpop.eup %8616  ;;  %8078 = vmatpush3.bf16.msra.mxu0 %v4406_v14 }
0x25bf   :  { %8079 = vmatprep.subr.bf16.mxu0 %v11053_v24  ;;  %v4394_v12 = vmul.f32 %v8617_v32, %v8613_v31 }
0x25c0   :  { %v8619_v53 = vpop.eup %8618 }
0x25c1   :  { %v4395_v6 = vmul.f32 %v8619_v53, %v8615_v48 }
0x25c2   :  { %8080 = vmatpush3.bf16.msra.mxu0 %v4408_v55 }
0x25c3   :  { %v4396_v33 = vpack.c.bf16 %v4395_v6, %v4394_v12  ;;  %8085 = vmatprep.subr.bf16.mxu0 %v11053_v24 }
0x25c5   :  { %8082 = vmatmul.mubr.msk.bf16.vlgmr.msra.gmra.mrb[96].mxu0 %vm1210_vm10, %v4396_v33 }
0x25c6   :  { %8087 = vmatprep.mubr.msk.bf16.mxu0 %vm8816_vm8, %v11053_v24  ;;  %8086 = vmatpush3.bf16.msra.mxu0 %v4458_v26 }
0x25c7   :  { %8103 = vmatprep.subr.bf16.mxu0 %v11053_v24 }
0x25ea   :  { %v4568_v41 = vpop.xlane.xlu0 %4567 }
0x25eb   :  { %v4572_v63 = vsub.f32 %v4564_v34, %v4568_v41 }
0x25ec   :  { %v4571_v30 = vpop.xlane.xlu1 %4570 }
0x25ed   :  { %v4574_v54 = vmul.f32 1.442695, %v4572_v63  ;;  %v4573_v23 = vsub.f32 %v4565_v40, %v4571_v30 }
0x25ef   :  { %8620 = vpow2.f32 %v4574_v54  ;;  %v4576_v10 = vmul.f32 1.442695, %v4573_v23  ;;  %v7327_v23 = vld [vmem:[%s11047_s9 + $0x48] sm:$0xff] }
0x25f0   :  { %v4594_v59 = vpop.permute.xlu1 %4593 }
0x25f1   :  { %8622 = vpow2.f32 %v4576_v10  ;;  %v7329_v10 = vld [vmem:[%s11047_s9 + $0x58] sm:$0xff] }
0x25f4   :  { %v4598_v20 = vpop.permute.xlu1 %4597 }
0x25f8   :  { %v4600_v3 = vpop.permute.xlu1 %4599 }
0x25f9   :  { %v8621_v13 = vpop.eup %8620 }
0x25fa   :  { %v4578_v37 = vsel %vm1210_vm10, %v8621_v13, 0.0 }
0x25fb   :  { %v8623_v27 = vpop.eup %8622  ;;  %4579 = vadd.xlane.f32.xlu0 %v4578_v37  ;;  %v4809_v37 = vpack.c.bf16 %v7329_v10, %v7327_v23 }
0x25fc   :  { %v4581_v18 = vsel %vm1210_vm10, %v8623_v27, 0.0 }
0x25fd   :  { %4829 = vmatprep.subr.bf16.mxu1 %v4809_v37 }
0x25ff   :  { %4582 = vadd.xlane.f32.xlu0 %v4581_v18  ;;  %v7331_v18 = vld [vmem:[%s11047_s9 + $0x68] sm:$0xff] }
0x2600   :  { %v4811_v26 = vpack.c.bf16 %v7333_v45, %v7331_v18 }
0x2615   :  { %4595 = vrot.lane.b32.xlu0 %v10454_v16, %s8817_s0 }
0x2688   :  { %v4580_v35 = vpop.xlane.xlu0 %4579 }
0x268c   :  { %v4583_v21 = vpop.xlane.xlu0 %4582 }
0x268d   :  { %8624 = vrcp.f32 %v4583_v21  ;;  %v7332_v21 = vld [vmem:[%s11047_s9 + $0x70] sm:$0xff] }
0x268e   :  { %8626 = vrcp.f32 %v4580_v35  ;;  %v7330_v35 = vld [vmem:[%s11047_s9 + $0x60] sm:$0xff] }
0x2690   :  { %v4596_v16 = vpop.permute.xlu0 %4595 }
0x2697   :  { %v8625_v25 = vpop.eup %8624 }
0x2698   :  { %v4450_v8 = vpop.f32.mrb[96].mxu0  ;;  %v8627_v56 = vpop.eup %8626  ;;  %v4587_v15 = vmul.f32 %v8625_v25, %v8623_v27  ;;  %v7328_v27 = vld [vmem:[%s11047_s9 + $0x50] sm:$0xff] }
0x2699   :  { %v8083_v5 = vpop.f32.mrb[97].mxu0  ;;  %v4586_v1 = vmul.f32 %v8627_v56, %v8621_v13  ;;  %v7326_v13 = vld [vmem:[%s11047_s9 + $0x40] sm:$0xff] }
0x269a   :  { %v4453_v62 = vpop.f32.mrb[98].mxu0  ;;  %v4808_v43 = vpack.c.bf16 %v7328_v27, %v7326_v13 }
0x269b   :  { %v4457_v28 = vpack.c.bf16 %v4453_v62, %v4450_v8  ;;  %v8084_v46 = vpop.f32.mrb[99].mxu0  ;;  %v4588_v11 = vpack.c.bf16 %v4587_v15, %v4586_v1  ;;  %v4810_v8 = vpack.c.bf16 %v7332_v21, %v7330_v35 }
0x269d   :  { %8088 = vmatmul.mubr.msk.bf16.vlgmr.msra.gmra.mrb[100].mxu0 %vm1151_vm9, %v4457_v28 }
0x269e   :  { %8104 = vmatpush3.bf16.msra.mxu0 %v4594_v59  ;;  %8111 = vmatprep.mubr.msk.bf16.mxu0 %vm8816_vm8, %v11053_v24 }
0x269f   :  { %8105 = vmatprep.subr.bf16.mxu0 %v11053_v24 }
0x26a2   :  { %8106 = vmatpush3.bf16.msra.mxu0 %v4596_v16 }
0x26a3   :  { %8107 = vmatprep.subr.bf16.mxu0 %v11053_v24 }
0x26a6   :  { %8108 = vmatpush3.bf16.msra.mxu0 %v4598_v20 }
0x26a7   :  { %8109 = vmatprep.subr.bf16.mxu0 %v11053_v24 }
0x26aa   :  { %8110 = vmatpush3.bf16.msra.mxu0 %v4600_v3 }
0x26ad   :  { %8112 = vmatmul.mubr.msk.bf16.vlgmr.msra.gmra.mrb[104].mxu0 %vm1210_vm10, %v4588_v11 }
0x2770   :  { %v4496_v22 = vpop.f32.mrb[100].mxu0 }
0x2771   :  { %v4694_v0 = vadd.f32 %v4496_v22, %v10338_v49  ;;  %v8089_v52 = vpop.f32.mrb[101].mxu0 }
0x2772   :  { %v4499_v29 = vpop.f32.mrb[102].mxu0 }
0x2773   :  { %v10520_v58 = vadd.f32 %v7325_v4, %v4694_v0  ;;  %v4695_v57 = vadd.f32 %v4499_v29, %v10343_v17  ;;  %v8090_v9 = vpop.f32.mrb[103].mxu0 }
0x2775   :  { %v10523_v39 = vadd.f32 %v7325_v4, %v4695_v57  ;;  %v4738_v38 = vsel %vm687_vm2, %v10520_v58, 0.0  ;;  %v7351_v57 = vld [vmem:[%s11048_s13 + $0x1] ss:$0 sm:$0xff] }
0x2776   :  { %4739 = vadd.xlane.f32.xlu0 %v4738_v38 }
0x2777   :  { %v4741_v31 = vsel %vm687_vm2, %v10523_v39, 0.0 }
0x2778   :  { %4742 = vadd.xlane.f32.xlu1 %v4741_v31 }
0x2780   :  { %v4642_v61 = vpop.f32.mrb[104].mxu0 }
0x2781   :  { %v8113_v48 = vpop.f32.mrb[105].mxu0 }
0x2782   :  { %v4645_v49 = vpop.f32.mrb[106].mxu0 }
0x2783   :  { %v4649_v36 = vpack.c.bf16 %v4645_v49, %v4642_v61  ;;  %v8114_v34 = vpop.f32.mrb[107].mxu0  ;;  %v7352_v61 = vld [vmem:[%s11049_s17 + $0x1] ss:$0 sm:$0xff] }
0x2785   :  { %8118 = vmatmul.mubr.msk.bf16.vlgmr.msra.gmra.mrb[120].mxu1 %vm1151_vm9, %v4649_v36 }
0x2786   :  { %4861 = vmatprep.mubr.bf16.mxu1 %v11061_v7  ;;  %4830 = vmatpush1.bf16.msra.mxu1 %v4808_v43 }
0x2787   :  { %4831 = vmatprep.subr.bf16.mxu1 %v4811_v26 }
0x278a   :  { %4832 = vmatpush1.bf16.msra.mxu1 %v4810_v8 }
0x2803   :  { %v4740_v17 = vpop.xlane.xlu0 %4739 }
0x2804   :  { %v4750_v40 = vmul.f32 0.03125, %v4740_v17 }
0x2805   :  { %v4743_v19 = vpop.xlane.xlu1 %4742 }
0x2806   :  { %v4754_v42 = vsub.f32 %v10520_v58, %v4750_v40  ;;  %v4751_v14 = vmul.f32 0.03125, %v4743_v19 }
0x2808   :  { %v4758_v2 = vmul.f32 %v4754_v42, %v4754_v42  ;;  %v4755_v41 = vsub.f32 %v10523_v39, %v4751_v14 }
0x280a   :  { %v4762_v50 = vsel %vm687_vm2, %v4758_v2, 0.0  ;;  %v4759_v54 = vmul.f32 %v4755_v41, %v4755_v41 }
0x280b   :  { %4763 = vadd.xlane.f32.xlu1 %v4762_v50 }
0x2858   :  { %v4687_v51 = vpop.f32.mrb[120].mxu1 }
0x2859   :  { %v4696_v32 = vadd.f32 %v4687_v51, %v10335_v47  ;;  %v8119_v53 = vpop.f32.mrb[121].mxu1 }
0x285a   :  { %v4690_v12 = vpop.f32.mrb[122].mxu1 }
0x285b   :  { %v10534_v6 = vadd.f32 %v7325_v4, %v4696_v32  ;;  %v4697_v55 = vadd.f32 %v4690_v12, %v10348_v60  ;;  %v8120_v33 = vpop.f32.mrb[123].mxu1  ;;  %v4765_v60 = vsel %vm687_vm2, %v4759_v54, 0.0 }
0x285d   :  { %v10538_v63 = vadd.f32 %v7325_v4, %v4697_v55  ;;  %v4744_v30 = vsel %vm687_vm2, %v10534_v6, 0.0 }
0x285e   :  { %4745 = vadd.xlane.f32.xlu0 %v4744_v30 }
0x285f   :  { %v4747_v47 = vsel %vm687_vm2, %v10538_v63, 0.0 }
0x2862   :  { %4748 = vadd.xlane.f32.xlu0 %v4747_v47  ;;  %v7334_v47 = vld [vmem:[%s11050_s3 + $0x1] ss:$2 sm:$0x3] }
0x2863   :  { %v10564_v54 = vrot.slane %v7334_v47, %v9909_v44 }
0x2866   :  { %4766 = vadd.xlane.f32.xlu0 %v4765_v60 }
0x2898   :  { %v4764_v5 = vpop.xlane.xlu1 %4763 }
0x2899   :  { %v4774_v62 = vmul.f32 0.03125, %v4764_v5 }
0x289b   :  { %v4778_v59 = vadd.f32 1e-05, %v4774_v62 }
0x289d   :  { %8628 = vrsqrt.f32 %v4778_v59 }
0x28a7   :  { %v8629_v52 = vpop.eup %8628 }
0x28a8   :  { %v4786_v29 = vmul.f32 %v8629_v52, %v4754_v42 }
0x28aa   :  { %v4794_v38 = vmul.f32 %v7351_v57, %v4786_v29 }
0x28ac   :  { %v4802_v49 = vadd.f32 %v7352_v61, %v4794_v38 }
0x28eb   :  { %v4746_v28 = vpop.xlane.xlu0 %4745 }
0x28ec   :  { %v4752_v46 = vmul.f32 0.03125, %v4746_v28 }
0x28ee   :  { %v4756_v16 = vsub.f32 %v10534_v6, %v4752_v46 }
0x28ef   :  { %v4749_v20 = vpop.xlane.xlu0 %4748 }
0x28f0   :  { %v4753_v25 = vmul.f32 0.03125, %v4749_v20  ;;  %v4760_v56 = vmul.f32 %v4756_v16, %v4756_v16 }
0x28f2   :  { %v4757_v15 = vsub.f32 %v10538_v63, %v4753_v25  ;;  %v4768_v3 = vsel %vm687_vm2, %v4760_v56, 0.0 }
0x28f3   :  { %4769 = vadd.xlane.f32.xlu1 %v4768_v3  ;;  %v4767_v1 = vpop.xlane.xlu0 %4766 }
0x28f4   :  { %v4775_v11 = vmul.f32 0.03125, %v4767_v1  ;;  %v4761_v22 = vmul.f32 %v4757_v15, %v4757_v15 }
0x28f6   :  { %v4779_v4 = vadd.f32 1e-05, %v4775_v11  ;;  %v4771_v0 = vsel %vm687_vm2, %v4761_v22, 0.0 }
0x28f7   :  { %4772 = vadd.xlane.f32.xlu0 %v4771_v0 }
0x28f8   :  { %8630 = vrsqrt.f32 %v4779_v4 }
0x2902   :  { %v8631_v9 = vpop.eup %8630 }
0x2903   :  { %v4787_v31 = vmul.f32 %v8631_v9, %v4755_v41 }
0x2905   :  { %v4795_v48 = vmul.f32 %v7351_v57, %v4787_v31 }
0x2907   :  { %v4803_v36 = vadd.f32 %v7352_v61, %v4795_v48 }
0x2909   :  { %v4806_v34 = vpack.c.bf16 %v4803_v36, %v4802_v49 }
0x290b   :  { %7353 = vmatmul.mubr.msk.bf16.vlgmr.msra.gmra.mrb[124].mxu1 %vm687_vm2, %v4806_v34 }
0x290c   :  { %4871 = vmatprep.mubr.bf16.mxu1 %v11061_v7 }
0x2980   :  { %v4770_v17 = vpop.xlane.xlu1 %4769 }
0x2981   :  { %v4776_v40 = vmul.f32 0.03125, %v4770_v17 }
0x2983   :  { %v4780_v2 = vadd.f32 1e-05, %v4776_v40 }
0x2984   :  { %v4773_v50 = vpop.xlane.xlu0 %4772 }
0x2985   :  { %8632 = vrsqrt.f32 %v4780_v2  ;;  %v4777_v42 = vmul.f32 0.03125, %v4773_v50 }
0x2987   :  { %v4781_v19 = vadd.f32 1e-05, %v4777_v42 }
0x2989   :  { %8634 = vrsqrt.f32 %v4781_v19 }
0x298f   :  { %v8633_v51 = vpop.eup %8632 }
0x2990   :  { %v4788_v14 = vmul.f32 %v8633_v51, %v4756_v16  ;;  %v11091_v51 = vld [vmem:[#allocation33_spill] sm:$0xff] }
0x2992   :  { %v4796_v12 = vmul.f32 %v7351_v57, %v4788_v14  ;;  %v10569_v14 = vrot.slane %v7334_v47, %v11091_v51 }
0x2993   :  { %v8635_v32 = vpop.eup %8634 }
0x2994   :  { %v4789_v53 = vmul.f32 %v8635_v32, %v4757_v15  ;;  %v4804_v33 = vadd.f32 %v7352_v61, %v4796_v12 }
0x2996   :  { %v4797_v55 = vmul.f32 %v7351_v57, %v4789_v53 }
0x2998   :  { %v4805_v41 = vadd.f32 %v7352_v61, %v4797_v55 }
0x299a   :  { %v4807_v30 = vpack.c.bf16 %v4805_v41, %v4804_v33 }
0x299c   :  { %7354 = vmatmul.mubr.msk.bf16.gmra.mrb[128].mxu1 %vm687_vm2, %v4807_v30 }
0x29de   :  { %v4863_v60 = vpop.f32.mrb[124].mxu1 }
0x29df   :  { %v4865_v23 = vpop.f32.mrb[125].mxu1  ;;  %v4864_v41 = vadd.f32 %v4863_v60, %v10569_v14  ;;  %v7337_v60 = vld [vmem:[%s11051_s8 + $0x90] sm:$0xff] }
0x29e0   :  { %v4866_v10 = vadd.f32 %v4865_v23, %v10564_v54  ;;  %v4867_v13 = vpop.f32.mrb[126].mxu1 }
0x29e1   :  { %v4869_v37 = vpop.f32.mrb[127].mxu1  ;;  %v4868_v47 = vadd.f32 %v4867_v13, %v10569_v14  ;;  %v7339_v13 = vld [vmem:[%s11051_s8 + $0xa0] sm:$0xff] }
0x29e2   :  { %v4886_v27 = vmul.f32 0.70710677, %v4866_v10  ;;  %v4870_v18 = vadd.f32 %v4869_v37, %v10564_v54  ;;  %v4882_v12 = vmul.f32 0.5, %v4866_v10  ;;  %v7336_v10 = vld [vmem:[%s11051_s8 + $0x88] sm:$0xff] }
0x29e4   :  { %v4890_v45 = vand.u32 2147483647, %v4886_v27  ;;  %v4887_v43 = vmul.f32 0.70710677, %v4870_v18  ;;  %vm4970_vm3 = vcmp.lt.f32.partialorder %v4886_v27, 0.0  ;;  %v4883_v37 = vmul.f32 0.5, %v4870_v18 }
0x29e5   :  { %v7338_v18 = vld [vmem:[%s11051_s8 + $0x98] sm:$0xff] }
0x29e6   :  { %v4894_v26 = vmul.f32 0.3275911, %v4890_v45  ;;  %v4891_v35 = vand.u32 2147483647, %v4887_v43  ;;  %v4946_v62 = vsub.f32 0.0, %v4890_v45  ;;  %vm4971_vm4 = vcmp.lt.f32.partialorder %v4887_v43, 0.0 }
0x29e8   :  { %v4898_v21 = vadd.f32 1.0, %v4894_v26  ;;  %v4895_v8 = vmul.f32 0.3275911, %v4891_v35  ;;  %v4947_v28 = vsub.f32 0.0, %v4891_v35  ;;  %v4950_v59 = vmul.f32 %v4946_v62, %v4890_v45  ;;  %v7340_v62 = vld [vmem:[%s11051_s8 + $0xa8] sm:$0xff] }
0x29ea   :  { %8636 = vrcp.f32 %v4898_v21  ;;  %v4899_v5 = vadd.f32 1.0, %v4895_v8  ;;  %v4951_v56 = vmul.f32 %v4947_v28, %v4891_v35  ;;  %v4954_v15 = vmul.f32 1.442695, %v4950_v59  ;;  %v7335_v21 = vld [vmem:[%s11051_s8 + $0x80] sm:$0xff]  ;;  %v7342_v59 = vld [vmem:[%s11051_s8 + $0xb8] sm:$0xff] }
0x29eb   :  { %v4996_v8 = vpack.c.bf16 %v7336_v10, %v7335_v21  ;;  %v4998_v28 = vpack.c.bf16 %v7340_v62, %v7339_v13 }
0x29ec   :  { %8638 = vrcp.f32 %v4899_v5  ;;  %v4956_v4 = vmul.f32 1.442695, %v4951_v56  ;;  %v4997_v5 = vpack.c.bf16 %v7338_v18, %v7337_v60 }
0x29ed   :  { %8640 = vpow2.f32 %v4954_v15  ;;  %8121 = vmatprep.subr.bf16.mxu0 %v4996_v8  ;;  %v7345_v15 = vld [vmem:[%s11051_s8 + $0xd0] sm:$0xff] }
0x29ee   :  { %8642 = vpow2.f32 %v4956_v4  ;;  %8122 = vmatpush3.bf16.msra.mxu0 %v4996_v8 }
0x29ef   :  { %8123 = vmatprep.subr.bf16.mxu0 %v4997_v5 }
0x29f2   :  { %8124 = vmatpush3.bf16.msra.mxu0 %v4997_v5 }
0x29f3   :  { %8125 = vmatprep.subr.bf16.mxu0 %v4998_v28 }
0x29f4   :  { %v8637_v46 = vpop.eup %8636 }
0x29f5   :  { %v4910_v16 = vmul.f32 1.0614054, %v8637_v46 }
0x29f6   :  { %v8639_v20 = vpop.eup %8638  ;;  %8126 = vmatpush3.bf16.msra.mxu0 %v4998_v28 }
0x29f7   :  { %v4914_v25 = vadd.f32 -1.4531521, %v4910_v16  ;;  %v4911_v3 = vmul.f32 1.0614054, %v8639_v20  ;;  %v8641_v36 = vpop.eup %8640 }
0x29f8   :  { %v8643_v2 = vpop.eup %8642 }
0x29f9   :  { %v4918_v1 = vmul.f32 %v8637_v46, %v4914_v25  ;;  %v4915_v11 = vadd.f32 -1.4531521, %v4911_v3  ;;  %v7344_v25 = vld [vmem:[%s11051_s8 + $0xc8] sm:$0xff]  ;;  %v7346_v3 = vld [vmem:[%s11051_s8 + $0xd8] sm:$0xff] }
0x29fb   :  { %v4922_v22 = vadd.f32 1.4214138, %v4918_v1  ;;  %v4919_v0 = vmul.f32 %v8639_v20, %v4915_v11  ;;  %v5001_v1 = vpack.c.bf16 %v7346_v3, %v7345_v15  ;;  %v7347_v11 = vld [vmem:[%s11051_s8 + $0xe0] sm:$0xff] }
0x29fd   :  { %v4926_v52 = vmul.f32 %v8637_v46, %v4922_v22  ;;  %v4923_v29 = vadd.f32 1.4214138, %v4919_v0  ;;  %v7348_v22 = vld [vmem:[%s11051_s8 + $0xe8] sm:$0xff]  ;;  %v7349_v0 = vld [vmem:[%s11051_s8 + $0xf0] sm:$0xff] }
0x29fe   :  { %v5002_v4 = vpack.c.bf16 %v7348_v22, %v7347_v11 }
0x29ff   :  { %v4930_v57 = vadd.f32 -0.28449672, %v4926_v52  ;;  %v4927_v9 = vmul.f32 %v8639_v20, %v4923_v29  ;;  %v7350_v52 = vld [vmem:[%s11051_s8 + $0xf8] sm:$0xff] }
0x2a00   :  { %v5003_v29 = vpack.c.bf16 %v7350_v52, %v7349_v0 }
0x2a01   :  { %v4934_v38 = vmul.f32 %v8637_v46, %v4930_v57  ;;  %v4931_v31 = vadd.f32 -0.28449672, %v4927_v9 }
0x2a03   :  { %v4938_v61 = vadd.f32 0.2548296, %v4934_v38  ;;  %v4935_v48 = vmul.f32 %v8639_v20, %v4931_v31 }
0x2a05   :  { %v4942_v49 = vmul.f32 %v8637_v46, %v4938_v61  ;;  %v4939_v34 = vadd.f32 0.2548296, %v4935_v48  ;;  %v7341_v46 = vld [vmem:[%s11051_s8 + $0xb0] sm:$0xff] }
0x2a06   :  { %v4999_v16 = vpack.c.bf16 %v7342_v59, %v7341_v46 }
0x2a07   :  { %v4962_v17 = vmul.f32 %v8641_v36, %v4942_v49  ;;  %v4943_v40 = vmul.f32 %v8639_v20, %v4939_v34  ;;  %v7343_v20 = vld [vmem:[%s11051_s8 + $0xc0] sm:$0xff] }
0x2a08   :  { %8127 = vmatprep.subr.bf16.mxu0 %v4999_v16  ;;  %v5000_v56 = vpack.c.bf16 %v7344_v25, %v7343_v20 }
0x2a09   :  { %v4966_v50 = vsub.f32 1.0, %v4962_v17  ;;  %v4963_v42 = vmul.f32 %v8643_v2, %v4943_v40  ;;  %8128 = vmatpush3.bf16.msra.mxu0 %v4999_v16 }
0x2a0a   :  { %8129 = vmatprep.subr.bf16.mxu0 %v5000_v56 }
0x2a0b   :  { %v4974_v19 = vsub.f32 0.0, %v4966_v50  ;;  %v4967_v32 = vsub.f32 1.0, %v4963_v42 }
0x2a0d   :  { %v4978_v53 = vsel %vm4970_vm3, %v4974_v19, %v4966_v50  ;;  %v4975_v33 = vsub.f32 0.0, %v4967_v32  ;;  %8130 = vmatpush3.bf16.msra.mxu0 %v5000_v56 }
0x2a0e   :  { %v4982_v55 = vadd.f32 1.0, %v4978_v53  ;;  %8131 = vmatprep.subr.bf16.mxu0 %v5001_v1 }
0x2a0f   :  { %v4979_v23 = vsel %vm4971_vm4, %v4975_v33, %v4967_v32 }
0x2a10   :  { %v4986_v30 = vmul.f32 %v4982_v55, %v4882_v12  ;;  %v4983_v45 = vadd.f32 1.0, %v4979_v23 }
0x2a11   :  { %8132 = vmatpush3.bf16.msra.mxu0 %v5001_v1 }
0x2a12   :  { %v4990_v26 = vmul.f32 %v4986_v30, %v4864_v41  ;;  %v4987_v27 = vmul.f32 %v4983_v45, %v4883_v37  ;;  %8133 = vmatprep.subr.bf16.mxu0 %v5002_v4 }
0x2a14   :  { %v4991_v35 = vmul.f32 %v4987_v27, %v4868_v47 }
0x2a15   :  { %8134 = vmatpush3.bf16.msra.mxu0 %v5002_v4 }
0x2a16   :  { %v4994_v43 = vpack.c.bf16 %v4991_v35, %v4990_v26  ;;  %8135 = vmatprep.subr.bf16.mxu0 %v5003_v29 }
0x2a18   :  { %8137 = vmatprep.mubr.bf16.mxu0 %v4994_v43 }
0x2a19   :  { %8136 = vmatpush3.bf16.msra.mxu0 %v5003_v29 }
0x2a1a   :  { %8163 = vmatprep.subr.bf16.mxu0 %v11053_v24 }
0x2a6f   :  { %v4873_v57 = vpop.f32.mrb[128].mxu1 }
0x2a70   :  { %v4875_v9 = vpop.f32.mrb[129].mxu1  ;;  %v4874_v4 = vadd.f32 %v4873_v57, %v10569_v14 }
0x2a71   :  { %v4876_v38 = vadd.f32 %v4875_v9, %v10564_v54  ;;  %v4877_v31 = vpop.f32.mrb[130].mxu1 }
0x2a72   :  { %v4879_v61 = vpop.f32.mrb[131].mxu1 }
0x2a73   :  { %v4888_v48 = vmul.f32 0.70710677, %v4876_v38  ;;  %v4880_v49 = vadd.f32 %v4879_v61, %v10564_v54  ;;  %v4884_v1 = vmul.f32 0.5, %v4876_v38  ;;  %v7355_v38 = vld [vmem:[%s11054_s14 + $0x1] ss:$0 sm:$0xff] }
0x2a75   :  { %v4892_v36 = vand.u32 2147483647, %v4888_v48  ;;  %v4889_v34 = vmul.f32 0.70710677, %v4880_v49  ;;  %vm4972_vm7 = vcmp.lt.f32.partialorder %v4888_v48, 0.0  ;;  %v4885_v29 = vmul.f32 0.5, %v4880_v49 }
0x2a77   :  { %v4896_v17 = vmul.f32 0.3275911, %v4892_v36  ;;  %v4893_v40 = vand.u32 2147483647, %v4889_v34  ;;  %v4948_v19 = vsub.f32 0.0, %v4892_v36  ;;  %vm4973_vm10 = vcmp.lt.f32.partialorder %v4889_v34, 0.0 }
0x2a79   :  { %v4900_v2 = vadd.f32 1.0, %v4896_v17  ;;  %v4897_v50 = vmul.f32 0.3275911, %v4893_v40  ;;  %v4949_v32 = vsub.f32 0.0, %v4893_v40  ;;  %v4952_v12 = vmul.f32 %v4948_v19, %v4892_v36 }
0x2a7a   :  { %v4878_v36 = vadd.f32 %v4877_v31, %v10569_v14 }
0x2a7b   :  { %8644 = vrcp.f32 %v4900_v2  ;;  %v4901_v42 = vadd.f32 1.0, %v4897_v50  ;;  %v4953_v30 = vmul.f32 %v4949_v32, %v4893_v40  ;;  %v4958_v23 = vmul.f32 1.442695, %v4952_v12 }
0x2a7d   :  { %8646 = vrcp.f32 %v4901_v42  ;;  %v4960_v47 = vmul.f32 1.442695, %v4953_v30 }
0x2a7e   :  { %8648 = vpow2.f32 %v4958_v23 }
0x2a7f   :  { %8650 = vpow2.f32 %v4960_v47 }
0x2a85   :  { %v8645_v53 = vpop.eup %8644 }
0x2a86   :  { %v4912_v55 = vmul.f32 1.0614054, %v8645_v53 }
0x2a87   :  { %v8647_v33 = vpop.eup %8646 }
0x2a88   :  { %v4916_v41 = vadd.f32 -1.4531521, %v4912_v55  ;;  %v4913_v37 = vmul.f32 1.0614054, %v8647_v33  ;;  %v8649_v62 = vpop.eup %8648 }
0x2a89   :  { %v8651_v16 = vpop.eup %8650 }
0x2a8a   :  { %v4920_v54 = vmul.f32 %v8645_v53, %v4916_v41  ;;  %v4917_v45 = vadd.f32 -1.4531521, %v4913_v37 }
0x2a8c   :  { %v4924_v26 = vadd.f32 1.4214138, %v4920_v54  ;;  %v4921_v27 = vmul.f32 %v8647_v33, %v4917_v45 }
0x2a8e   :  { %v4928_v35 = vmul.f32 %v8645_v53, %v4924_v26  ;;  %v4925_v21 = vadd.f32 1.4214138, %v4921_v27 }
0x2a90   :  { %v4932_v10 = vadd.f32 -0.28449672, %v4928_v35  ;;  %v4929_v8 = vmul.f32 %v8647_v33, %v4925_v21 }
0x2a92   :  { %v4936_v43 = vmul.f32 %v8645_v53, %v4932_v10  ;;  %v4933_v60 = vadd.f32 -0.28449672, %v4929_v8 }
0x2a94   :  { %v4940_v18 = vadd.f32 0.2548296, %v4936_v43  ;;  %v4937_v5 = vmul.f32 %v8647_v33, %v4933_v60 }
0x2a96   :  { %v4944_v13 = vmul.f32 %v8645_v53, %v4940_v18  ;;  %v4941_v28 = vadd.f32 0.2548296, %v4937_v5 }
0x2a98   :  { %v4964_v46 = vmul.f32 %v8649_v62, %v4944_v13  ;;  %v4945_v59 = vmul.f32 %v8647_v33, %v4941_v28  ;;  %v7358_v62 = vld [vmem:[%s11055_s19 + $0x20] sm:$0xff]  ;;  %v7359_v28 = vld [vmem:[%s11055_s19 + $0x28] sm:$0xff] }
0x2a9a   :  { %v4968_v20 = vsub.f32 1.0, %v4964_v46  ;;  %v4965_v25 = vmul.f32 %v8651_v16, %v4945_v59  ;;  %v7360_v46 = vld [vmem:[%s11055_s19 + $0x30] sm:$0xff]  ;;  %v5138_v59 = vpack.c.bf16 %v7359_v28, %v7358_v62  ;;  %v7361_v16 = vld [vmem:[%s11055_s19 + $0x38] sm:$0xff] }
0x2a9c   :  { %v4976_v56 = vsub.f32 0.0, %v4968_v20  ;;  %v4969_v15 = vsub.f32 1.0, %v4965_v25  ;;  %8141 = vmatprep.subr.bf16.mxu1 %v5138_v59  ;;  %v7364_v25 = vld [vmem:[%s11056_s15 + $0x20] sm:$0xff] }
0x2a9d   :  { %8142 = vmatpush3.bf16.msra.mxu1 %v5138_v59 }
0x2a9e   :  { %v4980_v3 = vsel %vm4972_vm7, %v4976_v56, %v4968_v20  ;;  %v4977_v22 = vsub.f32 0.0, %v4969_v15  ;;  %v5139_v20 = vpack.c.bf16 %v7361_v16, %v7360_v46  ;;  %v7365_v56 = vld [vmem:[%s11056_s15 + $0x28] sm:$0xff] }
0x2a9f   :  { %v4984_v11 = vadd.f32 1.0, %v4980_v3 }
0x2aa0   :  { %v4981_v52 = vsel %vm4973_vm10, %v4977_v22, %v4969_v15  ;;  %8143 = vmatprep.subr.bf16.mxu1 %v5139_v20  ;;  %v5200_v15 = vpack.c.bf16 %v7365_v56, %v7364_v25 }
0x2aa1   :  { %v4988_v0 = vmul.f32 %v4984_v11, %v4884_v1  ;;  %v4985_v9 = vadd.f32 1.0, %v4981_v52  ;;  %8144 = vmatpush3.bf16.msra.mxu1 %v5139_v20 }
0x2aa2   :  { %8149 = vmatprep.subr.bf16.mxu1 %v5200_v15 }
0x2aa3   :  { %v4992_v61 = vmul.f32 %v4988_v0, %v4874_v4  ;;  %v4989_v17 = vmul.f32 %v4985_v9, %v4885_v29 }
0x2aa5   :  { %v4993_v40 = vmul.f32 %v4989_v17, %v4878_v36 }
0x2aa7   :  { %v4995_v2 = vpack.c.bf16 %v4993_v40, %v4992_v61 }
0x2aa9   :  { %8138 = vmatmul.mubr.bf16.vlgmr.msra.gmra.mrb[108].mxu0 %v4995_v2  ;;  %v7356_v2 = vld [vmem:[%s11057_s16 + $0x1] ss:$0 sm:$0xff] }
0x2aaa   :  { %8165 = vmatprep.mubr.msk.bf16.mxu0 %vm8816_vm8, %v11053_v24 }
0x2b7c   :  { %v8139_v48 = vpop.f32.mrb[108].mxu0 }
0x2b7d   :  { %v5042_v50 = vpop.f32.mrb[109].mxu0  ;;  %v5051_v34 = vadd.f32 %v8139_v48, %v7355_v38 }
0x2b7e   :  { %v5043_v42 = vadd.f32 %v7355_v38, %v5042_v50  ;;  %v8140_v57 = vpop.f32.mrb[110].mxu0 }
0x2b7f   :  { %v5045_v19 = vpop.f32.mrb[111].mxu0  ;;  %v5054_v32 = vadd.f32 %v8140_v57, %v7355_v38  ;;  %v10601_v14 = vadd.f32 %v5051_v34, %v10534_v6  ;;  %v7357_v57 = vld [vmem:[%s11058_s18 + $0x1] ss:$0 sm:$0xff] }
0x2b80   :  { %v10598_v49 = vadd.f32 %v5043_v42, %v10520_v58  ;;  %v5046_v53 = vadd.f32 %v7355_v38, %v5045_v19 }
0x2b81   :  { %v10609_v55 = vadd.f32 %v5054_v32, %v10538_v63  ;;  %v5069_v58 = vsel %vm687_vm2, %v10601_v14, 0.0 }
0x2b82   :  { %v10604_v31 = vadd.f32 %v5046_v53, %v10523_v39  ;;  %v5063_v12 = vsel %vm687_vm2, %v10598_v49, 0.0 }
0x2b83   :  { %5064 = vadd.xlane.f32.xlu1 %v5063_v12  ;;  %v5072_v6 = vsel %vm687_vm2, %v10609_v55, 0.0 }
0x2b84   :  { %v5066_v33 = vsel %vm687_vm2, %v10604_v31, 0.0 }
0x2b85   :  { %5067 = vadd.xlane.f32.xlu0 %v5066_v33 }
0x2b87   :  { %5070 = vadd.xlane.f32.xlu1 %v5069_v58 }
0x2b89   :  { %5073 = vadd.xlane.f32.xlu0 %v5072_v6 }
0x2c10   :  { %v5065_v39 = vpop.xlane.xlu1 %5064 }
0x2c11   :  { %v5075_v41 = vmul.f32 0.03125, %v5065_v39 }
0x2c12   :  { %v5068_v30 = vpop.xlane.xlu0 %5067 }
0x2c13   :  { %v5079_v23 = vsub.f32 %v10598_v49, %v5075_v41  ;;  %v5076_v37 = vmul.f32 0.03125, %v5068_v30  ;;  %v7366_v30 = vld [vmem:[%s11056_s15 + $0x30] sm:$0xff] }
0x2c14   :  { %v5071_v63 = vpop.xlane.xlu1 %5070 }
0x2c15   :  { %v5080_v54 = vsub.f32 %v10604_v31, %v5076_v37  ;;  %v5077_v45 = vmul.f32 0.03125, %v5071_v63  ;;  %v5083_v26 = vmul.f32 %v5079_v23, %v5079_v23  ;;  %v7367_v37 = vld [vmem:[%s11056_s15 + $0x38] sm:$0xff] }
0x2c16   :  { %v5074_v47 = vpop.xlane.xlu0 %5073 }
0x2c17   :  { %v5081_v27 = vsub.f32 %v10601_v14, %v5077_v45  ;;  %v5078_v35 = vmul.f32 0.03125, %v5074_v47  ;;  %v5087_v21 = vsel %vm687_vm2, %v5083_v26, 0.0  ;;  %v5084_v10 = vmul.f32 %v5080_v54, %v5080_v54 }
0x2c18   :  { %5088 = vadd.xlane.f32.xlu1 %v5087_v21 }
0x2c19   :  { %v5082_v8 = vsub.f32 %v10609_v55, %v5078_v35  ;;  %v5090_v43 = vsel %vm687_vm2, %v5084_v10, 0.0  ;;  %v5085_v60 = vmul.f32 %v5081_v27, %v5081_v27 }
0x2c1a   :  { %5091 = vadd.xlane.f32.xlu0 %v5090_v43 }
0x2c1b   :  { %v5093_v18 = vsel %vm687_vm2, %v5085_v60, 0.0  ;;  %v5086_v5 = vmul.f32 %v5082_v8, %v5082_v8 }
0x2c1c   :  { %5094 = vadd.xlane.f32.xlu1 %v5093_v18 }
0x2c1d   :  { %v5096_v13 = vsel %vm687_vm2, %v5086_v5, 0.0 }
0x2c1e   :  { %5097 = vadd.xlane.f32.xlu0 %v5096_v13 }
0x2ca5   :  { %v5089_v3 = vpop.xlane.xlu1 %5088 }
0x2ca6   :  { %v5099_v1 = vmul.f32 0.03125, %v5089_v3 }
0x2ca7   :  { %v5092_v11 = vpop.xlane.xlu0 %5091 }
0x2ca8   :  { %v5103_v22 = vadd.f32 1e-05, %v5099_v1  ;;  %v5100_v4 = vmul.f32 0.03125, %v5092_v11 }
0x2ca9   :  { %v5095_v0 = vpop.xlane.xlu1 %5094 }
0x2caa   :  { %8652 = vrsqrt.f32 %v5103_v22  ;;  %v5104_v52 = vadd.f32 1e-05, %v5100_v4  ;;  %v5101_v29 = vmul.f32 0.03125, %v5095_v0 }
0x2cab   :  { %v5098_v9 = vpop.xlane.xlu0 %5097 }
0x2cac   :  { %8654 = vrsqrt.f32 %v5104_v52  ;;  %v5105_v61 = vadd.f32 1e-05, %v5101_v29  ;;  %v5102_v36 = vmul.f32 0.03125, %v5098_v9 }
0x2cae   :  { %8656 = vrsqrt.f32 %v5105_v61  ;;  %v5106_v17 = vadd.f32 1e-05, %v5102_v36 }
0x2cb0   :  { %8658 = vrsqrt.f32 %v5106_v17 }
0x2cb4   :  { %v8653_v40 = vpop.eup %8652 }
0x2cb5   :  { %v5111_v38 = vmul.f32 %v8653_v40, %v5079_v23 }
0x2cb6   :  { %v8655_v48 = vpop.eup %8654 }
0x2cb7   :  { %v5112_v50 = vmul.f32 %v8655_v48, %v5080_v54  ;;  %v5119_v34 = vmul.f32 %v7356_v2, %v5111_v38  ;;  %v5201_v54 = vpack.c.bf16 %v7367_v37, %v7366_v30 }
0x2cb8   :  { %v8657_v42 = vpop.eup %8656 }
0x2cb9   :  { %v5113_v19 = vmul.f32 %v8657_v42, %v5081_v27  ;;  %v5120_v32 = vmul.f32 %v7356_v2, %v5112_v50  ;;  %v5127_v58 = vadd.f32 %v7357_v57, %v5119_v34 }
0x2cba   :  { %v8659_v53 = vpop.eup %8658 }
0x2cbb   :  { %v5121_v12 = vmul.f32 %v7356_v2, %v5113_v19  ;;  %v5114_v33 = vmul.f32 %v8659_v53, %v5082_v8  ;;  %v5128_v6 = vadd.f32 %v7357_v57, %v5120_v32 }
0x2cbd   :  { %v5122_v39 = vmul.f32 %v7356_v2, %v5114_v33  ;;  %v5136_v41 = vpack.c.bf16 %v5128_v6, %v5127_v58  ;;  %v5129_v63 = vadd.f32 %v7357_v57, %v5121_v12 }
0x2cbf   :  { %v5130_v45 = vadd.f32 %v7357_v57, %v5122_v39  ;;  %8145 = vmatprep.mubr.msk.bf16.mxu1 %vm687_vm2, %v5136_v41 }
0x2cc1   :  { %v5137_v23 = vpack.c.bf16 %v5130_v45, %v5129_v63 }
0x2cc3   :  { %8146 = vmatmul.mubr.msk.bf16.vlgmr.msra.gmra.mrb[132].mxu1 %vm687_vm2, %v5137_v23 }
0x2cc4   :  { %8150 = vmatpush3.bf16.msra.mxu1 %v5200_v15  ;;  %8153 = vmatprep.mubr.msk.bf16.mxu1 %vm687_vm2, %v5136_v41 }
0x2cc5   :  { %8151 = vmatprep.subr.bf16.mxu1 %v5201_v54 }
0x2cc8   :  { %8152 = vmatpush3.bf16.msra.mxu1 %v5201_v54 }
0x2cc9   :  { %8157 = vmatprep.subr.bf16.mxu1 %v11053_v24 }
0x2ccb   :  { %8154 = vmatmul.mubr.msk.bf16.vlgmr.msra.gmra.mrb[136].mxu1 %vm687_vm2, %v5137_v23 }
0x2ccc   :  { %8159 = vmatprep.mubr.msk.bf16.mxu1 %vm8816_vm8, %v11053_v24 }
0x2d96   :  { %v8147_v26 = vpop.f32.mrb[132].mxu1 }
0x2d97   :  { %v5180_v47 = vpop.f32.mrb[133].mxu1 }
0x2d98   :  { %v8148_v27 = vpop.f32.mrb[134].mxu1 }
0x2d99   :  { %v10642_v35 = vpack.c.bf16 %v8148_v27, %v8147_v26  ;;  %v5183_v21 = vpop.f32.mrb[135].mxu1 }
0x2d9a   :  { %v10644_v10 = vpack.c.bf16 %v5183_v21, %v5180_v47 }
0x2d9c   :  { %5381 = vrot.lane.b32.xlu0 %v10644_v10, %s8819_s22 }
0x2d9e   :  { %v8155_v8 = vpop.f32.mrb[136].mxu1 }
0x2d9f   :  { %v5236_v43 = vpop.f32.mrb[137].mxu1 }
0x2da0   :  { %v8156_v60 = vpop.f32.mrb[138].mxu1 }
0x2da1   :  { %v10648_v18 = vpack.c.bf16 %v8156_v60, %v8155_v8  ;;  %v5239_v5 = vpop.f32.mrb[139].mxu1 }
0x2da2   :  { %v10650_v13 = vpack.c.bf16 %v5239_v5, %v5236_v43 }
0x2da4   :  { %5383 = vrot.lane.b32.xlu1 %v10650_v13, %s8819_s22  ;;  %v5262_v62 = vsel %vm186_vm1, %v10650_v13, 0 }
0x2da5   :  { %8158 = vmatpush3.bf16.xpose.msra.mxu1 %v5262_v62 }
0x2da6   :  { %8169 = vmatprep.subr.bf16.mxu1 %v11053_v24 }
0x2dac   :  { %8160 = vmatmul.mubr.msk.bf16.vlgmr.msra.gmra.mrb[140].mxu1 %vm186_vm1, %v10644_v10 }
0x2dad   :  { %8171 = vmatprep.mubr.msk.bf16.mxu1 %vm8816_vm8, %v11053_v24 }
0x2e0e   :  { %v5382_v59 = vpop.permute.xlu0 %5381 }
0x2e16   :  { %v5384_v28 = vpop.permute.xlu1 %5383 }
0x2e17   :  { %v5389_v46 = vsel %vm186_vm1, %v5384_v28, 0 }
0x2e18   :  { %8170 = vmatpush3.bf16.xpose.msra.mxu1 %v5389_v46 }
0x2e19   :  { %8181 = vmatprep.subr.bf16.mxu1 %v11053_v24 }
0x2e1f   :  { %8172 = vmatmul.mubr.msk.bf16.vlgmr.msra.gmra.mrb[144].mxu1 %vm186_vm1, %v5382_v59 }
0x2e20   :  { %8183 = vmatprep.mubr.msk.bf16.mxu1 %vm8816_vm8, %v11053_v24 }
0x2e7f   :  { %v5298_v16 = vpop.f32.mrb[140].mxu1 }
0x2e80   :  { %v5305_v20 = vmul.f32 0.35355338, %v5298_v16  ;;  %v8161_v25 = vpop.f32.mrb[141].mxu1  ;;  %v7370_v16 = vld [vmem:[%s11059_s28 + $0x20] sm:$0xff] }
0x2e81   :  { %v5301_v56 = vpop.f32.mrb[142].mxu1  ;;  %v7371_v25 = vld [vmem:[%s11059_s28 + $0x28] sm:$0xff] }
0x2e82   :  { %v5306_v15 = vmul.f32 0.35355338, %v5301_v56  ;;  %v8162_v3 = vpop.f32.mrb[143].mxu1  ;;  %v5307_v1 = vsel %vm1151_vm9, %v5305_v20, -inf }
0x2e83   :  { %5308 = vmax.xlane.f32.xlu1 %v5307_v1 }
0x2e84   :  { %v5310_v11 = vsel %vm1151_vm9, %v5306_v15, -inf }
0x2e85   :  { %5311 = vmax.xlane.f32.xlu0 %v5310_v11 }
0x2ef2   :  { %v5425_v22 = vpop.f32.mrb[144].mxu1 }
0x2ef3   :  { %v5432_v4 = vmul.f32 0.35355338, %v5425_v22  ;;  %v8173_v0 = vpop.f32.mrb[145].mxu1 }
0x2ef4   :  { %v5428_v52 = vpop.f32.mrb[146].mxu1 }
0x2ef5   :  { %v5433_v29 = vmul.f32 0.35355338, %v5428_v52  ;;  %v8174_v9 = vpop.f32.mrb[147].mxu1  ;;  %v5434_v61 = vsel %vm1151_vm9, %v5432_v4, -inf }
0x2ef6   :  { %5435 = vmax.xlane.f32.xlu1 %v5434_v61 }
0x2ef7   :  { %v5437_v36 = vsel %vm1151_vm9, %v5433_v29, -inf }
0x2ef8   :  { %5438 = vmax.xlane.f32.xlu0 %v5437_v36 }
0x2f10   :  { %v5309_v17 = vpop.xlane.xlu1 %5308 }
0x2f11   :  { %v5313_v40 = vsub.f32 %v5305_v20, %v5309_v17  ;;  %v5379_v20 = vpack.c.bf16 %v7370_v16, %v7370_v16 }
0x2f12   :  { %v5312_v2 = vpop.xlane.xlu0 %5311 }
0x2f13   :  { %v5315_v38 = vmul.f32 1.442695, %v5313_v40  ;;  %v5314_v48 = vsub.f32 %v5306_v15, %v5312_v2  ;;  %v10693_v56 = vsel %vm211_vm0, %v5379_v20, 0  ;;  %v5505_v15 = vpack.c.bf16 %v7371_v25, %v7371_v25 }
0x2f15   :  { %8660 = vpow2.f32 %v5315_v38  ;;  %v5317_v50 = vmul.f32 1.442695, %v5314_v48  ;;  %v10697_v3 = vsel %vm211_vm0, %v5505_v15, 0 }
0x2f16   :  { %8182 = vmatpush3.bf16.msra.mxu1 %v10697_v3 }
0x2f17   :  { %8662 = vpow2.f32 %v5317_v50  ;;  %8193 = vmatprep.subr.bf16.mxu1 %v11053_v24 }
0x2f1f   :  { %v8661_v34 = vpop.eup %8660 }
0x2f20   :  { %v5319_v42 = vsel %vm1151_vm9, %v8661_v34, 0.0 }
0x2f21   :  { %v8663_v57 = vpop.eup %8662  ;;  %5320 = vadd.xlane.f32.xlu1 %v5319_v42 }
0x2f22   :  { %v5322_v19 = vsel %vm1151_vm9, %v8663_v57, 0.0 }
0x2f23   :  { %5323 = vadd.xlane.f32.xlu0 %v5322_v19 }
0x2f83   :  { %v5436_v32 = vpop.xlane.xlu1 %5435 }
0x2f84   :  { %v5440_v53 = vsub.f32 %v5432_v4, %v5436_v32 }
0x2f85   :  { %v5439_v12 = vpop.xlane.xlu0 %5438 }
0x2f86   :  { %v5442_v33 = vmul.f32 1.442695, %v5440_v53  ;;  %v5441_v58 = vsub.f32 %v5433_v29, %v5439_v12 }
0x2f88   :  { %8664 = vpow2.f32 %v5442_v33  ;;  %v5444_v6 = vmul.f32 1.442695, %v5441_v58 }
0x2f8a   :  { %8666 = vpow2.f32 %v5444_v6 }
0x2f92   :  { %v8665_v39 = vpop.eup %8664 }
0x2f93   :  { %v5446_v41 = vsel %vm1151_vm9, %v8665_v39, 0.0 }
0x2f94   :  { %v8667_v30 = vpop.eup %8666  ;;  %5447 = vadd.xlane.f32.xlu1 %v5446_v41 }
0x2f95   :  { %v5449_v37 = vsel %vm1151_vm9, %v8667_v30, 0.0 }
0x2f96   :  { %5450 = vadd.xlane.f32.xlu0 %v5449_v37 }
0x2fa5   :  { %5331 = vrot.lane.b32.xlu1 %v10650_v13, %s11092_s25 }
0x2fa9   :  { %5602 = vrot.lane.b32.xlu1 %v10650_v13, %s8817_s0 }
0x2fac   :  { %5457 = vrot.lane.b32.xlu0 %v10650_v13, %s11093_s29 }
0x2fad   :  { %5600 = vrot.lane.b32.xlu1 %v10644_v10, %s8817_s0 }
0x2fae   :  { %v5321_v45 = vpop.xlane.xlu1 %5320 }
0x2fb0   :  { %v5324_v63 = vpop.xlane.xlu0 %5323 }
0x2fb1   :  { %8668 = vrcp.f32 %v5324_v63 }
0x2fb2   :  { %8670 = vrcp.f32 %v5321_v45 }
0x2fbb   :  { %v8669_v23 = vpop.eup %8668 }
0x2fbc   :  { %v8671_v26 = vpop.eup %8670  ;;  %v5328_v47 = vmul.f32 %v8669_v23, %v8663_v57 }
0x2fbd   :  { %v5327_v21 = vmul.f32 %v8671_v26, %v8661_v34 }
0x2fbf   :  { %v5329_v43 = vpack.c.bf16 %v5328_v47, %v5327_v21 }
0x3021   :  { %v5448_v54 = vpop.xlane.xlu1 %5447 }
0x3022   :  { %8672 = vrcp.f32 %v5448_v54 }
0x3023   :  { %v5451_v27 = vpop.xlane.xlu0 %5450 }
0x3024   :  { %8674 = vrcp.f32 %v5451_v27 }
0x3025   :  { %v5332_v8 = vpop.permute.xlu1 %5331 }
0x3026   :  { %8164 = vmatpush3.bf16.msra.mxu0 %v5332_v8 }
0x3027   :  { %8175 = vmatprep.subr.bf16.mxu0 %v11053_v24  ;;  %v5458_v60 = vpop.permute.xlu0 %5457 }
0x3029   :  { %8166 = vmatmul.mubr.msk.bf16.vlgmr.msra.gmra.mrb[112].mxu0 %vm1151_vm9, %v5329_v43  ;;  %v5603_v9 = vpop.permute.xlu1 %5602 }
0x302a   :  { %8176 = vmatpush3.bf16.msra.mxu0 %v5458_v60  ;;  %8177 = vmatprep.mubr.msk.bf16.mxu0 %vm8816_vm8, %v11053_v24  ;;  %v5608_v40 = vsel %vm186_vm1, %v5603_v9, 0 }
0x302b   :  { %8187 = vmatprep.subr.bf16.mxu0 %v11053_v24 }
0x302c   :  { %v8673_v5 = vpop.eup %8672 }
0x302d   :  { %v5454_v28 = vmul.f32 %v8673_v5, %v8665_v39  ;;  %v5601_v2 = vpop.permute.xlu1 %5600 }
0x302e   :  { %v8675_v62 = vpop.eup %8674 }
0x302f   :  { %v5455_v46 = vmul.f32 %v8675_v62, %v8667_v30 }
0x3031   :  { %v5456_v59 = vpack.c.bf16 %v5455_v46, %v5454_v28 }
0x3033   :  { %8178 = vmatmul.mubr.msk.bf16.vlgmr.msra.gmra.mrb[116].mxu0 %vm1151_vm9, %v5456_v59 }
0x3034   :  { %8189 = vmatprep.mubr.msk.bf16.mxu0 %vm8816_vm8, %v11053_v24  ;;  %8188 = vmatpush3.bf16.msra.mxu0 %v10693_v56 }
0x3035   :  { %8199 = vmatprep.subr.bf16.mxu0 %v11053_v24 }
0x30fc   :  { %v5371_v1 = vpop.f32.mrb[112].mxu0 }
0x30fd   :  { %v8167_v11 = vpop.f32.mrb[113].mxu0 }
0x30fe   :  { %v5374_v22 = vpop.f32.mrb[114].mxu0  ;;  %v7372_v11 = vld [vmem:[%s11059_s28 + $0x30] sm:$0xff] }
0x30ff   :  { %v5378_v4 = vpack.c.bf16 %v5374_v22, %v5371_v1  ;;  %v8168_v0 = vpop.f32.mrb[115].mxu0  ;;  %v5724_v22 = vpack.c.bf16 %v7372_v11, %v7372_v11 }
0x3101   :  { %8190 = vmatmul.mubr.msk.bf16.vlgmr.msra.gmra.mrb[120].mxu0 %vm186_vm1, %v5378_v4  ;;  %v10738_v4 = vsel %vm211_vm0, %v5724_v22, 0 }
0x3102   :  { %8201 = vmatprep.mubr.msk.bf16.mxu0 %vm8816_vm8, %v11053_v24 }
0x3106   :  { %v5497_v52 = vpop.f32.mrb[116].mxu0 }
0x3107   :  { %v8179_v29 = vpop.f32.mrb[117].mxu0 }
0x3108   :  { %v5500_v61 = vpop.f32.mrb[118].mxu0 }
0x3109   :  { %v5504_v36 = vpack.c.bf16 %v5500_v61, %v5497_v52  ;;  %v8180_v17 = vpop.f32.mrb[119].mxu0 }
0x310b   :  { %8184 = vmatmul.mubr.msk.bf16.vlgmr.msra.gmra.mrb[148].mxu1 %vm186_vm1, %v5504_v36 }
0x310c   :  { %8194 = vmatpush3.bf16.xpose.msra.mxu1 %v5608_v40  ;;  %8195 = vmatprep.mubr.msk.bf16.mxu1 %vm8816_vm8, %v11053_v24 }
0x310d   :  { %8205 = vmatprep.subr.bf16.mxu1 %v11053_v24 }
0x3113   :  { %8196 = vmatmul.mubr.msk.bf16.vlgmr.msra.gmra.mrb[152].mxu1 %vm186_vm1, %v5601_v2 }
0x3114   :  { %8207 = vmatprep.mubr.msk.bf16.mxu1 %vm8816_vm8, %v11053_v24  ;;  %8206 = vmatpush3.bf16.msra.mxu1 %v10738_v4 }
0x3115   :  { %8217 = vmatprep.subr.bf16.mxu1 %v11053_v24 }
0x31d4   :  { %v5593_v38 = vpop.f32.mrb[120].mxu0 }
0x31d5   :  { %v8191_v48 = vpop.f32.mrb[121].mxu0 }
0x31d6   :  { %v5596_v50 = vpop.f32.mrb[122].mxu0 }
0x31d7   :  { %v8192_v34 = vpop.f32.mrb[123].mxu0 }
0x31de   :  { %v5546_v42 = vpop.f32.mrb[148].mxu1 }
0x31df   :  { %v10713_v57 = vadd.f32 %v5593_v38, %v5546_v42  ;;  %v8185_v19 = vpop.f32.mrb[149].mxu1 }
0x31e0   :  { %v5549_v32 = vpop.f32.mrb[150].mxu1 }
0x31e1   :  { %v10715_v53 = vadd.f32 %v5596_v50, %v5549_v32  ;;  %v8186_v12 = vpop.f32.mrb[151].mxu1 }
0x31e6   :  { %v5644_v33 = vpop.f32.mrb[152].mxu1 }
0x31e7   :  { %v5651_v58 = vmul.f32 0.35355338, %v5644_v33  ;;  %v8197_v6 = vpop.f32.mrb[153].mxu1 }
0x31e8   :  { %v5647_v39 = vpop.f32.mrb[154].mxu1 }
0x31e9   :  { %v5652_v41 = vmul.f32 0.35355338, %v5647_v39  ;;  %v8198_v30 = vpop.f32.mrb[155].mxu1  ;;  %v5653_v37 = vsel %vm1151_vm9, %v5651_v58, -inf }
0x31ea   :  { %5654 = vmax.xlane.f32.xlu0 %v5653_v37 }
0x31eb   :  { %v5656_v63 = vsel %vm1151_vm9, %v5652_v41, -inf }
0x31ec   :  { %5657 = vmax.xlane.f32.xlu1 %v5656_v63 }
0x31fd   :  { %5676 = vrot.lane.b32.xlu1 %v10650_v13, %s11094_s24 }
0x3201   :  { %5774 = vrot.lane.b32.xlu1 %v10644_v10, %s11095_s30 }
0x3277   :  { %v5655_v45 = vpop.xlane.xlu0 %5654 }
0x3278   :  { %v5659_v23 = vsub.f32 %v5651_v58, %v5655_v45 }
0x3279   :  { %v5658_v54 = vpop.xlane.xlu1 %5657 }
0x327a   :  { %v5661_v26 = vmul.f32 1.442695, %v5659_v23  ;;  %v5660_v47 = vsub.f32 %v5652_v41, %v5658_v54 }
0x327c   :  { %8676 = vpow2.f32 %v5661_v26  ;;  %v5663_v27 = vmul.f32 1.442695, %v5660_v47 }
0x327d   :  { %v5677_v21 = vpop.permute.xlu1 %5676 }
0x327e   :  { %8678 = vpow2.f32 %v5663_v27  ;;  %8200 = vmatpush3.bf16.msra.mxu0 %v5677_v21 }
0x327f   :  { %8211 = vmatprep.subr.bf16.mxu0 %v11053_v24 }
0x3281   :  { %v5775_v1 = vpop.permute.xlu1 %5774 }
0x3286   :  { %v8677_v8 = vpop.eup %8676 }
0x3287   :  { %v5665_v43 = vsel %vm1151_vm9, %v8677_v8, 0.0 }
0x3288   :  { %v8679_v60 = vpop.eup %8678  ;;  %5666 = vadd.xlane.f32.xlu0 %v5665_v43 }
0x3289   :  { %v5668_v5 = vsel %vm1151_vm9, %v8679_v60, 0.0 }
0x328c   :  { %5669 = vadd.xlane.f32.xlu0 %v5668_v5 }
0x32a2   :  { %5776 = vrot.lane.b32.xlu0 %v10650_v13, %s11095_s30 }
0x3315   :  { %v5667_v10 = vpop.xlane.xlu0 %5666 }
0x3316   :  { %8680 = vrcp.f32 %v5667_v10 }
0x3319   :  { %v5670_v62 = vpop.xlane.xlu0 %5669 }
0x331a   :  { %8682 = vrcp.f32 %v5670_v62 }
0x331d   :  { %v5777_v20 = vpop.permute.xlu0 %5776 }
0x331e   :  { %v5782_v15 = vsel %vm186_vm1, %v5777_v20, 0 }
0x3320   :  { %v8681_v28 = vpop.eup %8680 }
0x3321   :  { %v5673_v59 = vmul.f32 %v8681_v28, %v8677_v8  ;;  %v7373_v28 = vld [vmem:[%s11059_s28 + $0x38] sm:$0xff] }
0x3324   :  { %v8683_v46 = vpop.eup %8682 }
0x3325   :  { %v5674_v16 = vmul.f32 %v8683_v46, %v8679_v60  ;;  %v5898_v46 = vpack.c.bf16 %v7373_v28, %v7373_v28 }
0x3327   :  { %v5675_v25 = vpack.c.bf16 %v5674_v16, %v5673_v59  ;;  %v10781_v59 = vsel %vm211_vm0, %v5898_v46, 0 }
0x3329   :  { %8202 = vmatmul.mubr.msk.bf16.vlgmr.msra.gmra.mrb[124].mxu0 %vm1151_vm9, %v5675_v25 }
0x332a   :  { %8212 = vmatpush3.bf16.xpose.msra.mxu0 %v5782_v15  ;;  %8213 = vmatprep.mubr.msk.bf16.mxu0 %vm8816_vm8, %v11053_v24 }
0x332b   :  { %8223 = vmatprep.subr.bf16.mxu0 %v11053_v24 }
0x3331   :  { %8214 = vmatmul.mubr.msk.bf16.vlgmr.msra.gmra.mrb[128].mxu0 %vm186_vm1, %v5775_v1 }
0x3332   :  { %8225 = vmatprep.mubr.msk.bf16.mxu0 %vm8816_vm8, %v11053_v24  ;;  %8224 = vmatpush3.bf16.msra.mxu0 %v10781_v59 }
0x3333   :  { %8235 = vmatprep.subr.bf16.mxu0 %v11053_v24 }
0x33fc   :  { %v5716_v0 = vpop.f32.mrb[124].mxu0 }
0x33fd   :  { %v8203_v52 = vpop.f32.mrb[125].mxu0 }
0x33fe   :  { %v5719_v29 = vpop.f32.mrb[126].mxu0 }
0x33ff   :  { %v5723_v9 = vpack.c.bf16 %v5719_v29, %v5716_v0  ;;  %v8204_v61 = vpop.f32.mrb[127].mxu0 }
0x3401   :  { %8208 = vmatmul.mubr.msk.bf16.vlgmr.msra.gmra.mrb[156].mxu1 %vm186_vm1, %v5723_v9 }
0x3402   :  { %8219 = vmatprep.mubr.msk.bf16.mxu1 %vm8816_vm8, %v11053_v24 }
0x3404   :  { %v5818_v36 = vpop.f32.mrb[128].mxu0 }
0x3405   :  { %v5825_v17 = vmul.f32 0.35355338, %v5818_v36  ;;  %v8215_v40 = vpop.f32.mrb[129].mxu0 }
0x3406   :  { %v5821_v2 = vpop.f32.mrb[130].mxu0 }
0x3407   :  { %v5826_v38 = vmul.f32 0.35355338, %v5821_v2  ;;  %v8216_v48 = vpop.f32.mrb[131].mxu0  ;;  %v5827_v50 = vsel %vm1151_vm9, %v5825_v17, -inf }
0x3408   :  { %5828 = vmax.xlane.f32.xlu1 %v5827_v50 }
0x3409   :  { %v5830_v34 = vsel %vm1151_vm9, %v5826_v38, -inf }
0x340a   :  { %5831 = vmax.xlane.f32.xlu0 %v5830_v34 }
0x3495   :  { %v5829_v42 = vpop.xlane.xlu1 %5828 }
0x3496   :  { %v5833_v19 = vsub.f32 %v5825_v17, %v5829_v42 }
0x3497   :  { %v5832_v32 = vpop.xlane.xlu0 %5831 }
0x3498   :  { %v5835_v12 = vmul.f32 1.442695, %v5833_v19  ;;  %v5834_v33 = vsub.f32 %v5826_v38, %v5832_v32 }
0x349a   :  { %8684 = vpow2.f32 %v5835_v12  ;;  %v5837_v58 = vmul.f32 1.442695, %v5834_v33 }
0x349c   :  { %8686 = vpow2.f32 %v5837_v58 }
0x34a4   :  { %v8685_v6 = vpop.eup %8684 }
0x34a5   :  { %v5839_v39 = vsel %vm1151_vm9, %v8685_v6, 0.0 }
0x34a6   :  { %v8687_v41 = vpop.eup %8686  ;;  %5840 = vadd.xlane.f32.xlu0 %v5839_v39 }
0x34a7   :  { %v5842_v30 = vsel %vm1151_vm9, %v8687_v41, 0.0 }
0x34a8   :  { %5843 = vadd.xlane.f32.xlu1 %v5842_v30 }
0x34b9   :  { %6074 = vrot.lane.b32.xlu1 %v10648_v18, %s8819_s22 }
0x34bc   :  { %5850 = vrot.lane.b32.xlu0 %v10650_v13, %s11096_s6 }
0x34bd   :  { %6072 = vrot.lane.b32.xlu1 %v10642_v35, %s8819_s22 }
0x34d4   :  { %v5765_v37 = vpop.f32.mrb[156].mxu1 }
0x34d5   :  { %v10756_v63 = vadd.f32 %v5765_v37, %v10713_v57  ;;  %v8209_v45 = vpop.f32.mrb[157].mxu1 }
0x34d6   :  { %v5768_v23 = vpop.f32.mrb[158].mxu1 }
0x34d7   :  { %v10759_v54 = vadd.f32 %v5768_v23, %v10715_v53  ;;  %v8210_v26 = vpop.f32.mrb[159].mxu1  ;;  %v5954_v53 = vsel %vm186_vm1, %v10648_v18, 0 }
0x3533   :  { %v5841_v47 = vpop.xlane.xlu0 %5840 }
0x3534   :  { %8688 = vrcp.f32 %v5841_v47 }
0x3535   :  { %v5844_v27 = vpop.xlane.xlu1 %5843 }
0x3536   :  { %8690 = vrcp.f32 %v5844_v27 }
0x3537   :  { %v5851_v21 = vpop.permute.xlu0 %5850 }
0x3538   :  { %8218 = vmatpush3.bf16.msra.mxu1 %v5851_v21 }
0x3539   :  { %8229 = vmatprep.subr.bf16.mxu1 %v11053_v24  ;;  %v6075_v5 = vpop.permute.xlu1 %6074 }
0x353a   :  { %v6080_v10 = vsel %vm186_vm1, %v6075_v5, 0 }
0x353d   :  { %v6073_v62 = vpop.permute.xlu1 %6072 }
0x353e   :  { %v8689_v13 = vpop.eup %8688 }
0x353f   :  { %v5847_v43 = vmul.f32 %v8689_v13, %v8685_v6 }
0x3540   :  { %v8691_v8 = vpop.eup %8690 }
0x3541   :  { %v5848_v60 = vmul.f32 %v8691_v8, %v8687_v41 }
0x3543   :  { %v5849_v57 = vpack.c.bf16 %v5848_v60, %v5847_v43 }
0x3545   :  { %8220 = vmatmul.mubr.msk.bf16.vlgmr.msra.gmra.mrb[160].mxu1 %vm1151_vm9, %v5849_v57 }
0x3546   :  { %8230 = vmatpush3.bf16.xpose.msra.mxu1 %v5954_v53  ;;  %8231 = vmatprep.mubr.msk.bf16.mxu1 %vm8816_vm8, %v11053_v24 }
0x3547   :  { %8241 = vmatprep.subr.bf16.mxu1 %v11053_v24 }
0x354d   :  { %8232 = vmatmul.mubr.msk.bf16.vlgmr.msra.gmra.mrb[164].mxu1 %vm186_vm1, %v10642_v35 }
0x354e   :  { %8242 = vmatpush3.bf16.xpose.msra.mxu1 %v6080_v10  ;;  %8243 = vmatprep.mubr.msk.bf16.mxu1 %vm8816_vm8, %v11053_v24 }
0x354f   :  { %8253 = vmatprep.subr.bf16.mxu1 %v11053_v24 }
0x3555   :  { %8244 = vmatmul.mubr.msk.bf16.vlgmr.msra.gmra.mrb[168].mxu1 %vm186_vm1, %v6073_v62 }
0x3556   :  { %8254 = vmatpush3.bf16.msra.mxu1 %v10697_v3  ;;  %8255 = vmatprep.mubr.msk.bf16.mxu1 %vm8816_vm8, %v11053_v24 }
0x3557   :  { %8265 = vmatprep.subr.bf16.mxu1 %v11053_v24 }
0x3618   :  { %v5890_v16 = vpop.f32.mrb[160].mxu1 }
0x3619   :  { %v8221_v20 = vpop.f32.mrb[161].mxu1 }
0x361a   :  { %v5893_v25 = vpop.f32.mrb[162].mxu1 }
0x361b   :  { %v5897_v15 = vpack.c.bf16 %v5893_v25, %v5890_v16  ;;  %v8222_v1 = vpop.f32.mrb[163].mxu1 }
0x361d   :  { %8226 = vmatmul.mubr.msk.bf16.vlgmr.msra.gmra.mrb[132].mxu0 %vm186_vm1, %v5897_v15 }
0x361e   :  { %8237 = vmatprep.mubr.msk.bf16.mxu0 %vm8816_vm8, %v11053_v24 }
0x3620   :  { %v5990_v3 = vpop.f32.mrb[164].mxu1 }
0x3621   :  { %v5997_v11 = vmul.f32 0.35355338, %v5990_v3  ;;  %v8233_v22 = vpop.f32.mrb[165].mxu1 }
0x3622   :  { %v5993_v0 = vpop.f32.mrb[166].mxu1 }
0x3623   :  { %v5998_v52 = vmul.f32 0.35355338, %v5993_v0  ;;  %v8234_v29 = vpop.f32.mrb[167].mxu1  ;;  %v5999_v9 = vsel %vm1151_vm9, %v5997_v11, -inf }
0x3624   :  { %6000 = vmax.xlane.f32.xlu0 %v5999_v9 }
0x3625   :  { %v6002_v61 = vsel %vm1151_vm9, %v5998_v52, -inf }
0x3626   :  { %6003 = vmax.xlane.f32.xlu1 %v6002_v61 }
0x3628   :  { %v6116_v36 = vpop.f32.mrb[168].mxu1 }
0x3629   :  { %v6123_v17 = vmul.f32 0.35355338, %v6116_v36  ;;  %v8245_v40 = vpop.f32.mrb[169].mxu1 }
0x362a   :  { %v6119_v2 = vpop.f32.mrb[170].mxu1 }
0x362b   :  { %v6124_v38 = vmul.f32 0.35355338, %v6119_v2  ;;  %v8246_v48 = vpop.f32.mrb[171].mxu1  ;;  %v6125_v50 = vsel %vm1151_vm9, %v6123_v17, -inf }
0x362c   :  { %6126 = vmax.xlane.f32.xlu0 %v6125_v50 }
0x362d   :  { %v6128_v34 = vsel %vm1151_vm9, %v6124_v38, -inf }
0x3630   :  { %6129 = vmax.xlane.f32.xlu0 %v6128_v34 }
0x36b1   :  { %v6001_v42 = vpop.xlane.xlu0 %6000 }
0x36b2   :  { %v6005_v19 = vsub.f32 %v5997_v11, %v6001_v42 }
0x36b3   :  { %v6004_v32 = vpop.xlane.xlu1 %6003 }
0x36b4   :  { %v6007_v12 = vmul.f32 1.442695, %v6005_v19  ;;  %v6006_v33 = vsub.f32 %v5998_v52, %v6004_v32 }
0x36b6   :  { %8692 = vpow2.f32 %v6007_v12  ;;  %v6009_v58 = vmul.f32 1.442695, %v6006_v33 }
0x36b8   :  { %8694 = vpow2.f32 %v6009_v58 }
0x36b9   :  { %v6127_v6 = vpop.xlane.xlu0 %6126 }
0x36ba   :  { %v6131_v39 = vsub.f32 %v6123_v17, %v6127_v6 }
0x36bc   :  { %v6133_v41 = vmul.f32 1.442695, %v6131_v39 }
0x36bd   :  { %v6130_v30 = vpop.xlane.xlu0 %6129 }
0x36be   :  { %8696 = vpow2.f32 %v6133_v41  ;;  %v6132_v37 = vsub.f32 %v6124_v38, %v6130_v30 }
0x36c0   :  { %v8693_v45 = vpop.eup %8692  ;;  %v6135_v23 = vmul.f32 1.442695, %v6132_v37 }
0x36c1   :  { %v6011_v26 = vsel %vm1151_vm9, %v8693_v45, 0.0 }
0x36c2   :  { %v8695_v47 = vpop.eup %8694  ;;  %8698 = vpow2.f32 %v6135_v23  ;;  %6012 = vadd.xlane.f32.xlu1 %v6011_v26 }
0x36c3   :  { %v6014_v27 = vsel %vm1151_vm9, %v8695_v47, 0.0 }
0x36c4   :  { %6015 = vadd.xlane.f32.xlu0 %v6014_v27 }
0x36c8   :  { %v8697_v21 = vpop.eup %8696 }
0x36c9   :  { %v6137_v13 = vsel %vm1151_vm9, %v8697_v21, 0.0 }
0x36ca   :  { %6138 = vadd.xlane.f32.xlu1 %v6137_v13 }
0x36cc   :  { %v8699_v8 = vpop.eup %8698 }
0x36cd   :  { %v6140_v43 = vsel %vm1151_vm9, %v8699_v8, 0.0 }
0x36ce   :  { %6141 = vadd.xlane.f32.xlu0 %v6140_v43 }
0x36db   :  { %6023 = vrot.lane.b32.xlu1 %v10648_v18, %s11092_s25 }
0x36df   :  { %6286 = vrot.lane.b32.xlu1 %v10648_v18, %s8817_s0 }
0x36e3   :  { %6284 = vrot.lane.b32.xlu1 %v10642_v35, %s8817_s0  ;;  %s11098_s0 = sld [smem:[#allocation25_spill]] }
0x36e4   :  { %6148 = vrot.lane.b32.xlu0 %v10648_v18, %s11093_s29 }
0x36f0   :  { %v5939_v60 = vpop.f32.mrb[132].mxu0 }
0x36f1   :  { %v10805_v57 = vadd.f32 %v5939_v60, %v10756_v63  ;;  %v8227_v53 = vpop.f32.mrb[133].mxu0 }
0x36f2   :  { %v5942_v5 = vpop.f32.mrb[134].mxu0 }
0x36f3   :  { %v10808_v10 = vadd.f32 %v5942_v5, %v10759_v54  ;;  %v8228_v62 = vpop.f32.mrb[135].mxu0 }
0x374f   :  { %v6013_v28 = vpop.xlane.xlu1 %6012 }
0x3750   :  { %8700 = vrcp.f32 %v6013_v28 }
0x3751   :  { %v6016_v46 = vpop.xlane.xlu0 %6015 }
0x3752   :  { %8702 = vrcp.f32 %v6016_v46 }
0x3757   :  { %v6139_v16 = vpop.xlane.xlu1 %6138 }
0x3758   :  { %8704 = vrcp.f32 %v6139_v16 }
0x375a   :  { %v8701_v20 = vpop.eup %8700 }
0x375b   :  { %v6024_v25 = vpop.permute.xlu1 %6023  ;;  %v6142_v15 = vpop.xlane.xlu0 %6141  ;;  %v6019_v63 = vmul.f32 %v8701_v20, %v8693_v45 }
0x375c   :  { %v8703_v1 = vpop.eup %8702  ;;  %8706 = vrcp.f32 %v6142_v15  ;;  %8236 = vmatpush3.bf16.msra.mxu0 %v6024_v25 }
0x375d   :  { %v6020_v3 = vmul.f32 %v8703_v1, %v8695_v47  ;;  %8247 = vmatprep.subr.bf16.mxu0 %v11053_v24 }
0x375f   :  { %v6149_v11 = vpop.permute.xlu0 %6148  ;;  %v6021_v54 = vpack.c.bf16 %v6020_v3, %v6019_v63  ;;  %v6287_v50 = vpop.permute.xlu1 %6286 }
0x3760   :  { %v6292_v19 = vsel %vm186_vm1, %v6287_v50, 0 }
0x3761   :  { %8238 = vmatmul.mubr.msk.bf16.vlgmr.msra.gmra.mrb[136].mxu0 %vm1151_vm9, %v6021_v54 }
0x3762   :  { %8248 = vmatpush3.bf16.msra.mxu0 %v6149_v11  ;;  %8249 = vmatprep.mubr.msk.bf16.mxu0 %vm8816_vm8, %v11053_v24  ;;  %v8705_v22 = vpop.eup %8704 }
0x3763   :  { %8259 = vmatprep.subr.bf16.mxu0 %v11053_v24  ;;  %v6145_v52 = vmul.f32 %v8705_v22, %v8697_v21  ;;  %v6285_v32 = vpop.permute.xlu1 %6284 }
0x3766   :  { %v8707_v0 = vpop.eup %8706 }
0x3767   :  { %v6146_v29 = vmul.f32 %v8707_v0, %v8699_v8 }
0x3769   :  { %v6147_v9 = vpack.c.bf16 %v6146_v29, %v6145_v52 }
0x376b   :  { %8250 = vmatmul.mubr.msk.bf16.vlgmr.msra.gmra.mrb[140].mxu0 %vm1151_vm9, %v6147_v9 }
0x376c   :  { %8260 = vmatpush3.bf16.msra.mxu0 %v10693_v56  ;;  %8261 = vmatprep.mubr.msk.bf16.mxu0 %vm8816_vm8, %v11053_v24 }
0x376d   :  { %8271 = vmatprep.subr.bf16.mxu0 %v11053_v24 }
0x3834   :  { %v6063_v61 = vpop.f32.mrb[136].mxu0 }
0x3835   :  { %v8239_v36 = vpop.f32.mrb[137].mxu0 }
0x3836   :  { %v6066_v17 = vpop.f32.mrb[138].mxu0 }
0x3837   :  { %v6070_v40 = vpack.c.bf16 %v6066_v17, %v6063_v61  ;;  %v8240_v2 = vpop.f32.mrb[139].mxu0 }
0x3839   :  { %8262 = vmatmul.mubr.msk.bf16.vlgmr.msra.gmra.mrb[144].mxu0 %vm186_vm1, %v6070_v40 }
0x383a   :  { %8273 = vmatprep.mubr.msk.bf16.mxu0 %vm8816_vm8, %v11053_v24 }
0x383e   :  { %v6188_v38 = vpop.f32.mrb[140].mxu0 }
0x383f   :  { %v8251_v48 = vpop.f32.mrb[141].mxu0 }
0x3840   :  { %v6191_v34 = vpop.f32.mrb[142].mxu0 }
0x3841   :  { %v6195_v56 = vpack.c.bf16 %v6191_v34, %v6188_v38  ;;  %v8252_v42 = vpop.f32.mrb[143].mxu0 }
0x3843   :  { %8256 = vmatmul.mubr.msk.bf16.vlgmr.msra.gmra.mrb[172].mxu1 %vm186_vm1, %v6195_v56 }
0x3844   :  { %8266 = vmatpush3.bf16.xpose.msra.mxu1 %v6292_v19  ;;  %8267 = vmatprep.mubr.msk.bf16.mxu1 %vm8816_vm8, %v11053_v24 }
0x3845   :  { %8277 = vmatprep.subr.bf16.mxu1 %v11053_v24 }
0x384b   :  { %8268 = vmatmul.mubr.msk.bf16.vlgmr.msra.gmra.mrb[176].mxu1 %vm186_vm1, %v6285_v32 }
0x384c   :  { %8278 = vmatpush3.bf16.msra.mxu1 %v10738_v4  ;;  %8279 = vmatprep.mubr.msk.bf16.mxu1 %vm8816_vm8, %v11053_v24 }
0x384d   :  { %8289 = vmatprep.subr.bf16.mxu1 %v11053_v24 }
0x390c   :  { %v6277_v12 = vpop.f32.mrb[144].mxu0 }
0x390d   :  { %v8263_v33 = vpop.f32.mrb[145].mxu0 }
0x390e   :  { %v6280_v58 = vpop.f32.mrb[146].mxu0 }
0x390f   :  { %v8264_v6 = vpop.f32.mrb[147].mxu0 }
0x3916   :  { %v6233_v39 = vpop.f32.mrb[172].mxu1 }
0x3917   :  { %v10833_v41 = vadd.f32 %v6277_v12, %v6233_v39  ;;  %v8257_v30 = vpop.f32.mrb[173].mxu1 }
0x3918   :  { %v6236_v37 = vpop.f32.mrb[174].mxu1  ;;  %v6624_v30 = vadd.f32 %v10805_v57, %v10598_v49 }
0x3919   :  { %v10835_v45 = vadd.f32 %v6280_v58, %v6236_v37  ;;  %v8258_v23 = vpop.f32.mrb[175].mxu1 }
0x391a   :  { %v7398_v23 = vld [vmem:[%s11060_s10 + $0x1] ss:$0 sm:$0xff] }
0x391e   :  { %v6328_v26 = vpop.f32.mrb[176].mxu1 }
0x391f   :  { %v6335_v47 = vmul.f32 0.35355338, %v6328_v26  ;;  %v8269_v4 = vpop.f32.mrb[177].mxu1 }
0x3920   :  { %v6331_v27 = vpop.f32.mrb[178].mxu1  ;;  %v10866_v4 = vadd.f32 %v7398_v23, %v6624_v30 }
0x3921   :  { %v6336_v21 = vmul.f32 0.35355338, %v6331_v27  ;;  %v8270_v13 = vpop.f32.mrb[179].mxu1  ;;  %v6337_v8 = vsel %vm1151_vm9, %v6335_v47, -inf  ;;  %v6625_v27 = vadd.f32 %v10808_v10, %v10604_v31 }
0x3922   :  { %6338 = vmax.xlane.f32.xlu0 %v6337_v8  ;;  %v6668_v8 = vsel %vm687_vm2, %v10866_v4, 0.0 }
0x3923   :  { %v6340_v43 = vsel %vm1151_vm9, %v6336_v21, -inf  ;;  %v10871_v13 = vadd.f32 %v7398_v23, %v6625_v27 }
0x3924   :  { %6341 = vmax.xlane.f32.xlu1 %v6340_v43 }
0x3925   :  { %v6671_v49 = vsel %vm687_vm2, %v10871_v13, 0.0 }
0x3935   :  { %6360 = vrot.lane.b32.xlu1 %v10648_v18, %s11094_s24 }
0x3939   :  { %6454 = vrot.lane.b32.xlu1 %v10642_v35, %s11095_s30 }
0x39af   :  { %v6339_v60 = vpop.xlane.xlu0 %6338 }
0x39b0   :  { %v6343_v53 = vsub.f32 %v6335_v47, %v6339_v60 }
0x39b1   :  { %v6342_v5 = vpop.xlane.xlu1 %6341 }
0x39b2   :  { %v6345_v62 = vmul.f32 1.442695, %v6343_v53  ;;  %v6344_v28 = vsub.f32 %v6336_v21, %v6342_v5 }
0x39b4   :  { %8708 = vpow2.f32 %v6345_v62  ;;  %v6347_v46 = vmul.f32 1.442695, %v6344_v28 }
0x39b5   :  { %v6361_v16 = vpop.permute.xlu1 %6360 }
0x39b6   :  { %8710 = vpow2.f32 %v6347_v46  ;;  %8272 = vmatpush3.bf16.msra.mxu0 %v6361_v16 }
0x39b7   :  { %8283 = vmatprep.subr.bf16.mxu0 %v11053_v24 }
0x39b9   :  { %v6455_v9 = vpop.permute.xlu1 %6454 }
0x39be   :  { %v8709_v20 = vpop.eup %8708 }
0x39bf   :  { %v6349_v25 = vsel %vm1151_vm9, %v8709_v20, 0.0 }
0x39c0   :  { %v8711_v15 = vpop.eup %8710  ;;  %6350 = vadd.xlane.f32.xlu0 %v6349_v25 }
0x39c1   :  { %v6352_v1 = vsel %vm1151_vm9, %v8711_v15, 0.0 }
0x39c4   :  { %6353 = vadd.xlane.f32.xlu0 %v6352_v1 }
0x39da   :  { %6456 = vrot.lane.b32.xlu0 %v10648_v18, %s11095_s30 }
0x3a4d   :  { %v6351_v35 = vpop.xlane.xlu0 %6350 }
0x3a4e   :  { %8712 = vrcp.f32 %v6351_v35 }
0x3a51   :  { %v6354_v63 = vpop.xlane.xlu0 %6353 }
0x3a52   :  { %8714 = vrcp.f32 %v6354_v63 }
0x3a55   :  { %v6457_v0 = vpop.permute.xlu0 %6456 }
0x3a56   :  { %v6462_v29 = vsel %vm186_vm1, %v6457_v0, 0 }
0x3a58   :  { %v8713_v3 = vpop.eup %8712 }
0x3a59   :  { %v6357_v54 = vmul.f32 %v8713_v3, %v8709_v20 }
0x3a5c   :  { %v8715_v11 = vpop.eup %8714 }
0x3a5d   :  { %v6358_v22 = vmul.f32 %v8715_v11, %v8711_v15 }
0x3a5f   :  { %v6359_v52 = vpack.c.bf16 %v6358_v22, %v6357_v54 }
0x3a61   :  { %8274 = vmatmul.mubr.msk.bf16.vlgmr.msra.gmra.mrb[148].mxu0 %vm1151_vm9, %v6359_v52 }
0x3a62   :  { %8284 = vmatpush3.bf16.xpose.msra.mxu0 %v6462_v29  ;;  %8285 = vmatprep.mubr.msk.bf16.mxu0 %vm8816_vm8, %v11053_v24 }
0x3a63   :  { %8295 = vmatprep.subr.bf16.mxu0 %v11053_v24 }
0x3a69   :  { %8286 = vmatmul.mubr.msk.bf16.vlgmr.msra.gmra.mrb[152].mxu0 %vm186_vm1, %v6455_v9 }
0x3a6a   :  { %8296 = vmatpush3.bf16.msra.mxu0 %v10781_v59  ;;  %8297 = vmatprep.mubr.msk.bf16.mxu0 %vm8816_vm8, %v11053_v24 }
0x3b34   :  { %v6400_v61 = vpop.f32.mrb[148].mxu0 }
0x3b35   :  { %v8275_v36 = vpop.f32.mrb[149].mxu0 }
0x3b36   :  { %v6403_v17 = vpop.f32.mrb[150].mxu0 }
0x3b37   :  { %v6407_v40 = vpack.c.bf16 %v6403_v17, %v6400_v61  ;;  %v8276_v2 = vpop.f32.mrb[151].mxu0 }
0x3b39   :  { %8280 = vmatmul.mubr.msk.bf16.vlgmr.msra.gmra.mrb[180].mxu1 %vm186_vm1, %v6407_v40 }
0x3b3a   :  { %8291 = vmatprep.mubr.msk.bf16.mxu1 %vm8816_vm8, %v11053_v24 }
0x3b3c   :  { %v6498_v38 = vpop.f32.mrb[152].mxu0 }
0x3b3d   :  { %v6505_v48 = vmul.f32 0.35355338, %v6498_v38  ;;  %v8287_v50 = vpop.f32.mrb[153].mxu0 }
0x3b3e   :  { %v6501_v34 = vpop.f32.mrb[154].mxu0 }
0x3b3f   :  { %v6506_v56 = vmul.f32 0.35355338, %v6501_v34  ;;  %v8288_v59 = vpop.f32.mrb[155].mxu0  ;;  %v6507_v42 = vsel %vm1151_vm9, %v6505_v48, -inf }
0x3b40   :  { %6508 = vmax.xlane.f32.xlu1 %v6507_v42  ;;  %v7400_v42 = vld [vmem:[%s11062_s11 + $0x48] sm:$0xff] }
0x3b41   :  { %v6510_v19 = vsel %vm1151_vm9, %v6506_v56, -inf }
0x3b42   :  { %6511 = vmax.xlane.f32.xlu0 %v6510_v19  ;;  %v7402_v19 = vld [vmem:[%s11062_s11 + $0x58] sm:$0xff] }
0x3bcd   :  { %v6509_v32 = vpop.xlane.xlu1 %6508 }
0x3bce   :  { %v6513_v12 = vsub.f32 %v6505_v48, %v6509_v32  ;;  %v7399_v32 = vld [vmem:[%s11062_s11 + $0x40] sm:$0xff] }
0x3bcf   :  { %v6512_v33 = vpop.xlane.xlu0 %6511 }
0x3bd0   :  { %v6515_v58 = vmul.f32 1.442695, %v6513_v12  ;;  %v6514_v6 = vsub.f32 %v6506_v56, %v6512_v33  ;;  %v6739_v12 = vpack.c.bf16 %v7402_v19, %v7400_v42  ;;  %v7401_v33 = vld [vmem:[%s11062_s11 + $0x50] sm:$0xff] }
0x3bd2   :  { %8716 = vpow2.f32 %v6515_v58  ;;  %v6517_v39 = vmul.f32 1.442695, %v6514_v6  ;;  %v7404_v58 = vld [vmem:[%s11062_s11 + $0x68] sm:$0xff]  ;;  %v7406_v6 = vld [vmem:[%s11062_s11 + $0x78] sm:$0xff] }
0x3bd3   :  { %v6741_v30 = vpack.c.bf16 %v7406_v6, %v7404_v58 }
0x3bd4   :  { %8718 = vpow2.f32 %v6517_v39  ;;  %v6738_v39 = vpack.c.bf16 %v7401_v33, %v7399_v32 }
0x3bdc   :  { %v8717_v37 = vpop.eup %8716 }
0x3bdd   :  { %v6519_v26 = vsel %vm1151_vm9, %v8717_v37, 0.0 }
0x3bde   :  { %v8719_v47 = vpop.eup %8718  ;;  %6520 = vadd.xlane.f32.xlu0 %v6519_v26 }
0x3bdf   :  { %v6522_v21 = vsel %vm1151_vm9, %v8719_v47, 0.0 }
0x3be0   :  { %6523 = vadd.xlane.f32.xlu1 %v6522_v21 }
0x3be4   :  { %6669 = vadd.xlane.f32.xlu1 %v6668_v8 }
0x3be8   :  { %6672 = vadd.xlane.f32.xlu1 %v6671_v49 }
0x3bf4   :  { %6530 = vrot.lane.b32.xlu0 %v10648_v18, %s11096_s6 }
0x3c0c   :  { %v6445_v57 = vpop.f32.mrb[180].mxu1 }
0x3c0d   :  { %v6452_v43 = vadd.f32 %v6445_v57, %v10833_v41  ;;  %v8281_v31 = vpop.f32.mrb[181].mxu1 }
0x3c0e   :  { %v6448_v10 = vpop.f32.mrb[182].mxu1 }
0x3c0f   :  { %v6453_v60 = vadd.f32 %v6448_v10, %v10835_v45  ;;  %v8282_v53 = vpop.f32.mrb[183].mxu1 }
0x3c6b   :  { %v6521_v5 = vpop.xlane.xlu0 %6520 }
0x3c6c   :  { %8720 = vrcp.f32 %v6521_v5 }
0x3c6d   :  { %v6524_v62 = vpop.xlane.xlu1 %6523 }
0x3c6e   :  { %8722 = vrcp.f32 %v6524_v62 }
0x3c6f   :  { %v6531_v28 = vpop.permute.xlu0 %6530 }
0x3c70   :  { %8290 = vmatpush3.bf16.msra.mxu1 %v6531_v28 }
0x3c71   :  { %v6670_v63 = vpop.xlane.xlu1 %6669  ;;  %6759 = vmatprep.subr.bf16.mxu1 %v6739_v12 }
0x3c72   :  { %v6680_v0 = vmul.f32 0.03125, %v6670_v63 }
0x3c74   :  { %v6684_v40 = vsub.f32 %v10866_v4, %v6680_v0 }
0x3c75   :  { %v6673_v61 = vpop.xlane.xlu1 %6672 }
0x3c76   :  { %v8721_v46 = vpop.eup %8720  ;;  %v6681_v2 = vmul.f32 0.03125, %v6673_v61 }
0x3c77   :  { %v6527_v20 = vmul.f32 %v8721_v46, %v8717_v37  ;;  %v7403_v37 = vld [vmem:[%s11062_s11 + $0x60] sm:$0xff] }
0x3c78   :  { %v8723_v16 = vpop.eup %8722 }
0x3c79   :  { %v6528_v25 = vmul.f32 %v8723_v16, %v8719_v47 }
0x3c7b   :  { %v6529_v15 = vpack.c.bf16 %v6528_v25, %v6527_v20 }
0x3c7d   :  { %8292 = vmatmul.mubr.msk.bf16.vlgmr.msra.gmra.mrb[184].mxu1 %vm1151_vm9, %v6529_v15  ;;  %v7424_v15 = vld [vmem:[%s11063_s7 + $0x1] ss:$0 sm:$0xff] }
0x3c7e   :  { %6791 = vmatprep.mubr.bf16.mxu1 %v11061_v7  ;;  %6760 = vmatpush1.bf16.msra.mxu1 %v6738_v39 }
0x3c7f   :  { %6761 = vmatprep.subr.bf16.mxu1 %v6741_v30 }
0x3d50   :  { %v6570_v18 = vpop.f32.mrb[184].mxu1 }
0x3d51   :  { %v8293_v41 = vpop.f32.mrb[185].mxu1 }
0x3d52   :  { %v6573_v1 = vpop.f32.mrb[186].mxu1 }
0x3d53   :  { %v6577_v45 = vpack.c.bf16 %v6573_v1, %v6570_v18  ;;  %v8294_v35 = vpop.f32.mrb[187].mxu1 }
0x3d55   :  { %8298 = vmatmul.mubr.msk.bf16.vlgmr.msra.gmra.mrb[156].mxu0 %vm186_vm1, %v6577_v45  ;;  %v7425_v45 = vld [vmem:[%s11064_s1 + $0x1] ss:$0 sm:$0xff] }
0x3e28   :  { %v6615_v3 = vpop.f32.mrb[156].mxu0 }
0x3e29   :  { %v6622_v11 = vadd.f32 %v6615_v3, %v6452_v43  ;;  %v8299_v54 = vpop.f32.mrb[157].mxu0 }
0x3e2a   :  { %v6618_v22 = vpop.f32.mrb[158].mxu0 }
0x3e2b   :  { %v6626_v52 = vadd.f32 %v6622_v11, %v10601_v14  ;;  %v6623_v29 = vadd.f32 %v6618_v22, %v6453_v60  ;;  %v8300_v9 = vpop.f32.mrb[159].mxu0  ;;  %v6685_v14 = vsub.f32 %v10871_v13, %v6681_v2 }
0x3e2d   :  { %v10885_v36 = vadd.f32 %v7398_v23, %v6626_v52  ;;  %v6627_v17 = vadd.f32 %v6623_v29, %v10609_v55  ;;  %v6688_v55 = vmul.f32 %v6684_v40, %v6684_v40  ;;  %v6689_v56 = vmul.f32 %v6685_v14, %v6685_v14 }
0x3e2f   :  { %v10889_v38 = vadd.f32 %v7398_v23, %v6627_v17  ;;  %v6674_v48 = vsel %vm687_vm2, %v10885_v36, 0.0  ;;  %v6692_v34 = vsel %vm687_vm2, %v6688_v55, 0.0  ;;  %v6695_v59 = vsel %vm687_vm2, %v6689_v56, 0.0  ;;  %v7405_v23 = vld [vmem:[%s11062_s11 + $0x70] sm:$0xff] }
0x3e30   :  { %6675 = vadd.xlane.f32.xlu1 %v6674_v48  ;;  %v6740_v26 = vpack.c.bf16 %v7405_v23, %v7403_v37 }
0x3e31   :  { %v6677_v50 = vsel %vm687_vm2, %v10889_v38, 0.0 }
0x3e32   :  { %6762 = vmatpush1.bf16.msra.mxu1 %v6740_v26 }
0x3e34   :  { %6678 = vadd.xlane.f32.xlu1 %v6677_v50 }
0x3e38   :  { %6693 = vadd.xlane.f32.xlu1 %v6692_v34 }
0x3e3c   :  { %6696 = vadd.xlane.f32.xlu1 %v6695_v59 }
0x3ebd   :  { %v6676_v47 = vpop.xlane.xlu1 %6675 }
0x3ebe   :  { %v6682_v27 = vmul.f32 0.03125, %v6676_v47 }
0x3ec0   :  { %v6686_v21 = vsub.f32 %v10885_v36, %v6682_v27 }
0x3ec1   :  { %v6679_v8 = vpop.xlane.xlu1 %6678 }
0x3ec2   :  { %v6683_v49 = vmul.f32 0.03125, %v6679_v8  ;;  %v6690_v57 = vmul.f32 %v6686_v21, %v6686_v21 }
0x3ec4   :  { %v6687_v43 = vsub.f32 %v10889_v38, %v6683_v49  ;;  %v6698_v31 = vsel %vm687_vm2, %v6690_v57, 0.0 }
0x3ec5   :  { %6699 = vadd.xlane.f32.xlu0 %v6698_v31  ;;  %v6694_v10 = vpop.xlane.xlu1 %6693 }
0x3ec6   :  { %v6704_v60 = vmul.f32 0.03125, %v6694_v10  ;;  %v6691_v53 = vmul.f32 %v6687_v43, %v6687_v43 }
0x3ec8   :  { %v6708_v5 = vadd.f32 1e-05, %v6704_v60  ;;  %v6701_v62 = vsel %vm687_vm2, %v6691_v53, 0.0 }
0x3ec9   :  { %6702 = vadd.xlane.f32.xlu1 %v6701_v62  ;;  %v6697_v28 = vpop.xlane.xlu1 %6696 }
0x3eca   :  { %8724 = vrsqrt.f32 %v6708_v5  ;;  %v6705_v46 = vmul.f32 0.03125, %v6697_v28 }
0x3ecc   :  { %v6709_v16 = vadd.f32 1e-05, %v6705_v46 }
0x3ece   :  { %8726 = vrsqrt.f32 %v6709_v16 }
0x3ed4   :  { %v8725_v20 = vpop.eup %8724 }
0x3ed5   :  { %v6716_v25 = vmul.f32 %v8725_v20, %v6684_v40 }
0x3ed7   :  { %v6724_v41 = vmul.f32 %v7424_v15, %v6716_v25 }
0x3ed8   :  { %v8727_v18 = vpop.eup %8726 }
0x3ed9   :  { %v6717_v1 = vmul.f32 %v8727_v18, %v6685_v14  ;;  %v6732_v63 = vadd.f32 %v7425_v45, %v6724_v41 }
0x3edb   :  { %v6725_v35 = vmul.f32 %v7424_v15, %v6717_v1 }
0x3edd   :  { %v6733_v3 = vadd.f32 %v7425_v45, %v6725_v35 }
0x3edf   :  { %v6736_v11 = vpack.c.bf16 %v6733_v3, %v6732_v63 }
0x3ee1   :  { %7426 = vmatmul.mubr.msk.bf16.vlgmr.msra.gmra.mrb[188].mxu1 %vm687_vm2, %v6736_v11 }
0x3ee2   :  { %6801 = vmatprep.mubr.bf16.mxu1 %v11061_v7  ;;  %v7407_v7 = vld [vmem:[%s11065_s2 + $0x1] ss:$2 sm:$0x3] }
0x3ee3   :  { %v10919_v56 = vrot.slane %v7407_v7, %v9909_v44 }
0x3f52   :  { %v6700_v54 = vpop.xlane.xlu0 %6699 }
0x3f53   :  { %v6706_v22 = vmul.f32 0.03125, %v6700_v54 }
0x3f55   :  { %v6710_v0 = vadd.f32 1e-05, %v6706_v22 }
0x3f56   :  { %v6703_v52 = vpop.xlane.xlu1 %6702 }
0x3f57   :  { %8728 = vrsqrt.f32 %v6710_v0  ;;  %v6707_v29 = vmul.f32 0.03125, %v6703_v52 }
0x3f59   :  { %v6711_v9 = vadd.f32 1e-05, %v6707_v29 }
0x3f5b   :  { %8730 = vrsqrt.f32 %v6711_v9  ;;  %v10926_v9 = vrot.slane %v7407_v7, %v11091_v51 }
0x3f61   :  { %v8729_v61 = vpop.eup %8728 }
0x3f62   :  { %v6718_v17 = vmul.f32 %v8729_v61, %v6686_v21 }
0x3f64   :  { %v6726_v48 = vmul.f32 %v7424_v15, %v6718_v17 }
0x3f65   :  { %v8731_v40 = vpop.eup %8730 }
0x3f66   :  { %v6719_v2 = vmul.f32 %v8731_v40, %v6687_v43  ;;  %v6734_v50 = vadd.f32 %v7425_v45, %v6726_v48 }
0x3f68   :  { %v6727_v14 = vmul.f32 %v7424_v15, %v6719_v2 }
0x3f6a   :  { %v6735_v55 = vadd.f32 %v7425_v45, %v6727_v14 }
0x3f6c   :  { %v6737_v34 = vpack.c.bf16 %v6735_v55, %v6734_v50 }
0x3f6e   :  { %7427 = vmatmul.mubr.msk.bf16.gmra.mrb[192].mxu1 %vm687_vm2, %v6737_v34  ;;  %v7408_v34 = vld [vmem:[%s11066_s23 + $0x80] sm:$0xff] }
0x3f6f   :  { %8329 = vmatprep.mubr.msk.f32.mxu1 %vm8816_vm8, %v11053_v24 }
0x3fb4   :  { %v6793_v59 = vpop.f32.mrb[188].mxu1 }
0x3fb5   :  { %v6795_v42 = vpop.f32.mrb[189].mxu1  ;;  %v6794_v14 = vadd.f32 %v6793_v59, %v10926_v9  ;;  %v7411_v59 = vld [vmem:[%s11066_s23 + $0x98] sm:$0xff] }
0x3fb6   :  { %v6796_v19 = vadd.f32 %v6795_v42, %v10919_v56  ;;  %v10922_v32 = vpop.f32.mrb[190].mxu1  ;;  %v7409_v42 = vld [vmem:[%s11066_s23 + $0x88] sm:$0xff] }
0x3fb7   :  { %v6799_v12 = vpop.f32.mrb[191].mxu1  ;;  %v6926_v7 = vpack.c.bf16 %v7409_v42, %v7408_v34 }
0x3fb8   :  { %v6816_v33 = vmul.f32 0.70710677, %v6796_v19  ;;  %v6800_v58 = vadd.f32 %v6799_v12, %v10919_v56  ;;  %v6812_v40 = vmul.f32 0.5, %v6796_v19  ;;  %v6798_v19 = vadd.f32 %v10922_v32, %v10926_v9 }
0x3fb9   :  { %8301 = vmatprep.subr.bf16.mxu0 %v6926_v7 }
0x3fba   :  { %v6820_v6 = vand.u32 2147483647, %v6816_v33  ;;  %v6817_v39 = vmul.f32 0.70710677, %v6800_v58  ;;  %vm6900_vm0 = vcmp.lt.f32.partialorder %v6816_v33, 0.0  ;;  %v6813_v12 = vmul.f32 0.5, %v6800_v58  ;;  %8302 = vmatpush3.bf16.msra.mxu0 %v6926_v7 }
0x3fbb   :  { %v7412_v58 = vld [vmem:[%s11066_s23 + $0xa0] sm:$0xff] }
0x3fbc   :  { %v6824_v30 = vmul.f32 0.3275911, %v6820_v6  ;;  %v6821_v37 = vand.u32 2147483647, %v6817_v39  ;;  %v6876_v44 = vsub.f32 0.0, %v6820_v6  ;;  %vm6901_vm1 = vcmp.lt.f32.partialorder %v6817_v39, 0.0 }
0x3fbd   :  { %v7410_v39 = vld [vmem:[%s11066_s23 + $0x90] sm:$0xff] }
0x3fbe   :  { %v6828_v23 = vadd.f32 1.0, %v6824_v30  ;;  %v6825_v26 = vmul.f32 0.3275911, %v6821_v37  ;;  %v6877_v27 = vsub.f32 0.0, %v6821_v37  ;;  %v6880_v8 = vmul.f32 %v6876_v44, %v6820_v6  ;;  %v7415_v44 = vld [vmem:[%s11066_s23 + $0xb8] sm:$0xff] }
0x3fc0   :  { %8732 = vrcp.f32 %v6828_v23  ;;  %v6829_v47 = vadd.f32 1.0, %v6825_v26  ;;  %v6881_v31 = vmul.f32 %v6877_v27, %v6821_v37  ;;  %v6884_v10 = vmul.f32 1.442695, %v6880_v8  ;;  %v7413_v26 = vld [vmem:[%s11066_s23 + $0xa8] sm:$0xff] }
0x3fc1   :  { %v6927_v37 = vpack.c.bf16 %v7411_v59, %v7410_v39  ;;  %v6928_v32 = vpack.c.bf16 %v7413_v26, %v7412_v58  ;;  %v7417_v8 = vld [vmem:[%s11066_s23 + $0xc8] sm:$0xff] }
0x3fc2   :  { %8734 = vrcp.f32 %v6829_v47  ;;  %v6886_v28 = vmul.f32 1.442695, %v6881_v31  ;;  %v7414_v47 = vld [vmem:[%s11066_s23 + $0xb0] sm:$0xff]  ;;  %v7420_v31 = vld [vmem:[%s11066_s23 + $0xe0] sm:$0xff] }
0x3fc3   :  { %8736 = vpow2.f32 %v6884_v10  ;;  %8303 = vmatprep.subr.bf16.mxu0 %v6927_v37  ;;  %v6929_v27 = vpack.c.bf16 %v7415_v44, %v7414_v47 }
0x3fc4   :  { %8738 = vpow2.f32 %v6886_v28  ;;  %8304 = vmatpush3.bf16.msra.mxu0 %v6927_v37 }
0x3fc5   :  { %8305 = vmatprep.subr.bf16.mxu0 %v6928_v32 }
0x3fc8   :  { %8306 = vmatpush3.bf16.msra.mxu0 %v6928_v32 }
0x3fc9   :  { %8307 = vmatprep.subr.bf16.mxu0 %v6929_v27 }
0x3fca   :  { %v8733_v21 = vpop.eup %8732 }
0x3fcb   :  { %v6840_v49 = vmul.f32 1.0614054, %v8733_v21 }
0x3fcc   :  { %v8735_v57 = vpop.eup %8734  ;;  %8308 = vmatpush3.bf16.msra.mxu0 %v6929_v27 }
0x3fcd   :  { %v6844_v43 = vadd.f32 -1.4531521, %v6840_v49  ;;  %v6841_v60 = vmul.f32 1.0614054, %v8735_v57  ;;  %v8737_v63 = vpop.eup %8736 }
0x3fce   :  { %v8739_v22 = vpop.eup %8738 }
0x3fcf   :  { %v6848_v53 = vmul.f32 %v8733_v21, %v6844_v43  ;;  %v6845_v5 = vadd.f32 -1.4531521, %v6841_v60  ;;  %v7419_v43 = vld [vmem:[%s11066_s23 + $0xd8] sm:$0xff]  ;;  %v7421_v60 = vld [vmem:[%s11066_s23 + $0xe8] sm:$0xff] }
0x3fd1   :  { %v6852_v62 = vadd.f32 1.4214138, %v6848_v53  ;;  %v6849_v46 = vmul.f32 %v8735_v57, %v6845_v5  ;;  %v6932_v53 = vpack.c.bf16 %v7421_v60, %v7420_v31  ;;  %v7422_v5 = vld [vmem:[%s11066_s23 + $0xf0] sm:$0xff] }
0x3fd3   :  { %v6856_v16 = vmul.f32 %v8733_v21, %v6852_v62  ;;  %v6853_v20 = vadd.f32 1.4214138, %v6849_v46  ;;  %v7423_v62 = vld [vmem:[%s11066_s23 + $0xf8] sm:$0xff] }
0x3fd4   :  { %v6933_v28 = vpack.c.bf16 %v7423_v62, %v7422_v5 }
0x3fd5   :  { %v6860_v25 = vadd.f32 -0.28449672, %v6856_v16  ;;  %v6857_v15 = vmul.f32 %v8735_v57, %v6853_v20 }
0x3fd7   :  { %v6864_v18 = vmul.f32 %v8733_v21, %v6860_v25  ;;  %v6861_v41 = vadd.f32 -0.28449672, %v6857_v15 }
0x3fd9   :  { %v6868_v1 = vadd.f32 0.2548296, %v6864_v18  ;;  %v6865_v45 = vmul.f32 %v8735_v57, %v6861_v41 }
0x3fdb   :  { %v6872_v35 = vmul.f32 %v8733_v21, %v6868_v1  ;;  %v6869_v3 = vadd.f32 0.2548296, %v6865_v45  ;;  %v7416_v21 = vld [vmem:[%s11066_s23 + $0xc0] sm:$0xff] }
0x3fdc   :  { %v6930_v49 = vpack.c.bf16 %v7417_v8, %v7416_v21 }
0x3fdd   :  { %v6892_v11 = vmul.f32 %v8737_v63, %v6872_v35  ;;  %v6873_v54 = vmul.f32 %v8735_v57, %v6869_v3  ;;  %v7418_v57 = vld [vmem:[%s11066_s23 + $0xd0] sm:$0xff] }
0x3fde   :  { %8309 = vmatprep.subr.bf16.mxu0 %v6930_v49  ;;  %v6931_v10 = vpack.c.bf16 %v7419_v43, %v7418_v57 }
0x3fdf   :  { %v6896_v0 = vsub.f32 1.0, %v6892_v11  ;;  %v6893_v52 = vmul.f32 %v8739_v22, %v6873_v54  ;;  %8310 = vmatpush3.bf16.msra.mxu0 %v6930_v49 }
0x3fe0   :  { %8311 = vmatprep.subr.bf16.mxu0 %v6931_v10 }
0x3fe1   :  { %v6904_v29 = vsub.f32 0.0, %v6896_v0  ;;  %v6897_v61 = vsub.f32 1.0, %v6893_v52 }
0x3fe3   :  { %v6908_v17 = vsel %vm6900_vm0, %v6904_v29, %v6896_v0  ;;  %v6905_v48 = vsub.f32 0.0, %v6897_v61  ;;  %8312 = vmatpush3.bf16.msra.mxu0 %v6931_v10 }
0x3fe4   :  { %v6912_v2 = vadd.f32 1.0, %v6908_v17  ;;  %8313 = vmatprep.subr.bf16.mxu0 %v6932_v53 }
0x3fe5   :  { %v6909_v55 = vsel %vm6901_vm1, %v6905_v48, %v6897_v61 }
0x3fe6   :  { %v6916_v50 = vmul.f32 %v6912_v2, %v6812_v40  ;;  %v6913_v51 = vadd.f32 1.0, %v6909_v55 }
0x3fe7   :  { %8314 = vmatpush3.bf16.msra.mxu0 %v6932_v53 }
0x3fe8   :  { %v6920_v33 = vmul.f32 %v6916_v50, %v6794_v14  ;;  %v6917_v6 = vmul.f32 %v6913_v51, %v6813_v12  ;;  %8315 = vmatprep.subr.bf16.mxu0 %v6933_v28 }
0x3fea   :  { %v6921_v30 = vmul.f32 %v6917_v6, %v6798_v19 }
0x3feb   :  { %8316 = vmatpush3.bf16.msra.mxu0 %v6933_v28 }
0x3fec   :  { %v6924_v23 = vpack.c.bf16 %v6921_v30, %v6920_v33 }
0x3fee   :  { %8317 = vmatprep.mubr.bf16.mxu0 %v6924_v23 }
0x4041   :  { %v6803_v46 = vpop.f32.mrb[192].mxu1 }
0x4042   :  { %v6805_v16 = vpop.f32.mrb[193].mxu1  ;;  %v6804_v31 = vadd.f32 %v6803_v46, %v10926_v9 }
0x4043   :  { %v6806_v20 = vadd.f32 %v6805_v16, %v10919_v56  ;;  %v6807_v25 = vpop.f32.mrb[194].mxu1 }
0x4044   :  { %v6809_v15 = vpop.f32.mrb[195].mxu1  ;;  %v6808_v28 = vadd.f32 %v6807_v25, %v10926_v9 }
0x4045   :  { %v6818_v18 = vmul.f32 0.70710677, %v6806_v20  ;;  %v6810_v41 = vadd.f32 %v6809_v15, %v10919_v56  ;;  %v6814_v49 = vmul.f32 0.5, %v6806_v20  ;;  %v7428_v20 = vld [vmem:[%s11067_s26 + $0x1] ss:$0 sm:$0xff] }
0x4047   :  { %v6822_v1 = vand.u32 2147483647, %v6818_v18  ;;  %v6819_v45 = vmul.f32 0.70710677, %v6810_v41  ;;  %vm6902_vm9 = vcmp.lt.f32.partialorder %v6818_v18, 0.0  ;;  %v6815_v53 = vmul.f32 0.5, %v6810_v41 }
0x4048   :  { %v8825_v18 = vmov 0.0|0.0  }
0x4049   :  { %v6826_v35 = vmul.f32 0.3275911, %v6822_v1  ;;  %v6823_v63 = vand.u32 2147483647, %v6819_v45  ;;  %v6878_v22 = vsub.f32 0.0, %v6822_v1  ;;  %vm6903_vm12 = vcmp.lt.f32.partialorder %v6819_v45, 0.0  ;;  %8340 = vmatprep.subr.bf16.mxu1 %v8825_v18 }
0x404b   :  { %v6830_v3 = vadd.f32 1.0, %v6826_v35  ;;  %v6827_v11 = vmul.f32 0.3275911, %v6823_v63  ;;  %v6879_v0 = vsub.f32 0.0, %v6823_v63  ;;  %v6882_v29 = vmul.f32 %v6878_v22, %v6822_v1 }
0x404d   :  { %8740 = vrcp.f32 %v6830_v3  ;;  %v6831_v54 = vadd.f32 1.0, %v6827_v11  ;;  %v6883_v2 = vmul.f32 %v6879_v0, %v6823_v63  ;;  %v6888_v48 = vmul.f32 1.442695, %v6882_v29 }
0x404f   :  { %8742 = vrcp.f32 %v6831_v54  ;;  %v6890_v34 = vmul.f32 1.442695, %v6883_v2 }
0x4050   :  { %8744 = vpow2.f32 %v6888_v48 }
0x4051   :  { %8746 = vpow2.f32 %v6890_v34  ;;  %v7098_v34 = vld [vmem:[%s9015_s27 + $0x18] sm:$0xff] }
0x4057   :  { %v8741_v52 = vpop.eup %8740 }
0x4058   :  { %v6842_v61 = vmul.f32 1.0614054, %v8741_v52 }
0x4059   :  { %v8743_v17 = vpop.eup %8742 }
0x405a   :  { %v6846_v40 = vadd.f32 -1.4531521, %v6842_v61  ;;  %v6843_v14 = vmul.f32 1.0614054, %v8743_v17  ;;  %v8745_v37 = vpop.eup %8744  ;;  %v6991_v61 = vld [vmem:[%s11097_s12] sm:$0x3] }
0x405b   :  { %v8747_v32 = vpop.eup %8746 }
0x405c   :  { %v6850_v56 = vmul.f32 %v8741_v52, %v6846_v40  ;;  %v6847_v50 = vadd.f32 -1.4531521, %v6843_v14  ;;  %v7095_v14 = vld [vmem:[%s9015_s27] sm:$0xff] }
0x405e   :  { %v6854_v55 = vadd.f32 1.4214138, %v6850_v56  ;;  %v6851_v42 = vmul.f32 %v8743_v17, %v6847_v50  ;;  %v7096_v56 = vld [vmem:[%s9015_s27 + $0x8] sm:$0xff]  ;;  %v7097_v50 = vld [vmem:[%s9015_s27 + $0x10] sm:$0xff]  ;;  %s8826_s27 = smov [#allocation2]  }
0x405f   :  { %s7160_s5 = sshll.u32 %s8826_s27, 4  ;;  %s7161_s5 = int_to_ptr.vmem [resolvable:$true] %s7160_s5 }
0x4060   :  { %v6858_v12 = vmul.f32 %v8741_v52, %v6854_v55  ;;  %v6855_v51 = vadd.f32 1.4214138, %v6851_v42  ;;  %v7100_v55 = vpack.c.bf16 %v7096_v56, %v7095_v14  ;;  %v7101_v42 = vpack.c.bf16 %v7098_v34, %v7097_v50  ;;  %s8752_s9 = scalar_lea.vmem %s7161_s5, 32  ;;  %p8757_p1 = scmp.lt.s32.totalorder %s7161_s5, %s7161_s5 }
0x4061   :  { %p8753_p0 = scmp.ne.s32.totalorder %s7161_s5, %s8752_s9  ;;  %p8758_p2 = scmp.lt.s32.totalorder %s8752_s9, %s8752_s9 }
0x4062   :  { %v6862_v7 = vadd.f32 -0.28449672, %v6858_v12  ;;  %v6859_v33 = vmul.f32 %v8743_v17, %v6855_v51 }
0x4063   :  { %p8759_p3 = por %p8758_p2, %p8757_p1 }
0x4064   :  { %v6866_v19 = vmul.f32 %v8741_v52, %v6862_v7  ;;  %v6863_v6 = vadd.f32 -0.28449672, %v6859_v33 }
0x4065   :  { %p8760_p4 = pnand %p8759_p3, %p8753_p0 }
0x4066   :  { %v6870_v39 = vadd.f32 0.2548296, %v6866_v19  ;;  %v6867_v59 = vmul.f32 %v8743_v17, %v6863_v6  ;;  %v7430_v19 = vld [vmem:[%s11098_s0] ss:$0 sm:$0xff] }
0x4068   :  { %v6874_v30 = vmul.f32 %v8741_v52, %v6870_v39  ;;  %v6871_v23 = vadd.f32 0.2548296, %v6867_v59  ;;  %v7431_v39 = vld [vmem:[%s9010_s20] ss:$0 sm:$0xff] }
0x406a   :  { %v6894_v58 = vmul.f32 %v8745_v37, %v6874_v30  ;;  %v6875_v26 = vmul.f32 %v8743_v17, %v6871_v23  ;;  %v7432_v23 = vld [vmem:[%s9020_s4] ss:$0 sm:$0xff] }
0x406c   :  { %v6898_v47 = vsub.f32 1.0, %v6894_v58  ;;  %v6895_v44 = vmul.f32 %v8747_v32, %v6875_v26 }
0x406e   :  { %v6906_v27 = vsub.f32 0.0, %v6898_v47  ;;  %v6899_v21 = vsub.f32 1.0, %v6895_v44 }
0x4070   :  { %v6910_v8 = vsel %vm6902_vm9, %v6906_v27, %v6898_v47  ;;  %v6907_v43 = vsub.f32 0.0, %v6899_v21 }
0x4071   :  { %v6914_v57 = vadd.f32 1.0, %v6910_v8 }
0x4072   :  { %v6911_v60 = vsel %vm6903_vm12, %v6907_v43, %v6899_v21 }
0x4073   :  { %v6918_v10 = vmul.f32 %v6914_v57, %v6814_v49  ;;  %v6915_v5 = vadd.f32 1.0, %v6911_v60 }
0x4075   :  { %v6922_v62 = vmul.f32 %v6918_v10, %v6804_v31  ;;  %v6919_v16 = vmul.f32 %v6915_v5, %v6815_v53 }
0x4077   :  { %v6923_v15 = vmul.f32 %v6919_v16, %v6808_v28 }
0x4079   :  { %v6925_v1 = vpack.c.bf16 %v6923_v15, %v6922_v62 }
0x407b   :  { %8318 = vmatmul.mubr.bf16.vlgmr.msra.gmra.mrb[160].mxu0 %v6925_v1 }
0x414e   :  { %v8319_v35 = vpop.f32.mrb[160].mxu0 }
0x414f   :  { %v6981_v63 = vadd.f32 %v8319_v35, %v7428_v20  ;;  %v6972_v45 = vpop.f32.mrb[161].mxu0 }
0x4150   :  { %v6973_v3 = vadd.f32 %v7428_v20, %v6972_v45  ;;  %v8320_v46 = vpop.f32.mrb[162].mxu0 }
0x4151   :  { %v6984_v11 = vadd.f32 %v8320_v46, %v7428_v20  ;;  %v6975_v54 = vpop.f32.mrb[163].mxu0  ;;  %v6989_v22 = vadd.f32 %v6981_v63, %v10885_v36 }
0x4152   :  { %v6976_v41 = vadd.f32 %v7428_v20, %v6975_v54  ;;  %v6987_v25 = vadd.f32 %v6973_v3, %v10866_v4 }
0x4153   :  { %v6990_v9 = vadd.f32 %v6984_v11, %v10889_v38 }
0x4154   :  { %v6988_v0 = vadd.f32 %v6976_v41, %v10871_v13 }
0x4155   :  { %v8344_v52 = vpack.c.bf16 %v6990_v9, %v6989_v22 }
0x4156   :  { %v8341_v29 = vpack.c.bf16 %v6988_v0, %v6987_v25 }
0x4158   :  { %8342 = vmatpush3.bf16.msra.mxu1 %v8341_v29 }
0x4159   :  { %8343 = vmatprep.subr.bf16.mxu1 %v8825_v18 }
0x415c   :  { %8345 = vmatpush3.bf16.msra.mxu1 %v8344_v52 }
0x415d   :  { %8332 = vmatprep.subr.bf16.mxu1 %v11053_v24 }
0x415f   :  { %8330 = vmatmul.mubr.msk.f32.vlgmr.msra.gmra.mrb[196].mxu1 %vm687_vm2, %v6991_v61 }
0x4160   :  { %8336 = vmatprep.mubr.msk.bf16.mxu1 %vm8816_vm8, %v11053_v24  ;;  %8333 = vmatpush3.bf16.msra.mxu1 %v7100_v55  ;;  %vm7152_vm8 = vcmask 74752  }
0x4161   :  { %8334 = vmatprep.subr.bf16.mxu1 %v11053_v24 }
0x4164   :  { %8335 = vmatpush3.bf16.msra.mxu1 %v7101_v42 }
0x4232   :  { %v7061_v4 = vpop.f32.mrb[196].mxu1 }
0x4233   :  { %v7068_v13 = vsel %vm7067_vm13, %v7061_v4, 0.0  ;;  %v8331_v36 = vpop.f32.mrb[197].mxu1 }
0x4234   :  { %7069 = vadd.xlane.f32.xlu1 %v7068_v13 }
0x42c1   :  { %v7070_v38 = vpop.xlane.xlu1 %7069 }
0x42c2   :  { %v7071_v17 = vmul.f32 0.03125, %v7070_v38 }
0x42c4   :  { %v7072_v40 = vsub.f32 %v7061_v4, %v7071_v17 }
0x42c6   :  { %v7073_v2 = vmul.f32 %v7072_v40, %v7072_v40 }
0x42c8   :  { %v7074_v48 = vsel %vm7067_vm13, %v7073_v2, 0.0 }
0x42c9   :  { %7075 = vadd.xlane.f32.xlu1 %v7074_v48 }
0x4356   :  { %v7076_v12 = vpop.xlane.xlu1 %7075 }
0x4357   :  { %v7077_v51 = vmul.f32 0.03125, %v7076_v12 }
0x4359   :  { %v7078_v7 = vadd.f32 1e-05, %v7077_v51 }
0x435b   :  { %8748 = vrsqrt.f32 %v7078_v7 }
0x4365   :  { %v8749_v33 = vpop.eup %8748 }
0x4366   :  { %v7080_v6 = vmul.f32 %v8749_v33, %v7072_v40 }
0x4368   :  { %v7087_v59 = vmul.f32 %v7430_v19, %v7080_v6 }
0x436a   :  { %v7094_v30 = vadd.f32 %v7431_v39, %v7087_v59 }
0x436c   :  { %v7099_v37 = vpack.c.bf16 %v7094_v30, %v7094_v30 }
0x436e   :  { %8337 = vmatmul.mubr.msk.bf16.vlgmr.msra.gmra.mrb[200].mxu1 %vm687_vm2, %v7099_v37 }
0x4441   :  { %v7146_v58 = vpop.f32.mrb[200].mxu1 }
0x4442   :  { %v7147_v24 = vadd.f32 %v7432_v23, %v7146_v58  ;;  %v8338_v26 = vpop.f32.mrb[201].mxu1 }
0x4443   :  { %v7149_v32 = vpop.f32.mrb[202].mxu1 }
0x4444   :  { %v8339_v47 = vpop.f32.mrb[203].mxu1  ;;  %7153 = vst.msk [vmem:[#allocation2] sm:$0x3] %vm7152_vm8, %v7147_v24 }
0x4445   :  { %8763 = shalt.err (!%p8760_p4)
}
0x4446   :  { %s8764_s20 = scalar_lea.hbm %s9025_s21, 32 }
0x4447   :  { %p8765_p5 = scmp.ne.s32.totalorder %s9025_s21, %s8764_s20  ;;  %p8768_p6 = scmp.lt.u32.totalorder %s8764_s20, %s9025_s21 }
0x4449   :  { %p8770_p7 = pnand %p8768_p6, %p8765_p5 }
0x444b   :  { %8773 = shalt.err (!%p8770_p7)
}
0x444c   :  { %7163 = dma.vmem_to_hbm [thread:$0]  %s7161_s5, 32, %s9025_s21, [#allocation3]  }
0x444d   :  { %8774 = dma.done.wait [#allocation3], 32  }
0x444e   :  { %8775 = vsyncadd [#allocation3], 4294967264 }
0x444f   :  { %7167 = vsyncpa [#allocation3], 1 }

</bundles_post_ra>
